<compile_context>
chip_gen: v7x
topology: tpu7x:2x2x1
jax: 0.10.0
libtpu: 0.0.40
codegen_flags: <defaults>
</compile_context>

<pallas_src>
import functools

import jax
import jax.numpy as jnp
from jax import lax
from jax.experimental import pallas as pl
from jax.experimental.pallas import tpu as pltpu

F32 = jnp.float32
BF16 = jnp.bfloat16
LN_EPS = 1e-5
NEG_INF = -1e30


def _ln(x, g, b):
    mu = jnp.mean(x, axis=-1, keepdims=True)
    xc = x - mu
    var = jnp.mean(xc * xc, axis=-1, keepdims=True)
    return xc * lax.rsqrt(var + LN_EPS) * g + b


def _rel_shift_2d(x, S, low, diag1):
    """Transformer-XL relative shift of a (S, S) score tile, done in VMEM.

    Equivalent to the reference zero-pad / reshape trick:
      out[i, j] = x[i, S-1+j-i]   for j <= i
                = 0               for j == i+1
                = x[i+1, j-i-2]   for j >= i+2
    One strided lane rotate (row i rotated right by i+1) + one sublane rotate
    + two selects -- XLU work only, no unaligned reshapes.
    """
    y = pltpu.roll(x, 1, axis=1, stride=1, stride_axis=0)   # y[i,j] = x[i,(j-i-1)%S]
    yup = pltpu.roll(y, S - 1, axis=0)                      # yup[i] = y[(i+1)%S]
    return jnp.where(low, y, jnp.where(diag1, 0.0, yup))


# ----------------------------- fused kernel -----------------------------


def _encoder_block_kernel(x_ref, m_ref, cln_ref, cdw_ref, cpw_ref, cpb_ref,
                          aln_ref, wqkv_ref, r_ref, wr_ref, rb_ref, wo_ref,
                          fln_ref, w1_ref, fb_ref, w2_ref, o_ref,
                          *, n_head, head_dim, ksize, n_conv):
    S, D = x_ref.shape[1], x_ref.shape[2]
    n, d = n_head, head_dim
    nd = n * d
    K = ksize
    P = K // 2
    scale = 1.0 / (d ** 0.5)

    x = x_ref[0].astype(F32)                                  # (S, D) residual carry

    # ---------------- conv sub-blocks (LN + depthwise + pointwise + relu + res) ----
    row = lax.broadcasted_iota(jnp.int32, (S, D), 0)
    tap_valid = [(row >= (P - k)) & (row < S + (P - k)) for k in range(K)]
    for l in range(n_conv):
        g = cln_ref[2 * l:2 * l + 1, :]
        b = cln_ref[2 * l + 1:2 * l + 2, :]
        h = _ln(x, g, b)
        dw = cdw_ref[l].astype(F32)                           # (K, D)
        acc = jnp.zeros((S, D), F32)
        for k in range(K):                                    # static unroll, VPU MACs
            sh = (P - k) % S
            hk = h if sh == 0 else pltpu.roll(h, sh, axis=0)  # hk[s] = h[s + k - P]
            acc = acc + dw[k:k + 1, :] * jnp.where(tap_valid[k], hk, 0.0)
        z = jnp.dot(acc.astype(BF16), cpw_ref[l],
                    preferred_element_type=F32) + cpb_ref[l:l + 1, :]
        x = jax.nn.relu(z) + x

    # ---------------- relative multi-head attention ----------------
    res = x
    aln = aln_ref[...]
    h = _ln(x, aln[0:1, :], aln[1:2, :])                      # layer_norm_att
    h = _ln(h, aln[2:3, :], aln[3:4, :])                      # att.layer_norm (pre_lnorm)
    qkv = jnp.dot(h.astype(BF16), wqkv_ref[...],
                  preferred_element_type=F32)                 # (S, 3nd)
    rk = jnp.dot(r_ref[...].astype(BF16), wr_ref[...],
                 preferred_element_type=F32)                  # (S, nd), r_net in-kernel

    q = qkv[:, 0:nd]
    kb = qkv[:, nd:2 * nd].astype(BF16)
    vb = qkv[:, 2 * nd:3 * nd].astype(BF16)
    rkb = rk.astype(BF16)

    mq = m_ref[0].astype(F32)                                 # (S, 1) query-axis mask
    neg = (1.0 - mq) * NEG_INF                                # hoisted out of head loop

    row_i = lax.broadcasted_iota(jnp.int32, (S, S), 0)
    col_j = lax.broadcasted_iota(jnp.int32, (S, S), 1)
    low = col_j <= row_i
    diag1 = col_j == row_i + 1

    dn = (((1,), (1,)), ((), ()))                             # contract head_dim
    heads = []
    for hh in range(n):                                       # per-head (S,S) tiles
        lo, hi = hh * d, (hh + 1) * d
        q_h = q[:, lo:hi]
        rwq_h = (q_h + rb_ref[hh:hh + 1, :]).astype(BF16)            # + r_w_bias[h]
        rrq_h = (q_h + rb_ref[n + hh:n + hh + 1, :]).astype(BF16)    # + r_r_bias[h]
        ac = lax.dot_general(rwq_h, kb[:, lo:hi], dn, preferred_element_type=F32)
        bd = lax.dot_general(rrq_h, rkb[:, lo:hi], dn, preferred_element_type=F32)
        bd = _rel_shift_2d(bd, S, low, diag1)
        s = (ac + bd) * scale
        s = s * mq + neg                                      # faithful to mask_logits
        s = s - jnp.max(s, axis=-1, keepdims=True)
        e = jnp.exp(s)
        p = e * pl.reciprocal(jnp.sum(e, axis=-1, keepdims=True), approx=True)
        heads.append(jnp.dot(p.astype(BF16), vb[:, lo:hi],
                             preferred_element_type=F32))
    attn_vec = jnp.concatenate(heads, axis=-1)                # (S, nd) lane-dense

    x = jnp.dot(attn_vec.astype(BF16), wo_ref[...],
                preferred_element_type=F32) + res

    # ---------------- position-wise feed-forward ----------------
    res = x
    fln = fln_ref[...]
    h = _ln(x, fln[0:1, :], fln[1:2, :])
    h = jnp.dot(h.astype(BF16), w1_ref[...], preferred_element_type=F32) + fb_ref[0:1, :]
    h = jax.nn.relu(h)
    h = jnp.dot(h.astype(BF16), w2_ref[...], preferred_element_type=F32) + fb_ref[1:2, :]
    o_ref[0] = (h + res).astype(o_ref.dtype)


# ----------------------------- forward wrapper -----------------------------


def qaxl_encoder_block_forward(x, mask, r, kp):
    """Eval-mode QAXLEncoderBlock forward as a single fused Pallas kernel.

    x: (B, S, D) f32, mask: (B, S) f32 (1 = keep), r: (S, D) relative pos. emb.
    (l / num_blocks / dec_attn_mask / mems only affect training-time dropout
    paths and the unused mems branch, so they are omitted here.)
    """
    B, S, D = x.shape
    n2, d = kp["r_bias"].shape                                # (2n, d)
    n = n2 // 2
    L, K, _ = kp["conv_dw"].shape
    nd = n * d

    mask_q = mask.astype(F32).reshape(B, S, 1)

    kern = functools.partial(_encoder_block_kernel,
                             n_head=n, head_dim=d, ksize=K, n_conv=L)
    z2 = lambda b: (0, 0)
    z3 = lambda b: (0, 0, 0)
    return pl.pallas_call(
        kern,
        out_shape=jax.ShapeDtypeStruct((B, S, D), F32),
        grid=(B,),
        in_specs=[
            pl.BlockSpec((1, S, D), lambda b: (b, 0, 0)),     # x
            pl.BlockSpec((1, S, 1), lambda b: (b, 0, 0)),     # query mask
            pl.BlockSpec((2 * L, D), z2),                     # conv LN g/b
            pl.BlockSpec((L, K, D), z3),                      # depthwise taps
            pl.BlockSpec((L, D, D), z3),                      # pointwise weights (bf16)
            pl.BlockSpec((L, D), z2),                         # pointwise bias
            pl.BlockSpec((4, D), z2),                         # att LN stack
            pl.BlockSpec((D, 3 * nd), z2),                    # W_qkv (bf16)
            pl.BlockSpec((S, D), z2),                         # r
            pl.BlockSpec((D, nd), z2),                        # W_r (bf16)
            pl.BlockSpec((2 * n, d), z2),                     # [r_w_bias; r_r_bias]
            pl.BlockSpec((nd, D), z2),                        # W_o (bf16)
            pl.BlockSpec((2, D), z2),                         # FFN LN g/b
            pl.BlockSpec((D, D), z2),                         # W1 (bf16)
            pl.BlockSpec((2, D), z2),                         # [b1; b2]
            pl.BlockSpec((D, D), z2),                         # W2 (bf16)
        ],
        out_specs=pl.BlockSpec((1, S, D), lambda b: (b, 0, 0)),
        compiler_params=pltpu.CompilerParams(
            dimension_semantics=("parallel",),
            vmem_limit_bytes=32 * 1024 * 1024),
    )(x, mask_q, kp["conv_ln"], kp["conv_dw"], kp["conv_pw"], kp["conv_pb"],
      kp["att_ln"], kp["w_qkv"], r, kp["w_r"], kp["r_bias"], kp["w_o"],
      kp["ffn_ln"], kp["w1"], kp["ffn_b"], kp["w2"])


# --------------------- parameters (torch layout) ---------------------


def make_torch_layout_params(key, model_dim, n_head, head_dim, conv_layer_num, ksize):
    D, n, d = model_dim, n_head, head_dim
    keys = iter(jax.random.split(key, 5 * conv_layer_num + 15))

    def nrm(shape, scale=1.0):
        return jax.random.normal(next(keys), shape, dtype=F32) * scale

    def gamma(shape):
        return 1.0 + 0.1 * jax.random.normal(next(keys), shape, dtype=F32)

    convs = []
    for _ in range(conv_layer_num):
        convs.append(dict(
            ln_g=gamma((D,)),
            ln_b=nrm((D,), 0.1),
            dw_w=nrm((D, 1, ksize), (1.0 / ksize) ** 0.5),   # Conv1d depthwise (C,1,K)
            pw_w=nrm((D, D, 1), (1.0 / D) ** 0.5),           # Conv1d pointwise (out,in,1)
            pw_b=nrm((D,), 0.1),
        ))
    attn = dict(
        ln_att_g=gamma((D,)), ln_att_b=nrm((D,), 0.1),
        ln_inner_g=gamma((D,)), ln_inner_b=nrm((D,), 0.1),
        w_qkv=nrm((3 * n * d, D), (1.0 / D) ** 0.5),
        w_r=nrm((n * d, D), (1.0 / D) ** 0.5),
        w_o=nrm((D, n * d), (1.0 / (n * d)) ** 0.5),
        r_w_bias=nrm((n, d), 0.1),
        r_r_bias=nrm((n, d), 0.1),
    )
    ffn = dict(
        ln_g=gamma((D,)), ln_b=nrm((D,), 0.1),
        w1=nrm((D, D), (1.0 / D) ** 0.5), b1=nrm((D,), 0.1),
        w2=nrm((D, D), (1.0 / D) ** 0.5), b2=nrm((D,), 0.1),
    )
    return dict(convs=convs, attn=attn, ffn=ffn)


def prepare_kernel_params(p):
    """One-time layout prep: transpose Linear/Conv1d weights to (in,out), cast
    MXU weights to bf16, stack per-layer / per-feature params for residency."""
    convs = p["convs"]
    conv_ln = jnp.concatenate(
        [jnp.stack([c["ln_g"], c["ln_b"]], axis=0) for c in convs], axis=0)       # (2L, D)
    conv_dw = jnp.stack(
        [jnp.transpose(c["dw_w"][:, 0, :], (1, 0)) for c in convs], axis=0)       # (L, K, D)
    conv_pw = jnp.stack(
        [jnp.transpose(c["pw_w"][:, :, 0], (1, 0)) for c in convs],
        axis=0).astype(BF16)                                                      # (L, Din, Dout)
    conv_pb = jnp.stack([c["pw_b"] for c in convs], axis=0)                       # (L, D)

    a = p["attn"]
    f = p["ffn"]
    return dict(
        conv_ln=conv_ln, conv_dw=conv_dw, conv_pw=conv_pw, conv_pb=conv_pb,
        att_ln=jnp.stack([a["ln_att_g"], a["ln_att_b"],
                          a["ln_inner_g"], a["ln_inner_b"]], axis=0),             # (4, D)
        w_qkv=jnp.transpose(a["w_qkv"]).astype(BF16),                             # (D, 3nd)
        w_r=jnp.transpose(a["w_r"]).astype(BF16),                                 # (D, nd)
        w_o=jnp.transpose(a["w_o"]).astype(BF16),                                 # (nd, D)
        r_bias=jnp.concatenate([a["r_w_bias"], a["r_r_bias"]], axis=0),           # (2n, d)
        ffn_ln=jnp.stack([f["ln_g"], f["ln_b"]], axis=0),                         # (2, D)
        w1=jnp.transpose(f["w1"]).astype(BF16),
        w2=jnp.transpose(f["w2"]).astype(BF16),
        ffn_b=jnp.stack([f["b1"], f["b2"]], axis=0),                              # (2, D)
    )


# ----------------------------- reference -----------------------------


def _rel_shift_ref(x):
    """Transformer-XL relative shift (reference zero-pad/view trick), (B,n,I,J)."""
    B, n, I, J = x.shape
    zp = jnp.zeros((B, n, I, 1), x.dtype)
    xp = jnp.concatenate([zp, x], axis=-1)
    xp = xp.reshape(B, n, J + 1, I)
    return xp[:, :, 1:, :].reshape(B, n, I, J)


def reference_forward(x, mask, r, p):
    """Pure-JAX f32 mirror of the PyTorch QAXLEncoderBlock.forward (eval mode)."""
    B, S, D = x.shape
    a = p["attn"]
    n, d = a["r_w_bias"].shape
    scale = 1.0 / (d ** 0.5)

    def ln(v, g, b):
        mu = v.mean(-1, keepdims=True)
        var = ((v - mu) ** 2).mean(-1, keepdims=True)
        return (v - mu) / jnp.sqrt(var + LN_EPS) * g + b

    for c in p["convs"]:
        res = x
        h = ln(x, c["ln_g"], c["ln_b"])
        K = c["dw_w"].shape[-1]
        P = K // 2
        hp = jnp.pad(h, ((0, 0), (P, P), (0, 0)))
        dwo = jnp.zeros_like(h)
        for k in range(K):
            dwo = dwo + hp[:, k:k + S, :] * c["dw_w"][:, 0, k][None, None, :]
        z = jnp.einsum("bsd,ed->bse", dwo, c["pw_w"][:, :, 0]) + c["pw_b"]
        x = jax.nn.relu(z) + res

    res = x
    h = ln(x, a["ln_att_g"], a["ln_att_b"])
    h = ln(h, a["ln_inner_g"], a["ln_inner_b"])
    w_heads = h @ a["w_qkv"].T
    q, k, v = jnp.split(w_heads, 3, axis=-1)
    q = q.reshape(B, S, n, d)
    k = k.reshape(B, S, n, d)
    v = v.reshape(B, S, n, d)
    rk = (r @ a["w_r"].T).reshape(S, n, d)
    AC = jnp.einsum("bind,bjnd->bnij", q + a["r_w_bias"], k)
    BD = jnp.einsum("bind,jnd->bnij", q + a["r_r_bias"], rk)
    BD = _rel_shift_ref(BD)
    score = (AC + BD) * scale
    m = mask.astype(F32)[:, None, :, None]   # query-axis mask, as the torch permutes do
    score = score * m + (1.0 - m) * NEG_INF
    prob = jax.nn.softmax(score, axis=-1)
    vec = jnp.einsum("bnij,bjnd->bind", prob, v).reshape(B, S, n * d)
    x = vec @ a["w_o"].T + res

    f = p["ffn"]
    res = x
    h = ln(x, f["ln_g"], f["ln_b"])
    h = jax.nn.relu(h @ f["w1"].T + f["b1"])
    h = h @ f["w2"].T + f["b2"]
    return h + res


if __name__ == "__main__":
    B, S, D = 4, 128, 128
    n_head, head_dim = 4, 32
    conv_layer_num, ksize = 2, 7

    key = jax.random.PRNGKey(0)
    kparam, kx, kr = jax.random.split(key, 3)

    params = make_torch_layout_params(kparam, D, n_head, head_dim, conv_layer_num, ksize)
    kparams = prepare_kernel_params(params)

    x = jax.random.normal(kx, (B, S, D), dtype=F32)
    r = jax.random.normal(kr, (S, D), dtype=F32)
    lengths = jnp.array([S, S - 17, S // 2, S - 1], dtype=jnp.int32)
    mask = (jnp.arange(S)[None, :] < lengths[:, None]).astype(F32)

    fwd = jax.jit(qaxl_encoder_block_forward)
    out = jax.block_until_ready(fwd(x, mask, r, kparams))

    ref = reference_forward(x, mask, r, params)
    assert out.shape == (B, S, D)
    assert bool(jnp.isfinite(out).all()), "non-finite output"
    err = jnp.linalg.norm(out - ref) / (jnp.linalg.norm(ref) + 1e-12)
    assert float(err) < 3e-2, f"relative error too large: {float(err):.3e}"

    print("KERNEL_OK")
</pallas_src>

<mosaic_0001>
module attributes {stable_mosaic.version = 11 : i64} {
  func.func @_encoder_block_kernel(%arg0: i32, %arg1: memref<1x128x128xf32, #tpu.memory_space<vmem>>, %arg2: memref<1x128x1xf32, #tpu.memory_space<vmem>>, %arg3: memref<4x128xf32, #tpu.memory_space<vmem>>, %arg4: memref<2x7x128xf32, #tpu.memory_space<vmem>>, %arg5: memref<2x128x128xbf16, #tpu.memory_space<vmem>>, %arg6: memref<2x128xf32, #tpu.memory_space<vmem>>, %arg7: memref<4x128xf32, #tpu.memory_space<vmem>>, %arg8: memref<128x384xbf16, #tpu.memory_space<vmem>>, %arg9: memref<128x128xf32, #tpu.memory_space<vmem>>, %arg10: memref<128x128xbf16, #tpu.memory_space<vmem>>, %arg11: memref<8x32xf32, #tpu.memory_space<vmem>>, %arg12: memref<128x128xbf16, #tpu.memory_space<vmem>>, %arg13: memref<2x128xf32, #tpu.memory_space<vmem>>, %arg14: memref<128x128xbf16, #tpu.memory_space<vmem>>, %arg15: memref<2x128xf32, #tpu.memory_space<vmem>>, %arg16: memref<128x128xbf16, #tpu.memory_space<vmem>>, %arg17: memref<1x128x128xf32, #tpu.memory_space<vmem>>) attributes {dimension_semantics = [#tpu.dimension_semantics<parallel>], iteration_bounds = array<i64: 4>, scalar_prefetch = 0 : i64, scratch_operands = 0 : i64, tpu.core_type = #tpu.core_type<tc>, window_params = [{transform_indices = @transform_0, window_bounds = array<i64: 1, 128, 128>}, {transform_indices = @transform_1, window_bounds = array<i64: 1, 128, 1>}, {pipeline_mode = #tpu.pipeline_mode<synchronous>, transform_indices = @transform_2, window_bounds = array<i64: 4, 128>}, {pipeline_mode = #tpu.pipeline_mode<synchronous>, transform_indices = @transform_3, window_bounds = array<i64: 2, 7, 128>}, {pipeline_mode = #tpu.pipeline_mode<synchronous>, transform_indices = @transform_4, window_bounds = array<i64: 2, 128, 128>}, {pipeline_mode = #tpu.pipeline_mode<synchronous>, transform_indices = @transform_5, window_bounds = array<i64: 2, 128>}, {pipeline_mode = #tpu.pipeline_mode<synchronous>, transform_indices = @transform_6, window_bounds = array<i64: 4, 128>}, {pipeline_mode = #tpu.pipeline_mode<synchronous>, transform_indices = @transform_7, window_bounds = array<i64: 128, 384>}, {pipeline_mode = #tpu.pipeline_mode<synchronous>, transform_indices = @transform_8, window_bounds = array<i64: 128, 128>}, {pipeline_mode = #tpu.pipeline_mode<synchronous>, transform_indices = @transform_9, window_bounds = array<i64: 128, 128>}, {pipeline_mode = #tpu.pipeline_mode<synchronous>, transform_indices = @transform_10, window_bounds = array<i64: 8, 32>}, {pipeline_mode = #tpu.pipeline_mode<synchronous>, transform_indices = @transform_11, window_bounds = array<i64: 128, 128>}, {pipeline_mode = #tpu.pipeline_mode<synchronous>, transform_indices = @transform_12, window_bounds = array<i64: 2, 128>}, {pipeline_mode = #tpu.pipeline_mode<synchronous>, transform_indices = @transform_13, window_bounds = array<i64: 128, 128>}, {pipeline_mode = #tpu.pipeline_mode<synchronous>, transform_indices = @transform_14, window_bounds = array<i64: 2, 128>}, {pipeline_mode = #tpu.pipeline_mode<synchronous>, transform_indices = @transform_15, window_bounds = array<i64: 128, 128>}, {transform_indices = @transform_16, window_bounds = array<i64: 1, 128, 128>}]} {
    %c0 = arith.constant 0 : index
    %c0_0 = arith.constant 0 : index
    %c0_1 = arith.constant 0 : index
    %0 = vector.load %arg1[%c0, %c0_0, %c0_1] : memref<1x128x128xf32, #tpu.memory_space<vmem>>, vector<1x128x128xf32>
    %1 = vector.shape_cast %0 : vector<1x128x128xf32> to vector<128x128xf32>
    %2 = tpu.iota {dimensions = array<i32: 0>} : vector<128x128xi32>
    %c3_i32 = arith.constant 3 : i32
    %3 = vector.broadcast %c3_i32 : i32 to vector<128x128xi32>
    %4 = arith.cmpi sge, %2, %3 : vector<128x128xi32>
    %c131_i32 = arith.constant 131 : i32
    %5 = vector.broadcast %c131_i32 : i32 to vector<128x128xi32>
    %6 = arith.cmpi slt, %2, %5 : vector<128x128xi32>
    %7 = arith.andi %4, %6 : vector<128x128xi1>
    %c2_i32 = arith.constant 2 : i32
    %8 = vector.broadcast %c2_i32 : i32 to vector<128x128xi32>
    %9 = arith.cmpi sge, %2, %8 : vector<128x128xi32>
    %c130_i32 = arith.constant 130 : i32
    %10 = vector.broadcast %c130_i32 : i32 to vector<128x128xi32>
    %11 = arith.cmpi slt, %2, %10 : vector<128x128xi32>
    %12 = arith.andi %9, %11 : vector<128x128xi1>
    %c1_i32 = arith.constant 1 : i32
    %13 = vector.broadcast %c1_i32 : i32 to vector<128x128xi32>
    %14 = arith.cmpi sge, %2, %13 : vector<128x128xi32>
    %c129_i32 = arith.constant 129 : i32
    %15 = vector.broadcast %c129_i32 : i32 to vector<128x128xi32>
    %16 = arith.cmpi slt, %2, %15 : vector<128x128xi32>
    %17 = arith.andi %14, %16 : vector<128x128xi1>
    %c0_i32 = arith.constant 0 : i32
    %18 = vector.broadcast %c0_i32 : i32 to vector<128x128xi32>
    %19 = arith.cmpi sge, %2, %18 : vector<128x128xi32>
    %c128_i32 = arith.constant 128 : i32
    %20 = vector.broadcast %c128_i32 : i32 to vector<128x128xi32>
    %21 = arith.cmpi slt, %2, %20 : vector<128x128xi32>
    %22 = arith.andi %19, %21 : vector<128x128xi1>
    %c-1_i32 = arith.constant -1 : i32
    %23 = vector.broadcast %c-1_i32 : i32 to vector<128x128xi32>
    %24 = arith.cmpi sge, %2, %23 : vector<128x128xi32>
    %c127_i32 = arith.constant 127 : i32
    %25 = vector.broadcast %c127_i32 : i32 to vector<128x128xi32>
    %26 = arith.cmpi slt, %2, %25 : vector<128x128xi32>
    %27 = arith.andi %24, %26 : vector<128x128xi1>
    %c-2_i32 = arith.constant -2 : i32
    %28 = vector.broadcast %c-2_i32 : i32 to vector<128x128xi32>
    %29 = arith.cmpi sge, %2, %28 : vector<128x128xi32>
    %c126_i32 = arith.constant 126 : i32
    %30 = vector.broadcast %c126_i32 : i32 to vector<128x128xi32>
    %31 = arith.cmpi slt, %2, %30 : vector<128x128xi32>
    %32 = arith.andi %29, %31 : vector<128x128xi1>
    %c-3_i32 = arith.constant -3 : i32
    %33 = vector.broadcast %c-3_i32 : i32 to vector<128x128xi32>
    %34 = arith.cmpi sge, %2, %33 : vector<128x128xi32>
    %c125_i32 = arith.constant 125 : i32
    %35 = vector.broadcast %c125_i32 : i32 to vector<128x128xi32>
    %36 = arith.cmpi slt, %2, %35 : vector<128x128xi32>
    %37 = arith.andi %34, %36 : vector<128x128xi1>
    %c0_2 = arith.constant 0 : index
    %c0_3 = arith.constant 0 : index
    %38 = vector.load %arg3[%c0_2, %c0_3] : memref<4x128xf32, #tpu.memory_space<vmem>>, vector<1x128xf32>
    %c1 = arith.constant 1 : index
    %c0_4 = arith.constant 0 : index
    %39 = vector.load %arg3[%c1, %c0_4] : memref<4x128xf32, #tpu.memory_space<vmem>>, vector<1x128xf32>
    %cst = arith.constant dense<0.000000e+00> : vector<128xf32>
    %40 = vector.multi_reduction <add>, %1, %cst [1] : vector<128x128xf32> to vector<128xf32>
    %41 = vector.shape_cast %40 : vector<128xf32> to vector<128x1xf32>
    %cst_5 = arith.constant 1.280000e+02 : f32
    %42 = vector.broadcast %cst_5 : f32 to vector<128x1xf32>
    %43 = arith.divf %41, %42 : vector<128x1xf32>
    %44 = vector.broadcast %43 : vector<128x1xf32> to vector<128x128xf32>
    %45 = arith.subf %1, %44 : vector<128x128xf32>
    %46 = arith.mulf %45, %45 : vector<128x128xf32>
    %cst_6 = arith.constant dense<0.000000e+00> : vector<128xf32>
    %47 = vector.multi_reduction <add>, %46, %cst_6 [1] : vector<128x128xf32> to vector<128xf32>
    %48 = vector.shape_cast %47 : vector<128xf32> to vector<128x1xf32>
    %cst_7 = arith.constant 1.280000e+02 : f32
    %49 = vector.broadcast %cst_7 : f32 to vector<128x1xf32>
    %50 = arith.divf %48, %49 : vector<128x1xf32>
    %cst_8 = arith.constant 9.99999974E-6 : f32
    %51 = vector.broadcast %cst_8 : f32 to vector<128x1xf32>
    %52 = arith.addf %50, %51 : vector<128x1xf32>
    %53 = math.rsqrt %52 : vector<128x1xf32>
    %54 = vector.broadcast %53 : vector<128x1xf32> to vector<128x128xf32>
    %55 = arith.mulf %45, %54 : vector<128x128xf32>
    %56 = vector.broadcast %38 : vector<1x128xf32> to vector<128x128xf32>
    %57 = arith.mulf %55, %56 : vector<128x128xf32>
    %58 = vector.broadcast %39 : vector<1x128xf32> to vector<128x128xf32>
    %59 = arith.addf %57, %58 : vector<128x128xf32>
    %c0_9 = arith.constant 0 : index
    %c0_10 = arith.constant 0 : index
    %c0_11 = arith.constant 0 : index
    %60 = vector.load %arg4[%c0_9, %c0_10, %c0_11] : memref<2x7x128xf32, #tpu.memory_space<vmem>>, vector<1x7x128xf32>
    %61 = vector.shape_cast %60 : vector<1x7x128xf32> to vector<7x128xf32>
    %cst_12 = arith.constant 0.000000e+00 : f32
    %62 = vector.broadcast %cst_12 : f32 to vector<128x128xf32>
    %c3_i32_13 = arith.constant 3 : i32
    %63 = tpu.dynamic_rotate %59 by %c3_i32_13 dim 0 : vector<128x128xf32>, i32 -> vector<128x128xf32>
    %64 = vector.extract_strided_slice %61 {offsets = [0, 0], sizes = [1, 128], strides = [1, 1]} : vector<7x128xf32> to vector<1x128xf32>
    %cst_14 = arith.constant 0.000000e+00 : f32
    %65 = vector.broadcast %cst_14 : f32 to vector<128x128xf32>
    %66 = arith.select %7, %63, %65 : vector<128x128xi1>, vector<128x128xf32>
    %67 = vector.broadcast %64 : vector<1x128xf32> to vector<128x128xf32>
    %68 = arith.mulf %67, %66 : vector<128x128xf32>
    %69 = arith.addf %62, %68 : vector<128x128xf32>
    %c2_i32_15 = arith.constant 2 : i32
    %70 = tpu.dynamic_rotate %59 by %c2_i32_15 dim 0 : vector<128x128xf32>, i32 -> vector<128x128xf32>
    %71 = vector.extract_strided_slice %61 {offsets = [1, 0], sizes = [1, 128], strides = [1, 1]} : vector<7x128xf32> to vector<1x128xf32>
    %cst_16 = arith.constant 0.000000e+00 : f32
    %72 = vector.broadcast %cst_16 : f32 to vector<128x128xf32>
    %73 = arith.select %12, %70, %72 : vector<128x128xi1>, vector<128x128xf32>
    %74 = vector.broadcast %71 : vector<1x128xf32> to vector<128x128xf32>
    %75 = arith.mulf %74, %73 : vector<128x128xf32>
    %76 = arith.addf %69, %75 : vector<128x128xf32>
    %c1_i32_17 = arith.constant 1 : i32
    %77 = tpu.dynamic_rotate %59 by %c1_i32_17 dim 0 : vector<128x128xf32>, i32 -> vector<128x128xf32>
    %78 = vector.extract_strided_slice %61 {offsets = [2, 0], sizes = [1, 128], strides = [1, 1]} : vector<7x128xf32> to vector<1x128xf32>
    %cst_18 = arith.constant 0.000000e+00 : f32
    %79 = vector.broadcast %cst_18 : f32 to vector<128x128xf32>
    %80 = arith.select %17, %77, %79 : vector<128x128xi1>, vector<128x128xf32>
    %81 = vector.broadcast %78 : vector<1x128xf32> to vector<128x128xf32>
    %82 = arith.mulf %81, %80 : vector<128x128xf32>
    %83 = arith.addf %76, %82 : vector<128x128xf32>
    %84 = vector.extract_strided_slice %61 {offsets = [3, 0], sizes = [1, 128], strides = [1, 1]} : vector<7x128xf32> to vector<1x128xf32>
    %cst_19 = arith.constant 0.000000e+00 : f32
    %85 = vector.broadcast %cst_19 : f32 to vector<128x128xf32>
    %86 = arith.select %22, %59, %85 : vector<128x128xi1>, vector<128x128xf32>
    %87 = vector.broadcast %84 : vector<1x128xf32> to vector<128x128xf32>
    %88 = arith.mulf %87, %86 : vector<128x128xf32>
    %89 = arith.addf %83, %88 : vector<128x128xf32>
    %c127_i32_20 = arith.constant 127 : i32
    %90 = tpu.dynamic_rotate %59 by %c127_i32_20 dim 0 : vector<128x128xf32>, i32 -> vector<128x128xf32>
    %91 = vector.extract_strided_slice %61 {offsets = [4, 0], sizes = [1, 128], strides = [1, 1]} : vector<7x128xf32> to vector<1x128xf32>
    %cst_21 = arith.constant 0.000000e+00 : f32
    %92 = vector.broadcast %cst_21 : f32 to vector<128x128xf32>
    %93 = arith.select %27, %90, %92 : vector<128x128xi1>, vector<128x128xf32>
    %94 = vector.broadcast %91 : vector<1x128xf32> to vector<128x128xf32>
    %95 = arith.mulf %94, %93 : vector<128x128xf32>
    %96 = arith.addf %89, %95 : vector<128x128xf32>
    %c126_i32_22 = arith.constant 126 : i32
    %97 = tpu.dynamic_rotate %59 by %c126_i32_22 dim 0 : vector<128x128xf32>, i32 -> vector<128x128xf32>
    %98 = vector.extract_strided_slice %61 {offsets = [5, 0], sizes = [1, 128], strides = [1, 1]} : vector<7x128xf32> to vector<1x128xf32>
    %cst_23 = arith.constant 0.000000e+00 : f32
    %99 = vector.broadcast %cst_23 : f32 to vector<128x128xf32>
    %100 = arith.select %32, %97, %99 : vector<128x128xi1>, vector<128x128xf32>
    %101 = vector.broadcast %98 : vector<1x128xf32> to vector<128x128xf32>
    %102 = arith.mulf %101, %100 : vector<128x128xf32>
    %103 = arith.addf %96, %102 : vector<128x128xf32>
    %c125_i32_24 = arith.constant 125 : i32
    %104 = tpu.dynamic_rotate %59 by %c125_i32_24 dim 0 : vector<128x128xf32>, i32 -> vector<128x128xf32>
    %105 = vector.extract_strided_slice %61 {offsets = [6, 0], sizes = [1, 128], strides = [1, 1]} : vector<7x128xf32> to vector<1x128xf32>
    %cst_25 = arith.constant 0.000000e+00 : f32
    %106 = vector.broadcast %cst_25 : f32 to vector<128x128xf32>
    %107 = arith.select %37, %104, %106 : vector<128x128xi1>, vector<128x128xf32>
    %108 = vector.broadcast %105 : vector<1x128xf32> to vector<128x128xf32>
    %109 = arith.mulf %108, %107 : vector<128x128xf32>
    %110 = arith.addf %103, %109 : vector<128x128xf32>
    %111 = arith.truncf %110 : vector<128x128xf32> to vector<128x128xbf16>
    %c0_26 = arith.constant 0 : index
    %c0_27 = arith.constant 0 : index
    %c0_28 = arith.constant 0 : index
    %112 = vector.load %arg5[%c0_26, %c0_27, %c0_28] : memref<2x128x128xbf16, #tpu.memory_space<vmem>>, vector<1x128x128xbf16>
    %113 = vector.shape_cast %112 : vector<1x128x128xbf16> to vector<128x128xbf16>
    %cst_29 = arith.constant dense<0.000000e+00> : vector<128x128xf32>
    %114 = tpu.matmul %111, %113, %cst_29 {dimension_numbers = #tpu.dot_dimension_numbers<[1], [0], [0], [1], [0, 0, 1, 1], [], []>} : vector<128x128xbf16>, vector<128x128xbf16>, vector<128x128xf32> -> vector<128x128xf32>
    %c0_30 = arith.constant 0 : index
    %c0_31 = arith.constant 0 : index
    %115 = vector.load %arg6[%c0_30, %c0_31] : memref<2x128xf32, #tpu.memory_space<vmem>>, vector<1x128xf32>
    %116 = vector.broadcast %115 : vector<1x128xf32> to vector<128x128xf32>
    %117 = arith.addf %114, %116 : vector<128x128xf32>
    %cst_32 = arith.constant 0.000000e+00 : f32
    %118 = vector.broadcast %cst_32 : f32 to vector<128x128xf32>
    %119 = arith.maximumf %117, %118 : vector<128x128xf32>
    %120 = arith.addf %119, %1 : vector<128x128xf32>
    %c2 = arith.constant 2 : index
    %c0_33 = arith.constant 0 : index
    %121 = vector.load %arg3[%c2, %c0_33] : memref<4x128xf32, #tpu.memory_space<vmem>>, vector<1x128xf32>
    %c3 = arith.constant 3 : index
    %c0_34 = arith.constant 0 : index
    %122 = vector.load %arg3[%c3, %c0_34] : memref<4x128xf32, #tpu.memory_space<vmem>>, vector<1x128xf32>
    %cst_35 = arith.constant dense<0.000000e+00> : vector<128xf32>
    %123 = vector.multi_reduction <add>, %120, %cst_35 [1] : vector<128x128xf32> to vector<128xf32>
    %124 = vector.shape_cast %123 : vector<128xf32> to vector<128x1xf32>
    %cst_36 = arith.constant 1.280000e+02 : f32
    %125 = vector.broadcast %cst_36 : f32 to vector<128x1xf32>
    %126 = arith.divf %124, %125 : vector<128x1xf32>
    %127 = vector.broadcast %126 : vector<128x1xf32> to vector<128x128xf32>
    %128 = arith.subf %120, %127 : vector<128x128xf32>
    %129 = arith.mulf %128, %128 : vector<128x128xf32>
    %cst_37 = arith.constant dense<0.000000e+00> : vector<128xf32>
    %130 = vector.multi_reduction <add>, %129, %cst_37 [1] : vector<128x128xf32> to vector<128xf32>
    %131 = vector.shape_cast %130 : vector<128xf32> to vector<128x1xf32>
    %cst_38 = arith.constant 1.280000e+02 : f32
    %132 = vector.broadcast %cst_38 : f32 to vector<128x1xf32>
    %133 = arith.divf %131, %132 : vector<128x1xf32>
    %cst_39 = arith.constant 9.99999974E-6 : f32
    %134 = vector.broadcast %cst_39 : f32 to vector<128x1xf32>
    %135 = arith.addf %133, %134 : vector<128x1xf32>
    %136 = math.rsqrt %135 : vector<128x1xf32>
    %137 = vector.broadcast %136 : vector<128x1xf32> to vector<128x128xf32>
    %138 = arith.mulf %128, %137 : vector<128x128xf32>
    %139 = vector.broadcast %121 : vector<1x128xf32> to vector<128x128xf32>
    %140 = arith.mulf %138, %139 : vector<128x128xf32>
    %141 = vector.broadcast %122 : vector<1x128xf32> to vector<128x128xf32>
    %142 = arith.addf %140, %141 : vector<128x128xf32>
    %c1_40 = arith.constant 1 : index
    %c0_41 = arith.constant 0 : index
    %c0_42 = arith.constant 0 : index
    %143 = vector.load %arg4[%c1_40, %c0_41, %c0_42] : memref<2x7x128xf32, #tpu.memory_space<vmem>>, vector<1x7x128xf32>
    %144 = vector.shape_cast %143 : vector<1x7x128xf32> to vector<7x128xf32>
    %cst_43 = arith.constant 0.000000e+00 : f32
    %145 = vector.broadcast %cst_43 : f32 to vector<128x128xf32>
    %c3_i32_44 = arith.constant 3 : i32
    %146 = tpu.dynamic_rotate %142 by %c3_i32_44 dim 0 : vector<128x128xf32>, i32 -> vector<128x128xf32>
    %147 = vector.extract_strided_slice %144 {offsets = [0, 0], sizes = [1, 128], strides = [1, 1]} : vector<7x128xf32> to vector<1x128xf32>
    %cst_45 = arith.constant 0.000000e+00 : f32
    %148 = vector.broadcast %cst_45 : f32 to vector<128x128xf32>
    %149 = arith.select %7, %146, %148 : vector<128x128xi1>, vector<128x128xf32>
    %150 = vector.broadcast %147 : vector<1x128xf32> to vector<128x128xf32>
    %151 = arith.mulf %150, %149 : vector<128x128xf32>
    %152 = arith.addf %145, %151 : vector<128x128xf32>
    %c2_i32_46 = arith.constant 2 : i32
    %153 = tpu.dynamic_rotate %142 by %c2_i32_46 dim 0 : vector<128x128xf32>, i32 -> vector<128x128xf32>
    %154 = vector.extract_strided_slice %144 {offsets = [1, 0], sizes = [1, 128], strides = [1, 1]} : vector<7x128xf32> to vector<1x128xf32>
    %cst_47 = arith.constant 0.000000e+00 : f32
    %155 = vector.broadcast %cst_47 : f32 to vector<128x128xf32>
    %156 = arith.select %12, %153, %155 : vector<128x128xi1>, vector<128x128xf32>
    %157 = vector.broadcast %154 : vector<1x128xf32> to vector<128x128xf32>
    %158 = arith.mulf %157, %156 : vector<128x128xf32>
    %159 = arith.addf %152, %158 : vector<128x128xf32>
    %c1_i32_48 = arith.constant 1 : i32
    %160 = tpu.dynamic_rotate %142 by %c1_i32_48 dim 0 : vector<128x128xf32>, i32 -> vector<128x128xf32>
    %161 = vector.extract_strided_slice %144 {offsets = [2, 0], sizes = [1, 128], strides = [1, 1]} : vector<7x128xf32> to vector<1x128xf32>
    %cst_49 = arith.constant 0.000000e+00 : f32
    %162 = vector.broadcast %cst_49 : f32 to vector<128x128xf32>
    %163 = arith.select %17, %160, %162 : vector<128x128xi1>, vector<128x128xf32>
    %164 = vector.broadcast %161 : vector<1x128xf32> to vector<128x128xf32>
    %165 = arith.mulf %164, %163 : vector<128x128xf32>
    %166 = arith.addf %159, %165 : vector<128x128xf32>
    %167 = vector.extract_strided_slice %144 {offsets = [3, 0], sizes = [1, 128], strides = [1, 1]} : vector<7x128xf32> to vector<1x128xf32>
    %cst_50 = arith.constant 0.000000e+00 : f32
    %168 = vector.broadcast %cst_50 : f32 to vector<128x128xf32>
    %169 = arith.select %22, %142, %168 : vector<128x128xi1>, vector<128x128xf32>
    %170 = vector.broadcast %167 : vector<1x128xf32> to vector<128x128xf32>
    %171 = arith.mulf %170, %169 : vector<128x128xf32>
    %172 = arith.addf %166, %171 : vector<128x128xf32>
    %c127_i32_51 = arith.constant 127 : i32
    %173 = tpu.dynamic_rotate %142 by %c127_i32_51 dim 0 : vector<128x128xf32>, i32 -> vector<128x128xf32>
    %174 = vector.extract_strided_slice %144 {offsets = [4, 0], sizes = [1, 128], strides = [1, 1]} : vector<7x128xf32> to vector<1x128xf32>
    %cst_52 = arith.constant 0.000000e+00 : f32
    %175 = vector.broadcast %cst_52 : f32 to vector<128x128xf32>
    %176 = arith.select %27, %173, %175 : vector<128x128xi1>, vector<128x128xf32>
    %177 = vector.broadcast %174 : vector<1x128xf32> to vector<128x128xf32>
    %178 = arith.mulf %177, %176 : vector<128x128xf32>
    %179 = arith.addf %172, %178 : vector<128x128xf32>
    %c126_i32_53 = arith.constant 126 : i32
    %180 = tpu.dynamic_rotate %142 by %c126_i32_53 dim 0 : vector<128x128xf32>, i32 -> vector<128x128xf32>
    %181 = vector.extract_strided_slice %144 {offsets = [5, 0], sizes = [1, 128], strides = [1, 1]} : vector<7x128xf32> to vector<1x128xf32>
    %cst_54 = arith.constant 0.000000e+00 : f32
    %182 = vector.broadcast %cst_54 : f32 to vector<128x128xf32>
    %183 = arith.select %32, %180, %182 : vector<128x128xi1>, vector<128x128xf32>
    %184 = vector.broadcast %181 : vector<1x128xf32> to vector<128x128xf32>
    %185 = arith.mulf %184, %183 : vector<128x128xf32>
    %186 = arith.addf %179, %185 : vector<128x128xf32>
    %c125_i32_55 = arith.constant 125 : i32
    %187 = tpu.dynamic_rotate %142 by %c125_i32_55 dim 0 : vector<128x128xf32>, i32 -> vector<128x128xf32>
    %188 = vector.extract_strided_slice %144 {offsets = [6, 0], sizes = [1, 128], strides = [1, 1]} : vector<7x128xf32> to vector<1x128xf32>
    %cst_56 = arith.constant 0.000000e+00 : f32
    %189 = vector.broadcast %cst_56 : f32 to vector<128x128xf32>
    %190 = arith.select %37, %187, %189 : vector<128x128xi1>, vector<128x128xf32>
    %191 = vector.broadcast %188 : vector<1x128xf32> to vector<128x128xf32>
    %192 = arith.mulf %191, %190 : vector<128x128xf32>
    %193 = arith.addf %186, %192 : vector<128x128xf32>
    %194 = arith.truncf %193 : vector<128x128xf32> to vector<128x128xbf16>
    %c1_57 = arith.constant 1 : index
    %c0_58 = arith.constant 0 : index
    %c0_59 = arith.constant 0 : index
    %195 = vector.load %arg5[%c1_57, %c0_58, %c0_59] : memref<2x128x128xbf16, #tpu.memory_space<vmem>>, vector<1x128x128xbf16>
    %196 = vector.shape_cast %195 : vector<1x128x128xbf16> to vector<128x128xbf16>
    %cst_60 = arith.constant dense<0.000000e+00> : vector<128x128xf32>
    %197 = tpu.matmul %194, %196, %cst_60 {dimension_numbers = #tpu.dot_dimension_numbers<[1], [0], [0], [1], [0, 0, 1, 1], [], []>} : vector<128x128xbf16>, vector<128x128xbf16>, vector<128x128xf32> -> vector<128x128xf32>
    %c1_61 = arith.constant 1 : index
    %c0_62 = arith.constant 0 : index
    %198 = vector.load %arg6[%c1_61, %c0_62] : memref<2x128xf32, #tpu.memory_space<vmem>>, vector<1x128xf32>
    %199 = vector.broadcast %198 : vector<1x128xf32> to vector<128x128xf32>
    %200 = arith.addf %197, %199 : vector<128x128xf32>
    %cst_63 = arith.constant 0.000000e+00 : f32
    %201 = vector.broadcast %cst_63 : f32 to vector<128x128xf32>
    %202 = arith.maximumf %200, %201 : vector<128x128xf32>
    %203 = arith.addf %202, %120 : vector<128x128xf32>
    %c0_64 = arith.constant 0 : index
    %c0_65 = arith.constant 0 : index
    %204 = vector.load %arg7[%c0_64, %c0_65] : memref<4x128xf32, #tpu.memory_space<vmem>>, vector<4x128xf32>
    %205 = vector.extract_strided_slice %204 {offsets = [0, 0], sizes = [1, 128], strides = [1, 1]} : vector<4x128xf32> to vector<1x128xf32>
    %206 = vector.extract_strided_slice %204 {offsets = [1, 0], sizes = [1, 128], strides = [1, 1]} : vector<4x128xf32> to vector<1x128xf32>
    %cst_66 = arith.constant dense<0.000000e+00> : vector<128xf32>
    %207 = vector.multi_reduction <add>, %203, %cst_66 [1] : vector<128x128xf32> to vector<128xf32>
    %208 = vector.shape_cast %207 : vector<128xf32> to vector<128x1xf32>
    %cst_67 = arith.constant 1.280000e+02 : f32
    %209 = vector.broadcast %cst_67 : f32 to vector<128x1xf32>
    %210 = arith.divf %208, %209 : vector<128x1xf32>
    %211 = vector.broadcast %210 : vector<128x1xf32> to vector<128x128xf32>
    %212 = arith.subf %203, %211 : vector<128x128xf32>
    %213 = arith.mulf %212, %212 : vector<128x128xf32>
    %cst_68 = arith.constant dense<0.000000e+00> : vector<128xf32>
    %214 = vector.multi_reduction <add>, %213, %cst_68 [1] : vector<128x128xf32> to vector<128xf32>
    %215 = vector.shape_cast %214 : vector<128xf32> to vector<128x1xf32>
    %cst_69 = arith.constant 1.280000e+02 : f32
    %216 = vector.broadcast %cst_69 : f32 to vector<128x1xf32>
    %217 = arith.divf %215, %216 : vector<128x1xf32>
    %cst_70 = arith.constant 9.99999974E-6 : f32
    %218 = vector.broadcast %cst_70 : f32 to vector<128x1xf32>
    %219 = arith.addf %217, %218 : vector<128x1xf32>
    %220 = math.rsqrt %219 : vector<128x1xf32>
    %221 = vector.broadcast %220 : vector<128x1xf32> to vector<128x128xf32>
    %222 = arith.mulf %212, %221 : vector<128x128xf32>
    %223 = vector.broadcast %205 : vector<1x128xf32> to vector<128x128xf32>
    %224 = arith.mulf %222, %223 : vector<128x128xf32>
    %225 = vector.broadcast %206 : vector<1x128xf32> to vector<128x128xf32>
    %226 = arith.addf %224, %225 : vector<128x128xf32>
    %227 = vector.extract_strided_slice %204 {offsets = [2, 0], sizes = [1, 128], strides = [1, 1]} : vector<4x128xf32> to vector<1x128xf32>
    %228 = vector.extract_strided_slice %204 {offsets = [3, 0], sizes = [1, 128], strides = [1, 1]} : vector<4x128xf32> to vector<1x128xf32>
    %cst_71 = arith.constant dense<0.000000e+00> : vector<128xf32>
    %229 = vector.multi_reduction <add>, %226, %cst_71 [1] : vector<128x128xf32> to vector<128xf32>
    %230 = vector.shape_cast %229 : vector<128xf32> to vector<128x1xf32>
    %cst_72 = arith.constant 1.280000e+02 : f32
    %231 = vector.broadcast %cst_72 : f32 to vector<128x1xf32>
    %232 = arith.divf %230, %231 : vector<128x1xf32>
    %233 = vector.broadcast %232 : vector<128x1xf32> to vector<128x128xf32>
    %234 = arith.subf %226, %233 : vector<128x128xf32>
    %235 = arith.mulf %234, %234 : vector<128x128xf32>
    %cst_73 = arith.constant dense<0.000000e+00> : vector<128xf32>
    %236 = vector.multi_reduction <add>, %235, %cst_73 [1] : vector<128x128xf32> to vector<128xf32>
    %237 = vector.shape_cast %236 : vector<128xf32> to vector<128x1xf32>
    %cst_74 = arith.constant 1.280000e+02 : f32
    %238 = vector.broadcast %cst_74 : f32 to vector<128x1xf32>
    %239 = arith.divf %237, %238 : vector<128x1xf32>
    %cst_75 = arith.constant 9.99999974E-6 : f32
    %240 = vector.broadcast %cst_75 : f32 to vector<128x1xf32>
    %241 = arith.addf %239, %240 : vector<128x1xf32>
    %242 = math.rsqrt %241 : vector<128x1xf32>
    %243 = vector.broadcast %242 : vector<128x1xf32> to vector<128x128xf32>
    %244 = arith.mulf %234, %243 : vector<128x128xf32>
    %245 = vector.broadcast %227 : vector<1x128xf32> to vector<128x128xf32>
    %246 = arith.mulf %244, %245 : vector<128x128xf32>
    %247 = vector.broadcast %228 : vector<1x128xf32> to vector<128x128xf32>
    %248 = arith.addf %246, %247 : vector<128x128xf32>
    %249 = arith.truncf %248 : vector<128x128xf32> to vector<128x128xbf16>
    %c0_76 = arith.constant 0 : index
    %c0_77 = arith.constant 0 : index
    %250 = vector.load %arg8[%c0_76, %c0_77] : memref<128x384xbf16, #tpu.memory_space<vmem>>, vector<128x384xbf16>
    %cst_78 = arith.constant dense<0.000000e+00> : vector<128x384xf32>
    %251 = tpu.matmul %249, %250, %cst_78 {dimension_numbers = #tpu.dot_dimension_numbers<[1], [0], [0], [1], [0, 0, 1, 1], [], []>} : vector<128x128xbf16>, vector<128x384xbf16>, vector<128x384xf32> -> vector<128x384xf32>
    %c0_79 = arith.constant 0 : index
    %c0_80 = arith.constant 0 : index
    %252 = vector.load %arg9[%c0_79, %c0_80] : memref<128x128xf32, #tpu.memory_space<vmem>>, vector<128x128xf32>
    %253 = arith.truncf %252 : vector<128x128xf32> to vector<128x128xbf16>
    %c0_81 = arith.constant 0 : index
    %c0_82 = arith.constant 0 : index
    %254 = vector.load %arg10[%c0_81, %c0_82] : memref<128x128xbf16, #tpu.memory_space<vmem>>, vector<128x128xbf16>
    %cst_83 = arith.constant dense<0.000000e+00> : vector<128x128xf32>
    %255 = tpu.matmul %253, %254, %cst_83 {dimension_numbers = #tpu.dot_dimension_numbers<[1], [0], [0], [1], [0, 0, 1, 1], [], []>} : vector<128x128xbf16>, vector<128x128xbf16>, vector<128x128xf32> -> vector<128x128xf32>
    %256 = vector.extract_strided_slice %251 {offsets = [0, 0], sizes = [128, 128], strides = [1, 1]} : vector<128x384xf32> to vector<128x128xf32>
    %257 = vector.extract_strided_slice %251 {offsets = [0, 128], sizes = [128, 128], strides = [1, 1]} : vector<128x384xf32> to vector<128x128xf32>
    %258 = arith.truncf %257 : vector<128x128xf32> to vector<128x128xbf16>
    %259 = vector.extract_strided_slice %251 {offsets = [0, 256], sizes = [128, 128], strides = [1, 1]} : vector<128x384xf32> to vector<128x128xf32>
    %260 = arith.truncf %259 : vector<128x128xf32> to vector<128x128xbf16>
    %261 = arith.truncf %255 : vector<128x128xf32> to vector<128x128xbf16>
    %c0_84 = arith.constant 0 : index
    %c0_85 = arith.constant 0 : index
    %c0_86 = arith.constant 0 : index
    %262 = vector.load %arg2[%c0_84, %c0_85, %c0_86] : memref<1x128x1xf32, #tpu.memory_space<vmem>>, vector<1x128x1xf32>
    %263 = vector.shape_cast %262 : vector<1x128x1xf32> to vector<128x1xf32>
    %cst_87 = arith.constant 1.000000e+00 : f32
    %264 = vector.broadcast %cst_87 : f32 to vector<128x1xf32>
    %265 = arith.subf %264, %263 : vector<128x1xf32>
    %cst_88 = arith.constant -1.000000e+30 : f32
    %266 = vector.broadcast %cst_88 : f32 to vector<128x1xf32>
    %267 = arith.mulf %265, %266 : vector<128x1xf32>
    %268 = tpu.iota {dimensions = array<i32: 0>} : vector<128x128xi32>
    %269 = tpu.iota {dimensions = array<i32: 1>} : vector<128x128xi32>
    %270 = arith.cmpi sle, %269, %268 : vector<128x128xi32>
    %c1_i32_89 = arith.constant 1 : i32
    %271 = vector.broadcast %c1_i32_89 : i32 to vector<128x128xi32>
    %272 = arith.addi %268, %271 : vector<128x128xi32>
    %273 = arith.cmpi eq, %269, %272 : vector<128x128xi32>
    %274 = vector.extract_strided_slice %256 {offsets = [0, 0], sizes = [128, 32], strides = [1, 1]} : vector<128x128xf32> to vector<128x32xf32>
    %c0_90 = arith.constant 0 : index
    %c0_91 = arith.constant 0 : index
    %275 = vector.load %arg11[%c0_90, %c0_91] : memref<8x32xf32, #tpu.memory_space<vmem>>, vector<1x32xf32>
    %276 = vector.broadcast %275 : vector<1x32xf32> to vector<128x32xf32>
    %277 = arith.addf %274, %276 : vector<128x32xf32>
    %278 = arith.truncf %277 : vector<128x32xf32> to vector<128x32xbf16>
    %c4 = arith.constant 4 : index
    %c0_92 = arith.constant 0 : index
    %279 = vector.load %arg11[%c4, %c0_92] : memref<8x32xf32, #tpu.memory_space<vmem>>, vector<1x32xf32>
    %280 = vector.broadcast %279 : vector<1x32xf32> to vector<128x32xf32>
    %281 = arith.addf %274, %280 : vector<128x32xf32>
    %282 = arith.truncf %281 : vector<128x32xf32> to vector<128x32xbf16>
    %283 = vector.extract_strided_slice %258 {offsets = [0, 0], sizes = [128, 32], strides = [1, 1]} : vector<128x128xbf16> to vector<128x32xbf16>
    %cst_93 = arith.constant dense<0.000000e+00> : vector<128x128xf32>
    %284 = tpu.matmul %278, %283, %cst_93 {dimension_numbers = #tpu.dot_dimension_numbers<[1], [1], [0], [0], [0, 0, 1, 0], [], []>} : vector<128x32xbf16>, vector<128x32xbf16>, vector<128x128xf32> -> vector<128x128xf32>
    %285 = vector.extract_strided_slice %261 {offsets = [0, 0], sizes = [128, 32], strides = [1, 1]} : vector<128x128xbf16> to vector<128x32xbf16>
    %cst_94 = arith.constant dense<0.000000e+00> : vector<128x128xf32>
    %286 = tpu.matmul %282, %285, %cst_94 {dimension_numbers = #tpu.dot_dimension_numbers<[1], [1], [0], [0], [0, 0, 1, 0], [], []>} : vector<128x32xbf16>, vector<128x32xbf16>, vector<128x128xf32> -> vector<128x128xf32>
    %c1_i32_95 = arith.constant 1 : i32
    %287 = tpu.dynamic_rotate %286 by %c1_i32_95 dim 1 {stride = 1 : si32, stride_dimension = 0 : si32} : vector<128x128xf32>, i32 -> vector<128x128xf32>
    %c127_i32_96 = arith.constant 127 : i32
    %288 = tpu.dynamic_rotate %287 by %c127_i32_96 dim 0 : vector<128x128xf32>, i32 -> vector<128x128xf32>
    %cst_97 = arith.constant 0.000000e+00 : f32
    %289 = vector.broadcast %cst_97 : f32 to vector<128x128xf32>
    %290 = arith.select %273, %289, %288 : vector<128x128xi1>, vector<128x128xf32>
    %291 = arith.select %270, %287, %290 : vector<128x128xi1>, vector<128x128xf32>
    %292 = arith.addf %284, %291 : vector<128x128xf32>
    %cst_98 = arith.constant 0.176776692 : f32
    %293 = vector.broadcast %cst_98 : f32 to vector<128x128xf32>
    %294 = arith.mulf %292, %293 : vector<128x128xf32>
    %295 = vector.broadcast %263 : vector<128x1xf32> to vector<128x128xf32>
    %296 = arith.mulf %294, %295 : vector<128x128xf32>
    %297 = vector.broadcast %267 : vector<128x1xf32> to vector<128x128xf32>
    %298 = arith.addf %296, %297 : vector<128x128xf32>
    %cst_99 = arith.constant dense<0xFF800000> : vector<128xf32>
    %299 = vector.multi_reduction <maximumf>, %298, %cst_99 [1] : vector<128x128xf32> to vector<128xf32>
    %300 = vector.shape_cast %299 : vector<128xf32> to vector<128x1xf32>
    %301 = vector.broadcast %300 : vector<128x1xf32> to vector<128x128xf32>
    %302 = arith.subf %298, %301 : vector<128x128xf32>
    %303 = math.exp %302 : vector<128x128xf32>
    %cst_100 = arith.constant dense<0.000000e+00> : vector<128xf32>
    %304 = vector.multi_reduction <add>, %303, %cst_100 [1] : vector<128x128xf32> to vector<128xf32>
    %305 = vector.shape_cast %304 : vector<128xf32> to vector<128x1xf32>
    %306 = tpu.reciprocal %305 {approx = true} : vector<128x1xf32> -> vector<128x1xf32>
    %307 = vector.broadcast %306 : vector<128x1xf32> to vector<128x128xf32>
    %308 = arith.mulf %303, %307 : vector<128x128xf32>
    %309 = arith.truncf %308 : vector<128x128xf32> to vector<128x128xbf16>
    %310 = vector.extract_strided_slice %260 {offsets = [0, 0], sizes = [128, 32], strides = [1, 1]} : vector<128x128xbf16> to vector<128x32xbf16>
    %cst_101 = arith.constant dense<0.000000e+00> : vector<128x32xf32>
    %311 = tpu.matmul %309, %310, %cst_101 {dimension_numbers = #tpu.dot_dimension_numbers<[1], [0], [0], [1], [0, 0, 1, 1], [], []>} : vector<128x128xbf16>, vector<128x32xbf16>, vector<128x32xf32> -> vector<128x32xf32>
    %312 = vector.extract_strided_slice %256 {offsets = [0, 32], sizes = [128, 32], strides = [1, 1]} : vector<128x128xf32> to vector<128x32xf32>
    %c1_102 = arith.constant 1 : index
    %c0_103 = arith.constant 0 : index
    %313 = vector.load %arg11[%c1_102, %c0_103] : memref<8x32xf32, #tpu.memory_space<vmem>>, vector<1x32xf32>
    %314 = vector.broadcast %313 : vector<1x32xf32> to vector<128x32xf32>
    %315 = arith.addf %312, %314 : vector<128x32xf32>
    %316 = arith.truncf %315 : vector<128x32xf32> to vector<128x32xbf16>
    %c5 = arith.constant 5 : index
    %c0_104 = arith.constant 0 : index
    %317 = vector.load %arg11[%c5, %c0_104] : memref<8x32xf32, #tpu.memory_space<vmem>>, vector<1x32xf32>
    %318 = vector.broadcast %317 : vector<1x32xf32> to vector<128x32xf32>
    %319 = arith.addf %312, %318 : vector<128x32xf32>
    %320 = arith.truncf %319 : vector<128x32xf32> to vector<128x32xbf16>
    %321 = vector.extract_strided_slice %258 {offsets = [0, 32], sizes = [128, 32], strides = [1, 1]} : vector<128x128xbf16> to vector<128x32xbf16>
    %cst_105 = arith.constant dense<0.000000e+00> : vector<128x128xf32>
    %322 = tpu.matmul %316, %321, %cst_105 {dimension_numbers = #tpu.dot_dimension_numbers<[1], [1], [0], [0], [0, 0, 1, 0], [], []>} : vector<128x32xbf16>, vector<128x32xbf16>, vector<128x128xf32> -> vector<128x128xf32>
    %323 = vector.extract_strided_slice %261 {offsets = [0, 32], sizes = [128, 32], strides = [1, 1]} : vector<128x128xbf16> to vector<128x32xbf16>
    %cst_106 = arith.constant dense<0.000000e+00> : vector<128x128xf32>
    %324 = tpu.matmul %320, %323, %cst_106 {dimension_numbers = #tpu.dot_dimension_numbers<[1], [1], [0], [0], [0, 0, 1, 0], [], []>} : vector<128x32xbf16>, vector<128x32xbf16>, vector<128x128xf32> -> vector<128x128xf32>
    %c1_i32_107 = arith.constant 1 : i32
    %325 = tpu.dynamic_rotate %324 by %c1_i32_107 dim 1 {stride = 1 : si32, stride_dimension = 0 : si32} : vector<128x128xf32>, i32 -> vector<128x128xf32>
    %c127_i32_108 = arith.constant 127 : i32
    %326 = tpu.dynamic_rotate %325 by %c127_i32_108 dim 0 : vector<128x128xf32>, i32 -> vector<128x128xf32>
    %cst_109 = arith.constant 0.000000e+00 : f32
    %327 = vector.broadcast %cst_109 : f32 to vector<128x128xf32>
    %328 = arith.select %273, %327, %326 : vector<128x128xi1>, vector<128x128xf32>
    %329 = arith.select %270, %325, %328 : vector<128x128xi1>, vector<128x128xf32>
    %330 = arith.addf %322, %329 : vector<128x128xf32>
    %cst_110 = arith.constant 0.176776692 : f32
    %331 = vector.broadcast %cst_110 : f32 to vector<128x128xf32>
    %332 = arith.mulf %330, %331 : vector<128x128xf32>
    %333 = vector.broadcast %263 : vector<128x1xf32> to vector<128x128xf32>
    %334 = arith.mulf %332, %333 : vector<128x128xf32>
    %335 = vector.broadcast %267 : vector<128x1xf32> to vector<128x128xf32>
    %336 = arith.addf %334, %335 : vector<128x128xf32>
    %cst_111 = arith.constant dense<0xFF800000> : vector<128xf32>
    %337 = vector.multi_reduction <maximumf>, %336, %cst_111 [1] : vector<128x128xf32> to vector<128xf32>
    %338 = vector.shape_cast %337 : vector<128xf32> to vector<128x1xf32>
    %339 = vector.broadcast %338 : vector<128x1xf32> to vector<128x128xf32>
    %340 = arith.subf %336, %339 : vector<128x128xf32>
    %341 = math.exp %340 : vector<128x128xf32>
    %cst_112 = arith.constant dense<0.000000e+00> : vector<128xf32>
    %342 = vector.multi_reduction <add>, %341, %cst_112 [1] : vector<128x128xf32> to vector<128xf32>
    %343 = vector.shape_cast %342 : vector<128xf32> to vector<128x1xf32>
    %344 = tpu.reciprocal %343 {approx = true} : vector<128x1xf32> -> vector<128x1xf32>
    %345 = vector.broadcast %344 : vector<128x1xf32> to vector<128x128xf32>
    %346 = arith.mulf %341, %345 : vector<128x128xf32>
    %347 = arith.truncf %346 : vector<128x128xf32> to vector<128x128xbf16>
    %348 = vector.extract_strided_slice %260 {offsets = [0, 32], sizes = [128, 32], strides = [1, 1]} : vector<128x128xbf16> to vector<128x32xbf16>
    %cst_113 = arith.constant dense<0.000000e+00> : vector<128x32xf32>
    %349 = tpu.matmul %347, %348, %cst_113 {dimension_numbers = #tpu.dot_dimension_numbers<[1], [0], [0], [1], [0, 0, 1, 1], [], []>} : vector<128x128xbf16>, vector<128x32xbf16>, vector<128x32xf32> -> vector<128x32xf32>
    %350 = vector.extract_strided_slice %256 {offsets = [0, 64], sizes = [128, 32], strides = [1, 1]} : vector<128x128xf32> to vector<128x32xf32>
    %c2_114 = arith.constant 2 : index
    %c0_115 = arith.constant 0 : index
    %351 = vector.load %arg11[%c2_114, %c0_115] : memref<8x32xf32, #tpu.memory_space<vmem>>, vector<1x32xf32>
    %352 = vector.broadcast %351 : vector<1x32xf32> to vector<128x32xf32>
    %353 = arith.addf %350, %352 : vector<128x32xf32>
    %354 = arith.truncf %353 : vector<128x32xf32> to vector<128x32xbf16>
    %c6 = arith.constant 6 : index
    %c0_116 = arith.constant 0 : index
    %355 = vector.load %arg11[%c6, %c0_116] : memref<8x32xf32, #tpu.memory_space<vmem>>, vector<1x32xf32>
    %356 = vector.broadcast %355 : vector<1x32xf32> to vector<128x32xf32>
    %357 = arith.addf %350, %356 : vector<128x32xf32>
    %358 = arith.truncf %357 : vector<128x32xf32> to vector<128x32xbf16>
    %359 = vector.extract_strided_slice %258 {offsets = [0, 64], sizes = [128, 32], strides = [1, 1]} : vector<128x128xbf16> to vector<128x32xbf16>
    %cst_117 = arith.constant dense<0.000000e+00> : vector<128x128xf32>
    %360 = tpu.matmul %354, %359, %cst_117 {dimension_numbers = #tpu.dot_dimension_numbers<[1], [1], [0], [0], [0, 0, 1, 0], [], []>} : vector<128x32xbf16>, vector<128x32xbf16>, vector<128x128xf32> -> vector<128x128xf32>
    %361 = vector.extract_strided_slice %261 {offsets = [0, 64], sizes = [128, 32], strides = [1, 1]} : vector<128x128xbf16> to vector<128x32xbf16>
    %cst_118 = arith.constant dense<0.000000e+00> : vector<128x128xf32>
    %362 = tpu.matmul %358, %361, %cst_118 {dimension_numbers = #tpu.dot_dimension_numbers<[1], [1], [0], [0], [0, 0, 1, 0], [], []>} : vector<128x32xbf16>, vector<128x32xbf16>, vector<128x128xf32> -> vector<128x128xf32>
    %c1_i32_119 = arith.constant 1 : i32
    %363 = tpu.dynamic_rotate %362 by %c1_i32_119 dim 1 {stride = 1 : si32, stride_dimension = 0 : si32} : vector<128x128xf32>, i32 -> vector<128x128xf32>
    %c127_i32_120 = arith.constant 127 : i32
    %364 = tpu.dynamic_rotate %363 by %c127_i32_120 dim 0 : vector<128x128xf32>, i32 -> vector<128x128xf32>
    %cst_121 = arith.constant 0.000000e+00 : f32
    %365 = vector.broadcast %cst_121 : f32 to vector<128x128xf32>
    %366 = arith.select %273, %365, %364 : vector<128x128xi1>, vector<128x128xf32>
    %367 = arith.select %270, %363, %366 : vector<128x128xi1>, vector<128x128xf32>
    %368 = arith.addf %360, %367 : vector<128x128xf32>
    %cst_122 = arith.constant 0.176776692 : f32
    %369 = vector.broadcast %cst_122 : f32 to vector<128x128xf32>
    %370 = arith.mulf %368, %369 : vector<128x128xf32>
    %371 = vector.broadcast %263 : vector<128x1xf32> to vector<128x128xf32>
    %372 = arith.mulf %370, %371 : vector<128x128xf32>
    %373 = vector.broadcast %267 : vector<128x1xf32> to vector<128x128xf32>
    %374 = arith.addf %372, %373 : vector<128x128xf32>
    %cst_123 = arith.constant dense<0xFF800000> : vector<128xf32>
    %375 = vector.multi_reduction <maximumf>, %374, %cst_123 [1] : vector<128x128xf32> to vector<128xf32>
    %376 = vector.shape_cast %375 : vector<128xf32> to vector<128x1xf32>
    %377 = vector.broadcast %376 : vector<128x1xf32> to vector<128x128xf32>
    %378 = arith.subf %374, %377 : vector<128x128xf32>
    %379 = math.exp %378 : vector<128x128xf32>
    %cst_124 = arith.constant dense<0.000000e+00> : vector<128xf32>
    %380 = vector.multi_reduction <add>, %379, %cst_124 [1] : vector<128x128xf32> to vector<128xf32>
    %381 = vector.shape_cast %380 : vector<128xf32> to vector<128x1xf32>
    %382 = tpu.reciprocal %381 {approx = true} : vector<128x1xf32> -> vector<128x1xf32>
    %383 = vector.broadcast %382 : vector<128x1xf32> to vector<128x128xf32>
    %384 = arith.mulf %379, %383 : vector<128x128xf32>
    %385 = arith.truncf %384 : vector<128x128xf32> to vector<128x128xbf16>
    %386 = vector.extract_strided_slice %260 {offsets = [0, 64], sizes = [128, 32], strides = [1, 1]} : vector<128x128xbf16> to vector<128x32xbf16>
    %cst_125 = arith.constant dense<0.000000e+00> : vector<128x32xf32>
    %387 = tpu.matmul %385, %386, %cst_125 {dimension_numbers = #tpu.dot_dimension_numbers<[1], [0], [0], [1], [0, 0, 1, 1], [], []>} : vector<128x128xbf16>, vector<128x32xbf16>, vector<128x32xf32> -> vector<128x32xf32>
    %388 = vector.extract_strided_slice %256 {offsets = [0, 96], sizes = [128, 32], strides = [1, 1]} : vector<128x128xf32> to vector<128x32xf32>
    %c3_126 = arith.constant 3 : index
    %c0_127 = arith.constant 0 : index
    %389 = vector.load %arg11[%c3_126, %c0_127] : memref<8x32xf32, #tpu.memory_space<vmem>>, vector<1x32xf32>
    %390 = vector.broadcast %389 : vector<1x32xf32> to vector<128x32xf32>
    %391 = arith.addf %388, %390 : vector<128x32xf32>
    %392 = arith.truncf %391 : vector<128x32xf32> to vector<128x32xbf16>
    %c7 = arith.constant 7 : index
    %c0_128 = arith.constant 0 : index
    %393 = vector.load %arg11[%c7, %c0_128] : memref<8x32xf32, #tpu.memory_space<vmem>>, vector<1x32xf32>
    %394 = vector.broadcast %393 : vector<1x32xf32> to vector<128x32xf32>
    %395 = arith.addf %388, %394 : vector<128x32xf32>
    %396 = arith.truncf %395 : vector<128x32xf32> to vector<128x32xbf16>
    %397 = vector.extract_strided_slice %258 {offsets = [0, 96], sizes = [128, 32], strides = [1, 1]} : vector<128x128xbf16> to vector<128x32xbf16>
    %cst_129 = arith.constant dense<0.000000e+00> : vector<128x128xf32>
    %398 = tpu.matmul %392, %397, %cst_129 {dimension_numbers = #tpu.dot_dimension_numbers<[1], [1], [0], [0], [0, 0, 1, 0], [], []>} : vector<128x32xbf16>, vector<128x32xbf16>, vector<128x128xf32> -> vector<128x128xf32>
    %399 = vector.extract_strided_slice %261 {offsets = [0, 96], sizes = [128, 32], strides = [1, 1]} : vector<128x128xbf16> to vector<128x32xbf16>
    %cst_130 = arith.constant dense<0.000000e+00> : vector<128x128xf32>
    %400 = tpu.matmul %396, %399, %cst_130 {dimension_numbers = #tpu.dot_dimension_numbers<[1], [1], [0], [0], [0, 0, 1, 0], [], []>} : vector<128x32xbf16>, vector<128x32xbf16>, vector<128x128xf32> -> vector<128x128xf32>
    %c1_i32_131 = arith.constant 1 : i32
    %401 = tpu.dynamic_rotate %400 by %c1_i32_131 dim 1 {stride = 1 : si32, stride_dimension = 0 : si32} : vector<128x128xf32>, i32 -> vector<128x128xf32>
    %c127_i32_132 = arith.constant 127 : i32
    %402 = tpu.dynamic_rotate %401 by %c127_i32_132 dim 0 : vector<128x128xf32>, i32 -> vector<128x128xf32>
    %cst_133 = arith.constant 0.000000e+00 : f32
    %403 = vector.broadcast %cst_133 : f32 to vector<128x128xf32>
    %404 = arith.select %273, %403, %402 : vector<128x128xi1>, vector<128x128xf32>
    %405 = arith.select %270, %401, %404 : vector<128x128xi1>, vector<128x128xf32>
    %406 = arith.addf %398, %405 : vector<128x128xf32>
    %cst_134 = arith.constant 0.176776692 : f32
    %407 = vector.broadcast %cst_134 : f32 to vector<128x128xf32>
    %408 = arith.mulf %406, %407 : vector<128x128xf32>
    %409 = vector.broadcast %263 : vector<128x1xf32> to vector<128x128xf32>
    %410 = arith.mulf %408, %409 : vector<128x128xf32>
    %411 = vector.broadcast %267 : vector<128x1xf32> to vector<128x128xf32>
    %412 = arith.addf %410, %411 : vector<128x128xf32>
    %cst_135 = arith.constant dense<0xFF800000> : vector<128xf32>
    %413 = vector.multi_reduction <maximumf>, %412, %cst_135 [1] : vector<128x128xf32> to vector<128xf32>
    %414 = vector.shape_cast %413 : vector<128xf32> to vector<128x1xf32>
    %415 = vector.broadcast %414 : vector<128x1xf32> to vector<128x128xf32>
    %416 = arith.subf %412, %415 : vector<128x128xf32>
    %417 = math.exp %416 : vector<128x128xf32>
    %cst_136 = arith.constant dense<0.000000e+00> : vector<128xf32>
    %418 = vector.multi_reduction <add>, %417, %cst_136 [1] : vector<128x128xf32> to vector<128xf32>
    %419 = vector.shape_cast %418 : vector<128xf32> to vector<128x1xf32>
    %420 = tpu.reciprocal %419 {approx = true} : vector<128x1xf32> -> vector<128x1xf32>
    %421 = vector.broadcast %420 : vector<128x1xf32> to vector<128x128xf32>
    %422 = arith.mulf %417, %421 : vector<128x128xf32>
    %423 = arith.truncf %422 : vector<128x128xf32> to vector<128x128xbf16>
    %424 = vector.extract_strided_slice %260 {offsets = [0, 96], sizes = [128, 32], strides = [1, 1]} : vector<128x128xbf16> to vector<128x32xbf16>
    %cst_137 = arith.constant dense<0.000000e+00> : vector<128x32xf32>
    %425 = tpu.matmul %423, %424, %cst_137 {dimension_numbers = #tpu.dot_dimension_numbers<[1], [0], [0], [1], [0, 0, 1, 1], [], []>} : vector<128x128xbf16>, vector<128x32xbf16>, vector<128x32xf32> -> vector<128x32xf32>
    %426 = tpu.concatenate %311, %349, %387, %425 in 1 : vector<128x32xf32>, vector<128x32xf32>, vector<128x32xf32>, vector<128x32xf32> -> vector<128x128xf32>
    %427 = arith.truncf %426 : vector<128x128xf32> to vector<128x128xbf16>
    %c0_138 = arith.constant 0 : index
    %c0_139 = arith.constant 0 : index
    %428 = vector.load %arg12[%c0_138, %c0_139] : memref<128x128xbf16, #tpu.memory_space<vmem>>, vector<128x128xbf16>
    %cst_140 = arith.constant dense<0.000000e+00> : vector<128x128xf32>
    %429 = tpu.matmul %427, %428, %cst_140 {dimension_numbers = #tpu.dot_dimension_numbers<[1], [0], [0], [1], [0, 0, 1, 1], [], []>} : vector<128x128xbf16>, vector<128x128xbf16>, vector<128x128xf32> -> vector<128x128xf32>
    %430 = arith.addf %429, %203 : vector<128x128xf32>
    %c0_141 = arith.constant 0 : index
    %c0_142 = arith.constant 0 : index
    %431 = vector.load %arg13[%c0_141, %c0_142] : memref<2x128xf32, #tpu.memory_space<vmem>>, vector<2x128xf32>
    %432 = vector.extract_strided_slice %431 {offsets = [0, 0], sizes = [1, 128], strides = [1, 1]} : vector<2x128xf32> to vector<1x128xf32>
    %433 = vector.extract_strided_slice %431 {offsets = [1, 0], sizes = [1, 128], strides = [1, 1]} : vector<2x128xf32> to vector<1x128xf32>
    %cst_143 = arith.constant dense<0.000000e+00> : vector<128xf32>
    %434 = vector.multi_reduction <add>, %430, %cst_143 [1] : vector<128x128xf32> to vector<128xf32>
    %435 = vector.shape_cast %434 : vector<128xf32> to vector<128x1xf32>
    %cst_144 = arith.constant 1.280000e+02 : f32
    %436 = vector.broadcast %cst_144 : f32 to vector<128x1xf32>
    %437 = arith.divf %435, %436 : vector<128x1xf32>
    %438 = vector.broadcast %437 : vector<128x1xf32> to vector<128x128xf32>
    %439 = arith.subf %430, %438 : vector<128x128xf32>
    %440 = arith.mulf %439, %439 : vector<128x128xf32>
    %cst_145 = arith.constant dense<0.000000e+00> : vector<128xf32>
    %441 = vector.multi_reduction <add>, %440, %cst_145 [1] : vector<128x128xf32> to vector<128xf32>
    %442 = vector.shape_cast %441 : vector<128xf32> to vector<128x1xf32>
    %cst_146 = arith.constant 1.280000e+02 : f32
    %443 = vector.broadcast %cst_146 : f32 to vector<128x1xf32>
    %444 = arith.divf %442, %443 : vector<128x1xf32>
    %cst_147 = arith.constant 9.99999974E-6 : f32
    %445 = vector.broadcast %cst_147 : f32 to vector<128x1xf32>
    %446 = arith.addf %444, %445 : vector<128x1xf32>
    %447 = math.rsqrt %446 : vector<128x1xf32>
    %448 = vector.broadcast %447 : vector<128x1xf32> to vector<128x128xf32>
    %449 = arith.mulf %439, %448 : vector<128x128xf32>
    %450 = vector.broadcast %432 : vector<1x128xf32> to vector<128x128xf32>
    %451 = arith.mulf %449, %450 : vector<128x128xf32>
    %452 = vector.broadcast %433 : vector<1x128xf32> to vector<128x128xf32>
    %453 = arith.addf %451, %452 : vector<128x128xf32>
    %454 = arith.truncf %453 : vector<128x128xf32> to vector<128x128xbf16>
    %c0_148 = arith.constant 0 : index
    %c0_149 = arith.constant 0 : index
    %455 = vector.load %arg14[%c0_148, %c0_149] : memref<128x128xbf16, #tpu.memory_space<vmem>>, vector<128x128xbf16>
    %cst_150 = arith.constant dense<0.000000e+00> : vector<128x128xf32>
    %456 = tpu.matmul %454, %455, %cst_150 {dimension_numbers = #tpu.dot_dimension_numbers<[1], [0], [0], [1], [0, 0, 1, 1], [], []>} : vector<128x128xbf16>, vector<128x128xbf16>, vector<128x128xf32> -> vector<128x128xf32>
    %c0_151 = arith.constant 0 : index
    %c0_152 = arith.constant 0 : index
    %457 = vector.load %arg15[%c0_151, %c0_152] : memref<2x128xf32, #tpu.memory_space<vmem>>, vector<1x128xf32>
    %458 = vector.broadcast %457 : vector<1x128xf32> to vector<128x128xf32>
    %459 = arith.addf %456, %458 : vector<128x128xf32>
    %cst_153 = arith.constant 0.000000e+00 : f32
    %460 = vector.broadcast %cst_153 : f32 to vector<128x128xf32>
    %461 = arith.maximumf %459, %460 : vector<128x128xf32>
    %462 = arith.truncf %461 : vector<128x128xf32> to vector<128x128xbf16>
    %c0_154 = arith.constant 0 : index
    %c0_155 = arith.constant 0 : index
    %463 = vector.load %arg16[%c0_154, %c0_155] : memref<128x128xbf16, #tpu.memory_space<vmem>>, vector<128x128xbf16>
    %cst_156 = arith.constant dense<0.000000e+00> : vector<128x128xf32>
    %464 = tpu.matmul %462, %463, %cst_156 {dimension_numbers = #tpu.dot_dimension_numbers<[1], [0], [0], [1], [0, 0, 1, 1], [], []>} : vector<128x128xbf16>, vector<128x128xbf16>, vector<128x128xf32> -> vector<128x128xf32>
    %c1_157 = arith.constant 1 : index
    %c0_158 = arith.constant 0 : index
    %465 = vector.load %arg15[%c1_157, %c0_158] : memref<2x128xf32, #tpu.memory_space<vmem>>, vector<1x128xf32>
    %466 = vector.broadcast %465 : vector<1x128xf32> to vector<128x128xf32>
    %467 = arith.addf %464, %466 : vector<128x128xf32>
    %468 = arith.addf %467, %430 : vector<128x128xf32>
    %c0_159 = arith.constant 0 : index
    %c0_160 = arith.constant 0 : index
    %c0_161 = arith.constant 0 : index
    %469 = vector.load %arg17[%c0_159, %c0_160, %c0_161] : memref<1x128x128xf32, #tpu.memory_space<vmem>>, vector<1x128x128xf32>
    %470 = vector.shape_cast %469 : vector<1x128x128xf32> to vector<128x128xf32>
    %471 = vector.shape_cast %468 : vector<128x128xf32> to vector<1x128x128xf32>
    tpu.vector_store %arg17[%c0_159, %c0_160, %c0_161], %471 {strides = array<i32>} : memref<1x128x128xf32, #tpu.memory_space<vmem>>, vector<1x128x128xf32>,
    return
  }
  func.func @transform_0(%arg0: i32) -> (i32, i32, i32) {
    %c0_i32 = arith.constant 0 : i32
    %c0_i32_0 = arith.constant 0 : i32
    %c0_i32_1 = arith.constant 0 : i32
    return %arg0, %c0_i32, %c0_i32_0 : i32, i32, i32
  }
  func.func @transform_1(%arg0: i32) -> (i32, i32, i32) {
    %c0_i32 = arith.constant 0 : i32
    %c0_i32_0 = arith.constant 0 : i32
    %c0_i32_1 = arith.constant 0 : i32
    return %arg0, %c0_i32, %c0_i32_0 : i32, i32, i32
  }
  func.func @transform_2(%arg0: i32) -> (i32, i32) {
    %c0_i32 = arith.constant 0 : i32
    %c0_i32_0 = arith.constant 0 : i32
    %c0_i32_1 = arith.constant 0 : i32
    return %c0_i32, %c0_i32_0 : i32, i32
  }
  func.func @transform_3(%arg0: i32) -> (i32, i32, i32) {
    %c0_i32 = arith.constant 0 : i32
    %c0_i32_0 = arith.constant 0 : i32
    %c0_i32_1 = arith.constant 0 : i32
    %c0_i32_2 = arith.constant 0 : i32
    return %c0_i32, %c0_i32_0, %c0_i32_1 : i32, i32, i32
  }
  func.func @transform_4(%arg0: i32) -> (i32, i32, i32) {
    %c0_i32 = arith.constant 0 : i32
    %c0_i32_0 = arith.constant 0 : i32
    %c0_i32_1 = arith.constant 0 : i32
    %c0_i32_2 = arith.constant 0 : i32
    return %c0_i32, %c0_i32_0, %c0_i32_1 : i32, i32, i32
  }
  func.func @transform_5(%arg0: i32) -> (i32, i32) {
    %c0_i32 = arith.constant 0 : i32
    %c0_i32_0 = arith.constant 0 : i32
    %c0_i32_1 = arith.constant 0 : i32
    return %c0_i32, %c0_i32_0 : i32, i32
  }
  func.func @transform_6(%arg0: i32) -> (i32, i32) {
    %c0_i32 = arith.constant 0 : i32
    %c0_i32_0 = arith.constant 0 : i32
    %c0_i32_1 = arith.constant 0 : i32
    return %c0_i32, %c0_i32_0 : i32, i32
  }
  func.func @transform_7(%arg0: i32) -> (i32, i32) {
    %c0_i32 = arith.constant 0 : i32
    %c0_i32_0 = arith.constant 0 : i32
    %c0_i32_1 = arith.constant 0 : i32
    return %c0_i32, %c0_i32_0 : i32, i32
  }
  func.func @transform_8(%arg0: i32) -> (i32, i32) {
    %c0_i32 = arith.constant 0 : i32
    %c0_i32_0 = arith.constant 0 : i32
    %c0_i32_1 = arith.constant 0 : i32
    return %c0_i32, %c0_i32_0 : i32, i32
  }
  func.func @transform_9(%arg0: i32) -> (i32, i32) {
    %c0_i32 = arith.constant 0 : i32
    %c0_i32_0 = arith.constant 0 : i32
    %c0_i32_1 = arith.constant 0 : i32
    return %c0_i32, %c0_i32_0 : i32, i32
  }
  func.func @transform_10(%arg0: i32) -> (i32, i32) {
    %c0_i32 = arith.constant 0 : i32
    %c0_i32_0 = arith.constant 0 : i32
    %c0_i32_1 = arith.constant 0 : i32
    return %c0_i32, %c0_i32_0 : i32, i32
  }
  func.func @transform_11(%arg0: i32) -> (i32, i32) {
    %c0_i32 = arith.constant 0 : i32
    %c0_i32_0 = arith.constant 0 : i32
    %c0_i32_1 = arith.constant 0 : i32
    return %c0_i32, %c0_i32_0 : i32, i32
  }
  func.func @transform_12(%arg0: i32) -> (i32, i32) {
    %c0_i32 = arith.constant 0 : i32
    %c0_i32_0 = arith.constant 0 : i32
    %c0_i32_1 = arith.constant 0 : i32
    return %c0_i32, %c0_i32_0 : i32, i32
  }
  func.func @transform_13(%arg0: i32) -> (i32, i32) {
    %c0_i32 = arith.constant 0 : i32
    %c0_i32_0 = arith.constant 0 : i32
    %c0_i32_1 = arith.constant 0 : i32
    return %c0_i32, %c0_i32_0 : i32, i32
  }
  func.func @transform_14(%arg0: i32) -> (i32, i32) {
    %c0_i32 = arith.constant 0 : i32
    %c0_i32_0 = arith.constant 0 : i32
    %c0_i32_1 = arith.constant 0 : i32
    return %c0_i32, %c0_i32_0 : i32, i32
  }
  func.func @transform_15(%arg0: i32) -> (i32, i32) {
    %c0_i32 = arith.constant 0 : i32
    %c0_i32_0 = arith.constant 0 : i32
    %c0_i32_1 = arith.constant 0 : i32
    return %c0_i32, %c0_i32_0 : i32, i32
  }
  func.func @transform_16(%arg0: i32) -> (i32, i32, i32) {
    %c0_i32 = arith.constant 0 : i32
    %c0_i32_0 = arith.constant 0 : i32
    %c0_i32_1 = arith.constant 0 : i32
    return %arg0, %c0_i32, %c0_i32_0 : i32, i32, i32
  }
}

</mosaic_0001>

<bundles_post_ra>
// kernel: qaxl_encoder_block_forward.1
= control target key start
LH: loop header
LB: loop body
LE: loop exit
PB: predicated region body
PF: predicated region fallthrough
CT: control target
= control target key end

     0   :  { %s17488_s0 = inlined_call_operand.vmem [shape: f32[4,128,128], index: 0, kind: input, shape index: {}]   ;;  %s17489_s1 = inlined_call_operand.vmem [shape: f32[4,128,1], index: 1, kind: input, shape index: {}]   ;;  %s17490_s2 = inlined_call_operand.hbm [shape: f32[4,128], index: 2, kind: input, shape index: {}]   ;;  %s17491_s3 = inlined_call_operand.vmem [shape: f32[2,7,128], index: 3, kind: input, shape index: {}]   ;;  %s17492_s4 = inlined_call_operand.hbm [shape: bf16[2,128,128], index: 4, kind: input, shape index: {}]   ;;  %s17493_s5 = inlined_call_operand.hbm [shape: f32[2,128], index: 5, kind: input, shape index: {}]   ;;  %s17494_s6 = inlined_call_operand.hbm [shape: f32[4,128], index: 6, kind: input, shape index: {}]   ;;  %s17495_s7 = inlined_call_operand.hbm [shape: bf16[128,384], index: 7, kind: input, shape index: {}]   ;;  %s17496_s8 = inlined_call_operand.hbm [shape: f32[128,128], index: 8, kind: input, shape index: {}]   ;;  %s17497_s9 = inlined_call_operand.vmem [shape: bf16[128,128], index: 9, kind: input, shape index: {}]   ;;  %s17498_s10 = inlined_call_operand.hbm [shape: f32[8,32], index: 10, kind: input, shape index: {}]   ;;  %s17499_s11 = inlined_call_operand.hbm [shape: bf16[128,128], index: 11, kind: input, shape index: {}]   ;;  %s17500_s12 = inlined_call_operand.vmem [shape: f32[2,128], index: 12, kind: input, shape index: {}]   ;;  %s17501_s13 = inlined_call_operand.hbm [shape: bf16[128,128], index: 13, kind: input, shape index: {}]   ;;  %s17502_s14 = inlined_call_operand.hbm [shape: f32[2,128], index: 14, kind: input, shape index: {}]   ;;  %s17503_s15 = inlined_call_operand.hbm [shape: bf16[128,128], index: 15, kind: input, shape index: {}]   ;;  %s17504_s16 = inlined_call_operand.hbm [shape: f32[4,128,128], index: 16, kind: output, shape index: {}]  }
   0x1   :  { %17866 = sst [smem:[#allocation189_spill]] %s17488_s0 }
   0x2   :  { %17867 = sst [smem:[#allocation190_spill]] %s17489_s1 }
   0x3   :  { %17868 = sst [smem:[#allocation191_spill]] %s17492_s4 }
   0x4   :  { %17869 = sst [smem:[#allocation192_spill]] %s17494_s6 }
   0x5   :  { %17870 = sst [smem:[#allocation193_spill]] %s17500_s12 }
   0x6   :  { %17871 = sst [smem:[#allocation194_spill]] %s17504_s16 }
   0x7   :  { %21 = vsyncpa [#allocation3], 0 }
   0x8   :  { %22 = vsyncpa [#allocation6], 0 }
   0x9   :  { %23 = vsyncpa [#allocation9], 0 }
   0xa   :  { %24 = vsyncpa [#allocation12], 0 }
   0xb   :  { %25 = vsyncpa [#allocation15], 0 }
   0xc   :  { %26 = vsyncpa [#allocation18], 0 }
   0xd   :  { %27 = vsyncpa [#allocation4], 0 }
   0xe   :  { %29 = vsyncpa [#allocation4 + $0x1], 0  ;;  %s11482_s21 = smov 0   ;;  %s11484_s22 = smov 0  }
   0xf   :  { %s11486_s23 = smov 0   ;;  %s11488_s24 = smov 0  }
  0x10 LB: > { %17872 = sst [smem:[#allocation28_spill]] %s11343_s21  ;;  %s11503_s25 = sadd.s32 4294967295, %s11355_s24   ;;  %s11355_s24 = sphi %s11488_s24, %s18715_s24   ;;  %s11351_s23 = sphi %s11486_s23, %s18718_s23   ;;  %s11347_s22 = sphi %s11484_s22, %s18717_s22   ;;  %s11343_s21 = sphi %s11482_s21, %s18716_s21  }
  0x11   : > { %17873 = sst [smem:[#allocation29_spill]] %s11347_s22  ;;  %s8981_s26 = sadd.s32 4294967294, %s11355_s24  }
  0x12   : > { %17874 = sst [smem:[#allocation30_spill]] %s11351_s23  ;;  %s11507_s27 = sadd.s32 1, %s11355_s24  }
  0x13   : > { %17875 = sst [smem:[#allocation31_spill]] %s11355_s24  ;;  %s388_s28 = sadd.s32 1, %s11351_s23 }
  0x14   : > { %17876 = sst [smem:[#allocation32_spill]] %s11507_s27  ;;  %s385_s29 = ssub.s32 %s11355_s24, %s11507_s27 }
  0x15   : > { %p398_p0 = scmp.ne.s32.totalorder %s11351_s23, %s11347_s22  ;;  %p386_p1 = scmp.eq.s32.totalorder %s385_s29, 0 }
  0x16   : > { %p399_p2 = scmp.eq.s32.totalorder %s11503_s25, 3  ;;  %p404_p3 = scmp.ne.s32.totalorder %s11347_s22, %s11343_s21 }
  0x17   : > { %p405_p4 = scmp.eq.s32.totalorder %s8981_s26, 3  ;;  %p8982_p7 = scmp.ge.s32.totalorder %s11355_s24, 1 }
  0x18   : > { %s11518_s30 = scalar_select %p386_p1, %s11351_s23, %s388_s28  }
  0x19   : > { %p11520_p5 = por %p399_p2, %p398_p0  ;;  %p11524_p6 = por %p405_p4, %p404_p3 }
  0x1a   : > { %17877 = sst [smem:[#allocation33_spill]] %s11518_s30  ;;  %p412_p8 = scmp.lt.s32.totalorder %s11355_s24, 5 }
  0x1b   : > { %s17878_s0 = scalar_select %p11520_p5, 1, 0 }
  0x1c   : > { %s17880_s17 = scalar_select %p11524_p6, 1, 0 }
  0x1d   : > { %17879 = sst [smem:[#allocation34_spill]] %s17878_s0  ;;  %p17512_p9 = scmp.eq.s32.totalorder %s11503_s25, 0 }
  0x1e   : > { %17881 = sst [smem:[#allocation35_spill]] %s17880_s17  ;;  %p11531_p10 = pnand %p8982_p7, %p412_p8 }
  0x1f   : > { %s11357_s19 = smov [#allocation5]   ;;  %s11358_s28 = smov [#allocation8]  }
  0x20   : > { %s17882_s18 = scalar_select %p11531_p10, 1, 0 }
  0x21   : > { %s438_s20 = sshll.u32 %s11357_s19, 4  ;;  %p10195_p11 = pneg %p11531_p10  ;;  %s11537_s20 = int_to_ptr.vmem [resolvable:$true] %s438_s20 }
  0x22   : > { %s463_s29 = sshll.u32 %s11358_s28, 4  ;;  %s11359_s30 = smov [#allocation11]   ;;  %s11545_s29 = int_to_ptr.vmem [resolvable:$true] %s463_s29 }
  0x23   : > { %p11541_p12 = pnand %p17512_p9, %p10195_p11  ;;  %s11547_s23 = sshll.u32 %s11359_s30, 4  ;;  %s487_s23 = int_to_ptr.vmem [resolvable:$true] %s11547_s23 }
  0x24   : > { %s17884_s4 = sld [smem:[#allocation191_spill]] }
  0x25   : > { %p11557_p0 = pneg %p11541_p12 }
  0x2a   : > { %s10961_s19 = scalar_lea.hbm %s17884_s4, 2048 }
  0x2b   : > { %p10962_p13 = scmp.ne.s32.totalorder %s17884_s4, %s10961_s19  ;;  %p10968_p3 = scmp.lt.u32.totalorder %s10961_s19, %s17884_s4 }
  0x2d   : > { %p10964_p1 = pnand %p11557_p0, %p10962_p13 }
  0x2f   : > { %p10965_p2 = pneg %p10964_p1 }
  0x31   : > { %p10970_p4 = pnand %p10968_p3, %p10965_p2 }
  0x33   : > { %10973 = shalt.err (!%p10970_p4)
}
  0x34   : > { %s10974_s21 = scalar_lea.vmem %s11537_s20, 2048  ;;  %p10982_p9 = scmp.lt.s32.totalorder %s11537_s20, %s11537_s20 }
  0x35   : > { %p10975_p7 = scmp.ne.s32.totalorder %s11537_s20, %s10974_s21  ;;  %p10983_p6 = scmp.lt.s32.totalorder %s10974_s21, %s10974_s21 }
  0x37   : > { %p10977_p8 = pnand %p10975_p7, %p11557_p0  ;;  %p10984_p13 = por %p10983_p6, %p10982_p9 }
  0x39   : > { %p10978_p11 = pneg %p10977_p8 }
  0x3b   : > { %p10985_p1 = pnand %p10984_p13, %p10978_p11 }
  0x3d   : > { %10988 = shalt.err (!%p10985_p1)
}
  0x3e   : > { %s17519_s24 = smov 64   ;;  %s17521_s27 = smov 4  }
  0x3f   : > { %10201 = dma.hbm_to_vmem [thread:$0]  (!%p11541_p12), %s17884_s4, 2048, %s11537_s20, [#allocation6], %s17519_s24, %s17519_s24, %s17521_s27  }
  0x40   : > { %s17886_s6 = sld [smem:[#allocation192_spill]] }
  0x46   : > { %s10989_s21 = scalar_lea.hbm %s17886_s6, 64 }
  0x47   : > { %p10990_p6 = scmp.ne.s32.totalorder %s17886_s6, %s10989_s21  ;;  %p10996_p3 = scmp.lt.u32.totalorder %s10989_s21, %s17886_s6 }
  0x49   : > { %p10992_p9 = pnand %p10990_p6, %p11557_p0 }
  0x4b   : > { %p10993_p2 = pneg %p10992_p9 }
  0x4d   : > { %p10998_p4 = pnand %p10996_p3, %p10993_p2 }
  0x4f   : > { %11001 = shalt.err (!%p10998_p4)
}
  0x50   : > { %s11002_s20 = scalar_lea.vmem %s11545_s29, 64  ;;  %p11010_p13 = scmp.lt.s32.totalorder %s11545_s29, %s11545_s29 }
  0x51   : > { %p11003_p7 = scmp.ne.s32.totalorder %s11545_s29, %s11002_s20  ;;  %p11011_p1 = scmp.lt.s32.totalorder %s11002_s20, %s11002_s20 }
  0x53   : > { %p11005_p8 = pnand %p11003_p7, %p11557_p0  ;;  %p11012_p6 = por %p11011_p1, %p11010_p13 }
  0x55   : > { %p11006_p11 = pneg %p11005_p8 }
  0x57   : > { %p11013_p9 = pnand %p11012_p6, %p11006_p11 }
  0x59   : > { %11016 = shalt.err (!%p11013_p9)
}
  0x5a   : > { %10207 = dma.hbm_to_vmem [thread:$0]  (!%p11541_p12), %s17886_s6, 64, %s11545_s29, [#allocation9]  }
  0x5b   : > { %s11017_s17 = scalar_lea.hbm %s17496_s8, 2048 }
  0x5c   : > { %p11018_p2 = scmp.ne.s32.totalorder %s17496_s8, %s11017_s17  ;;  %p11024_p7 = scmp.lt.u32.totalorder %s11017_s17, %s17496_s8 }
  0x5e   : > { %p11020_p3 = pnand %p11018_p2, %p11557_p0 }
  0x60   : > { %p11021_p4 = pneg %p11020_p3 }
  0x62   : > { %p11026_p8 = pnand %p11024_p7, %p11021_p4 }
  0x64   : > { %11029 = shalt.err (!%p11026_p8)
}
  0x65   : > { %s11030_s20 = scalar_lea.vmem %s487_s23, 2048  ;;  %p11038_p6 = scmp.lt.s32.totalorder %s487_s23, %s487_s23 }
  0x66   : > { %p11031_p11 = scmp.ne.s32.totalorder %s487_s23, %s11030_s20  ;;  %p11039_p9 = scmp.lt.s32.totalorder %s11030_s20, %s11030_s20 }
  0x68   : > { %p11033_p13 = pnand %p11031_p11, %p11557_p0  ;;  %p11040_p5 = por %p11039_p9, %p11038_p6 }
  0x6a   : > { %p11034_p1 = pneg %p11033_p13 }
  0x6c   : > { %p11041_p10 = pnand %p11040_p5, %p11034_p1 }
  0x6e   : > { %11044 = shalt.err (!%p11041_p10)
}
  0x6f   : > { %s11362_s29 = smov 128   ;;  %s11363_s1 = smov 8  }
  0x70   : > { %10213 = dma.hbm_to_vmem [thread:$0]  (!%p11541_p12), %s17496_s8, 2048, %s487_s23, [#allocation12], %s11362_s29, %s11362_s29, %s11363_s1  }
  0x71   : > { %s11364_s0 = smov [#allocation14]   ;;  %s11365_s19 = smov [#allocation17]  }
  0x72   : > { %s513_s17 = sshll.u32 %s11364_s0, 4  ;;  %s543_s28 = sshll.u32 %s11365_s19, 4  ;;  %s514_s17 = int_to_ptr.vmem [resolvable:$true] %s513_s17  ;;  %s544_s28 = int_to_ptr.vmem [resolvable:$true] %s543_s28 }
  0x73   : > { %s11045_s20 = scalar_lea.hbm %s17499_s11, 1024 }
  0x74   : > { %p11046_p5 = scmp.ne.s32.totalorder %s17499_s11, %s11045_s20  ;;  %p11052_p3 = scmp.lt.u32.totalorder %s11045_s20, %s17499_s11 }
  0x76   : > { %p11048_p10 = pnand %p11046_p5, %p11557_p0 }
  0x78   : > { %p11049_p2 = pneg %p11048_p10 }
  0x7a   : > { %p11054_p4 = pnand %p11052_p3, %p11049_p2 }
  0x7c   : > { %11057 = shalt.err (!%p11054_p4)
}
  0x7d   : > { %s11058_s23 = scalar_lea.vmem %s514_s17, 1024  ;;  %p11066_p13 = scmp.lt.s32.totalorder %s514_s17, %s514_s17 }
  0x7e   : > { %p11059_p7 = scmp.ne.s32.totalorder %s514_s17, %s11058_s23  ;;  %p11067_p1 = scmp.lt.s32.totalorder %s11058_s23, %s11058_s23 }
  0x80   : > { %p11061_p8 = pnand %p11059_p7, %p11557_p0  ;;  %p11068_p6 = por %p11067_p1, %p11066_p13 }
  0x82   : > { %p11062_p11 = pneg %p11061_p8 }
  0x84   : > { %p11069_p9 = pnand %p11068_p6, %p11062_p11 }
  0x86   : > { %11072 = shalt.err (!%p11069_p9)
}
  0x87   : > { %s17887_s24 = smov 4   ;;  %s17888_s27 = smov 64  }
  0x88   : > { %10219 = dma.hbm_to_vmem [thread:$0]  (!%p11541_p12), %s17499_s11, 1024, %s514_s17, [#allocation15], %s17888_s27, %s17888_s27, %s17887_s24  }
  0x89   : > { %s11073_s12 = scalar_lea.hbm %s17502_s14, 32 }
  0x8a   : > { %p11074_p5 = scmp.ne.s32.totalorder %s17502_s14, %s11073_s12  ;;  %p11080_p3 = scmp.lt.u32.totalorder %s11073_s12, %s17502_s14 }
  0x8c   : > { %p11076_p10 = pnand %p11074_p5, %p11557_p0 }
  0x8e   : > { %p11077_p2 = pneg %p11076_p10 }
  0x90   : > { %p11082_p4 = pnand %p11080_p3, %p11077_p2 }
  0x92   : > { %11085 = shalt.err (!%p11082_p4)
}
  0x93   : > { %s11086_s21 = scalar_lea.vmem %s544_s28, 32  ;;  %p11094_p13 = scmp.lt.s32.totalorder %s544_s28, %s544_s28 }
  0x94   : > { %p11087_p7 = scmp.ne.s32.totalorder %s544_s28, %s11086_s21  ;;  %p11095_p1 = scmp.lt.s32.totalorder %s11086_s21, %s11086_s21 }
  0x96   : > { %p11089_p8 = pnand %p11087_p7, %p11557_p0  ;;  %p11096_p6 = por %p11095_p1, %p11094_p13 }
  0x98   : > { %p11090_p11 = pneg %p11089_p8 }
  0x9a   : > { %p11097_p9 = pnand %p11096_p6, %p11090_p11 }
  0x9c   : > { %11100 = shalt.err (!%p11097_p9)
}
  0x9d   : > { %10225 = dma.hbm_to_vmem [thread:$0]  (!%p11541_p12), %s17502_s14, 32, %s544_s28, [#allocation18]  }
  0x9e   : > { %s11366_s23 = smov [#allocation2]   ;;  %s11367_s6 = smov [#allocation7]  }
  0x9f   : > { %s425_s4 = sshll.u32 %s11366_s23, 4  ;;  %s452_s29 = sshll.u32 %s11367_s6, 4  ;;  %s426_s4 = int_to_ptr.vmem [resolvable:$true] %s425_s4  ;;  %s453_s29 = int_to_ptr.vmem [resolvable:$true] %s452_s29 }
  0xa0   : > { %s11101_s22 = scalar_lea.hbm %s17490_s2, 64 }
  0xa1   : > { %p11102_p5 = scmp.ne.s32.totalorder %s17490_s2, %s11101_s22  ;;  %p11108_p3 = scmp.lt.u32.totalorder %s11101_s22, %s17490_s2 }
  0xa3   : > { %p11104_p10 = pnand %p11102_p5, %p11557_p0 }
  0xa5   : > { %p11105_p2 = pneg %p11104_p10 }
  0xa7   : > { %p11110_p4 = pnand %p11108_p3, %p11105_p2 }
  0xa9   : > { %11113 = shalt.err (!%p11110_p4)
}
  0xaa   : > { %s11114_s28 = scalar_lea.vmem %s426_s4, 64  ;;  %p11122_p13 = scmp.lt.s32.totalorder %s426_s4, %s426_s4 }
  0xab   : > { %p11115_p7 = scmp.ne.s32.totalorder %s426_s4, %s11114_s28  ;;  %p11123_p1 = scmp.lt.s32.totalorder %s11114_s28, %s11114_s28 }
  0xad   : > { %p11117_p8 = pnand %p11115_p7, %p11557_p0  ;;  %p11124_p6 = por %p11123_p1, %p11122_p13 }
  0xaf   : > { %p11118_p11 = pneg %p11117_p8 }
  0xb1   : > { %p11125_p9 = pnand %p11124_p6, %p11118_p11 }
  0xb3   : > { %11128 = shalt.err (!%p11125_p9)
}
  0xb4   : > { %10198 = dma.hbm_to_vmem [thread:$0]  (!%p11541_p12), %s17490_s2, 64, %s426_s4, [#allocation3]  }
  0xb5   : > { %s11129_s1 = scalar_lea.hbm %s17493_s5, 32 }
  0xb6   : > { %p11130_p5 = scmp.ne.s32.totalorder %s17493_s5, %s11129_s1  ;;  %p11136_p3 = scmp.lt.u32.totalorder %s11129_s1, %s17493_s5 }
  0xb8   : > { %p11132_p10 = pnand %p11130_p5, %p11557_p0 }
  0xba   : > { %p11133_p2 = pneg %p11132_p10 }
  0xbc   : > { %p11138_p4 = pnand %p11136_p3, %p11133_p2 }
  0xbe   : > { %11141 = shalt.err (!%p11138_p4)
}
  0xbf   : > { %s11142_s30 = scalar_lea.vmem %s453_s29, 32  ;;  %p11150_p13 = scmp.lt.s32.totalorder %s453_s29, %s453_s29 }
  0xc0   : > { %p11143_p7 = scmp.ne.s32.totalorder %s453_s29, %s11142_s30  ;;  %p11151_p1 = scmp.lt.s32.totalorder %s11142_s30, %s11142_s30 }
  0xc2   : > { %p11145_p8 = pnand %p11143_p7, %p11557_p0  ;;  %p11152_p6 = por %p11151_p1, %p11150_p13 }
  0xc4   : > { %p11146_p11 = pneg %p11145_p8 }
  0xc6   : > { %p11153_p9 = pnand %p11152_p6, %p11146_p11 }
  0xc8   : > { %11156 = shalt.err (!%p11153_p9)
}
  0xc9   : > { %10204 = dma.hbm_to_vmem [thread:$0]  (!%p11541_p12), %s17493_s5, 32, %s453_s29, [#allocation6]  }
  0xca   : > { %s11368_s28 = smov [#allocation10]   ;;  %s11157_s6 = scalar_lea.hbm %s17495_s7, 3072 }
  0xcb   : > { %s473_s17 = sshll.u32 %s11368_s28, 4  ;;  %p11158_p5 = scmp.ne.s32.totalorder %s17495_s7, %s11157_s6  ;;  %s474_s17 = int_to_ptr.vmem [resolvable:$true] %s473_s17 }
  0xcc   : > { %p11164_p3 = scmp.lt.u32.totalorder %s11157_s6, %s17495_s7 }
  0xcd   : > { %p11160_p10 = pnand %p11158_p5, %p11557_p0 }
  0xcf   : > { %p11161_p2 = pneg %p11160_p10 }
  0xd1   : > { %p11166_p4 = pnand %p11164_p3, %p11161_p2 }
  0xd3   : > { %11169 = shalt.err (!%p11166_p4)
}
  0xd4   : > { %s11170_s29 = scalar_lea.vmem %s474_s17, 3072  ;;  %p11178_p13 = scmp.lt.s32.totalorder %s474_s17, %s474_s17 }
  0xd5   : > { %p11171_p7 = scmp.ne.s32.totalorder %s474_s17, %s11170_s29  ;;  %p11179_p1 = scmp.lt.s32.totalorder %s11170_s29, %s11170_s29 }
  0xd7   : > { %p11173_p8 = pnand %p11171_p7, %p11557_p0  ;;  %p11180_p6 = por %p11179_p1, %p11178_p13 }
  0xd9   : > { %p11174_p11 = pneg %p11173_p8 }
  0xdb   : > { %p11181_p9 = pnand %p11180_p6, %p11174_p11 }
  0xdd   : > { %11184 = shalt.err (!%p11181_p9)
}
  0xde   : > { %s11369_s19 = smov 192   ;;  %s11370_s30 = smov 12  }
  0xdf   : > { %10210 = dma.hbm_to_vmem [thread:$0]  (!%p11541_p12), %s17495_s7, 3072, %s474_s17, [#allocation9], %s11369_s19, %s11369_s19, %s11370_s30  }
  0xe0   : > { %s11371_s28 = smov [#allocation13]   ;;  %s11372_s23 = smov [#allocation16]  }
  0xe1   : > { %s503_s20 = sshll.u32 %s11371_s28, 4  ;;  %s529_s6 = sshll.u32 %s11372_s23, 4  ;;  %s504_s20 = int_to_ptr.vmem [resolvable:$true] %s503_s20  ;;  %s11716_s6 = int_to_ptr.vmem [resolvable:$true] %s529_s6 }
  0xe2   : > { %s11185_s22 = scalar_lea.hbm %s17498_s10, 128 }
  0xe3   : > { %p11186_p5 = scmp.ne.s32.totalorder %s17498_s10, %s11185_s22  ;;  %p11192_p3 = scmp.lt.u32.totalorder %s11185_s22, %s17498_s10 }
  0xe5   : > { %p11188_p10 = pnand %p11186_p5, %p11557_p0 }
  0xe7   : > { %p11189_p2 = pneg %p11188_p10 }
  0xe9   : > { %p11194_p4 = pnand %p11192_p3, %p11189_p2 }
  0xeb   : > { %11197 = shalt.err (!%p11194_p4)
}
  0xec   : > { %s11198_s19 = scalar_lea.vmem %s504_s20, 128  ;;  %p11206_p13 = scmp.lt.s32.totalorder %s504_s20, %s504_s20 }
  0xed   : > { %p11199_p7 = scmp.ne.s32.totalorder %s504_s20, %s11198_s19  ;;  %p11207_p1 = scmp.lt.s32.totalorder %s11198_s19, %s11198_s19 }
  0xef   : > { %p11201_p8 = pnand %p11199_p7, %p11557_p0  ;;  %p11208_p6 = por %p11207_p1, %p11206_p13 }
  0xf1   : > { %p11202_p11 = pneg %p11201_p8 }
  0xf3   : > { %p11209_p9 = pnand %p11208_p6, %p11202_p11 }
  0xf5   : > { %11212 = shalt.err (!%p11209_p9)
}
  0xf6   : > { %10216 = dma.hbm_to_vmem [thread:$0]  (!%p11541_p12), %s17498_s10, 128, %s504_s20, [#allocation12]  }
  0xf7   : > { %s11213_s1 = scalar_lea.hbm %s17501_s13, 1024 }
  0xf8   : > { %p11214_p5 = scmp.ne.s32.totalorder %s17501_s13, %s11213_s1  ;;  %p11220_p3 = scmp.lt.u32.totalorder %s11213_s1, %s17501_s13 }
  0xfa   : > { %p11216_p10 = pnand %p11214_p5, %p11557_p0 }
  0xfc   : > { %p11217_p2 = pneg %p11216_p10 }
  0xfe   : > { %p11222_p4 = pnand %p11220_p3, %p11217_p2 }
 0x100   : > { %11225 = shalt.err (!%p11222_p4)
}
 0x101   : > { %s11226_s20 = scalar_lea.vmem %s11716_s6, 1024  ;;  %p11234_p13 = scmp.lt.s32.totalorder %s11716_s6, %s11716_s6 }
 0x102   : > { %p11227_p7 = scmp.ne.s32.totalorder %s11716_s6, %s11226_s20  ;;  %p11235_p1 = scmp.lt.s32.totalorder %s11226_s20, %s11226_s20 }
 0x104   : > { %p11229_p8 = pnand %p11227_p7, %p11557_p0  ;;  %p11236_p6 = por %p11235_p1, %p11234_p13 }
 0x106   : > { %p11230_p11 = pneg %p11229_p8 }
 0x108   : > { %p11237_p9 = pnand %p11236_p6, %p11230_p11 }
 0x10a   : > { %11240 = shalt.err (!%p11237_p9)
}
 0x10b   : > { %10222 = dma.hbm_to_vmem [thread:$0]  (!%p11541_p12), %s17501_s13, 1024, %s11716_s6, [#allocation15], %s17888_s27, %s17888_s27, %s17887_s24  }
 0x10c   : > { %s11373_s19 = smov [#allocation19]   ;;  %s11241_s23 = scalar_lea.hbm %s17503_s15, 1024 }
 0x10d   : > { %s553_s30 = sshll.u32 %s11373_s19, 4  ;;  %p11242_p5 = scmp.ne.s32.totalorder %s17503_s15, %s11241_s23  ;;  %s554_s30 = int_to_ptr.vmem [resolvable:$true] %s553_s30 }
 0x10e   : > { %p11248_p3 = scmp.lt.u32.totalorder %s11241_s23, %s17503_s15 }
 0x10f   : > { %p11244_p10 = pnand %p11242_p5, %p11557_p0 }
 0x111   : > { %p11245_p2 = pneg %p11244_p10 }
 0x113   : > { %p11250_p4 = pnand %p11248_p3, %p11245_p2 }
 0x115   : > { %11253 = shalt.err (!%p11250_p4)
}
 0x116   : > { %s11254_s6 = scalar_lea.vmem %s554_s30, 1024  ;;  %p11262_p13 = scmp.lt.s32.totalorder %s554_s30, %s554_s30 }
 0x117   : > { %p11255_p7 = scmp.ne.s32.totalorder %s554_s30, %s11254_s6  ;;  %p11263_p1 = scmp.lt.s32.totalorder %s11254_s6, %s11254_s6 }
 0x119   : > { %p11257_p8 = pnand %p11255_p7, %p11557_p0  ;;  %p11264_p6 = por %p11263_p1, %p11262_p13 }
 0x11b   : > { %p11258_p11 = pneg %p11257_p8 }
 0x11d   : > { %p11265_p9 = pnand %p11264_p6, %p11258_p11 }
 0x11f   : > { %11268 = shalt.err (!%p11265_p9)
}
 0x120   : > { %10228 = dma.hbm_to_vmem [thread:$0]  (!%p11541_p12), %s17503_s15, 1024, %s554_s30, [#allocation18], %s17888_s27, %s17888_s27, %s17887_s24  }
 0x121   : > { %p17889_p5 = scmp.ne.s32.totalorder %s17882_s18, 0 }
 0x123   : > { %585 = sbr.rel (%p17889_p5) target bundleno = 6854 (0x1ac6), region = 84 }
 0x12a   : > { %p17890_p0 = scmp.eq.s32.totalorder %s11503_s25, 0 }
 0x12c   : > { %11314 = dma.done.wait (%p17890_p0), [#allocation3], 64   ;;  %p17891_p10 = pmov %p17890_p0 }
 0x12d   : > { %p17892_p2 = pmov %p17890_p0 }
 0x12e   : > { %11316 = vsyncadd (%p17891_p10), [#allocation3], 4294967232 }
 0x12f   : > { %11318 = dma.done.wait (%p17892_p2), [#allocation6], 2080   ;;  %p17893_p3 = pmov %p17890_p0 }
 0x130   : > { %p17894_p4 = pmov %p17890_p0 }
 0x131   : > { %11320 = vsyncadd (%p17893_p3), [#allocation6], 4294965216 }
 0x132   : > { %11322 = dma.done.wait (%p17894_p4), [#allocation9], 3136   ;;  %p17895_p12 = pmov %p17890_p0 }
 0x133   : > { %p17896_p7 = pmov %p17890_p0 }
 0x134   : > { %11324 = vsyncadd (%p17895_p12), [#allocation9], 4294964160 }
 0x135   : > { %11326 = dma.done.wait (%p17896_p7), [#allocation12], 2176   ;;  %p17897_p8 = pmov %p17890_p0 }
 0x136   : > { %p17898_p11 = pmov %p17890_p0 }
 0x137   : > { %11328 = vsyncadd (%p17897_p8), [#allocation12], 4294965120 }
 0x138   : > { %11330 = dma.done.wait (%p17898_p11), [#allocation15], 2048   ;;  %p17899_p13 = pmov %p17890_p0 }
 0x139   : > { %p17900_p1 = pmov %p17890_p0 }
 0x13a   : > { %11332 = vsyncadd (%p17899_p13), [#allocation15], 4294965248 }
 0x13b   : > { %11334 = dma.done.wait (%p17900_p1), [#allocation18], 1056   ;;  %p17901_p6 = pmov %p17890_p0 }
 0x13c   : > { %p680_p9 = scmp.lt.s32.totalorder %s11503_s25, 3  ;;  %s17902_s27 = sld [smem:[#allocation189_spill]]  ;;  %vm4207_vm12 = vcmask 261120  }
 0x13d   : > { %11336 = vsyncadd (%p17901_p6), [#allocation18], 4294966240  ;;  %s18050_s23 = sld [smem:[#allocation190_spill]]  ;;  %s11377_s12 = smov 281  }
 0x13e   : > { %s11811_s16 = scalar_select %p680_p9, %s11503_s25, 3 }
 0x13f   : > { %s11378_s22 = smov 265   ;;  %s11379_s0 = smov 32  }
 0x140   : > { %s9170_s18 = sshll.u32 %s11811_s16, 7  ;;  %s11375_s16 = smov 273  }
 0x141   : > { %s11380_s6 = smov 289   ;;  %s11381_s29 = smov 96  }
 0x142   : > { %s11819_s4 = scalar_lea.vmem %s17902_s27, %s9170_s18  ;;  %s11382_s20 = smov 313  }
 0x143   : > { %v691_v0 = vld [vmem:[%s11819_s4] sm:$0xff]  ;;  %v692_v1 = vld [vmem:[%s11819_s4 + $0x8] sm:$0xff]  ;;  %v706_v2 = vld [vmem:[%s11819_s4 + $0x78] sm:$0xff]  ;;  %s14124_s1 = scalar_lea.vmem %s18050_s23, %s9170_s18  ;;  %s11376_s18 = smov 257  }
 0x144   : > { %1062 = vadd.xlane.f32.xlu0 %v691_v0  ;;  %1064 = vadd.xlane.f32.xlu1 %v692_v1  ;;  %v693_v3 = vld [vmem:[%s11819_s4 + $0x10] sm:$0xff]  ;;  %v694_v4 = vld [vmem:[%s11819_s4 + $0x18] sm:$0xff]  ;;  %v695_v5 = vld [vmem:[%s11819_s4 + $0x20] sm:$0xff]  ;;  %s11383_s26 = smov 297   ;;  %s11384_s24 = smov 305  }
 0x145   : > { %v696_v6 = vld [vmem:[%s11819_s4 + $0x28] sm:$0xff]  ;;  %v697_v7 = vld [vmem:[%s11819_s4 + $0x30] sm:$0xff]  ;;  %v698_v8 = vld [vmem:[%s11819_s4 + $0x38] sm:$0xff]  ;;  %s11385_s27 = smov 345   ;;  %s11387_s17 = smov 329  }
 0x146   : > { %v699_v9 = vld [vmem:[%s11819_s4 + $0x40] sm:$0xff]  ;;  %v11832_v10 = vld [vmem:[%s11819_s4 + $0x48] sm:$0xff]  ;;  %v11835_v11 = vld [vmem:[%s11819_s4 + $0x50] sm:$0xff]  ;;  %s11388_s19 = smov 321   ;;  %s11389_s30 = smov 377  }
 0x147   : > { %v11838_v12 = vld [vmem:[%s11819_s4 + $0x58] sm:$0xff]  ;;  %v11841_v13 = vld [vmem:[%s11819_s4 + $0x60] sm:$0xff]  ;;  %v11846_v14 = vld [vmem:[%s11819_s4 + $0x68] sm:$0xff]  ;;  %s11390_s21 = smov 369   ;;  %s11391_s28 = smov 361  }
 0x148   : > { %1092 = vadd.xlane.f32.xlu0 %v706_v2  ;;  %1066 = vadd.xlane.f32.xlu1 %v693_v3  ;;  %v11849_v15 = vld [vmem:[%s11819_s4 + $0x70] sm:$0xff]  ;;  %s11392_s23 = smov 353  }
 0x14c   : > { %1068 = vadd.xlane.f32.xlu0 %v694_v4  ;;  %1070 = vadd.xlane.f32.xlu1 %v695_v5 }
 0x150   : > { %1072 = vadd.xlane.f32.xlu0 %v696_v6  ;;  %1074 = vadd.xlane.f32.xlu1 %v697_v7 }
 0x154   : > { %1076 = vadd.xlane.f32.xlu0 %v698_v8  ;;  %1078 = vadd.xlane.f32.xlu1 %v699_v9 }
 0x158   : > { %1080 = vadd.xlane.f32.xlu0 %v11832_v10  ;;  %1082 = vadd.xlane.f32.xlu1 %v11835_v11 }
 0x15c   : > { %1084 = vadd.xlane.f32.xlu0 %v11838_v12  ;;  %1086 = vadd.xlane.f32.xlu1 %v11841_v13 }
 0x160   : > { %1088 = vadd.xlane.f32.xlu0 %v11846_v14  ;;  %1090 = vadd.xlane.f32.xlu1 %v11849_v15 }
 0x1d1   : > { %v1063_v16 = vpop.xlane.xlu0 %1062  ;;  %v1065_v17 = vpop.xlane.xlu1 %1064 }
 0x1d2   : > { %v1095_v18 = vmul.f32 0.0078125, %v1063_v16  ;;  %v1096_v19 = vmul.f32 0.0078125, %v1065_v17 }
 0x1d4   : > { %v11855_v20 = vsub.f32 %v691_v0, %v1095_v18  ;;  %v11857_v21 = vsub.f32 %v692_v1, %v1096_v19  ;;  %v10449_v18 = vld [vmem:[#allocation5] sm:$0xff]   ;;  %v10450_v19 = vld [vmem:[#allocation5 + $0x8] sm:$0xff]  }
 0x1d5   : > { %v1093_v22 = vpop.xlane.xlu0 %1092  ;;  %v1067_v23 = vpop.xlane.xlu1 %1066  ;;  %9477 = vmatprep.subr.bf16.mxu0 %v10449_v18 }
 0x1d6   : > { %v1110_v24 = vmul.f32 0.0078125, %v1093_v22  ;;  %v1127_v25 = vmul.f32 %v11855_v20, %v11855_v20  ;;  %v1097_v26 = vmul.f32 0.0078125, %v1067_v23  ;;  %v1128_v27 = vmul.f32 %v11857_v21, %v11857_v21  ;;  %9478 = vmatpush3.bf16.msra.mxu0 %v10449_v18  ;;  %v10453_v22 = vld [vmem:[#allocation5 + $0x20] sm:$0xff]   ;;  %v10454_v23 = vld [vmem:[#allocation5 + $0x28] sm:$0xff]  }
 0x1d7   : > { %9479 = vmatprep.subr.bf16.mxu0 %v10450_v19 }
 0x1d8   : > { %1143 = vadd.xlane.f32.xlu0 %v1127_v25  ;;  %v11863_v28 = vsub.f32 %v706_v2, %v1110_v24  ;;  %v11865_v29 = vsub.f32 %v693_v3, %v1097_v26  ;;  %v10455_v24 = vld [vmem:[#allocation5 + $0x30] sm:$0xff]   ;;  %v10456_v25 = vld [vmem:[#allocation5 + $0x38] sm:$0xff]  }
 0x1d9   : > { %v1069_v30 = vpop.xlane.xlu0 %1068  ;;  %v1071_v31 = vpop.xlane.xlu1 %1070 }
 0x1da   : > { %v1098_v32 = vmul.f32 0.0078125, %v1069_v30  ;;  %v1142_v33 = vmul.f32 %v11863_v28, %v11863_v28  ;;  %v1099_v34 = vmul.f32 0.0078125, %v1071_v31  ;;  %v1129_v35 = vmul.f32 %v11865_v29, %v11865_v29  ;;  %9480 = vmatpush3.bf16.msra.mxu0 %v10450_v19 }
 0x1dc   : > { %1145 = vadd.xlane.f32.xlu0 %v1128_v27  ;;  %1173 = vadd.xlane.f32.xlu1 %v1142_v33  ;;  %v11871_v36 = vsub.f32 %v694_v4, %v1098_v32  ;;  %v11873_v37 = vsub.f32 %v695_v5, %v1099_v34 }
 0x1dd   : > { %v1073_v38 = vpop.xlane.xlu0 %1072  ;;  %v1075_v39 = vpop.xlane.xlu1 %1074 }
 0x1de   : > { %v1100_v40 = vmul.f32 0.0078125, %v1073_v38  ;;  %v1130_v41 = vmul.f32 %v11871_v36, %v11871_v36  ;;  %v1101_v42 = vmul.f32 0.0078125, %v1075_v39  ;;  %v1131_v43 = vmul.f32 %v11873_v37, %v11873_v37 }
 0x1e0   : > { %1147 = vadd.xlane.f32.xlu1 %v1129_v35  ;;  %1149 = vadd.xlane.f32.xlu0 %v1130_v41  ;;  %v11879_v44 = vsub.f32 %v696_v6, %v1100_v40  ;;  %v11881_v45 = vsub.f32 %v697_v7, %v1101_v42  ;;  %v17523_v35 = vlaneseq }
 0x1e1   : > { %v1077_v46 = vpop.xlane.xlu0 %1076  ;;  %v1079_v47 = vpop.xlane.xlu1 %1078 }
 0x1e2   : > { %v1102_v48 = vmul.f32 0.0078125, %v1077_v46  ;;  %v1132_v49 = vmul.f32 %v11879_v44, %v11879_v44  ;;  %v1103_v50 = vmul.f32 0.0078125, %v1079_v47  ;;  %v1133_v51 = vmul.f32 %v11881_v45, %v11881_v45 }
 0x1e3   : > { %v11926_v46 = vshrl.u32 %v17523_v35, 7 }
 0x1e4   : > { %1151 = vadd.xlane.f32.xlu1 %v1131_v43  ;;  %1153 = vadd.xlane.f32.xlu0 %v1132_v49  ;;  %v11887_v52 = vsub.f32 %v698_v8, %v1102_v48  ;;  %v11889_v53 = vsub.f32 %v699_v9, %v1103_v50 }
 0x1e5   : > { %v1081_v54 = vpop.xlane.xlu0 %1080  ;;  %v1083_v55 = vpop.xlane.xlu1 %1082  ;;  %vm1296_vm0 = vcmp.lt.s32.totalorder %v11926_v46, 3  ;;  %vm724_vm1 = vcmp.ge.s32.totalorder %v11926_v46, 3  ;;  %vm1381_vm2 = vcmp.lt.s32.totalorder %v11926_v46, 2  ;;  %vm772_vm3 = vcmp.ge.s32.totalorder %v11926_v46, 2 }
 0x1e6   : > { %v1104_v56 = vmul.f32 0.0078125, %v1081_v54  ;;  %v1134_v57 = vmul.f32 %v11887_v52, %v11887_v52  ;;  %v1105_v58 = vmul.f32 0.0078125, %v1083_v55  ;;  %v1135_v59 = vmul.f32 %v11889_v53, %v11889_v53 }
 0x1e7   : > { %vm1466_vm4 = vcmp.lt.s32.totalorder %v11926_v46, 1  ;;  %vm820_vm5 = vcmp.ge.s32.totalorder %v11926_v46, 1  ;;  %vm1603_vm6 = vcmp.lt.s32.totalorder %v11926_v46, 7  ;;  %vm1688_vm7 = vcmp.lt.s32.totalorder %v11926_v46, 6 }
 0x1e8   : > { %1155 = vadd.xlane.f32.xlu1 %v1133_v51  ;;  %1157 = vadd.xlane.f32.xlu0 %v1134_v57  ;;  %v11896_v60 = vsub.f32 %v11832_v10, %v1104_v56  ;;  %v11899_v61 = vsub.f32 %v11835_v11, %v1105_v58  ;;  %v11929_v51 = vsub.s32 0, %v11926_v46  ;;  %v11932_v56 = vsub.s32 3, %v11926_v46  ;;  %v11934_v57 = vld [vmem:[#allocation2] ss:$0 sm:$0xff] }
 0x1e9   : > { %v1085_v62 = vpop.xlane.xlu0 %1084  ;;  %v1087_v63 = vpop.xlane.xlu1 %1086  ;;  %v1279_v58 = vld [vmem:[%s17491_s3] sm:$0x7f]  ;;  %vm1773_vm8 = vcmp.lt.s32.totalorder %v11926_v46, 5 }
 0x1ea   : > { %v1106_v0 = vmul.f32 0.0078125, %v1085_v62  ;;  %v1136_v1 = vmul.f32 %v11896_v60, %v11896_v60  ;;  %v1107_v2 = vmul.f32 0.0078125, %v1087_v63  ;;  %v1137_v3 = vmul.f32 %v11899_v61, %v11899_v61  ;;  %17903 = vst [vmem:[#allocation36_spill] sm:$0xff] %v11929_v51  ;;  %17904 = vst [vmem:[#allocation37_spill] sm:$0xff] %v11932_v56 }
 0x1eb   : > { %v11943_v62 = vsub.s32 2, %v11926_v46  ;;  %v11956_v18 = vrot.slane %v1279_v58, %v11932_v56 }
 0x1ec   : > { %1159 = vadd.xlane.f32.xlu1 %v1135_v59  ;;  %1161 = vadd.xlane.f32.xlu0 %v1136_v1  ;;  %v11906_v4 = vsub.f32 %v11838_v12, %v1106_v0  ;;  %v11909_v5 = vsub.f32 %v11841_v13, %v1107_v2  ;;  %v11940_v59 = vsub.s32 1, %v11926_v46  ;;  %v1638_v2 = vsub.s32 4, %v11926_v46 }
 0x1ed   : > { %v1089_v6 = vpop.xlane.xlu0 %1088  ;;  %v1091_v7 = vpop.xlane.xlu1 %1090  ;;  %17906 = vst [vmem:[#allocation39_spill] sm:$0xff] %v11943_v62 }
 0x1ee   : > { %v1108_v8 = vmul.f32 0.0078125, %v1089_v6  ;;  %v1138_v9 = vmul.f32 %v11906_v4, %v11906_v4  ;;  %v1109_v10 = vmul.f32 0.0078125, %v1091_v7  ;;  %v1139_v11 = vmul.f32 %v11909_v5, %v11909_v5  ;;  %17905 = vst [vmem:[#allocation38_spill] sm:$0xff] %v11940_v59 }
 0x1f0   : > { %1163 = vadd.xlane.f32.xlu1 %v1137_v3  ;;  %1165 = vadd.xlane.f32.xlu0 %v1138_v9  ;;  %v11916_v16 = vsub.f32 %v11846_v14, %v1108_v8  ;;  %v11919_v12 = vsub.f32 %v11849_v15, %v1109_v10  ;;  %v10451_v14 = vld [vmem:[#allocation5 + $0x10] sm:$0xff]   ;;  %v10452_v15 = vld [vmem:[#allocation5 + $0x18] sm:$0xff]   ;;  %v1723_v3 = vsub.s32 5, %v11926_v46  ;;  %v11949_v9 = vrot.slane %v1279_v58, %v11929_v51 }
 0x1f1   : > { %9481 = vmatprep.subr.bf16.mxu0 %v10451_v14  ;;  %v1808_v10 = vsub.s32 6, %v11926_v46 }
 0x1f2   : > { %v1140_v13 = vmul.f32 %v11916_v16, %v11916_v16  ;;  %v1141_v17 = vmul.f32 %v11919_v12, %v11919_v12  ;;  %9482 = vmatpush3.bf16.msra.mxu0 %v10451_v14  ;;  %v11963_v14 = vrot.slane %v1279_v58, %v11943_v62 }
 0x1f3   : > { %9483 = vmatprep.subr.bf16.mxu0 %v10452_v15 }
 0x1f4   : > { %1167 = vadd.xlane.f32.xlu1 %v1139_v11  ;;  %1169 = vadd.xlane.f32.xlu0 %v1140_v13  ;;  %v11952_v11 = vld [vmem:[#allocation2 + $0x1] ss:$0 sm:$0xff] }
 0x1f6   : > { %9484 = vmatpush3.bf16.msra.mxu0 %v10452_v15 }
 0x1f7   : > { %9485 = vmatprep.subr.bf16.mxu0 %v10453_v22 }
 0x1f8   : > { %1171 = vadd.xlane.f32.xlu1 %v1141_v17 }
 0x1fa   : > { %9486 = vmatpush3.bf16.msra.mxu0 %v10453_v22 }
 0x1fb   : > { %9487 = vmatprep.subr.bf16.mxu0 %v10454_v23 }
 0x1fe   : > { %9488 = vmatpush3.bf16.msra.mxu0 %v10454_v23 }
 0x1ff   : > { %9489 = vmatprep.subr.bf16.mxu0 %v10455_v24 }
 0x202   : > { %9490 = vmatpush3.bf16.msra.mxu0 %v10455_v24  ;;  %v11967_v24 = vrot.slane %v1279_v58, %v1638_v2 }
 0x203   : > { %9491 = vmatprep.subr.bf16.mxu0 %v10456_v25 }
 0x206   : > { %9492 = vmatpush3.bf16.msra.mxu0 %v10456_v25  ;;  %v11971_v25 = vrot.slane %v1279_v58, %v1723_v3 }
 0x265   : > { %v1144_v26 = vpop.xlane.xlu0 %1143 }
 0x266   : > { %v1175_v27 = vmul.f32 0.0078125, %v1144_v26 }
 0x268   : > { %v1191_v30 = vadd.f32 1e-05, %v1175_v27 }
 0x269   : > { %v1174_v31 = vpop.xlane.xlu1 %1173  ;;  %v1146_v32 = vpop.xlane.xlu0 %1145 }
 0x26a   : > { %10529 = vrsqrt.f32 %v1191_v30  ;;  %v1190_v33 = vmul.f32 0.0078125, %v1174_v31  ;;  %v1176_v34 = vmul.f32 0.0078125, %v1146_v32 }
 0x26c   : > { %v1206_v38 = vadd.f32 1e-05, %v1190_v33  ;;  %v1192_v39 = vadd.f32 1e-05, %v1176_v34  ;;  %v11980_v33 = vrot.slane %v1279_v58, %v1808_v10  ;;  %v11983_v34 = vadd.s32 120, %v11926_v46 }
 0x26d   : > { %v1148_v40 = vpop.xlane.xlu1 %1147  ;;  %v1150_v41 = vpop.xlane.xlu0 %1149 }
 0x26e   : > { %10531 = vrsqrt.f32 %v1206_v38  ;;  %v1177_v42 = vmul.f32 0.0078125, %v1148_v40  ;;  %v1178_v43 = vmul.f32 0.0078125, %v1150_v41  ;;  %17907 = vst [vmem:[#allocation40_spill] sm:$0xff] %v11983_v34  ;;  %vm947_vm9 = vcmp.lt.s32.totalorder %v11983_v34, 127 }
 0x26f   : > { %10533 = vrsqrt.f32 %v1192_v39  ;;  %vm995_vm10 = vcmp.lt.s32.totalorder %v11983_v34, 126  ;;  %vm1043_vm11 = vcmp.lt.s32.totalorder %v11983_v34, 125 }
 0x270   : > { %v1193_v47 = vadd.f32 1e-05, %v1177_v42  ;;  %v1194_v48 = vadd.f32 1e-05, %v1178_v43 }
 0x271   : > { %v1152_v49 = vpop.xlane.xlu1 %1151  ;;  %v1154_v50 = vpop.xlane.xlu0 %1153 }
 0x272   : > { %10535 = vrsqrt.f32 %v1193_v47  ;;  %v1179_v54 = vmul.f32 0.0078125, %v1152_v49  ;;  %v1180_v55 = vmul.f32 0.0078125, %v1154_v50 }
 0x273   : > { %10537 = vrsqrt.f32 %v1194_v48 }
 0x274   : > { %v10530_v63 = vpop.eup %10529  ;;  %v1195_v0 = vadd.f32 1e-05, %v1179_v54  ;;  %v1196_v1 = vadd.f32 1e-05, %v1180_v55 }
 0x275   : > { %v1223_v6 = vmul.f32 %v10530_v63, %v11855_v20  ;;  %v1156_v7 = vpop.xlane.xlu1 %1155  ;;  %v1158_v8 = vpop.xlane.xlu0 %1157  ;;  %v11960_v20 = vrot.slane %v1279_v58, %v11940_v59 }
 0x276   : > { %10539 = vrsqrt.f32 %v1195_v0  ;;  %v1181_v13 = vmul.f32 0.0078125, %v1156_v7  ;;  %v1182_v17 = vmul.f32 0.0078125, %v1158_v8 }
 0x277   : > { %v1243_v19 = vmul.f32 %v11934_v57, %v1223_v6  ;;  %10541 = vrsqrt.f32 %v1196_v1 }
 0x278   : > { %v10532_v15 = vpop.eup %10531  ;;  %v1197_v22 = vadd.f32 1e-05, %v1181_v13  ;;  %v1198_v23 = vadd.f32 1e-05, %v1182_v17 }
 0x279   : > { %v10534_v26 = vpop.eup %10533  ;;  %v11974_v27 = vadd.f32 %v11952_v11, %v1243_v19  ;;  %v1238_v30 = vmul.f32 %v10532_v15, %v11863_v28  ;;  %v1160_v31 = vpop.xlane.xlu1 %1159 }
 0x27a   : > { %v1162_v32 = vpop.xlane.xlu0 %1161  ;;  %v1224_v38 = vmul.f32 %v10534_v26, %v11857_v21  ;;  %10543 = vrsqrt.f32 %v1197_v22  ;;  %v1183_v39 = vmul.f32 0.0078125, %v1160_v31 }
 0x27b   : > { %v1184_v40 = vmul.f32 0.0078125, %v1162_v32  ;;  %v1258_v41 = vmul.f32 %v11934_v57, %v1238_v30  ;;  %10545 = vrsqrt.f32 %v1198_v23  ;;  %v1280_v28 = vrot.slane %v11974_v27, 5 }
 0x27c   : > { %v1365_v42 = vrot.slane %v11974_v27, 6  ;;  %v10536_v43 = vpop.eup %10535  ;;  %v1244_v47 = vmul.f32 %v11934_v57, %v1224_v38  ;;  %v1199_v48 = vadd.f32 1e-05, %v1183_v39  ;;  %v1450_v50 = vrot.slane %v11974_v27, 7 }
 0x27d   : > { %v1200_v49 = vadd.f32 1e-05, %v1184_v40  ;;  %v10538_v21 = vpop.eup %10537  ;;  %v11993_v54 = vadd.f32 %v11952_v11, %v1258_v41  ;;  %v1225_v55 = vmul.f32 %v10536_v43, %v11865_v29  ;;  %v1164_v58 = vpop.xlane.xlu1 %1163  ;;  %v11998_v0 = vmul.f32 %v11956_v18, %v11974_v27 }
 0x27e   : > { %v1166_v63 = vpop.xlane.xlu0 %1165  ;;  %v1587_v1 = vrot.slane %v11974_v27, 1  ;;  %v12002_v6 = vadd.f32 %v11952_v11, %v1244_v47  ;;  %v1226_v7 = vmul.f32 %v10538_v21, %v11871_v36  ;;  %10547 = vrsqrt.f32 %v1199_v48 }
 0x27f   : > { %v1185_v8 = vmul.f32 0.0078125, %v1164_v58  ;;  %v1245_v13 = vmul.f32 %v11934_v57, %v1225_v55  ;;  %10549 = vrsqrt.f32 %v1200_v49  ;;  %v1186_v17 = vmul.f32 0.0078125, %v1166_v63 }
 0x280   : > { %v1295_v29 = vrot.slane %v11993_v54, 5  ;;  %v10540_v19 = vpop.eup %10539  ;;  %v1246_v15 = vmul.f32 %v11934_v57, %v1226_v7  ;;  %v1281_v23 = vrot.slane %v12002_v6, 5  ;;  %v1366_v26 = vrot.slane %v12002_v6, 6 }
 0x281   : > { %v1201_v22 = vadd.f32 1e-05, %v1185_v8  ;;  %v10542_v36 = vpop.eup %10541  ;;  %v12013_v30 = vadd.f32 %v11952_v11, %v1245_v13  ;;  %v1227_v31 = vmul.f32 %v10540_v19, %v11873_v37  ;;  %v1202_v32 = vadd.f32 1e-05, %v1186_v17  ;;  %v1168_v38 = vpop.xlane.xlu1 %1167 }
 0x282   : > { %v1170_v39 = vpop.xlane.xlu0 %1169  ;;  %v1312_v40 = vsel %vm1296_vm0, %v1295_v29, %v1280_v28  ;;  %v12021_v41 = vadd.f32 %v11952_v11, %v1246_v15  ;;  %v1228_v43 = vmul.f32 %v10542_v36, %v11879_v44  ;;  %v1187_v47 = vmul.f32 0.0078125, %v1168_v38 }
 0x283   : > { %10551 = vrsqrt.f32 %v1201_v22  ;;  %v1247_v48 = vmul.f32 %v11934_v57, %v1227_v31  ;;  %v1188_v37 = vmul.f32 0.0078125, %v1170_v39  ;;  %v1311_v49 = vsel %vm1296_vm0, %v1280_v28, %v1281_v23 }
 0x284   : > { %10553 = vrsqrt.f32 %v1202_v32  ;;  %v10544_v21 = vpop.eup %10543  ;;  %v1248_v55 = vmul.f32 %v11934_v57, %v1228_v43  ;;  %v1203_v58 = vadd.f32 1e-05, %v1187_v47  ;;  %v1313_v44 = vsel %vm724_vm1, %v1312_v40, 0.0 }
 0x285   : > { %v1334_v63 = vmul.f32 %v11949_v9, %v1311_v49  ;;  %v10546_v7 = vpop.eup %10545  ;;  %v12035_v8 = vadd.f32 %v11952_v11, %v1247_v48  ;;  %v1229_v13 = vmul.f32 %v10544_v21, %v11881_v45  ;;  %v1204_v17 = vadd.f32 1e-05, %v1188_v37  ;;  %v1172_v19 = vpop.xlane.xlu1 %1171 }
 0x286   : > { %v1333_v15 = vmul.f32 %v11949_v9, %v1313_v44  ;;  %v12040_v28 = vadd.f32 %v11952_v11, %v1248_v55  ;;  %v1230_v22 = vmul.f32 %v10546_v7, %v11887_v52  ;;  %10555 = vrsqrt.f32 %v1203_v58 }
 0x287   : > { %v1189_v36 = vmul.f32 0.0078125, %v1172_v19  ;;  %v1249_v31 = vmul.f32 %v11934_v57, %v1229_v13  ;;  %10557 = vrsqrt.f32 %v1204_v17  ;;  %v1380_v32 = vrot.slane %v11993_v54, 6 }
 0x288   : > { %v1396_v45 = vsel %vm1381_vm2, %v1365_v42, %v1366_v26  ;;  %v10548_v38 = vpop.eup %10547  ;;  %v1250_v39 = vmul.f32 %v11934_v57, %v1230_v22  ;;  %v1451_v43 = vrot.slane %v12002_v6, 7  ;;  %v1465_v21 = vrot.slane %v11993_v54, 7 }
 0x289   : > { %v1205_v52 = vadd.f32 1e-05, %v1189_v36  ;;  %v1419_v40 = vmul.f32 %v11960_v20, %v1396_v45  ;;  %v10550_v47 = vpop.eup %10549  ;;  %v12057_v48 = vadd.f32 %v11952_v11, %v1249_v31  ;;  %v1231_v37 = vmul.f32 %v10548_v38, %v11889_v53 }
 0x28a   : > { %v1397_v49 = vsel %vm1381_vm2, %v1380_v32, %v1365_v42  ;;  %v12068_v55 = vadd.f32 %v11952_v11, %v1250_v39  ;;  %v1232_v58 = vmul.f32 %v10550_v47, %v11896_v60  ;;  %v1481_v42 = vsel %vm1466_vm4, %v1450_v50, %v1451_v43 }
 0x28b   : > { %10559 = vrsqrt.f32 %v1205_v52  ;;  %v1398_v44 = vsel %vm772_vm3, %v1397_v49, 0.0  ;;  %v1251_v53 = vmul.f32 %v11934_v57, %v1231_v37  ;;  %v1435_v13 = vadd.f32 %v1419_v40, %v1334_v63 }
 0x28c   : > { %v1418_v7 = vmul.f32 %v11960_v20, %v1398_v44  ;;  %v1252_v19 = vmul.f32 %v11934_v57, %v1232_v58  ;;  %v1482_v60 = vsel %vm1466_vm4, %v1465_v21, %v1450_v50  ;;  %v1504_v22 = vmul.f32 %v11963_v14, %v1481_v42 }
 0x28d   : > { %v10552_v17 = vpop.eup %10551  ;;  %v1556_v63 = vmul.f32 %v11956_v18, %v12002_v6  ;;  %v12092_v31 = vadd.f32 %v11952_v11, %v1251_v53  ;;  %v1483_v39 = vsel %vm820_vm5, %v1482_v60, 0.0  ;;  %v1588_v49 = vrot.slane %v12002_v6, 1 }
 0x28e   : > { %v10554_v36 = vpop.eup %10553  ;;  %v1233_v45 = vmul.f32 %v10552_v17, %v11899_v61  ;;  %v1434_v38 = vadd.f32 %v1418_v7, %v1333_v15  ;;  %v12099_v52 = vadd.f32 %v11952_v11, %v1252_v19  ;;  %v1503_v40 = vmul.f32 %v11963_v14, %v1483_v39 }
 0x28f   : > { %v1234_v50 = vmul.f32 %v10554_v36, %v11906_v4  ;;  %v1520_v47 = vadd.f32 %v1504_v22, %v1435_v13  ;;  %v1589_v61 = vrot.slane %v12013_v30, 1  ;;  %v1672_v15 = vrot.slane %v11974_v27, 2 }
 0x290   : > { %v1253_v37 = vmul.f32 %v11934_v57, %v1233_v45  ;;  %v10556_v58 = vpop.eup %10555  ;;  %v1519_v53 = vadd.f32 %v1503_v40, %v1434_v38  ;;  %v1673_v42 = vrot.slane %v12002_v6, 2  ;;  %v1618_v60 = vsel %vm1603_vm6, %v1587_v1, %v1588_v49 }
 0x291   : > { %v1254_v44 = vmul.f32 %v11934_v57, %v1234_v50  ;;  %v1572_v7 = vadd.f32 %v1556_v63, %v1520_v47  ;;  %v10558_v17 = vpop.eup %10557  ;;  %v1235_v13 = vmul.f32 %v10556_v58, %v11909_v5  ;;  %v1617_v19 = vsel %vm1603_vm6, %v1588_v49, %v1589_v61 }
 0x292   : > { %v12110_v4 = vadd.f32 %v11952_v11, %v1253_v37  ;;  %v1236_v63 = vmul.f32 %v10558_v17, %v11916_v16  ;;  %v1571_v36 = vadd.f32 %v11998_v0, %v1519_v53  ;;  %v1640_v45 = vmul.f32 %v11967_v24, %v1618_v60 }
 0x293   : > { %v12122_v22 = vadd.f32 %v11952_v11, %v1254_v44  ;;  %v1255_v5 = vmul.f32 %v11934_v57, %v1235_v13  ;;  %v1641_v38 = vmul.f32 %v11967_v24, %v1617_v19  ;;  %v1674_v39 = vrot.slane %v12013_v30, 2 }
 0x294   : > { %v1703_v50 = vsel %vm1688_vm7, %v1672_v15, %v1673_v42  ;;  %v1256_v47 = vmul.f32 %v11934_v57, %v1236_v63  ;;  %v1656_v37 = vadd.f32 %v1640_v45, %v1571_v36  ;;  %v1757_v0 = vrot.slane %v11974_v27, 3 }
 0x295   : > { %v10560_v40 = vpop.eup %10559  ;;  %v1725_v16 = vmul.f32 %v11971_v25, %v1703_v50  ;;  %v12138_v49 = vadd.f32 %v11952_v11, %v1255_v5  ;;  %v1657_v44 = vadd.f32 %v1641_v38, %v1572_v7  ;;  %v1702_v53 = vsel %vm1688_vm7, %v1673_v42, %v1674_v39 }
 0x296   : > { %v1237_v58 = vmul.f32 %v10560_v40, %v11919_v12  ;;  %v12146_v17 = vadd.f32 %v11952_v11, %v1256_v47  ;;  %v1726_v13 = vmul.f32 %v11971_v25, %v1702_v53  ;;  %v1758_v60 = vrot.slane %v12002_v6, 3 }
 0x297   : > { %v1741_v19 = vadd.f32 %v1725_v16, %v1656_v37  ;;  %v1759_v36 = vrot.slane %v12013_v30, 3  ;;  %v1282_v12 = vrot.slane %v12013_v30, 5  ;;  %v1283_v7 = vrot.slane %v12021_v41, 5 }
 0x298   : > { %v1257_v63 = vmul.f32 %v11934_v57, %v1237_v58  ;;  %v1742_v45 = vadd.f32 %v1726_v13, %v1657_v44  ;;  %v1788_v42 = vsel %vm1773_vm8, %v1757_v0, %v1758_v60  ;;  %v1367_v5 = vrot.slane %v12013_v30, 6 }
 0x299   : > { %v1368_v38 = vrot.slane %v12021_v41, 6  ;;  %v1787_v57 = vsel %vm1773_vm8, %v1758_v60, %v1759_v36  ;;  %v1810_v40 = vmul.f32 %v11980_v33, %v1788_v42  ;;  %v1309_v47 = vsel %vm1296_vm0, %v1282_v12, %v1283_v7 }
 0x29a   : > { %v12161_v50 = vadd.f32 %v11952_v11, %v1257_v63  ;;  %v1811_v37 = vmul.f32 %v11980_v33, %v1787_v57  ;;  %v1310_v16 = vsel %vm1296_vm0, %v1281_v23, %v1282_v12  ;;  %v1336_v58 = vmul.f32 %v11949_v9, %v1309_v47 }
 0x29b   : > { %v1394_v11 = vsel %vm1381_vm2, %v1367_v5, %v1368_v38  ;;  %v1826_v44 = vadd.f32 %v1810_v40, %v1741_v19  ;;  %v1335_v53 = vmul.f32 %v11949_v9, %v1310_v16  ;;  %v1395_v13 = vsel %vm1381_vm2, %v1366_v26, %v1367_v5 }
 0x29c   : > { %v1421_v60 = vmul.f32 %v11960_v20, %v1394_v11  ;;  %v1827_v63 = vadd.f32 %v1811_v37, %v1742_v45  ;;  %v1420_v23 = vmul.f32 %v11960_v20, %v1395_v13  ;;  %v1452_v12 = vrot.slane %v12013_v30, 7 }
 0x29d   : > { %v1453_v42 = vrot.slane %v12021_v41, 7  ;;  %v1557_v19 = vmul.f32 %v11956_v18, %v12013_v30  ;;  %v1558_v40 = vmul.f32 %v11956_v18, %v12021_v41  ;;  %v1590_v47 = vrot.slane %v12021_v41, 1 }
 0x29e   : > { %v1437_v57 = vadd.f32 %v1421_v60, %v1336_v58  ;;  %v1842_v16 = vpack.c.bf16 %v1827_v63, %v1826_v44  ;;  %v1436_v26 = vadd.f32 %v1420_v23, %v1335_v53  ;;  %v1480_v5 = vsel %vm1466_vm4, %v1451_v43, %v1452_v12 }
 0x29f   : > { %v1479_v45 = vsel %vm1466_vm4, %v1452_v12, %v1453_v42  ;;  %v1505_v37 = vmul.f32 %v11963_v14, %v1480_v5  ;;  %v1591_v11 = vrot.slane %v12035_v8, 1  ;;  %v1616_v44 = vsel %vm1603_vm6, %v1589_v61, %v1590_v47 }
 0x2a0   : > { %v1506_v58 = vmul.f32 %v11963_v14, %v1479_v45  ;;  %9493 = vmatprep.mubr.bf16.mxu0 %v1842_v16  ;;  %v1642_v53 = vmul.f32 %v11967_v24, %v1616_v44  ;;  %v1675_v13 = vrot.slane %v12021_v41, 2  ;;  %v1676_v6 = vrot.slane %v12035_v8, 2 }
 0x2a1   : > { %v1760_v43 = vrot.slane %v12021_v41, 3  ;;  %v1521_v60 = vadd.f32 %v1505_v37, %v1436_v26  ;;  %v1615_v23 = vsel %vm1603_vm6, %v1590_v47, %v1591_v11  ;;  %v1761_v12 = vrot.slane %v12035_v8, 3 }
 0x2a2   : > { %v1522_v63 = vadd.f32 %v1506_v58, %v1437_v57  ;;  %v1643_v45 = vmul.f32 %v11967_v24, %v1615_v23  ;;  %v1700_v61 = vsel %vm1688_vm7, %v1675_v13, %v1676_v6  ;;  %v1701_v16 = vsel %vm1688_vm7, %v1674_v39, %v1675_v13 }
 0x2a3   : > { %v1786_v5 = vsel %vm1773_vm8, %v1759_v36, %v1760_v43  ;;  %v1573_v26 = vadd.f32 %v1557_v19, %v1521_v60  ;;  %v1727_v37 = vmul.f32 %v11971_v25, %v1701_v16  ;;  %v1728_v47 = vmul.f32 %v11971_v25, %v1700_v61 }
 0x2a4   : > { %v1574_v57 = vadd.f32 %v1558_v40, %v1522_v63  ;;  %v1785_v58 = vsel %vm1773_vm8, %v1760_v43, %v1761_v12  ;;  %v1812_v44 = vmul.f32 %v11980_v33, %v1786_v5  ;;  %v1284_v23 = vrot.slane %v12035_v8, 5 }
 0x2a5   : > { %v1285_v30 = vrot.slane %v12040_v28, 5  ;;  %v1658_v35 = vadd.f32 %v1642_v53, %v1573_v26  ;;  %v1813_v13 = vmul.f32 %v11980_v33, %v1785_v58  ;;  %v1369_v36 = vrot.slane %v12035_v8, 6 }
 0x2a6   : > { %v1659_v39 = vadd.f32 %v1643_v45, %v1574_v57  ;;  %v1308_v40 = vsel %vm1296_vm0, %v1283_v7, %v1284_v23  ;;  %v1370_v43 = vrot.slane %v12040_v28, 6  ;;  %v1454_v60 = vrot.slane %v12035_v8, 7 }
 0x2a7   : > { %v1307_v19 = vsel %vm1296_vm0, %v1284_v23, %v1285_v30  ;;  %v1743_v63 = vadd.f32 %v1727_v37, %v1658_v35  ;;  %v1337_v53 = vmul.f32 %v11949_v9, %v1308_v40  ;;  %v1393_v5 = vsel %vm1381_vm2, %v1368_v38, %v1369_v36 }
 0x2a8   : > { %v1744_v61 = vadd.f32 %v1728_v47, %v1659_v39  ;;  %v1338_v45 = vmul.f32 %v11949_v9, %v1307_v19  ;;  %v1392_v16 = vsel %vm1381_vm2, %v1369_v36, %v1370_v43  ;;  %v1455_v7 = vrot.slane %v12040_v28, 7 }
 0x2a9   : > { %v1478_v26 = vsel %vm1466_vm4, %v1453_v42, %v1454_v60  ;;  %v1828_v57 = vadd.f32 %v1812_v44, %v1743_v63  ;;  %v1422_v37 = vmul.f32 %v11960_v20, %v1393_v5  ;;  %v1423_v47 = vmul.f32 %v11960_v20, %v1392_v16 }
 0x2aa   : > { %v1829_v35 = vadd.f32 %v1813_v13, %v1744_v61  ;;  %v1477_v58 = vsel %vm1466_vm4, %v1454_v60, %v1455_v7  ;;  %v1507_v23 = vmul.f32 %v11963_v14, %v1478_v26  ;;  %v1559_v41 = vmul.f32 %v11956_v18, %v12035_v8 }
 0x2ab   : > { %v1560_v38 = vmul.f32 %v11956_v18, %v12040_v28  ;;  %v1438_v36 = vadd.f32 %v1422_v37, %v1337_v53  ;;  %v1439_v42 = vadd.f32 %v1423_v47, %v1338_v45  ;;  %v1508_v44 = vmul.f32 %v11963_v14, %v1477_v58 }
 0x2ac   : > { %v1843_v39 = vpack.c.bf16 %v1829_v35, %v1828_v57  ;;  %v1592_v13 = vrot.slane %v12040_v28, 1  ;;  %v1593_v19 = vrot.slane %v12057_v48, 1  ;;  %v1677_v40 = vrot.slane %v12040_v28, 2 }
 0x2ad   : > { %v1678_v60 = vrot.slane %v12057_v48, 2  ;;  %v1523_v63 = vadd.f32 %v1507_v23, %v1438_v36  ;;  %v1524_v61 = vadd.f32 %v1508_v44, %v1439_v42  ;;  %v1762_v8 = vrot.slane %v12040_v28, 3 }
 0x2ae   : > { %9494 = vmatmul.mubr.bf16.vlgmr.msra.gmra.mrb[0].mxu0 %v1843_v39  ;;  %v1763_v16 = vrot.slane %v12057_v48, 3  ;;  %v1613_v53 = vsel %vm1603_vm6, %v1592_v13, %v1593_v19  ;;  %v1614_v45 = vsel %vm1603_vm6, %v1591_v11, %v1592_v13  ;;  %v1699_v26 = vsel %vm1688_vm7, %v1676_v6, %v1677_v40 }
 0x2af   : > { %v1698_v5 = vsel %vm1688_vm7, %v1677_v40, %v1678_v60  ;;  %v1575_v57 = vadd.f32 %v1559_v41, %v1523_v63  ;;  %v1576_v35 = vadd.f32 %v1560_v38, %v1524_v61  ;;  %v1644_v37 = vmul.f32 %v11967_v24, %v1614_v45 }
 0x2b0   : > { %v1645_v47 = vmul.f32 %v11967_v24, %v1613_v53  ;;  %v1729_v58 = vmul.f32 %v11971_v25, %v1699_v26  ;;  %v1730_v23 = vmul.f32 %v11971_v25, %v1698_v5  ;;  %v1783_v11 = vsel %vm1773_vm8, %v1762_v8, %v1763_v16 }
 0x2b1   : > { %v1784_v39 = vsel %vm1773_vm8, %v1761_v12, %v1762_v8  ;;  %v1660_v36 = vadd.f32 %v1644_v37, %v1575_v57  ;;  %v1815_v38 = vmul.f32 %v11980_v33, %v1783_v11  ;;  %v1286_v42 = vrot.slane %v12057_v48, 5 }
 0x2b2   : > { %v1661_v6 = vadd.f32 %v1645_v47, %v1576_v35  ;;  %v1814_v41 = vmul.f32 %v11980_v33, %v1784_v39  ;;  %v1287_v44 = vrot.slane %v12068_v55, 5  ;;  %v1371_v13 = vrot.slane %v12057_v48, 6 }
 0x2b3   : > { %v1372_v40 = vrot.slane %v12068_v55, 6  ;;  %v1745_v63 = vadd.f32 %v1729_v58, %v1660_v36  ;;  %v1456_v53 = vrot.slane %v12057_v48, 7  ;;  %v1457_v12 = vrot.slane %v12068_v55, 7 }
 0x2b4   : > { %v1746_v61 = vadd.f32 %v1730_v23, %v1661_v6  ;;  %v1305_v8 = vsel %vm1296_vm0, %v1286_v42, %v1287_v44  ;;  %v1306_v45 = vsel %vm1296_vm0, %v1285_v30, %v1286_v42  ;;  %v1391_v26 = vsel %vm1381_vm2, %v1370_v43, %v1371_v13 }
 0x2b5   : > { %v1390_v5 = vsel %vm1381_vm2, %v1371_v13, %v1372_v40  ;;  %v1830_v57 = vadd.f32 %v1814_v41, %v1745_v63  ;;  %v1339_v37 = vmul.f32 %v11949_v9, %v1306_v45  ;;  %v1340_v47 = vmul.f32 %v11949_v9, %v1305_v8 }
 0x2b6   : > { %v1831_v35 = vadd.f32 %v1815_v38, %v1746_v61  ;;  %v1424_v58 = vmul.f32 %v11960_v20, %v1391_v26  ;;  %v1425_v23 = vmul.f32 %v11960_v20, %v1390_v5  ;;  %v1475_v28 = vsel %vm1466_vm4, %v1456_v53, %v1457_v12 }
 0x2b7   : > { %v1476_v30 = vsel %vm1466_vm4, %v1455_v7, %v1456_v53  ;;  %v1510_v39 = vmul.f32 %v11963_v14, %v1475_v28  ;;  %v1561_v36 = vmul.f32 %v11956_v18, %v12057_v48  ;;  %v1562_v38 = vmul.f32 %v11956_v18, %v12068_v55 }
 0x2b8   : > { %v1844_v11 = vpack.c.bf16 %v1831_v35, %v1830_v57  ;;  %v1509_v43 = vmul.f32 %v11963_v14, %v1476_v30  ;;  %v1440_v6 = vadd.f32 %v1424_v58, %v1339_v37  ;;  %v1441_v41 = vadd.f32 %v1425_v23, %v1340_v47 }
 0x2b9   : > { %v1594_v42 = vrot.slane %v12068_v55, 1  ;;  %v1595_v13 = vrot.slane %v12092_v31, 1  ;;  %v1679_v7 = vrot.slane %v12068_v55, 2  ;;  %v1680_v63 = vrot.slane %v12092_v31, 2 }
 0x2ba   : > { %9497 = vmatprep.mubr.bf16.mxu0 %v1844_v11  ;;  %v1764_v61 = vrot.slane %v12068_v55, 3  ;;  %v1525_v53 = vadd.f32 %v1509_v43, %v1440_v6  ;;  %v1526_v8 = vadd.f32 %v1510_v39, %v1441_v41  ;;  %v1765_v5 = vrot.slane %v12092_v31, 3 }
 0x2bb   : > { %v1612_v45 = vsel %vm1603_vm6, %v1593_v19, %v1594_v42  ;;  %v1611_v26 = vsel %vm1603_vm6, %v1594_v42, %v1595_v13  ;;  %v1696_v35 = vsel %vm1688_vm7, %v1679_v7, %v1680_v63  ;;  %v1697_v37 = vsel %vm1688_vm7, %v1678_v60, %v1679_v7 }
 0x2bc   : > { %v1646_v57 = vmul.f32 %v11967_v24, %v1612_v45  ;;  %v1577_v47 = vadd.f32 %v1561_v36, %v1525_v53  ;;  %v1578_v58 = vadd.f32 %v1562_v38, %v1526_v8  ;;  %v1647_v19 = vmul.f32 %v11967_v24, %v1611_v26 }
 0x2bd   : > { %v1731_v23 = vmul.f32 %v11971_v25, %v1697_v37  ;;  %v1732_v28 = vmul.f32 %v11971_v25, %v1696_v35  ;;  %v1781_v30 = vsel %vm1773_vm8, %v1764_v61, %v1765_v5  ;;  %v1782_v11 = vsel %vm1773_vm8, %v1763_v16, %v1764_v61 }
 0x2be   : > { %v1288_v60 = vrot.slane %v12092_v31, 5  ;;  %v1662_v43 = vadd.f32 %v1646_v57, %v1577_v47  ;;  %v1663_v39 = vadd.f32 %v1647_v19, %v1578_v58  ;;  %v1816_v36 = vmul.f32 %v11980_v33, %v1782_v11 }
 0x2bf   : > { %v1817_v6 = vmul.f32 %v11980_v33, %v1781_v30  ;;  %v1289_v41 = vrot.slane %v12099_v52, 5  ;;  %v1373_v42 = vrot.slane %v12092_v31, 6  ;;  %v1374_v48 = vrot.slane %v12099_v52, 6 }
 0x2c0   : > { %v1304_v38 = vsel %vm1296_vm0, %v1287_v44, %v1288_v60  ;;  %v1747_v7 = vadd.f32 %v1731_v23, %v1662_v43  ;;  %v1748_v53 = vadd.f32 %v1732_v28, %v1663_v39  ;;  %v1458_v61 = vrot.slane %v12092_v31, 7 }
 0x2c1   : > { %v1341_v16 = vmul.f32 %v11949_v9, %v1304_v38  ;;  %v1303_v8 = vsel %vm1296_vm0, %v1288_v60, %v1289_v41  ;;  %v1388_v45 = vsel %vm1381_vm2, %v1373_v42, %v1374_v48  ;;  %v1389_v44 = vsel %vm1381_vm2, %v1372_v40, %v1373_v42 }
 0x2c2   : > { %v1459_v26 = vrot.slane %v12099_v52, 7  ;;  %v1832_v57 = vadd.f32 %v1816_v36, %v1747_v7  ;;  %v1833_v35 = vadd.f32 %v1817_v6, %v1748_v53  ;;  %v1342_v37 = vmul.f32 %v11949_v9, %v1303_v8 }
 0x2c3   : > { %v1426_v47 = vmul.f32 %v11960_v20, %v1389_v44  ;;  %v1427_v58 = vmul.f32 %v11960_v20, %v1388_v45  ;;  %v1474_v23 = vsel %vm1466_vm4, %v1457_v12, %v1458_v61  ;;  %v1563_v40 = vmul.f32 %v11956_v18, %v12092_v31 }
 0x2c4   : > { %v1473_v19 = vsel %vm1466_vm4, %v1458_v61, %v1459_v26  ;;  %v1845_v28 = vpack.c.bf16 %v1833_v35, %v1832_v57  ;;  %v1511_v11 = vmul.f32 %v11963_v14, %v1474_v23  ;;  %v1564_v39 = vmul.f32 %v11956_v18, %v12099_v52 }
 0x2c5   : > { %v1442_v30 = vadd.f32 %v1426_v47, %v1341_v16  ;;  %v1512_v60 = vmul.f32 %v11963_v14, %v1473_v19  ;;  %v1443_v43 = vadd.f32 %v1427_v58, %v1342_v37  ;;  %v1596_v36 = vrot.slane %v12099_v52, 1 }
 0x2c6   : > { %v1597_v55 = vrot.slane %v12110_v4, 1  ;;  %9498 = vmatmul.mubr.bf16.gmra.mrb[4].mxu0 %v1845_v28  ;;  %v1681_v12 = vrot.slane %v12099_v52, 2  ;;  %v1682_v38 = vrot.slane %v12110_v4, 2  ;;  %v1766_v42 = vrot.slane %v12099_v52, 3 }
 0x2c7   : > { %v1527_v6 = vadd.f32 %v1511_v11, %v1442_v30  ;;  %v1528_v7 = vadd.f32 %v1512_v60, %v1443_v43  ;;  %v1610_v16 = vsel %vm1603_vm6, %v1595_v13, %v1596_v36  ;;  %v1767_v61 = vrot.slane %v12110_v4, 3 }
 0x2c8   : > { %v1609_v53 = vsel %vm1603_vm6, %v1596_v36, %v1597_v55  ;;  %v1648_v45 = vmul.f32 %v11967_v24, %v1610_v16  ;;  %v1694_v57 = vsel %vm1688_vm7, %v1681_v12, %v1682_v38  ;;  %v1695_v37 = vsel %vm1688_vm7, %v1680_v63, %v1681_v12 }
 0x2c9   : > { %v1579_v8 = vadd.f32 %v1563_v40, %v1527_v6  ;;  %v1649_v44 = vmul.f32 %v11967_v24, %v1609_v53  ;;  %v1580_v35 = vadd.f32 %v1564_v39, %v1528_v7  ;;  %v1734_v47 = vmul.f32 %v11971_v25, %v1694_v57 }
 0x2ca   : > { %v1779_v13 = vsel %vm1773_vm8, %v1766_v42, %v1767_v61  ;;  %v1733_v19 = vmul.f32 %v11971_v25, %v1695_v37  ;;  %v1780_v23 = vsel %vm1773_vm8, %v1765_v5, %v1766_v42  ;;  %v1290_v30 = vrot.slane %v12110_v4, 5 }
 0x2cb   : > { %v1664_v58 = vadd.f32 %v1648_v45, %v1579_v8  ;;  %v1819_v40 = vmul.f32 %v11980_v33, %v1779_v13  ;;  %v1665_v28 = vadd.f32 %v1649_v44, %v1580_v35  ;;  %v1818_v63 = vmul.f32 %v11980_v33, %v1780_v23 }
 0x2cc   : > { %v1291_v11 = vrot.slane %v12122_v22, 5  ;;  %v1375_v43 = vrot.slane %v12110_v4, 6  ;;  %v1376_v39 = vrot.slane %v12122_v22, 6  ;;  %v1460_v36 = vrot.slane %v12110_v4, 7 }
 0x2cd   : > { %v1749_v60 = vadd.f32 %v1733_v19, %v1664_v58  ;;  %v1750_v31 = vadd.f32 %v1734_v47, %v1665_v28  ;;  %v1302_v6 = vsel %vm1296_vm0, %v1289_v41, %v1290_v30  ;;  %v1461_v12 = vrot.slane %v12122_v22, 7 }
 0x2ce   : > { %v1301_v5 = vsel %vm1296_vm0, %v1290_v30, %v1291_v11  ;;  %v1343_v7 = vmul.f32 %v11949_v9, %v1302_v6  ;;  %v1386_v16 = vsel %vm1381_vm2, %v1375_v43, %v1376_v39  ;;  %v1387_v45 = vsel %vm1381_vm2, %v1374_v48, %v1375_v43 }
 0x2cf   : > { %v1834_v42 = vadd.f32 %v1818_v63, %v1749_v60  ;;  %v1344_v53 = vmul.f32 %v11949_v9, %v1301_v5  ;;  %v1835_v8 = vadd.f32 %v1819_v40, %v1750_v31  ;;  %v1429_v44 = vmul.f32 %v11960_v20, %v1386_v16 }
 0x2d0   : > { %v1471_v41 = vsel %vm1466_vm4, %v1460_v36, %v1461_v12  ;;  %v1428_v57 = vmul.f32 %v11960_v20, %v1387_v45  ;;  %v1472_v35 = vsel %vm1466_vm4, %v1459_v26, %v1460_v36  ;;  %v1565_v47 = vmul.f32 %v11956_v18, %v12110_v4 }
 0x2d1   : > { %v1514_v37 = vmul.f32 %v11963_v14, %v1471_v41  ;;  %v1846_v13 = vpack.c.bf16 %v1835_v8, %v1834_v42  ;;  %v1445_v52 = vadd.f32 %v1429_v44, %v1344_v53  ;;  %v1513_v58 = vmul.f32 %v11963_v14, %v1472_v35 }
 0x2d2   : > { %v1566_v48 = vmul.f32 %v11956_v18, %v12122_v22  ;;  %v1444_v19 = vadd.f32 %v1428_v57, %v1343_v7  ;;  %v1598_v23 = vrot.slane %v12122_v22, 1  ;;  %v1599_v40 = vrot.slane %v12138_v49, 1 }
 0x2d3   : > { %v1683_v28 = vrot.slane %v12122_v22, 2  ;;  %9501 = vmatprep.mubr.bf16.mxu0 %v1846_v13  ;;  %v1530_v26 = vadd.f32 %v1514_v37, %v1445_v52  ;;  %v1684_v63 = vrot.slane %v12138_v49, 2  ;;  %v1768_v30 = vrot.slane %v12122_v22, 3 }
 0x2d4   : > { %v1769_v60 = vrot.slane %v12138_v49, 3  ;;  %v1529_v43 = vadd.f32 %v1513_v58, %v1444_v19  ;;  %v1607_v36 = vsel %vm1603_vm6, %v1598_v23, %v1599_v40  ;;  %v1608_v31 = vsel %vm1603_vm6, %v1597_v55, %v1598_v23 }
 0x2d5   : > { %v1693_v5 = vsel %vm1688_vm7, %v1682_v38, %v1683_v28  ;;  %v1582_v6 = vadd.f32 %v1566_v48, %v1530_v26  ;;  %v1650_v42 = vmul.f32 %v11967_v24, %v1608_v31  ;;  %v1651_v7 = vmul.f32 %v11967_v24, %v1607_v36 }
 0x2d6   : > { %v1692_v22 = vsel %vm1688_vm7, %v1683_v28, %v1684_v63  ;;  %v1581_v53 = vadd.f32 %v1565_v47, %v1529_v43  ;;  %v1735_v16 = vmul.f32 %v11971_v25, %v1693_v5  ;;  %v1777_v55 = vsel %vm1773_vm8, %v1768_v30, %v1769_v60 }
 0x2d7   : > { %v1736_v8 = vmul.f32 %v11971_v25, %v1692_v22  ;;  %v1667_v38 = vadd.f32 %v1651_v7, %v1582_v6  ;;  %v1778_v45 = vsel %vm1773_vm8, %v1767_v61, %v1768_v30  ;;  %v1821_v44 = vmul.f32 %v11980_v33, %v1777_v55 }
 0x2d8   : > { %v1292_v41 = vrot.slane %v12138_v49, 5  ;;  %v1666_v57 = vadd.f32 %v1650_v42, %v1581_v53  ;;  %v1820_v35 = vmul.f32 %v11980_v33, %v1778_v45  ;;  %v1293_v37 = vrot.slane %v12146_v17, 5 }
 0x2d9   : > { %v1377_v47 = vrot.slane %v12138_v49, 6  ;;  %v1752_v13 = vadd.f32 %v1736_v8, %v1667_v38  ;;  %v1378_v4 = vrot.slane %v12146_v17, 6  ;;  %v1462_v58 = vrot.slane %v12138_v49, 7 }
 0x2da   : > { %v1300_v52 = vsel %vm1296_vm0, %v1291_v11, %v1292_v41  ;;  %v1751_v61 = vadd.f32 %v1735_v16, %v1666_v57  ;;  %v1299_v48 = vsel %vm1296_vm0, %v1292_v41, %v1293_v37  ;;  %v1463_v31 = vrot.slane %v12146_v17, 7 }
 0x2db   : > { %v1345_v19 = vmul.f32 %v11949_v9, %v1300_v52  ;;  %v1385_v23 = vsel %vm1381_vm2, %v1376_v39, %v1377_v47  ;;  %v1837_v28 = vadd.f32 %v1821_v44, %v1752_v13  ;;  %v1346_v26 = vmul.f32 %v11949_v9, %v1299_v48 }
 0x2dc   : > { %v1384_v30 = vsel %vm1381_vm2, %v1377_v47, %v1378_v4  ;;  %v1430_v11 = vmul.f32 %v11960_v20, %v1385_v23  ;;  %v1836_v43 = vadd.f32 %v1820_v35, %v1751_v61  ;;  %v1470_v5 = vsel %vm1466_vm4, %v1461_v12, %v1462_v58 }
 0x2dd   : > { %v1431_v36 = vmul.f32 %v11960_v20, %v1384_v30  ;;  %v1515_v42 = vmul.f32 %v11963_v14, %v1470_v5  ;;  %v1567_v39 = vmul.f32 %v11956_v18, %v12138_v49  ;;  %v1568_v7 = vmul.f32 %v11956_v18, %v12146_v17 }
 0x2de   : > { %v1446_v6 = vadd.f32 %v1430_v11, %v1345_v19  ;;  %v1847_v22 = vpack.c.bf16 %v1837_v28, %v1836_v43  ;;  %v1469_v16 = vsel %vm1466_vm4, %v1462_v58, %v1463_v31  ;;  %v1600_v8 = vrot.slane %v12146_v17, 1 }
 0x2df   : > { %v1447_v53 = vadd.f32 %v1431_v36, %v1346_v26  ;;  %v1516_v55 = vmul.f32 %v11963_v14, %v1469_v16  ;;  %v1601_v12 = vrot.slane %v12161_v50, 1  ;;  %v1685_v45 = vrot.slane %v12146_v17, 2 }
 0x2e0   : > { %v1531_v38 = vadd.f32 %v1515_v42, %v1446_v6  ;;  %9502 = vmatmul.mubr.bf16.gmra.mrb[8].mxu0 %v1847_v22  ;;  %v1606_v44 = vsel %vm1603_vm6, %v1599_v40, %v1600_v8  ;;  %v1686_v41 = vrot.slane %v12161_v50, 2  ;;  %v1770_v57 = vrot.slane %v12146_v17, 3 }
 0x2e1   : > { %v1771_v35 = vrot.slane %v12161_v50, 3  ;;  %v1532_v47 = vadd.f32 %v1516_v55, %v1447_v53  ;;  %v1605_v52 = vsel %vm1603_vm6, %v1600_v8, %v1601_v12  ;;  %v1652_v58 = vmul.f32 %v11967_v24, %v1606_v44 }
 0x2e2   : > { %v1583_v13 = vadd.f32 %v1567_v39, %v1531_v38  ;;  %v1653_v61 = vmul.f32 %v11967_v24, %v1605_v52  ;;  %v1690_v48 = vsel %vm1688_vm7, %v1685_v45, %v1686_v41  ;;  %v1691_v40 = vsel %vm1688_vm7, %v1684_v63, %v1685_v45 }
 0x2e3   : > { %v1775_v17 = vsel %vm1773_vm8, %v1770_v57, %v1771_v35  ;;  %v1584_v19 = vadd.f32 %v1568_v7, %v1532_v47  ;;  %v1737_v28 = vmul.f32 %v11971_v25, %v1691_v40  ;;  %v1738_v26 = vmul.f32 %v11971_v25, %v1690_v48 }
 0x2e4   : > { %v1668_v23 = vadd.f32 %v1652_v58, %v1583_v13  ;;  %v1776_v30 = vsel %vm1773_vm8, %v1769_v60, %v1770_v57  ;;  %v1823_v63 = vmul.f32 %v11980_v33, %v1775_v17  ;;  %v1294_v11 = vrot.slane %v12161_v50, 5 }
 0x2e5   : > { %v1379_v43 = vrot.slane %v12161_v50, 6  ;;  %v1669_v36 = vadd.f32 %v1653_v61, %v1584_v19  ;;  %v1822_v6 = vmul.f32 %v11980_v33, %v1776_v30  ;;  %v1464_v42 = vrot.slane %v12161_v50, 7 }
 0x2e6   : > { %v1753_v5 = vadd.f32 %v1737_v28, %v1668_v23  ;;  %v1297_v49 = vsel %vm1296_vm0, %v1294_v11, %v1295_v29  ;;  %v1298_v60 = vsel %vm1296_vm0, %v1293_v37, %v1294_v11  ;;  %v1602_v57 = vrot.slane %v11993_v54, 1 }
 0x2e7   : > { %v1382_v39 = vsel %vm1381_vm2, %v1379_v43, %v1380_v32  ;;  %v1383_v7 = vsel %vm1381_vm2, %v1378_v4, %v1379_v43  ;;  %v1754_v22 = vadd.f32 %v1738_v26, %v1669_v36  ;;  %v1347_v16 = vmul.f32 %v11949_v9, %v1298_v60 }
 0x2e8   : > { %v1838_v53 = vadd.f32 %v1822_v6, %v1753_v5  ;;  %v1348_v8 = vmul.f32 %v11949_v9, %v1297_v49  ;;  %v1432_v55 = vmul.f32 %v11960_v20, %v1383_v7  ;;  %v1433_v29 = vmul.f32 %v11960_v20, %v1382_v39  ;;  %v10945_v7 = vld [vmem:[%s11819_s4] sm:$0xff] }
 0x2e9   : > { %v1467_v37 = vsel %vm1466_vm4, %v1464_v42, %v1465_v21  ;;  %v1468_v32 = vsel %vm1466_vm4, %v1463_v31, %v1464_v42  ;;  %v1839_v38 = vadd.f32 %v1823_v63, %v1754_v22  ;;  %v1569_v20 = vmul.f32 %v11956_v18, %v12161_v50 }
 0x2ea   : > { %v1517_v4 = vmul.f32 %v11963_v14, %v1468_v32  ;;  %v1518_v45 = vmul.f32 %v11963_v14, %v1467_v37  ;;  %v1448_v9 = vadd.f32 %v1432_v55, %v1347_v16  ;;  %v1449_v44 = vadd.f32 %v1433_v29, %v1348_v8  ;;  %v10946_v8 = vld [vmem:[%s11819_s4 + $0x8] sm:$0xff]  ;;  %v10947_v29 = vld [vmem:[%s11819_s4 + $0x18] sm:$0xff] }
 0x2eb   : > { %v1848_v47 = vpack.c.bf16 %v1839_v38, %v1838_v53  ;;  %v1570_v21 = vmul.f32 %v11956_v18, %v11993_v54  ;;  %v1687_v31 = vrot.slane %v11993_v54, 2  ;;  %v1772_v13 = vrot.slane %v11993_v54, 3 }
 0x2ec   : > { %v1533_v52 = vadd.f32 %v1517_v4, %v1448_v9  ;;  %v1534_v58 = vadd.f32 %v1518_v45, %v1449_v44  ;;  %v1604_v14 = vsel %vm1603_vm6, %v1601_v12, %v1602_v57  ;;  %v1619_v50 = vsel %vm1603_vm6, %v1602_v57, %v1587_v1 }
 0x2ed   : > { %9505 = vmatprep.mubr.bf16.mxu0 %v1848_v47  ;;  %v1635_v61 = vsel %vm947_vm9, %v1619_v50, 0.0  ;;  %v1654_v18 = vmul.f32 %v11967_v24, %v1604_v14  ;;  %v1689_v48 = vsel %vm1688_vm7, %v1686_v41, %v1687_v31  ;;  %v1704_v54 = vsel %vm1688_vm7, %v1687_v31, %v1672_v15  ;;  %v10948_v47 = vld [vmem:[%s11819_s4 + $0x28] sm:$0xff]  ;;  %v10949_v31 = vld [vmem:[%s11819_s4 + $0x38] sm:$0xff] }
 0x2ee   : > { %v1585_v12 = vadd.f32 %v1569_v20, %v1533_v52  ;;  %v1586_v40 = vadd.f32 %v1570_v21, %v1534_v58  ;;  %v1655_v17 = vmul.f32 %v11967_v24, %v1635_v61  ;;  %v1720_v1 = vsel %vm995_vm10, %v1704_v54, 0.0 }
 0x2ef   : > { %v1739_v19 = vmul.f32 %v11971_v25, %v1689_v48  ;;  %v1774_v23 = vsel %vm1773_vm8, %v1771_v35, %v1772_v13  ;;  %v1789_v41 = vsel %vm1773_vm8, %v1772_v13, %v1757_v0  ;;  %v1740_v15 = vmul.f32 %v11971_v25, %v1720_v1  ;;  %v12596_v0 = vld [vmem:[#allocation7] ss:$0 sm:$0xff] }
 0x2f0   : > { %v1670_v28 = vadd.f32 %v1654_v18, %v1585_v12  ;;  %v1671_v26 = vadd.f32 %v1655_v17, %v1586_v40  ;;  %v1805_v24 = vsel %vm1043_vm11, %v1789_v41, 0.0  ;;  %v1824_v11 = vmul.f32 %v11980_v33, %v1774_v23  ;;  %v10950_v12 = vld [vmem:[%s11819_s4 + $0x48] sm:$0xff]  ;;  %v10951_v17 = vld [vmem:[%s11819_s4 + $0x58] sm:$0xff] }
 0x2f1   : > { %v1825_v43 = vmul.f32 %v11980_v33, %v1805_v24 }
 0x2f2   : > { %v1755_v30 = vadd.f32 %v1739_v19, %v1670_v28  ;;  %v1756_v63 = vadd.f32 %v1740_v15, %v1671_v26 }
 0x2f4   : > { %v1840_v35 = vadd.f32 %v1824_v11, %v1755_v30  ;;  %v1841_v36 = vadd.f32 %v1825_v43, %v1756_v63 }
 0x2f6   : > { %v1849_v27 = vpack.c.bf16 %v1841_v36, %v1840_v35  ;;  %v10952_v35 = vld [vmem:[%s11819_s4 + $0x78] sm:$0xff] }
 0x2f8   : > { %9506 = vmatmul.mubr.bf16.gmra.mrb[12].mxu0 %v1849_v27  ;;  %v10953_v27 = vld [vmem:[%s11819_s4 + $0x68] sm:$0xff] }
 0x381   : > { %v9495_v5 = vpop.f32.mrb[0].mxu0 }
 0x382   : > { %v1953_v25 = vpop.f32.mrb[1].mxu0  ;;  %v1962_v28 = vadd.f32 %v9495_v5, %v12596_v0  ;;  %v10954_v5 = vld [vmem:[%s11819_s4 + $0x10] sm:$0xff] }
 0x383   : > { %v1954_v6 = vadd.f32 %v12596_v0, %v1953_v25  ;;  %v9496_v42 = vpop.f32.mrb[2].mxu0 }
 0x384   : > { %v1956_v49 = vpop.f32.mrb[3].mxu0  ;;  %v1965_v33 = vadd.f32 %v9496_v42, %v12596_v0  ;;  %v2018_v11 = vmax.f32 %v1962_v28, 0.0 }
 0x385   : > { %v2016_v60 = vmax.f32 %v1954_v6, 0.0  ;;  %v1957_v39 = vadd.f32 %v12596_v0, %v1956_v49 }
 0x386   : > { %v2019_v16 = vmax.f32 %v1965_v33, 0.0  ;;  %v12646_v6 = vadd.f32 %v10954_v5, %v2018_v11 }
 0x387   : > { %v12601_v22 = vadd.f32 %v10945_v7, %v2016_v60  ;;  %v2017_v53 = vmax.f32 %v1957_v39, 0.0  ;;  %v10955_v39 = vld [vmem:[%s11819_s4 + $0x20] sm:$0xff] }
 0x388   : > { %v12610_v37 = vadd.f32 %v10947_v29, %v2019_v16 }
 0x389   : > { %2050 = vadd.xlane.f32.xlu0 %v12601_v22  ;;  %v12606_v55 = vadd.f32 %v10946_v8, %v2017_v53  ;;  %v10956_v53 = vld [vmem:[%s11819_s4 + $0x30] sm:$0xff] }
 0x38d   : > { %2052 = vadd.xlane.f32.xlu0 %v12606_v55 }
 0x391   : > { %2056 = vadd.xlane.f32.xlu0 %v12610_v37 }
 0x399   : > { %v9499_v32 = vpop.f32.mrb[4].mxu0 }
 0x39a   : > { %v1969_v38 = vpop.f32.mrb[5].mxu0  ;;  %v1978_v42 = vadd.f32 %v9499_v32, %v12596_v0 }
 0x39b   : > { %v9500_v4 = vpop.f32.mrb[6].mxu0  ;;  %v1970_v43 = vadd.f32 %v12596_v0, %v1969_v38  ;;  %v10957_v38 = vld [vmem:[%s11819_s4 + $0x40] sm:$0xff] }
 0x39c   : > { %v1972_v45 = vpop.f32.mrb[7].mxu0  ;;  %v1981_v9 = vadd.f32 %v9500_v4, %v12596_v0  ;;  %v2022_v60 = vmax.f32 %v1978_v42, 0.0 }
 0x39d   : > { %v1973_v44 = vadd.f32 %v12596_v0, %v1972_v45  ;;  %v2020_v49 = vmax.f32 %v1970_v43, 0.0 }
 0x39e   : > { %v2023_v57 = vmax.f32 %v1981_v9, 0.0  ;;  %v12656_v16 = vadd.f32 %v10956_v53, %v2022_v60  ;;  %v10958_v9 = vld [vmem:[%s11819_s4 + $0x50] sm:$0xff] }
 0x39f   : > { %v2021_v20 = vmax.f32 %v1973_v44, 0.0  ;;  %v12651_v7 = vadd.f32 %v10955_v39, %v2020_v49 }
 0x3a0   : > { %v12620_v13 = vadd.f32 %v10949_v31, %v2023_v57  ;;  %v10959_v31 = vld [vmem:[%s11819_s4 + $0x60] sm:$0xff] }
 0x3a1   : > { %v12616_v21 = vadd.f32 %v10948_v47, %v2021_v20 }
 0x3a3   : > { %2060 = vadd.xlane.f32.xlu0 %v12616_v21 }
 0x3a7   : > { %2064 = vadd.xlane.f32.xlu0 %v12620_v13 }
 0x3b3   : > { %v9503_v52 = vpop.f32.mrb[8].mxu0 }
 0x3b4   : > { %v1985_v58 = vpop.f32.mrb[9].mxu0  ;;  %v1994_v8 = vadd.f32 %v9503_v52, %v12596_v0 }
 0x3b5   : > { %v9504_v14 = vpop.f32.mrb[10].mxu0  ;;  %v1986_v33 = vadd.f32 %v12596_v0, %v1985_v58  ;;  %v10960_v58 = vld [vmem:[%s11819_s4 + $0x70] sm:$0xff]  ;;  %s11386_s4 = smov 337  }
 0x3b6   : > { %v1988_v50 = vpop.f32.mrb[11].mxu0  ;;  %v1997_v61 = vadd.f32 %v9504_v14, %v12596_v0  ;;  %v2026_v32 = vmax.f32 %v1994_v8, 0.0 }
 0x3b7   : > { %v1989_v18 = vadd.f32 %v12596_v0, %v1988_v50  ;;  %v2024_v29 = vmax.f32 %v1986_v33, 0.0 }
 0x3b8   : > { %v2027_v54 = vmax.f32 %v1997_v61, 0.0  ;;  %v12666_v44 = vadd.f32 %v10958_v9, %v2026_v32 }
 0x3b9   : > { %v2025_v48 = vmax.f32 %v1989_v18, 0.0  ;;  %v12661_v4 = vadd.f32 %v10957_v38, %v2024_v29 }
 0x3ba   : > { %v12630_v1 = vadd.f32 %v10951_v17, %v2027_v54  ;;  %17913 = vst [vmem:[#allocation46_spill] sm:$0xff] %v12666_v44 }
 0x3bb   : > { %v12626_v40 = vadd.f32 %v10950_v12, %v2025_v48  ;;  %17912 = vst [vmem:[#allocation45_spill] sm:$0xff] %v12661_v4 }
 0x3bc   : > { %17909 = vst [vmem:[#allocation42_spill] sm:$0xff] %v12630_v1 }
 0x3bd   : > { %17908 = vst [vmem:[#allocation41_spill] sm:$0xff] %v12626_v40  ;;  %2068 = vadd.xlane.f32.xlu0 %v12626_v40 }
 0x3c1   : > { %2072 = vadd.xlane.f32.xlu0 %v12630_v1 }
 0x3cb   : > { %v9507_v19 = vpop.f32.mrb[12].mxu0 }
 0x3cc   : > { %v2001_v23 = vpop.f32.mrb[13].mxu0  ;;  %v2010_v20 = vadd.f32 %v9507_v19, %v12596_v0 }
 0x3cd   : > { %v9508_v41 = vpop.f32.mrb[14].mxu0  ;;  %v2002_v45 = vadd.f32 %v12596_v0, %v2001_v23 }
 0x3ce   : > { %v2013_v26 = vadd.f32 %v9508_v41, %v12596_v0  ;;  %v2004_v15 = vpop.f32.mrb[15].mxu0  ;;  %v2030_v47 = vmax.f32 %v2010_v20, 0.0 }
 0x3cf   : > { %v2005_v24 = vadd.f32 %v12596_v0, %v2004_v15  ;;  %v2028_v57 = vmax.f32 %v2002_v45, 0.0 }
 0x3d0   : > { %v2031_v30 = vmax.f32 %v2013_v26, 0.0  ;;  %v12675_v14 = vadd.f32 %v10960_v58, %v2030_v47 }
 0x3d1   : > { %v2029_v63 = vmax.f32 %v2005_v24, 0.0  ;;  %v12671_v52 = vadd.f32 %v10959_v31, %v2028_v57 }
 0x3d2   : > { %v12638_v36 = vadd.f32 %v10952_v35, %v2031_v30  ;;  %17915 = vst [vmem:[#allocation48_spill] sm:$0xff] %v12675_v14 }
 0x3d3   : > { %v12641_v25 = vadd.f32 %v10953_v27, %v2029_v63  ;;  %17914 = vst [vmem:[#allocation47_spill] sm:$0xff] %v12671_v52 }
 0x3d4   : > { %17910 = vst [vmem:[#allocation43_spill] sm:$0xff] %v12638_v36  ;;  %2080 = vadd.xlane.f32.xlu1 %v12638_v36 }
 0x3d5   : > { %17911 = vst [vmem:[#allocation44_spill] sm:$0xff] %v12641_v25  ;;  %2076 = vadd.xlane.f32.xlu0 %v12641_v25 }
 0x3d8   : > { %2054 = vadd.xlane.f32.xlu1 %v12646_v6 }
 0x3dc   : > { %2058 = vadd.xlane.f32.xlu1 %v12651_v7 }
 0x3e0   : > { %2062 = vadd.xlane.f32.xlu1 %v12656_v16 }
 0x3e4   : > { %2066 = vadd.xlane.f32.xlu1 %v12661_v4 }
 0x3e8   : > { %2070 = vadd.xlane.f32.xlu1 %v12666_v44 }
 0x3ec   : > { %2074 = vadd.xlane.f32.xlu1 %v12671_v52 }
 0x3f0   : > { %2078 = vadd.xlane.f32.xlu1 %v12675_v14 }
 0x416   : > { %v2051_v50 = vpop.xlane.xlu0 %2050 }
 0x417   : > { %v2082_v61 = vmul.f32 0.0078125, %v2051_v50 }
 0x419   : > { %v12679_v18 = vsub.f32 %v12601_v22, %v2082_v61 }
 0x41a   : > { %v2053_v0 = vpop.xlane.xlu0 %2052 }
 0x41b   : > { %v2083_v48 = vmul.f32 0.0078125, %v2053_v0  ;;  %v2114_v54 = vmul.f32 %v12679_v18, %v12679_v18 }
 0x41d   : > { %2130 = vadd.xlane.f32.xlu0 %v2114_v54  ;;  %v12684_v12 = vsub.f32 %v12606_v55, %v2083_v48 }
 0x41e   : > { %v2057_v17 = vpop.xlane.xlu0 %2056 }
 0x41f   : > { %v2085_v19 = vmul.f32 0.0078125, %v2057_v17  ;;  %v2115_v23 = vmul.f32 %v12684_v12, %v12684_v12 }
 0x421   : > { %2132 = vadd.xlane.f32.xlu0 %v2115_v23  ;;  %v12689_v41 = vsub.f32 %v12610_v37, %v2085_v19 }
 0x423   : > { %v2117_v28 = vmul.f32 %v12689_v41, %v12689_v41 }
 0x425   : > { %2136 = vadd.xlane.f32.xlu0 %v2117_v28 }
 0x430   : > { %v2061_v26 = vpop.xlane.xlu0 %2060 }
 0x431   : > { %v2087_v15 = vmul.f32 0.0078125, %v2061_v26 }
 0x433   : > { %v12694_v24 = vsub.f32 %v12616_v21, %v2087_v15 }
 0x434   : > { %v2065_v30 = vpop.xlane.xlu0 %2064 }
 0x435   : > { %v2089_v63 = vmul.f32 0.0078125, %v2065_v30  ;;  %v2119_v11 = vmul.f32 %v12694_v24, %v12694_v24 }
 0x437   : > { %2140 = vadd.xlane.f32.xlu0 %v2119_v11  ;;  %v12699_v43 = vsub.f32 %v12620_v13, %v2089_v63 }
 0x439   : > { %v2121_v35 = vmul.f32 %v12699_v43, %v12699_v43 }
 0x43b   : > { %2144 = vadd.xlane.f32.xlu0 %v2121_v35 }
 0x44a   : > { %v2069_v27 = vpop.xlane.xlu0 %2068 }
 0x44b   : > { %v2091_v5 = vmul.f32 0.0078125, %v2069_v27 }
 0x44d   : > { %v12704_v42 = vsub.f32 %v12626_v40, %v2091_v5 }
 0x44e   : > { %v2073_v49 = vpop.xlane.xlu0 %2072 }
 0x44f   : > { %v2093_v60 = vmul.f32 0.0078125, %v2073_v49  ;;  %v2123_v39 = vmul.f32 %v12704_v42, %v12704_v42 }
 0x451   : > { %2148 = vadd.xlane.f32.xlu0 %v2123_v39  ;;  %v12709_v33 = vsub.f32 %v12630_v1, %v2093_v60 }
 0x453   : > { %v2125_v53 = vmul.f32 %v12709_v33, %v12709_v33 }
 0x455   : > { %2152 = vadd.xlane.f32.xlu0 %v2125_v53 }
 0x461   : > { %v2081_v8 = vpop.xlane.xlu1 %2080 }
 0x462   : > { %v2097_v29 = vmul.f32 0.0078125, %v2081_v8  ;;  %v2077_v32 = vpop.xlane.xlu0 %2076 }
 0x463   : > { %v2095_v38 = vmul.f32 0.0078125, %v2077_v32 }
 0x464   : > { %v12714_v45 = vsub.f32 %v12638_v36, %v2097_v29 }
 0x465   : > { %v2055_v9 = vpop.xlane.xlu1 %2054  ;;  %v12717_v20 = vsub.f32 %v12641_v25, %v2095_v38 }
 0x466   : > { %v2084_v57 = vmul.f32 0.0078125, %v2055_v9  ;;  %v2129_v47 = vmul.f32 %v12714_v45, %v12714_v45  ;;  %v10457_v9 = vld [vmem:[#allocation5 + $0x40] sm:$0xff]  }
 0x467   : > { %v2127_v31 = vmul.f32 %v12717_v20, %v12717_v20  ;;  %9509 = vmatprep.subr.bf16.mxu1 %v10457_v9 }
 0x468   : > { %2160 = vadd.xlane.f32.xlu1 %v2129_v47  ;;  %v12724_v58 = vsub.f32 %v12646_v6, %v2084_v57  ;;  %9510 = vmatpush3.bf16.msra.mxu1 %v10457_v9  ;;  %v10458_v57 = vld [vmem:[#allocation5 + $0x48] sm:$0xff]   ;;  %v10459_v47 = vld [vmem:[#allocation5 + $0x50] sm:$0xff]  }
 0x469   : > { %v2059_v50 = vpop.xlane.xlu1 %2058  ;;  %2156 = vadd.xlane.f32.xlu0 %v2127_v31  ;;  %9511 = vmatprep.subr.bf16.mxu1 %v10458_v57  ;;  %v10460_v31 = vld [vmem:[#allocation5 + $0x58] sm:$0xff]  }
 0x46a   : > { %v2086_v61 = vmul.f32 0.0078125, %v2059_v50  ;;  %v2116_v0 = vmul.f32 %v12724_v58, %v12724_v58  ;;  %v10461_v50 = vld [vmem:[#allocation5 + $0x60] sm:$0xff]  }
 0x46c   : > { %2134 = vadd.xlane.f32.xlu1 %v2116_v0  ;;  %v12729_v48 = vsub.f32 %v12651_v7, %v2086_v61  ;;  %9512 = vmatpush3.bf16.msra.mxu1 %v10458_v57  ;;  %v10462_v61 = vld [vmem:[#allocation5 + $0x68] sm:$0xff]   ;;  %v10463_v0 = vld [vmem:[#allocation5 + $0x70] sm:$0xff]  }
 0x46d   : > { %v2063_v54 = vpop.xlane.xlu1 %2062  ;;  %9513 = vmatprep.subr.bf16.mxu1 %v10459_v47 }
 0x46e   : > { %v2088_v17 = vmul.f32 0.0078125, %v2063_v54  ;;  %v2118_v19 = vmul.f32 %v12729_v48, %v12729_v48  ;;  %v10464_v54 = vld [vmem:[#allocation5 + $0x78] sm:$0xff]  }
 0x470   : > { %2138 = vadd.xlane.f32.xlu1 %v2118_v19  ;;  %v12734_v23 = vsub.f32 %v12656_v16, %v2088_v17  ;;  %9514 = vmatpush3.bf16.msra.mxu1 %v10459_v47 }
 0x471   : > { %v2067_v28 = vpop.xlane.xlu1 %2066  ;;  %9515 = vmatprep.subr.bf16.mxu1 %v10460_v31 }
 0x472   : > { %v2090_v26 = vmul.f32 0.0078125, %v2067_v28  ;;  %v2120_v15 = vmul.f32 %v12734_v23, %v12734_v23 }
 0x474   : > { %2142 = vadd.xlane.f32.xlu1 %v2120_v15  ;;  %v12739_v30 = vsub.f32 %v12661_v4, %v2090_v26  ;;  %9516 = vmatpush3.bf16.msra.mxu1 %v10460_v31 }
 0x475   : > { %v2071_v63 = vpop.xlane.xlu1 %2070  ;;  %9517 = vmatprep.subr.bf16.mxu1 %v10461_v50 }
 0x476   : > { %v2092_v11 = vmul.f32 0.0078125, %v2071_v63  ;;  %v2122_v35 = vmul.f32 %v12739_v30, %v12739_v30 }
 0x478   : > { %2146 = vadd.xlane.f32.xlu1 %v2122_v35  ;;  %v12744_v27 = vsub.f32 %v12666_v44, %v2092_v11  ;;  %9518 = vmatpush3.bf16.msra.mxu1 %v10461_v50  ;;  %v12760_v50 = vld [vmem:[#allocation2 + $0x2] ss:$0 sm:$0xff] }
 0x479   : > { %v2075_v5 = vpop.xlane.xlu1 %2074  ;;  %9519 = vmatprep.subr.bf16.mxu1 %v10462_v61 }
 0x47a   : > { %v2094_v49 = vmul.f32 0.0078125, %v2075_v5  ;;  %v2124_v60 = vmul.f32 %v12744_v27, %v12744_v27 }
 0x47c   : > { %2150 = vadd.xlane.f32.xlu1 %v2124_v60  ;;  %v12749_v39 = vsub.f32 %v12671_v52, %v2094_v49  ;;  %9520 = vmatpush3.bf16.msra.mxu1 %v10462_v61 }
 0x47d   : > { %v2079_v53 = vpop.xlane.xlu1 %2078  ;;  %9521 = vmatprep.subr.bf16.mxu1 %v10463_v0 }
 0x47e   : > { %v2096_v8 = vmul.f32 0.0078125, %v2079_v53  ;;  %v2126_v29 = vmul.f32 %v12749_v39, %v12749_v39 }
 0x480   : > { %2154 = vadd.xlane.f32.xlu1 %v2126_v29  ;;  %v12754_v32 = vsub.f32 %v12675_v14, %v2096_v8  ;;  %9522 = vmatpush3.bf16.msra.mxu1 %v10463_v0 }
 0x481   : > { %9523 = vmatprep.subr.bf16.mxu1 %v10464_v54 }
 0x482   : > { %v2128_v38 = vmul.f32 %v12754_v32, %v12754_v32 }
 0x484   : > { %2158 = vadd.xlane.f32.xlu1 %v2128_v38  ;;  %9524 = vmatpush3.bf16.msra.mxu1 %v10464_v54 }
 0x4aa   : > { %v2131_v17 = vpop.xlane.xlu0 %2130 }
 0x4ab   : > { %v2162_v15 = vmul.f32 0.0078125, %v2131_v17 }
 0x4ad   : > { %v2178_v11 = vadd.f32 1e-05, %v2162_v15 }
 0x4ae   : > { %v2133_v19 = vpop.xlane.xlu0 %2132 }
 0x4af   : > { %v2163_v28 = vmul.f32 0.0078125, %v2133_v19 }
 0x4b1   : > { %v2179_v63 = vadd.f32 1e-05, %v2163_v28 }
 0x4b2   : > { %v2137_v26 = vpop.xlane.xlu0 %2136 }
 0x4b3   : > { %10561 = vrsqrt.f32 %v2179_v63  ;;  %v2165_v49 = vmul.f32 0.0078125, %v2137_v26  ;;  %v12764_v26 = vld [vmem:[#allocation2 + $0x3] ss:$0 sm:$0xff] }
 0x4b4   : > { %10563 = vrsqrt.f32 %v2178_v11 }
 0x4b5   : > { %v2181_v53 = vadd.f32 1e-05, %v2165_v49  ;;  %v9025_v49 = vld [vmem:[%s17491_s3 + $0x8] sm:$0x7f] }
 0x4b7   : > { %10565 = vrsqrt.f32 %v2181_v53 }
 0x4bd   : > { %v10562_v60 = vpop.eup %10561 }
 0x4be   : > { %v10564_v38 = vpop.eup %10563  ;;  %v2211_v9 = vmul.f32 %v10562_v60, %v12684_v12 }
 0x4bf   : > { %v2210_v47 = vmul.f32 %v10564_v38, %v12679_v18  ;;  %v12784_v38 = vrot.slane %v9025_v49, %v11940_v59 }
 0x4c0   : > { %v2231_v54 = vmul.f32 %v12760_v50, %v2211_v9 }
 0x4c1   : > { %v2230_v19 = vmul.f32 %v12760_v50, %v2210_v47  ;;  %v10566_v11 = vpop.eup %10565  ;;  %v12799_v47 = vrot.slane %v9025_v49, %v11932_v56 }
 0x4c2   : > { %v12767_v12 = vadd.f32 %v12764_v26, %v2231_v54  ;;  %v2213_v60 = vmul.f32 %v10566_v11, %v12689_v41 }
 0x4c3   : > { %v12770_v18 = vadd.f32 %v12764_v26, %v2230_v19 }
 0x4c4   : > { %v2141_v35 = vpop.xlane.xlu0 %2140  ;;  %v2233_v54 = vmul.f32 %v12760_v50, %v2213_v60  ;;  %v17537_v19 = vrot.slane %v12767_v12, 1  ;;  %v17929_v4 = vrot.slane %v12767_v12, 6 }
 0x4c5   : > { %v2167_v8 = vmul.f32 0.0078125, %v2141_v35  ;;  %v17525_v35 = vrot.slane %v12767_v12, 5  ;;  %v17527_v53 = vrot.slane %v12770_v18, 5  ;;  %v17536_v60 = vrot.slane %v12770_v18, 1 }
 0x4c7   : > { %v2183_v31 = vadd.f32 1e-05, %v2167_v8  ;;  %v17526_v8 = vrot.slane %v12770_v18, 6 }
 0x4c8   : > { %v2145_v5 = vpop.xlane.xlu0 %2144 }
 0x4c9   : > { %v2169_v57 = vmul.f32 0.0078125, %v2145_v5  ;;  %10567 = vrsqrt.f32 %v2183_v31  ;;  %v17524_v5 = vrot.slane %v12767_v12, 6  ;;  %v17528_v31 = vrot.slane %v12767_v12, 7 }
 0x4cb   : > { %v2185_v17 = vadd.f32 1e-05, %v2169_v57  ;;  %v2298_v57 = vsel %vm1296_vm0, %v17527_v53, %v17525_v35  ;;  %v2382_v41 = vsel %vm1381_vm2, %v17526_v8, %v17524_v5  ;;  %v12818_v35 = vmul.f32 %v12799_v47, %v12770_v18 }
 0x4cc   : > { %v2405_v11 = vmul.f32 %v12784_v38, %v2382_v41  ;;  %v12823_v8 = vrot.slane %v9025_v49, %v1723_v3  ;;  %v12839_v5 = vadd.f32 %v12764_v26, %v2233_v54  ;;  %v17916_v3 = vrot.slane %v12767_v12, 2 }
 0x4cd   : > { %10569 = vrsqrt.f32 %v2185_v17  ;;  %v17529_v17 = vrot.slane %v12770_v18, 7  ;;  %v17917_v54 = vrot.slane %v12770_v18, 2 }
 0x4cf   : > { %v2466_v41 = vsel %vm1466_vm4, %v17529_v17, %v17528_v31 }
 0x4d3   : > { %v10568_v9 = vpop.eup %10567 }
 0x4de   : > { %v2149_v29 = vpop.xlane.xlu0 %2148 }
 0x4df   : > { %v2171_v61 = vmul.f32 0.0078125, %v2149_v29  ;;  %v12781_v29 = vrot.slane %v9025_v49, %v11929_v51 }
 0x4e1   : > { %v2187_v15 = vadd.f32 1e-05, %v2171_v61  ;;  %v12803_v61 = vrot.slane %v9025_v49, %v11943_v62 }
 0x4e2   : > { %v2153_v0 = vpop.xlane.xlu0 %2152 }
 0x4e3   : > { %v2173_v28 = vmul.f32 0.0078125, %v2153_v0  ;;  %10571 = vrsqrt.f32 %v2187_v15  ;;  %v10570_v0 = vpop.eup %10569  ;;  %v2215_v15 = vmul.f32 %v10568_v9, %v12694_v24  ;;  %v2489_v51 = vmul.f32 %v12803_v61, %v2466_v41 }
 0x4e4   : > { %v2217_v9 = vmul.f32 %v10570_v0, %v12699_v43  ;;  %v2602_v43 = vsel %vm1603_vm6, %v17536_v60, %v17537_v19  ;;  %v17539_v0 = vrot.slane %v12770_v18, 3  ;;  %v2541_v60 = vmul.f32 %v12799_v47, %v12767_v12 }
 0x4e5   : > { %v2189_v63 = vadd.f32 1e-05, %v2173_v28  ;;  %v12810_v28 = vrot.slane %v9025_v49, %v1638_v2  ;;  %v12827_v2 = vrot.slane %v9025_v49, %v1808_v10  ;;  %v2235_v31 = vmul.f32 %v12760_v50, %v2215_v15 }
 0x4e6   : > { %v2237_v15 = vmul.f32 %v12760_v50, %v2217_v9  ;;  %v17918_v19 = vrot.slane %v12767_v12, 3 }
 0x4e7   : > { %10573 = vrsqrt.f32 %v2189_v63  ;;  %v2321_v63 = vmul.f32 %v12781_v29, %v2298_v57 }
 0x4e9   : > { %v2421_v53 = vadd.f32 %v2405_v11, %v2321_v63  ;;  %v12861_v11 = vmul.f32 %v12810_v28, %v2602_v43 }
 0x4ed   : > { %v10572_v24 = vpop.eup %10571 }
 0x4ee   : > { %v2219_v62 = vmul.f32 %v10572_v24, %v12704_v42  ;;  %v2770_v42 = vsel %vm1773_vm8, %v17539_v0, %v17918_v19  ;;  %v12883_v19 = vadd.f32 %v12764_v26, %v2237_v15 }
 0x4ef   : > { %v12879_v36 = vmul.f32 %v12827_v2, %v2770_v42 }
 0x4f0   : > { %v2239_v43 = vmul.f32 %v12760_v50, %v2219_v62  ;;  %v12917_v15 = vmul.f32 %v12799_v47, %v12883_v19 }
 0x4f1   : > { %v10574_v56 = vpop.eup %10573 }
 0x4f2   : > { %v2221_v9 = vmul.f32 %v10574_v56, %v12709_v33 }
 0x4f5   : > { %v2161_v57 = vpop.xlane.xlu1 %2160 }
 0x4f6   : > { %v2177_v10 = vmul.f32 0.0078125, %v2161_v57  ;;  %v2157_v49 = vpop.xlane.xlu0 %2156  ;;  %v2686_v57 = vsel %vm1688_vm7, %v17917_v54, %v17916_v3 }
 0x4f7   : > { %v2175_v17 = vmul.f32 0.0078125, %v2157_v49  ;;  %v12870_v41 = vmul.f32 %v12823_v8, %v2686_v57 }
 0x4f8   : > { %v2193_v59 = vadd.f32 1e-05, %v2177_v10  ;;  %v2505_v10 = vadd.f32 %v2489_v51, %v2421_v53  ;;  %v2241_v53 = vmul.f32 %v12760_v50, %v2221_v9 }
 0x4f9   : > { %v2191_v49 = vadd.f32 1e-05, %v2175_v17  ;;  %v2135_v63 = vpop.xlane.xlu1 %2134  ;;  %v12874_v17 = vadd.f32 %v12764_v26, %v2235_v31  ;;  %v12888_v31 = vmul.f32 %v12799_v47, %v12839_v5 }
 0x4fa   : > { %10575 = vrsqrt.f32 %v2193_v59  ;;  %v2164_v24 = vmul.f32 0.0078125, %v2135_v63  ;;  %v12913_v63 = vadd.f32 %v12764_v26, %v2241_v53 }
 0x4fb   : > { %10577 = vrsqrt.f32 %v2191_v49  ;;  %v12894_v49 = vadd.f32 %v2541_v60, %v2505_v10 }
 0x4fc   : > { %v2180_v54 = vadd.f32 1e-05, %v2164_v24  ;;  %v12899_v24 = vadd.f32 %v12764_v26, %v2239_v43 }
 0x4fd   : > { %v2139_v57 = vpop.xlane.xlu1 %2138 }
 0x4fe   : > { %10579 = vrsqrt.f32 %v2180_v54  ;;  %v2166_v56 = vmul.f32 0.0078125, %v2139_v57  ;;  %v12904_v54 = vmul.f32 %v12799_v47, %v12874_v17  ;;  %v12928_v59 = vmul.f32 %v12799_v47, %v12899_v24 }
 0x500   : > { %v2182_v0 = vadd.f32 1e-05, %v2166_v56 }
 0x501   : > { %v2143_v57 = vpop.xlane.xlu1 %2142 }
 0x502   : > { %10581 = vrsqrt.f32 %v2182_v0  ;;  %v2168_v42 = vmul.f32 0.0078125, %v2143_v57 }
 0x504   : > { %v10576_v9 = vpop.eup %10575  ;;  %v2184_v62 = vadd.f32 1e-05, %v2168_v42 }
 0x505   : > { %v10578_v56 = vpop.eup %10577  ;;  %v2225_v53 = vmul.f32 %v10576_v9, %v12714_v45  ;;  %v2147_v10 = vpop.xlane.xlu1 %2146 }
 0x506   : > { %v2223_v42 = vmul.f32 %v10578_v56, %v12717_v20  ;;  %10583 = vrsqrt.f32 %v2184_v62  ;;  %v2170_v0 = vmul.f32 0.0078125, %v2147_v10  ;;  %v12941_v20 = vmul.f32 %v12799_v47, %v12913_v63 }
 0x507   : > { %v2245_v43 = vmul.f32 %v12760_v50, %v2225_v53 }
 0x508   : > { %v10580_v51 = vpop.eup %10579  ;;  %v2243_v3 = vmul.f32 %v12760_v50, %v2223_v42  ;;  %v2186_v14 = vadd.f32 1e-05, %v2170_v0  ;;  %v17919_v42 = vrot.slane %v12770_v18, 5 }
 0x509   : > { %v12944_v62 = vadd.f32 %v12764_v26, %v2245_v43  ;;  %v2212_v10 = vmul.f32 %v10580_v51, %v12724_v58  ;;  %v2151_v56 = vpop.xlane.xlu1 %2150 }
 0x50a   : > { %v12950_v45 = vadd.f32 %v12764_v26, %v2243_v3  ;;  %10585 = vrsqrt.f32 %v2186_v14  ;;  %v2172_v0 = vmul.f32 0.0078125, %v2151_v56 }
 0x50b   : > { %v2232_v60 = vmul.f32 %v12760_v50, %v2212_v10  ;;  %v17541_v33 = vrot.slane %v12944_v62, 5  ;;  %v17543_v43 = vrot.slane %v12944_v62, 6  ;;  %v17922_v25 = vrot.slane %v12944_v62, 7 }
 0x50c   : > { %v10582_v51 = vpop.eup %10581  ;;  %v2188_v57 = vadd.f32 1e-05, %v2172_v0  ;;  %v17920_v0 = vrot.slane %v12770_v18, 6 }
 0x50d   : > { %v12961_v14 = vadd.f32 %v12764_v26, %v2232_v60  ;;  %v2214_v56 = vmul.f32 %v10582_v51, %v12729_v48  ;;  %v2155_v10 = vpop.xlane.xlu1 %2154  ;;  %v2299_v58 = vsel %vm1296_vm0, %v17541_v33, %v17919_v42  ;;  %v17921_v33 = vrot.slane %v12770_v18, 7 }
 0x50e   : > { %v2383_v3 = vsel %vm1381_vm2, %v17543_v43, %v17920_v0  ;;  %10587 = vrsqrt.f32 %v2188_v57  ;;  %v2174_v60 = vmul.f32 0.0078125, %v2155_v10  ;;  %v2300_v48 = vsel %vm724_vm1, %v2299_v58, 0.0 }
 0x50f   : > { %v2384_v51 = vsel %vm772_vm3, %v2383_v3, 0.0  ;;  %v2234_v9 = vmul.f32 %v12760_v50, %v2214_v56  ;;  %v2320_v53 = vmul.f32 %v12781_v29, %v2300_v48  ;;  %v2467_v57 = vsel %vm1466_vm4, %v17922_v25, %v17921_v33 }
 0x510   : > { %v2404_v42 = vmul.f32 %v12784_v38, %v2384_v51  ;;  %v10584_v10 = vpop.eup %10583  ;;  %v2190_v0 = vadd.f32 1e-05, %v2174_v60  ;;  %v2468_v58 = vsel %vm820_vm5, %v2467_v57, 0.0  ;;  %v2574_v3 = vrot.slane %v12961_v14, 1 }
 0x511   : > { %v17548_v56 = vrot.slane %v12961_v14, 2  ;;  %v12994_v48 = vadd.f32 %v12764_v26, %v2234_v9  ;;  %v2216_v51 = vmul.f32 %v10584_v10, %v12734_v23  ;;  %v2159_v43 = vpop.xlane.xlu1 %2158  ;;  %v2488_v1 = vmul.f32 %v12803_v61, %v2468_v58 }
 0x512   : > { %v2420_v52 = vadd.f32 %v2404_v42, %v2320_v53  ;;  %10589 = vrsqrt.f32 %v2190_v0  ;;  %v2176_v25 = vmul.f32 0.0078125, %v2159_v43  ;;  %v17923_v33 = vrot.slane %v12767_v12, 1 }
 0x513   : > { %v17924_v57 = vrot.slane %v12767_v12, 2  ;;  %v2236_v23 = vmul.f32 %v12760_v50, %v2216_v51  ;;  %v2742_v58 = vrot.slane %v12961_v14, 3  ;;  %v2354_v44 = vrot.slane %v12961_v14, 6 }
 0x514   : > { %v2601_v60 = vsel %vm1603_vm6, %v17923_v33, %v2574_v3  ;;  %v2504_v10 = vadd.f32 %v2488_v1, %v2420_v52  ;;  %v10586_v43 = vpop.eup %10585  ;;  %v2192_v0 = vadd.f32 1e-05, %v2176_v25  ;;  %v2270_v33 = vrot.slane %v12961_v14, 5 }
 0x515   : > { %v2685_v9 = vsel %vm1688_vm7, %v17924_v57, %v17548_v56  ;;  %v2625_v53 = vmul.f32 %v12810_v28, %v2601_v60  ;;  %v13015_v40 = vadd.f32 %v12764_v26, %v2236_v23  ;;  %v2218_v57 = vmul.f32 %v10586_v43, %v12739_v30 }
 0x516   : > { %v2709_v42 = vmul.f32 %v12823_v8, %v2685_v9  ;;  %v2556_v51 = vadd.f32 %v12818_v35, %v2504_v10  ;;  %10591 = vrsqrt.f32 %v2192_v0  ;;  %v17925_v52 = vrot.slane %v12767_v12, 3 }
 0x517   : > { %v2641_v1 = vadd.f32 %v2625_v53, %v12894_v49  ;;  %v17926_v60 = vrot.slane %v12839_v5, 5  ;;  %v17927_v23 = vrot.slane %v12767_v12, 5  ;;  %v2238_v35 = vmul.f32 %v12760_v50, %v2218_v57 }
 0x518   : > { %v2769_v25 = vsel %vm1773_vm8, %v17925_v52, %v2742_v58  ;;  %v2640_v49 = vadd.f32 %v12861_v11, %v2556_v51  ;;  %v10588_v43 = vpop.eup %10587  ;;  %v17928_v56 = vrot.slane %v12839_v5, 6 }
 0x519   : > { %v2296_v9 = vsel %vm1296_vm0, %v2270_v33, %v17926_v60  ;;  %v2297_v30 = vsel %vm1296_vm0, %v17927_v23, %v2270_v33  ;;  %v2725_v10 = vadd.f32 %v2709_v42, %v2641_v1  ;;  %v2793_v53 = vmul.f32 %v12827_v2, %v2769_v25 }
 0x51a   : > { %v2322_v0 = vmul.f32 %v12781_v29, %v2297_v30  ;;  %v2323_v52 = vmul.f32 %v12781_v29, %v2296_v9  ;;  %v2380_v60 = vsel %vm1381_vm2, %v2354_v44, %v17928_v56  ;;  %v2381_v33 = vsel %vm1381_vm2, %v17929_v4, %v2354_v44 }
 0x51b   : > { %v13046_v11 = vadd.f32 %v12764_v26, %v2238_v35  ;;  %v2220_v42 = vmul.f32 %v10588_v43, %v12744_v27  ;;  %v2724_v57 = vadd.f32 %v12870_v41, %v2640_v49  ;;  %v2809_v51 = vadd.f32 %v2793_v53, %v2725_v10 }
 0x51c   : > { %v2406_v1 = vmul.f32 %v12784_v38, %v2381_v33  ;;  %v2407_v25 = vmul.f32 %v12784_v38, %v2380_v60  ;;  %v2438_v9 = vrot.slane %v12961_v14, 7  ;;  %v2542_v56 = vmul.f32 %v12799_v47, %v12961_v14  ;;  %v10590_v30 = vpop.eup %10589 }
 0x51d   : > { %v2240_v23 = vmul.f32 %v12760_v50, %v2220_v42  ;;  %v2808_v4 = vadd.f32 %v12879_v36, %v2724_v57  ;;  %v2576_v44 = vrot.slane %v12994_v48, 1  ;;  %v17930_v27 = vrot.slane %v12839_v5, 1 }
 0x51e   : > { %v2422_v35 = vadd.f32 %v2406_v1, %v2322_v0  ;;  %v2423_v49 = vadd.f32 %v2407_v25, %v2323_v52  ;;  %v17931_v10 = vrot.slane %v12839_v5, 7  ;;  %v17932_v43 = vrot.slane %v12767_v12, 7 }
 0x51f   : > { %v2600_v41 = vsel %vm1603_vm6, %v2574_v3, %v17930_v27  ;;  %v13071_v60 = vadd.f32 %v12764_v26, %v2240_v23  ;;  %v2222_v33 = vmul.f32 %v10590_v30, %v12749_v39  ;;  %v2824_v42 = vpack.c.bf16 %v2809_v51, %v2808_v4 }
 0x520   : > { %v2464_v53 = vsel %vm1466_vm4, %v2438_v9, %v17931_v10  ;;  %v2465_v36 = vsel %vm1466_vm4, %v17932_v43, %v2438_v9  ;;  %v17933_v52 = vmov %v17930_v27  ;;  %v2626_v57 = vmul.f32 %v12810_v28, %v2600_v41  ;;  %v10592_v27 = vpop.eup %10591 }
 0x521   : > { %v2490_v3 = vmul.f32 %v12803_v61, %v2465_v36  ;;  %v2491_v0 = vmul.f32 %v12803_v61, %v2464_v53  ;;  %v2599_v12 = vsel %vm1603_vm6, %v17933_v52, %v2576_v44  ;;  %v2660_v1 = vrot.slane %v12994_v48, 2  ;;  %9525 = vmatprep.mubr.bf16.mxu1 %v2824_v42 }
 0x522   : > { %v2242_v25 = vmul.f32 %v12760_v50, %v2222_v33  ;;  %v2627_v51 = vmul.f32 %v12810_v28, %v2599_v12  ;;  %v17934_v9 = vrot.slane %v12839_v5, 2  ;;  %v17935_v23 = vrot.slane %v12961_v14, 2 }
 0x523   : > { %v2506_v39 = vadd.f32 %v2490_v3, %v2422_v35  ;;  %v2507_v30 = vadd.f32 %v2491_v0, %v2423_v49  ;;  %v2744_v35 = vrot.slane %v12994_v48, 3  ;;  %v2224_v36 = vmul.f32 %v10592_v27, %v12754_v32 }
 0x524   : > { %v2684_v4 = vsel %vm1688_vm7, %v17935_v23, %v17934_v9  ;;  %v17936_v10 = vmov %v17934_v9  ;;  %v13099_v43 = vadd.f32 %v12764_v26, %v2242_v25  ;;  %v17937_v49 = vrot.slane %v12839_v5, 3 }
 0x525   : > { %v2683_v41 = vsel %vm1688_vm7, %v17936_v10, %v2660_v1  ;;  %v2710_v53 = vmul.f32 %v12823_v8, %v2684_v4  ;;  %v2558_v14 = vadd.f32 %v2542_v56, %v2506_v39  ;;  %v2559_v42 = vadd.f32 %v12888_v31, %v2507_v30 }
 0x526   : > { %v2711_v33 = vmul.f32 %v12823_v8, %v2683_v41  ;;  %v2767_v3 = vsel %vm1773_vm8, %v17937_v49, %v2744_v35  ;;  %v17938_v0 = vmov %v17937_v49  ;;  %v2272_v12 = vrot.slane %v12994_v48, 5 }
 0x527   : > { %v2768_v52 = vsel %vm1773_vm8, %v2742_v58, %v17938_v0  ;;  %v2244_v25 = vmul.f32 %v12760_v50, %v2224_v36  ;;  %v2642_v32 = vadd.f32 %v2626_v57, %v2558_v14  ;;  %v2795_v39 = vmul.f32 %v12827_v2, %v2767_v3 }
 0x528   : > { %v2794_v56 = vmul.f32 %v12827_v2, %v2768_v52  ;;  %v2643_v31 = vadd.f32 %v2627_v51, %v2559_v42  ;;  %v17939_v9 = vrot.slane %v12874_v17, 5  ;;  %v17940_v4 = vrot.slane %v12839_v5, 5 }
 0x529   : > { %v2356_v27 = vrot.slane %v12994_v48, 6  ;;  %v13126_v50 = vadd.f32 %v12764_v26, %v2244_v25  ;;  %v2726_v57 = vadd.f32 %v2710_v53, %v2642_v32  ;;  %v17941_v41 = vrot.slane %v12874_v17, 6 }
 0x52a   : > { %v2294_v23 = vsel %vm1296_vm0, %v2272_v12, %v17939_v9  ;;  %v2295_v58 = vsel %vm1296_vm0, %v17940_v4, %v2272_v12  ;;  %v2727_v10 = vadd.f32 %v2711_v33, %v2643_v31  ;;  %v17942_v14 = vrot.slane %v12839_v5, 6 }
 0x52b   : > { %v2324_v30 = vmul.f32 %v12781_v29, %v2295_v58  ;;  %v2325_v51 = vmul.f32 %v12781_v29, %v2294_v23  ;;  %v2378_v36 = vsel %vm1381_vm2, %v2356_v27, %v17941_v41  ;;  %v2440_v49 = vrot.slane %v12994_v48, 7 }
 0x52c   : > { %v2379_v42 = vsel %vm1381_vm2, %v17942_v14, %v2356_v27  ;;  %v2810_v26 = vadd.f32 %v2794_v56, %v2726_v57  ;;  %v2409_v3 = vmul.f32 %v12784_v38, %v2378_v36  ;;  %v2544_v33 = vmul.f32 %v12799_v47, %v12994_v48 }
 0x52d   : > { %v2408_v53 = vmul.f32 %v12784_v38, %v2379_v42  ;;  %v2811_v0 = vadd.f32 %v2795_v39, %v2727_v10  ;;  %v17943_v52 = vrot.slane %v12874_v17, 7  ;;  %v17944_v25 = vrot.slane %v12839_v5, 7 }
 0x52e   : > { %v2578_v56 = vrot.slane %v13015_v40, 1  ;;  %v2425_v9 = vadd.f32 %v2409_v3, %v2325_v51  ;;  %v17945_v39 = vrot.slane %v12874_v17, 1  ;;  %v17947_v14 = vrot.slane %v12874_v17, 2 }
 0x52f   : > { %v2462_v12 = vsel %vm1466_vm4, %v2440_v49, %v17943_v52  ;;  %v2463_v32 = vsel %vm1466_vm4, %v17944_v25, %v2440_v49  ;;  %v2424_v31 = vadd.f32 %v2408_v53, %v2324_v30  ;;  %v2825_v58 = vpack.c.bf16 %v2811_v0, %v2810_v26 }
 0x530   : > { %v2492_v23 = vmul.f32 %v12803_v61, %v2463_v32  ;;  %v2493_v4 = vmul.f32 %v12803_v61, %v2462_v12  ;;  %v2597_v27 = vsel %vm1603_vm6, %v17945_v39, %v2578_v56  ;;  %v17946_v57 = vmov %v17945_v39 }
 0x531   : > { %v2598_v5 = vsel %vm1603_vm6, %v2576_v44, %v17946_v57  ;;  %v2662_v30 = vrot.slane %v13015_v40, 2  ;;  %v2629_v36 = vmul.f32 %v12810_v28, %v2597_v27  ;;  %9526 = vmatmul.mubr.bf16.vlgmr.msra.gmra.mrb[0].mxu1 %v2825_v58  ;;  %v17948_v49 = vmov %v17947_v14 }
 0x532   : > { %v2508_v51 = vadd.f32 %v2492_v23, %v2424_v31  ;;  %v2509_v10 = vadd.f32 %v2493_v4, %v2425_v9  ;;  %v2628_v41 = vmul.f32 %v12810_v28, %v2598_v5  ;;  %v2682_v48 = vsel %vm1688_vm7, %v2660_v1, %v17948_v49 }
 0x533   : > { %v2681_v42 = vsel %vm1688_vm7, %v17947_v14, %v2662_v30  ;;  %v2746_v44 = vrot.slane %v13015_v40, 3  ;;  %v17949_v26 = vrot.slane %v12874_v17, 3  ;;  %v2712_v52 = vmul.f32 %v12823_v8, %v2682_v48 }
 0x534   : > { %v2560_v3 = vadd.f32 %v2544_v33, %v2508_v51  ;;  %v2561_v0 = vadd.f32 %v12904_v54, %v2509_v10  ;;  %v2713_v12 = vmul.f32 %v12823_v8, %v2681_v42  ;;  %v2274_v31 = vrot.slane %v13015_v40, 5 }
 0x535   : > { %v2766_v53 = vsel %vm1773_vm8, %v2744_v35, %v17949_v26  ;;  %v17950_v25 = vmov %v17949_v26  ;;  %v2358_v9 = vrot.slane %v13015_v40, 6  ;;  %v2442_v54 = vrot.slane %v13015_v40, 7 }
 0x536   : > { %v2765_v32 = vsel %vm1773_vm8, %v17950_v25, %v2746_v44  ;;  %v2796_v1 = vmul.f32 %v12827_v2, %v2766_v53  ;;  %v2644_v23 = vadd.f32 %v2628_v41, %v2560_v3  ;;  %v2645_v35 = vadd.f32 %v2629_v36, %v2561_v0 }
 0x537   : > { %v2797_v33 = vmul.f32 %v12827_v2, %v2765_v32  ;;  %v17951_v4 = vrot.slane %v12883_v19, 5  ;;  %v17952_v39 = vrot.slane %v12874_v17, 5  ;;  %v17953_v57 = vrot.slane %v12883_v19, 6 }
 0x538   : > { %v17954_v51 = vrot.slane %v12874_v17, 6  ;;  %v2728_v41 = vadd.f32 %v2712_v52, %v2644_v23  ;;  %v2729_v36 = vadd.f32 %v2713_v12, %v2645_v35  ;;  %v17955_v26 = vrot.slane %v12883_v19, 7 }
 0x539   : > { %v2292_v58 = vsel %vm1296_vm0, %v2274_v31, %v17951_v4  ;;  %v2293_v27 = vsel %vm1296_vm0, %v17952_v39, %v2274_v31  ;;  %v2376_v5 = vsel %vm1381_vm2, %v2358_v9, %v17953_v57  ;;  %v17956_v3 = vrot.slane %v12874_v17, 7 }
 0x53a   : > { %v2377_v10 = vsel %vm1381_vm2, %v17954_v51, %v2358_v9  ;;  %v2326_v14 = vmul.f32 %v12781_v29, %v2293_v27  ;;  %v2327_v42 = vmul.f32 %v12781_v29, %v2292_v58  ;;  %v2411_v48 = vmul.f32 %v12784_v38, %v2376_v5 }
 0x53b   : > { %v2410_v49 = vmul.f32 %v12784_v38, %v2377_v10  ;;  %v2460_v53 = vsel %vm1466_vm4, %v2442_v54, %v17955_v26  ;;  %v2461_v0 = vsel %vm1466_vm4, %v17956_v3, %v2442_v54  ;;  %v2812_v52 = vadd.f32 %v2796_v1, %v2728_v41 }
 0x53c   : > { %v2813_v12 = vadd.f32 %v2797_v33, %v2729_v36  ;;  %v2494_v25 = vmul.f32 %v12803_v61, %v2461_v0  ;;  %v2495_v32 = vmul.f32 %v12803_v61, %v2460_v53  ;;  %v2427_v9 = vadd.f32 %v2411_v48, %v2327_v42 }
 0x53d   : > { %v2426_v31 = vadd.f32 %v2410_v49, %v2326_v14  ;;  %v2546_v23 = vmul.f32 %v12799_v47, %v13015_v40  ;;  %v2580_v35 = vrot.slane %v13046_v11, 1  ;;  %v17957_v58 = vrot.slane %v12883_v19, 1 }
 0x53e   : > { %v2826_v4 = vpack.c.bf16 %v2813_v12, %v2812_v52  ;;  %v2664_v1 = vrot.slane %v13046_v11, 2  ;;  %v17958_v33 = vrot.slane %v12883_v19, 2  ;;  %v2511_v27 = vadd.f32 %v2495_v32, %v2427_v9 }
 0x53f   : > { %v2596_v17 = vsel %vm1603_vm6, %v2578_v56, %v17957_v58  ;;  %v2510_v39 = vadd.f32 %v2494_v25, %v2426_v31  ;;  %v17959_v57 = vmov %v17957_v58  ;;  %v17961_v49 = vrot.slane %v12883_v19, 3 }
 0x540   : > { %v2680_v54 = vsel %vm1688_vm7, %v2662_v30, %v17958_v33  ;;  %v2595_v40 = vsel %vm1603_vm6, %v17959_v57, %v2580_v35  ;;  %v2630_v5 = vmul.f32 %v12810_v28, %v2596_v17  ;;  %9529 = vmatprep.mubr.bf16.mxu1 %v2826_v4  ;;  %v17960_v56 = vmov %v17958_v33 }
 0x541   : > { %v2631_v51 = vmul.f32 %v12810_v28, %v2595_v40  ;;  %v2679_v10 = vsel %vm1688_vm7, %v17960_v56, %v2664_v1  ;;  %v2714_v41 = vmul.f32 %v12823_v8, %v2680_v54  ;;  %v2748_v30 = vrot.slane %v13046_v11, 3 }
 0x542   : > { %v2562_v36 = vadd.f32 %v2546_v23, %v2510_v39  ;;  %v2563_v14 = vadd.f32 %v12917_v15, %v2511_v27  ;;  %v2715_v42 = vmul.f32 %v12823_v8, %v2679_v10  ;;  %v2764_v48 = vsel %vm1773_vm8, %v2746_v44, %v17961_v49 }
 0x543   : > { %v17962_v26 = vmov %v17961_v49  ;;  %v2798_v3 = vmul.f32 %v12827_v2, %v2764_v48  ;;  %v2276_v0 = vrot.slane %v13046_v11, 5  ;;  %v2360_v52 = vrot.slane %v13046_v11, 6 }
 0x544   : > { %v2763_v53 = vsel %vm1773_vm8, %v17962_v26, %v2748_v30  ;;  %v2646_v12 = vadd.f32 %v2630_v5, %v2562_v36  ;;  %v2647_v15 = vadd.f32 %v2631_v51, %v2563_v14  ;;  %v2444_v32 = vrot.slane %v13046_v11, 7 }
 0x545   : > { %v2799_v25 = vmul.f32 %v12827_v2, %v2763_v53  ;;  %v17963_v31 = vrot.slane %v12899_v24, 5  ;;  %v17964_v9 = vrot.slane %v12883_v19, 5  ;;  %v17965_v4 = vrot.slane %v12899_v24, 6 }
 0x546   : > { %v17966_v17 = vrot.slane %v12883_v19, 6  ;;  %v2730_v54 = vadd.f32 %v2714_v41, %v2646_v12  ;;  %v2731_v39 = vadd.f32 %v2715_v42, %v2647_v15  ;;  %v17967_v51 = vrot.slane %v12899_v24, 7 }
 0x547   : > { %v2290_v44 = vsel %vm1296_vm0, %v2276_v0, %v17963_v31  ;;  %v2291_v23 = vsel %vm1296_vm0, %v17964_v9, %v2276_v0  ;;  %v2374_v58 = vsel %vm1381_vm2, %v2360_v52, %v17965_v4  ;;  %v17968_v10 = vrot.slane %v12883_v19, 7 }
 0x548   : > { %v2375_v33 = vsel %vm1381_vm2, %v17966_v17, %v2360_v52  ;;  %v2328_v27 = vmul.f32 %v12781_v29, %v2291_v23  ;;  %v2329_v57 = vmul.f32 %v12781_v29, %v2290_v44  ;;  %v2413_v5 = vmul.f32 %v12784_v38, %v2374_v58 }
 0x549   : > { %v2412_v40 = vmul.f32 %v12784_v38, %v2375_v33  ;;  %v2458_v56 = vsel %vm1466_vm4, %v2444_v32, %v17967_v51  ;;  %v2459_v36 = vsel %vm1466_vm4, %v17968_v10, %v2444_v32  ;;  %v2814_v41 = vadd.f32 %v2798_v3, %v2730_v54 }
 0x54a   : > { %v2815_v14 = vadd.f32 %v2799_v25, %v2731_v39  ;;  %v2496_v42 = vmul.f32 %v12803_v61, %v2459_v36  ;;  %v2497_v49 = vmul.f32 %v12803_v61, %v2458_v56  ;;  %v2429_v26 = vadd.f32 %v2413_v5, %v2329_v57 }
 0x54b   : > { %v2428_v48 = vadd.f32 %v2412_v40, %v2328_v27  ;;  %v2548_v53 = vmul.f32 %v12799_v47, %v13046_v11  ;;  %v2582_v0 = vrot.slane %v13071_v60, 1  ;;  %v17969_v12 = vrot.slane %v12899_v24, 1 }
 0x54c   : > { %v2827_v52 = vpack.c.bf16 %v2815_v14, %v2814_v41  ;;  %v2666_v3 = vrot.slane %v13071_v60, 2  ;;  %v17970_v15 = vrot.slane %v12899_v24, 2  ;;  %v2513_v31 = vadd.f32 %v2497_v49, %v2429_v26 }
 0x54d   : > { %v2594_v19 = vsel %vm1603_vm6, %v2580_v35, %v17969_v12  ;;  %v2512_v32 = vadd.f32 %v2496_v42, %v2428_v48  ;;  %v17971_v44 = vmov %v17969_v12  ;;  %v17973_v39 = vrot.slane %v12899_v24, 3 }
 0x54e   : > { %v2678_v25 = vsel %vm1688_vm7, %v2664_v1, %v17970_v15  ;;  %v2593_v11 = vsel %vm1603_vm6, %v17971_v44, %v2582_v0  ;;  %v2632_v9 = vmul.f32 %v12810_v28, %v2594_v19  ;;  %9530 = vmatmul.mubr.bf16.gmra.mrb[4].mxu1 %v2827_v52  ;;  %v17972_v35 = vmov %v17970_v15 }
 0x54f   : > { %v2633_v23 = vmul.f32 %v12810_v28, %v2593_v11  ;;  %v2677_v4 = vsel %vm1688_vm7, %v17972_v35, %v2666_v3  ;;  %v2716_v58 = vmul.f32 %v12823_v8, %v2678_v25  ;;  %v2750_v1 = vrot.slane %v13071_v60, 3 }
 0x550   : > { %v2564_v17 = vadd.f32 %v2548_v53, %v2512_v32  ;;  %v2565_v33 = vadd.f32 %v12928_v59, %v2513_v31  ;;  %v2717_v54 = vmul.f32 %v12823_v8, %v2677_v4  ;;  %v2762_v27 = vsel %vm1773_vm8, %v2748_v30, %v17973_v39 }
 0x551   : > { %v17974_v57 = vmov %v17973_v39  ;;  %v2800_v5 = vmul.f32 %v12827_v2, %v2762_v27  ;;  %v2278_v51 = vrot.slane %v13071_v60, 5  ;;  %v2362_v56 = vrot.slane %v13071_v60, 6 }
 0x552   : > { %v2761_v40 = vsel %vm1773_vm8, %v17974_v57, %v2750_v1  ;;  %v2648_v10 = vadd.f32 %v2632_v9, %v2564_v17  ;;  %v2649_v59 = vadd.f32 %v2633_v23, %v2565_v33  ;;  %v2446_v41 = vrot.slane %v13071_v60, 7 }
 0x553   : > { %v2801_v36 = vmul.f32 %v12827_v2, %v2761_v40  ;;  %v17975_v14 = vrot.slane %v12913_v63, 5  ;;  %v17976_v42 = vrot.slane %v12899_v24, 5  ;;  %v17977_v48 = vrot.slane %v12913_v63, 6 }
 0x554   : > { %v17978_v53 = vrot.slane %v12899_v24, 6  ;;  %v2732_v12 = vadd.f32 %v2716_v58, %v2648_v10  ;;  %v2733_v19 = vadd.f32 %v2717_v54, %v2649_v59  ;;  %v17979_v44 = vrot.slane %v12913_v63, 7 }
 0x555   : > { %v2288_v30 = vsel %vm1296_vm0, %v2278_v51, %v17975_v14  ;;  %v2289_v49 = vsel %vm1296_vm0, %v17976_v42, %v2278_v51  ;;  %v2372_v26 = vsel %vm1381_vm2, %v2362_v56, %v17977_v48  ;;  %v17980_v9 = vrot.slane %v12899_v24, 7 }
 0x556   : > { %v2373_v52 = vsel %vm1381_vm2, %v17978_v53, %v2362_v56  ;;  %v2330_v15 = vmul.f32 %v12781_v29, %v2289_v49  ;;  %v2331_v25 = vmul.f32 %v12781_v29, %v2288_v30  ;;  %v2415_v31 = vmul.f32 %v12784_v38, %v2372_v26 }
 0x557   : > { %v2414_v32 = vmul.f32 %v12784_v38, %v2373_v52  ;;  %v2456_v11 = vsel %vm1466_vm4, %v2446_v41, %v17979_v44  ;;  %v2457_v23 = vsel %vm1466_vm4, %v17980_v9, %v2446_v41  ;;  %v2816_v35 = vadd.f32 %v2800_v5, %v2732_v12 }
 0x558   : > { %v2817_v4 = vadd.f32 %v2801_v36, %v2733_v19  ;;  %v2498_v58 = vmul.f32 %v12803_v61, %v2457_v23  ;;  %v2499_v17 = vmul.f32 %v12803_v61, %v2456_v11  ;;  %v2431_v54 = vadd.f32 %v2415_v31, %v2331_v25 }
 0x559   : > { %v2430_v33 = vadd.f32 %v2414_v32, %v2330_v15  ;;  %v2550_v39 = vmul.f32 %v12799_v47, %v13071_v60  ;;  %v2584_v27 = vrot.slane %v13099_v43, 1  ;;  %v17981_v40 = vrot.slane %v12913_v63, 1 }
 0x55a   : > { %v2828_v57 = vpack.c.bf16 %v2817_v4, %v2816_v35  ;;  %v2668_v5 = vrot.slane %v13099_v43, 2  ;;  %v17982_v51 = vrot.slane %v12913_v63, 2  ;;  %v2515_v59 = vadd.f32 %v2499_v17, %v2431_v54 }
 0x55b   : > { %v2592_v24 = vsel %vm1603_vm6, %v2582_v0, %v17981_v40  ;;  %v2514_v10 = vadd.f32 %v2498_v58, %v2430_v33  ;;  %v17983_v36 = vmov %v17981_v40  ;;  %v17985_v53 = vrot.slane %v12913_v63, 3 }
 0x55c   : > { %v2676_v56 = vsel %vm1688_vm7, %v2666_v3, %v17982_v51  ;;  %v2591_v60 = vsel %vm1603_vm6, %v17983_v36, %v2584_v27  ;;  %v2634_v41 = vmul.f32 %v12810_v28, %v2592_v24  ;;  %9533 = vmatprep.mubr.bf16.mxu1 %v2828_v57  ;;  %v17984_v0 = vmov %v17982_v51 }
 0x55d   : > { %v2635_v14 = vmul.f32 %v12810_v28, %v2591_v60  ;;  %v2675_v30 = vsel %vm1688_vm7, %v17984_v0, %v2668_v5  ;;  %v2718_v42 = vmul.f32 %v12823_v8, %v2676_v56  ;;  %v2752_v3 = vrot.slane %v13099_v43, 3 }
 0x55e   : > { %v2566_v49 = vadd.f32 %v2550_v39, %v2514_v10  ;;  %v2567_v48 = vadd.f32 %v12941_v20, %v2515_v59  ;;  %v2719_v26 = vmul.f32 %v12823_v8, %v2675_v30  ;;  %v2760_v52 = vsel %vm1773_vm8, %v2750_v1, %v17985_v53 }
 0x55f   : > { %v17986_v12 = vmov %v17985_v53  ;;  %v2802_v15 = vmul.f32 %v12827_v2, %v2760_v52  ;;  %v2280_v25 = vrot.slane %v13099_v43, 5  ;;  %v2364_v32 = vrot.slane %v13099_v43, 6 }
 0x560   : > { %v2759_v19 = vsel %vm1773_vm8, %v17986_v12, %v2752_v3  ;;  %v2650_v31 = vadd.f32 %v2634_v41, %v2566_v49  ;;  %v2651_v20 = vadd.f32 %v2635_v14, %v2567_v48  ;;  %v2448_v11 = vrot.slane %v13099_v43, 7 }
 0x561   : > { %v2803_v44 = vmul.f32 %v12827_v2, %v2759_v19  ;;  %v17987_v9 = vrot.slane %v12950_v45, 5  ;;  %v17988_v23 = vrot.slane %v12913_v63, 5  ;;  %v17989_v4 = vrot.slane %v12950_v45, 6 }
 0x562   : > { %v17990_v17 = vrot.slane %v12913_v63, 6  ;;  %v2734_v54 = vadd.f32 %v2718_v42, %v2650_v31  ;;  %v2735_v39 = vadd.f32 %v2719_v26, %v2651_v20  ;;  %v17991_v56 = vrot.slane %v12950_v45, 7 }
 0x563   : > { %v2286_v1 = vsel %vm1296_vm0, %v2280_v25, %v17987_v9  ;;  %v2287_v35 = vsel %vm1296_vm0, %v17988_v23, %v2280_v25  ;;  %v2370_v58 = vsel %vm1381_vm2, %v2364_v32, %v17989_v4  ;;  %v17992_v59 = vrot.slane %v12913_v63, 7 }
 0x564   : > { %v2371_v33 = vsel %vm1381_vm2, %v17990_v17, %v2364_v32  ;;  %v2332_v57 = vmul.f32 %v12781_v29, %v2287_v35  ;;  %v2333_v40 = vmul.f32 %v12781_v29, %v2286_v1  ;;  %v2417_v51 = vmul.f32 %v12784_v38, %v2370_v58 }
 0x565   : > { %v2416_v24 = vmul.f32 %v12784_v38, %v2371_v33  ;;  %v2454_v10 = vsel %vm1466_vm4, %v2448_v11, %v17991_v56  ;;  %v2455_v36 = vsel %vm1466_vm4, %v17992_v59, %v2448_v11  ;;  %v2818_v60 = vadd.f32 %v2802_v15, %v2734_v54 }
 0x566   : > { %v2819_v41 = vadd.f32 %v2803_v44, %v2735_v39  ;;  %v2500_v14 = vmul.f32 %v12803_v61, %v2455_v36  ;;  %v2501_v0 = vmul.f32 %v12803_v61, %v2454_v10  ;;  %v2433_v42 = vadd.f32 %v2417_v51, %v2333_v40 }
 0x567   : > { %v2432_v30 = vadd.f32 %v2416_v24, %v2332_v57  ;;  %v2552_v49 = vmul.f32 %v12799_v47, %v13099_v43  ;;  %v2553_v48 = vmul.f32 %v12799_v47, %v12950_v45  ;;  %v2585_v63 = vrot.slane %v12950_v45, 1 }
 0x568   : > { %v2829_v26 = vpack.c.bf16 %v2819_v41, %v2818_v60  ;;  %v2586_v53 = vrot.slane %v13126_v50, 1  ;;  %v2669_v52 = vrot.slane %v12950_v45, 2  ;;  %v2517_v19 = vadd.f32 %v2501_v0, %v2433_v42 }
 0x569   : > { %v2516_v12 = vadd.f32 %v2500_v14, %v2432_v30  ;;  %v2670_v15 = vrot.slane %v13126_v50, 2  ;;  %v2753_v25 = vrot.slane %v12950_v45, 3  ;;  %v2590_v32 = vsel %vm1603_vm6, %v2584_v27, %v2585_v63 }
 0x56a   : > { %9534 = vmatmul.mubr.bf16.gmra.mrb[8].mxu1 %v2829_v26  ;;  %v2589_v43 = vsel %vm1603_vm6, %v2585_v63, %v2586_v53  ;;  %v2674_v31 = vsel %vm1688_vm7, %v2668_v5, %v2669_v52  ;;  %v2754_v20 = vrot.slane %v13126_v50, 3  ;;  %v2569_v11 = vadd.f32 %v2553_v48, %v2517_v19 }
 0x56b   : > { %v2568_v44 = vadd.f32 %v2552_v49, %v2516_v12  ;;  %v2636_v9 = vmul.f32 %v12810_v28, %v2590_v32  ;;  %v2637_v1 = vmul.f32 %v12810_v28, %v2589_v43  ;;  %v2673_v23 = vsel %vm1688_vm7, %v2669_v52, %v2670_v15 }
 0x56c   : > { %v2757_v35 = vsel %vm1773_vm8, %v2753_v25, %v2754_v20  ;;  %v2758_v27 = vsel %vm1773_vm8, %v2752_v3, %v2753_v25  ;;  %v2720_v5 = vmul.f32 %v12823_v8, %v2674_v31  ;;  %v2721_v17 = vmul.f32 %v12823_v8, %v2673_v23 }
 0x56d   : > { %v2652_v4 = vadd.f32 %v2636_v9, %v2568_v44  ;;  %v2653_v58 = vadd.f32 %v2637_v1, %v2569_v11  ;;  %v2282_v33 = vrot.slane %v13126_v50, 5  ;;  %v2366_v54 = vrot.slane %v13126_v50, 6 }
 0x56e   : > { %v2450_v39 = vrot.slane %v13126_v50, 7  ;;  %v2804_v24 = vmul.f32 %v12827_v2, %v2758_v27  ;;  %v2805_v51 = vmul.f32 %v12827_v2, %v2757_v35  ;;  %v17993_v3 = vrot.slane %v12944_v62, 5 }
 0x56f   : > { %v2736_v57 = vadd.f32 %v2720_v5, %v2652_v4  ;;  %v2737_v40 = vadd.f32 %v2721_v17, %v2653_v58  ;;  %v17994_v10 = vrot.slane %v12950_v45, 5  ;;  %v17995_v36 = vrot.slane %v12944_v62, 6 }
 0x570   : > { %v2284_v56 = vsel %vm1296_vm0, %v2282_v33, %v17993_v3  ;;  %v17996_v41 = vrot.slane %v12950_v45, 6  ;;  %v17997_v63 = vrot.slane %v12944_v62, 7  ;;  %v17998_v12 = vrot.slane %v12950_v45, 7 }
 0x571   : > { %v2285_v59 = vsel %vm1296_vm0, %v17994_v10, %v2282_v33  ;;  %v2368_v60 = vsel %vm1381_vm2, %v2366_v54, %v17995_v36  ;;  %v2820_v0 = vadd.f32 %v2804_v24, %v2736_v57  ;;  %v2821_v30 = vadd.f32 %v2805_v51, %v2737_v40 }
 0x572   : > { %v2369_v14 = vsel %vm1381_vm2, %v17996_v41, %v2366_v54  ;;  %v2334_v42 = vmul.f32 %v12781_v29, %v2285_v59  ;;  %v2335_v49 = vmul.f32 %v12781_v29, %v2284_v56  ;;  %v2419_v26 = vmul.f32 %v12784_v38, %v2368_v60 }
 0x573   : > { %v2418_v48 = vmul.f32 %v12784_v38, %v2369_v14  ;;  %v2452_v52 = vsel %vm1466_vm4, %v2450_v39, %v17997_v63  ;;  %v2453_v19 = vsel %vm1466_vm4, %v17998_v12, %v2450_v39  ;;  %v2830_v25 = vpack.c.bf16 %v2821_v30, %v2820_v0 }
 0x574   : > { %v2502_v43 = vmul.f32 %v12803_v61, %v2453_v19  ;;  %v2587_v32 = vrot.slane %v12944_v62, 1  ;;  %v2435_v31 = vadd.f32 %v2419_v26, %v2335_v49  ;;  %v2503_v44 = vmul.f32 %v12803_v61, %v2452_v52 }
 0x575   : > { %v2434_v29 = vadd.f32 %v2418_v48, %v2334_v42  ;;  %v2671_v38 = vrot.slane %v12944_v62, 2  ;;  %9537 = vmatprep.mubr.bf16.mxu1 %v2830_v25  ;;  %v2554_v11 = vmul.f32 %v12799_v47, %v13126_v50  ;;  %v17999_v9 = vrot.slane %v12770_v18, 1 }
 0x576   : > { %v2588_v45 = vsel %vm1603_vm6, %v2586_v53, %v2587_v32  ;;  %v2755_v23 = vrot.slane %v12944_v62, 3  ;;  %v2519_v27 = vadd.f32 %v2503_v44, %v2435_v31  ;;  %v2555_v61 = vmul.f32 %v12799_v47, %v12944_v62 }
 0x577   : > { %v2603_v1 = vsel %vm1603_vm6, %v2587_v32, %v17999_v9  ;;  %v2518_v35 = vadd.f32 %v2502_v43, %v2434_v29  ;;  %v2638_v50 = vmul.f32 %v12810_v28, %v2588_v45  ;;  %v2672_v53 = vsel %vm1688_vm7, %v2670_v15, %v2671_v38 }
 0x578   : > { %v2619_v4 = vsel %vm947_vm9, %v2603_v1, 0.0  ;;  %v18000_v58 = vrot.slane %v12770_v18, 2  ;;  %v2571_v33 = vadd.f32 %v2555_v61, %v2519_v27  ;;  %v2722_v62 = vmul.f32 %v12823_v8, %v2672_v53 }
 0x579   : > { %v2570_v17 = vadd.f32 %v2554_v11, %v2518_v35  ;;  %v2639_v54 = vmul.f32 %v12810_v28, %v2619_v4  ;;  %v2756_v39 = vsel %vm1773_vm8, %v2754_v20, %v2755_v23  ;;  %v18001_v57 = vrot.slane %v12770_v18, 3  ;;  %v13527_v18 = vld [vmem:[#allocation7 + $0x1] ss:$0 sm:$0xff] }
 0x57a   : > { %v2687_v5 = vsel %vm1688_vm7, %v2671_v38, %v18000_v58  ;;  %v2806_v10 = vmul.f32 %v12827_v2, %v2756_v39 }
 0x57b   : > { %v2703_v47 = vsel %vm995_vm10, %v2687_v5, 0.0  ;;  %v2771_v15 = vsel %vm1773_vm8, %v2755_v23, %v18001_v57  ;;  %v2654_v40 = vadd.f32 %v2638_v50, %v2570_v17  ;;  %v2655_v24 = vadd.f32 %v2639_v54, %v2571_v33  ;;  %v18014_v57 = vld [vmem:[#allocation46_spill] sm:$0xff] }
 0x57c   : > { %v2723_v51 = vmul.f32 %v12823_v8, %v2703_v47  ;;  %v2787_v28 = vsel %vm1043_vm11, %v2771_v15, 0.0 }
 0x57d   : > { %v2738_v3 = vadd.f32 %v2722_v62, %v2654_v40  ;;  %v2807_v59 = vmul.f32 %v12827_v2, %v2787_v28  ;;  %v18012_v62 = vld [vmem:[#allocation41_spill] sm:$0xff]  ;;  %v18016_v40 = vld [vmem:[#allocation42_spill] sm:$0xff] }
 0x57e   : > { %v2739_v56 = vadd.f32 %v2723_v51, %v2655_v24 }
 0x57f   : > { %v2822_v36 = vadd.f32 %v2806_v10, %v2738_v3 }
 0x580   : > { %v2823_v20 = vadd.f32 %v2807_v59, %v2739_v56 }
 0x582   : > { %v2831_v60 = vpack.c.bf16 %v2823_v20, %v2822_v36 }
 0x584   : > { %9538 = vmatmul.mubr.bf16.gmra.mrb[12].mxu1 %v2831_v60 }
 0x604   : > { %v9527_v41 = vpop.f32.mrb[0].mxu1 }
 0x605   : > { %v2936_v14 = vpop.f32.mrb[1].mxu1  ;;  %v2945_v0 = vadd.f32 %v9527_v41, %v13527_v18 }
 0x606   : > { %v2937_v8 = vadd.f32 %v13527_v18, %v2936_v14  ;;  %v9528_v30 = vpop.f32.mrb[2].mxu1  ;;  %v18018_v14 = vld [vmem:[#allocation47_spill] sm:$0xff] }
 0x607   : > { %v2939_v42 = vpop.f32.mrb[3].mxu1  ;;  %v2948_v48 = vadd.f32 %v9528_v30, %v13527_v18  ;;  %v3001_v2 = vmax.f32 %v2945_v0, 0.0 }
 0x608   : > { %v2999_v49 = vmax.f32 %v2937_v8, 0.0  ;;  %v2940_v26 = vadd.f32 %v13527_v18, %v2939_v42  ;;  %v18020_v42 = vld [vmem:[#allocation44_spill] sm:$0xff] }
 0x609   : > { %v3002_v12 = vmax.f32 %v2948_v48, 0.0  ;;  %v13541_v25 = vadd.f32 %v3001_v2, %v12646_v6  ;;  %v18022_v48 = vld [vmem:[#allocation48_spill] sm:$0xff]  ;;  %v18024_v2 = vld [vmem:[#allocation43_spill] sm:$0xff] }
 0x60a   : > { %v13534_v63 = vadd.f32 %v2999_v49, %v12601_v22  ;;  %v3000_v52 = vmax.f32 %v2940_v26, 0.0 }
 0x60b   : > { %18004 = vst [vmem:[#allocation51_spill] sm:$0xff] %v13541_v25  ;;  %v13545_v43 = vadd.f32 %v3002_v12, %v12610_v37 }
 0x60c   : > { %18002 = vst [vmem:[#allocation49_spill] sm:$0xff] %v13534_v63  ;;  %v13537_v19 = vadd.f32 %v3000_v52, %v12606_v55  ;;  %3032 = vadd.xlane.f32.xlu0 %v13534_v63 }
 0x60d   : > { %18005 = vst [vmem:[#allocation52_spill] sm:$0xff] %v13545_v43 }
 0x60e   : > { %18003 = vst [vmem:[#allocation50_spill] sm:$0xff] %v13537_v19  ;;  %3034 = vadd.xlane.f32.xlu1 %v13537_v19 }
 0x610   : > { %3036 = vadd.xlane.f32.xlu0 %v13541_v25 }
 0x612   : > { %3038 = vadd.xlane.f32.xlu1 %v13545_v43 }
 0x621   : > { %v9531_v22 = vpop.f32.mrb[4].mxu1 }
 0x622   : > { %v2952_v32 = vpop.f32.mrb[5].mxu1  ;;  %v2961_v29 = vadd.f32 %v9531_v22, %v13527_v18 }
 0x623   : > { %v2953_v55 = vadd.f32 %v13527_v18, %v2952_v32  ;;  %v9532_v31 = vpop.f32.mrb[6].mxu1 }
 0x624   : > { %v2955_v44 = vpop.f32.mrb[7].mxu1  ;;  %v2964_v6 = vadd.f32 %v9532_v31, %v13527_v18  ;;  %v3005_v45 = vmax.f32 %v2961_v29, 0.0 }
 0x625   : > { %v3003_v38 = vmax.f32 %v2953_v55, 0.0  ;;  %v2956_v11 = vadd.f32 %v13527_v18, %v2955_v44 }
 0x626   : > { %v3006_v1 = vmax.f32 %v2964_v6, 0.0  ;;  %v13561_v35 = vadd.f32 %v3005_v45, %v12656_v16 }
 0x627   : > { %v13554_v37 = vadd.f32 %v3003_v38, %v12651_v7  ;;  %v3004_v9 = vmax.f32 %v2956_v11, 0.0 }
 0x628   : > { %18008 = vst [vmem:[#allocation55_spill] sm:$0xff] %v13561_v35  ;;  %v13565_v27 = vadd.f32 %v3006_v1, %v12620_v13  ;;  %v18010_v13 = vld [vmem:[#allocation45_spill] sm:$0xff] }
 0x629   : > { %18006 = vst [vmem:[#allocation53_spill] sm:$0xff] %v13554_v37  ;;  %v13557_v23 = vadd.f32 %v3004_v9, %v12616_v21  ;;  %3040 = vadd.xlane.f32.xlu0 %v13554_v37 }
 0x62a   : > { %18009 = vst [vmem:[#allocation56_spill] sm:$0xff] %v13565_v27 }
 0x62b   : > { %18007 = vst [vmem:[#allocation54_spill] sm:$0xff] %v13557_v23  ;;  %3042 = vadd.xlane.f32.xlu1 %v13557_v23 }
 0x62d   : > { %3044 = vadd.xlane.f32.xlu0 %v13561_v35 }
 0x62f   : > { %3046 = vadd.xlane.f32.xlu1 %v13565_v27 }
 0x63d   : > { %v9535_v7 = vpop.f32.mrb[8].mxu1 }
 0x63e   : > { %v2968_v61 = vpop.f32.mrb[9].mxu1  ;;  %v2977_v4 = vadd.f32 %v9535_v7, %v13527_v18 }
 0x63f   : > { %v2969_v21 = vadd.f32 %v13527_v18, %v2968_v61  ;;  %v9536_v50 = vpop.f32.mrb[10].mxu1 }
 0x640   : > { %v2971_v53 = vpop.f32.mrb[11].mxu1  ;;  %v2980_v16 = vadd.f32 %v9536_v50, %v13527_v18  ;;  %v3009_v17 = vmax.f32 %v2977_v4, 0.0 }
 0x641   : > { %v3007_v58 = vmax.f32 %v2969_v21, 0.0  ;;  %v2972_v5 = vadd.f32 %v13527_v18, %v2971_v53 }
 0x642   : > { %v3010_v47 = vmax.f32 %v2980_v16, 0.0  ;;  %v13581_v15 = vadd.f32 %v3009_v17, %v18014_v57 }
 0x643   : > { %v13574_v33 = vadd.f32 %v3007_v58, %v18010_v13  ;;  %v3008_v54 = vmax.f32 %v2972_v5, 0.0 }
 0x644   : > { %18015 = vst [vmem:[#allocation46_spill] sm:$0xff] %v13581_v15  ;;  %v13585_v24 = vadd.f32 %v3010_v47, %v18016_v40 }
 0x645   : > { %18011 = vst [vmem:[#allocation45_spill] sm:$0xff] %v13574_v33  ;;  %v13577_v39 = vadd.f32 %v3008_v54, %v18012_v62  ;;  %3048 = vadd.xlane.f32.xlu0 %v13574_v33 }
 0x646   : > { %18017 = vst [vmem:[#allocation42_spill] sm:$0xff] %v13585_v24 }
 0x647   : > { %18013 = vst [vmem:[#allocation41_spill] sm:$0xff] %v13577_v39  ;;  %3050 = vadd.xlane.f32.xlu1 %v13577_v39 }
 0x649   : > { %3052 = vadd.xlane.f32.xlu0 %v13581_v15 }
 0x64b   : > { %3054 = vadd.xlane.f32.xlu1 %v13585_v24 }
 0x657   : > { %v9539_v51 = vpop.f32.mrb[12].mxu1 }
 0x658   : > { %v2984_v28 = vpop.f32.mrb[13].mxu1  ;;  %v2993_v3 = vadd.f32 %v9539_v51, %v13527_v18 }
 0x659   : > { %v2985_v56 = vadd.f32 %v13527_v18, %v2984_v28  ;;  %v9540_v10 = vpop.f32.mrb[14].mxu1 }
 0x65a   : > { %v2987_v59 = vpop.f32.mrb[15].mxu1  ;;  %v2996_v20 = vadd.f32 %v9540_v10, %v13527_v18  ;;  %v3013_v41 = vmax.f32 %v2993_v3, 0.0 }
 0x65b   : > { %v3011_v36 = vmax.f32 %v2985_v56, 0.0  ;;  %v2988_v60 = vadd.f32 %v13527_v18, %v2987_v59 }
 0x65c   : > { %v3014_v30 = vmax.f32 %v2996_v20, 0.0  ;;  %v13601_v26 = vadd.f32 %v3013_v41, %v18022_v48 }
 0x65d   : > { %v13594_v0 = vadd.f32 %v3011_v36, %v18018_v14  ;;  %v3012_v8 = vmax.f32 %v2988_v60, 0.0 }
 0x65e   : > { %18023 = vst [vmem:[#allocation48_spill] sm:$0xff] %v13601_v26  ;;  %v13605_v52 = vadd.f32 %v3014_v30, %v18024_v2 }
 0x65f   : > { %18019 = vst [vmem:[#allocation47_spill] sm:$0xff] %v13594_v0  ;;  %v13597_v49 = vadd.f32 %v3012_v8, %v18020_v42  ;;  %3056 = vadd.xlane.f32.xlu0 %v13594_v0 }
 0x660   : > { %18025 = vst [vmem:[#allocation43_spill] sm:$0xff] %v13605_v52 }
 0x661   : > { %18021 = vst [vmem:[#allocation44_spill] sm:$0xff] %v13597_v49  ;;  %3058 = vadd.xlane.f32.xlu1 %v13597_v49 }
 0x663   : > { %3060 = vadd.xlane.f32.xlu0 %v13601_v26 }
 0x665   : > { %3062 = vadd.xlane.f32.xlu1 %v13605_v52 }
 0x699   : > { %v3033_v18 = vpop.xlane.xlu0 %3032 }
 0x69a   : > { %v3064_v12 = vmul.f32 0.0078125, %v3033_v18 }
 0x69b   : > { %v3035_v22 = vpop.xlane.xlu1 %3034 }
 0x69c   : > { %v3065_v32 = vmul.f32 0.0078125, %v3035_v22  ;;  %v13610_v29 = vsub.f32 %v13534_v63, %v3064_v12 }
 0x69d   : > { %v3037_v55 = vpop.xlane.xlu0 %3036 }
 0x69e   : > { %v3066_v31 = vmul.f32 0.0078125, %v3037_v55  ;;  %v3096_v44 = vmul.f32 %v13610_v29, %v13610_v29  ;;  %v13615_v38 = vsub.f32 %v13537_v19, %v3065_v32 }
 0x69f   : > { %v3039_v6 = vpop.xlane.xlu1 %3038 }
 0x6a0   : > { %v3067_v11 = vmul.f32 0.0078125, %v3039_v6  ;;  %3112 = vadd.xlane.f32.xlu0 %v3096_v44  ;;  %v3097_v45 = vmul.f32 %v13615_v38, %v13615_v38  ;;  %v13620_v9 = vsub.f32 %v13541_v25, %v3066_v31 }
 0x6a2   : > { %3114 = vadd.xlane.f32.xlu1 %v3097_v45  ;;  %v3098_v1 = vmul.f32 %v13620_v9, %v13620_v9  ;;  %v13625_v7 = vsub.f32 %v13545_v43, %v3067_v11 }
 0x6a4   : > { %3116 = vadd.xlane.f32.xlu0 %v3098_v1  ;;  %v3099_v61 = vmul.f32 %v13625_v7, %v13625_v7 }
 0x6a6   : > { %3118 = vadd.xlane.f32.xlu1 %v3099_v61 }
 0x6b6   : > { %v3041_v4 = vpop.xlane.xlu0 %3040 }
 0x6b7   : > { %v3068_v21 = vmul.f32 0.0078125, %v3041_v4 }
 0x6b8   : > { %v3043_v50 = vpop.xlane.xlu1 %3042 }
 0x6b9   : > { %v3069_v53 = vmul.f32 0.0078125, %v3043_v50  ;;  %v13630_v58 = vsub.f32 %v13554_v37, %v3068_v21 }
 0x6ba   : > { %v3045_v16 = vpop.xlane.xlu0 %3044 }
 0x6bb   : > { %v3070_v5 = vmul.f32 0.0078125, %v3045_v16  ;;  %v3100_v17 = vmul.f32 %v13630_v58, %v13630_v58  ;;  %v13635_v13 = vsub.f32 %v13557_v23, %v3069_v53 }
 0x6bc   : > { %v3047_v54 = vpop.xlane.xlu1 %3046 }
 0x6bd   : > { %v3071_v47 = vmul.f32 0.0078125, %v3047_v54  ;;  %3120 = vadd.xlane.f32.xlu0 %v3100_v17  ;;  %v3101_v62 = vmul.f32 %v13635_v13, %v13635_v13  ;;  %v13640_v57 = vsub.f32 %v13561_v35, %v3070_v5 }
 0x6bf   : > { %3122 = vadd.xlane.f32.xlu1 %v3101_v62  ;;  %v3102_v40 = vmul.f32 %v13640_v57, %v13640_v57  ;;  %v13645_v51 = vsub.f32 %v13565_v27, %v3071_v47 }
 0x6c1   : > { %3124 = vadd.xlane.f32.xlu0 %v3102_v40  ;;  %v3103_v28 = vmul.f32 %v13645_v51, %v13645_v51 }
 0x6c3   : > { %3126 = vadd.xlane.f32.xlu1 %v3103_v28 }
 0x6d2   : > { %v3049_v3 = vpop.xlane.xlu0 %3048 }
 0x6d3   : > { %v3072_v56 = vmul.f32 0.0078125, %v3049_v3 }
 0x6d4   : > { %v3051_v10 = vpop.xlane.xlu1 %3050 }
 0x6d5   : > { %v3073_v59 = vmul.f32 0.0078125, %v3051_v10  ;;  %v13650_v36 = vsub.f32 %v13574_v33, %v3072_v56  ;;  %v4055_v33 = vld [vmem:[%s14124_s1 + $0x20] sm:$0xff] }
 0x6d6   : > { %v3053_v20 = vpop.xlane.xlu0 %3052 }
 0x6d7   : > { %v3074_v60 = vmul.f32 0.0078125, %v3053_v20  ;;  %v3104_v41 = vmul.f32 %v13650_v36, %v13650_v36  ;;  %v13655_v14 = vsub.f32 %v13577_v39, %v3073_v59 }
 0x6d8   : > { %v3055_v8 = vpop.xlane.xlu1 %3054 }
 0x6d9   : > { %v3075_v30 = vmul.f32 0.0078125, %v3055_v8  ;;  %3128 = vadd.xlane.f32.xlu0 %v3104_v41  ;;  %v3105_v42 = vmul.f32 %v13655_v14, %v13655_v14  ;;  %v13660_v48 = vsub.f32 %v13581_v15, %v3074_v60  ;;  %v13689_v41 = vld [vmem:[#allocation8] sm:$0xf]  ;;  %v18026_v8 = vld [vmem:[#allocation36_spill] sm:$0xff] }
 0x6db   : > { %3130 = vadd.xlane.f32.xlu1 %v3105_v42  ;;  %v3106_v2 = vmul.f32 %v13660_v48, %v13660_v48  ;;  %v13665_v18 = vsub.f32 %v13585_v24, %v3075_v30  ;;  %v13693_v30 = vrot.slane %v13689_v41, %v18026_v8 }
 0x6dd   : > { %3132 = vadd.xlane.f32.xlu0 %v3106_v2  ;;  %v3107_v12 = vmul.f32 %v13665_v18, %v13665_v18 }
 0x6df   : > { %3134 = vadd.xlane.f32.xlu1 %v3107_v12  ;;  %v18027_v12 = vld [vmem:[#allocation38_spill] sm:$0xff] }
 0x6ec   : > { %v3057_v22 = vpop.xlane.xlu0 %3056 }
 0x6ed   : > { %v3076_v32 = vmul.f32 0.0078125, %v3057_v22  ;;  %v13698_v22 = vrot.slane %v13689_v41, %v18027_v12 }
 0x6ee   : > { %v3059_v55 = vpop.xlane.xlu1 %3058 }
 0x6ef   : > { %v3077_v31 = vmul.f32 0.0078125, %v3059_v55  ;;  %v13670_v44 = vsub.f32 %v13594_v0, %v3076_v32 }
 0x6f0   : > { %v3061_v6 = vpop.xlane.xlu0 %3060 }
 0x6f1   : > { %v3078_v11 = vmul.f32 0.0078125, %v3061_v6  ;;  %v3108_v45 = vmul.f32 %v13670_v44, %v13670_v44  ;;  %v13675_v1 = vsub.f32 %v13597_v49, %v3077_v31 }
 0x6f2   : > { %v3063_v61 = vpop.xlane.xlu1 %3062 }
 0x6f3   : > { %v3079_v4 = vmul.f32 0.0078125, %v3063_v61  ;;  %3136 = vadd.xlane.f32.xlu0 %v3108_v45  ;;  %v3109_v21 = vmul.f32 %v13675_v1, %v13675_v1  ;;  %v13680_v50 = vsub.f32 %v13601_v26, %v3078_v11 }
 0x6f5   : > { %3138 = vadd.xlane.f32.xlu1 %v3109_v21  ;;  %v3110_v53 = vmul.f32 %v13680_v50, %v13680_v50  ;;  %v13685_v16 = vsub.f32 %v13605_v52, %v3079_v4 }
 0x6f7   : > { %3140 = vadd.xlane.f32.xlu0 %v3110_v53  ;;  %v3111_v5 = vmul.f32 %v13685_v16, %v13685_v16 }
 0x6f9   : > { %3142 = vadd.xlane.f32.xlu1 %v3111_v5 }
 0x72d   : > { %v3113_v17 = vpop.xlane.xlu0 %3112 }
 0x72e   : > { %v3144_v54 = vmul.f32 0.0078125, %v3113_v17 }
 0x72f   : > { %v3115_v47 = vpop.xlane.xlu1 %3114 }
 0x730   : > { %v3160_v62 = vadd.f32 1e-05, %v3144_v54  ;;  %v3145_v40 = vmul.f32 0.0078125, %v3115_v47 }
 0x731   : > { %v3117_v28 = vpop.xlane.xlu0 %3116 }
 0x732   : > { %10593 = vrsqrt.f32 %v3160_v62  ;;  %v3161_v3 = vadd.f32 1e-05, %v3145_v40  ;;  %v3146_v56 = vmul.f32 0.0078125, %v3117_v28 }
 0x733   : > { %v3119_v10 = vpop.xlane.xlu1 %3118 }
 0x734   : > { %10595 = vrsqrt.f32 %v3161_v3  ;;  %v3162_v59 = vadd.f32 1e-05, %v3146_v56  ;;  %v3147_v20 = vmul.f32 0.0078125, %v3119_v10 }
 0x736   : > { %10597 = vrsqrt.f32 %v3162_v59  ;;  %v3163_v60 = vadd.f32 1e-05, %v3147_v20 }
 0x738   : > { %10599 = vrsqrt.f32 %v3163_v60 }
 0x73c   : > { %v10594_v42 = vpop.eup %10593 }
 0x73d   : > { %v3192_v2 = vmul.f32 %v10594_v42, %v13610_v29 }
 0x73e   : > { %v10596_v32 = vpop.eup %10595 }
 0x73f   : > { %v3212_v55 = vmul.f32 %v13693_v30, %v3192_v2  ;;  %v3193_v31 = vmul.f32 %v10596_v32, %v13615_v38 }
 0x740   : > { %v10598_v6 = vpop.eup %10597 }
 0x741   : > { %v13703_v11 = vadd.f32 %v13698_v22, %v3212_v55  ;;  %v3213_v45 = vmul.f32 %v13693_v30, %v3193_v31  ;;  %v3194_v61 = vmul.f32 %v10598_v6, %v13620_v9 }
 0x742   : > { %v10600_v4 = vpop.eup %10599 }
 0x743   : > { %3248 = vadd.xlane.f32.xlu0 %v13703_v11  ;;  %v13709_v29 = vadd.f32 %v13698_v22, %v3213_v45  ;;  %v3214_v53 = vmul.f32 %v13693_v30, %v3194_v61  ;;  %v3195_v5 = vmul.f32 %v10600_v4, %v13625_v7 }
 0x745   : > { %3250 = vadd.xlane.f32.xlu1 %v13709_v29  ;;  %v13715_v54 = vadd.f32 %v13698_v22, %v3214_v53  ;;  %v3215_v9 = vmul.f32 %v13693_v30, %v3195_v5 }
 0x747   : > { %3252 = vadd.xlane.f32.xlu0 %v13715_v54  ;;  %v13720_v28 = vadd.f32 %v13698_v22, %v3215_v9 }
 0x749   : > { %3254 = vadd.xlane.f32.xlu1 %v13720_v28 }
 0x74a   : > { %v3121_v21 = vpop.xlane.xlu0 %3120 }
 0x74b   : > { %v3148_v38 = vmul.f32 0.0078125, %v3121_v21 }
 0x74c   : > { %v3123_v17 = vpop.xlane.xlu1 %3122 }
 0x74d   : > { %v3164_v47 = vadd.f32 1e-05, %v3148_v38  ;;  %v3149_v62 = vmul.f32 0.0078125, %v3123_v17 }
 0x74e   : > { %v3125_v40 = vpop.xlane.xlu0 %3124 }
 0x74f   : > { %10601 = vrsqrt.f32 %v3164_v47  ;;  %v3165_v3 = vadd.f32 1e-05, %v3149_v62  ;;  %v3150_v7 = vmul.f32 0.0078125, %v3125_v40 }
 0x750   : > { %v3127_v56 = vpop.xlane.xlu1 %3126 }
 0x751   : > { %10603 = vrsqrt.f32 %v3165_v3  ;;  %v3166_v10 = vadd.f32 1e-05, %v3150_v7  ;;  %v3151_v59 = vmul.f32 0.0078125, %v3127_v56 }
 0x753   : > { %10605 = vrsqrt.f32 %v3166_v10  ;;  %v3167_v20 = vadd.f32 1e-05, %v3151_v59 }
 0x755   : > { %10607 = vrsqrt.f32 %v3167_v20 }
 0x759   : > { %v10602_v60 = vpop.eup %10601 }
 0x75a   : > { %v3196_v42 = vmul.f32 %v10602_v60, %v13630_v58 }
 0x75b   : > { %v10604_v2 = vpop.eup %10603 }
 0x75c   : > { %v3216_v32 = vmul.f32 %v13693_v30, %v3196_v42  ;;  %v3197_v55 = vmul.f32 %v10604_v2, %v13635_v13 }
 0x75d   : > { %v10606_v31 = vpop.eup %10605 }
 0x75e   : > { %v13727_v6 = vadd.f32 %v13698_v22, %v3216_v32  ;;  %v3217_v45 = vmul.f32 %v13693_v30, %v3197_v55  ;;  %v3198_v61 = vmul.f32 %v10606_v31, %v13640_v57 }
 0x75f   : > { %v10608_v4 = vpop.eup %10607 }
 0x760   : > { %3256 = vadd.xlane.f32.xlu0 %v13727_v6  ;;  %v13733_v53 = vadd.f32 %v13698_v22, %v3217_v45  ;;  %v3218_v58 = vmul.f32 %v13693_v30, %v3198_v61  ;;  %v3199_v5 = vmul.f32 %v10608_v4, %v13645_v51 }
 0x762   : > { %3258 = vadd.xlane.f32.xlu1 %v13733_v53  ;;  %v13739_v17 = vadd.f32 %v13698_v22, %v3218_v58  ;;  %v3219_v57 = vmul.f32 %v13693_v30, %v3199_v5 }
 0x764   : > { %3260 = vadd.xlane.f32.xlu0 %v13739_v17  ;;  %v13744_v40 = vadd.f32 %v13698_v22, %v3219_v57 }
 0x766   : > { %v3129_v21 = vpop.xlane.xlu0 %3128  ;;  %3262 = vadd.xlane.f32.xlu1 %v13744_v40 }
 0x767   : > { %v3152_v13 = vmul.f32 0.0078125, %v3129_v21 }
 0x768   : > { %v3131_v38 = vpop.xlane.xlu1 %3130 }
 0x769   : > { %v3168_v9 = vadd.f32 1e-05, %v3152_v13  ;;  %v3153_v47 = vmul.f32 0.0078125, %v3131_v38 }
 0x76a   : > { %v3133_v62 = vpop.xlane.xlu0 %3132 }
 0x76b   : > { %10609 = vrsqrt.f32 %v3168_v9  ;;  %v3169_v3 = vadd.f32 1e-05, %v3153_v47  ;;  %v3154_v51 = vmul.f32 0.0078125, %v3133_v62 }
 0x76c   : > { %v3135_v7 = vpop.xlane.xlu1 %3134 }
 0x76d   : > { %10611 = vrsqrt.f32 %v3169_v3  ;;  %v3170_v56 = vadd.f32 1e-05, %v3154_v51  ;;  %v3155_v10 = vmul.f32 0.0078125, %v3135_v7 }
 0x76f   : > { %10613 = vrsqrt.f32 %v3170_v56  ;;  %v3171_v59 = vadd.f32 1e-05, %v3155_v10 }
 0x771   : > { %10615 = vrsqrt.f32 %v3171_v59 }
 0x775   : > { %v10610_v20 = vpop.eup %10609 }
 0x776   : > { %v3200_v60 = vmul.f32 %v10610_v20, %v13650_v36 }
 0x777   : > { %v10612_v42 = vpop.eup %10611 }
 0x778   : > { %v3220_v2 = vmul.f32 %v13693_v30, %v3200_v60  ;;  %v3201_v32 = vmul.f32 %v10612_v42, %v13655_v14 }
 0x779   : > { %v10614_v55 = vpop.eup %10613 }
 0x77a   : > { %v13751_v31 = vadd.f32 %v13698_v22, %v3220_v2  ;;  %v3221_v45 = vmul.f32 %v13693_v30, %v3201_v32  ;;  %v3202_v61 = vmul.f32 %v10614_v55, %v13660_v48 }
 0x77b   : > { %v10616_v4 = vpop.eup %10615 }
 0x77c   : > { %3264 = vadd.xlane.f32.xlu0 %v13751_v31  ;;  %v13757_v21 = vadd.f32 %v13698_v22, %v3221_v45  ;;  %v3222_v36 = vmul.f32 %v13693_v30, %v3202_v61  ;;  %v3203_v58 = vmul.f32 %v10616_v4, %v13665_v18 }
 0x77e   : > { %3266 = vadd.xlane.f32.xlu1 %v13757_v21  ;;  %v13763_v14 = vadd.f32 %v13698_v22, %v3222_v36  ;;  %v3223_v13 = vmul.f32 %v13693_v30, %v3203_v58 }
 0x780   : > { %v3137_v5 = vpop.xlane.xlu0 %3136  ;;  %3268 = vadd.xlane.f32.xlu0 %v13763_v14  ;;  %v13768_v57 = vadd.f32 %v13698_v22, %v3223_v13  ;;  %v10465_v13 = vld [vmem:[#allocation10] ss:$12 sps:$4 sm:$0xff]  }
 0x781   : > { %v3156_v38 = vmul.f32 0.0078125, %v3137_v5 }
 0x782   : > { %v3139_v48 = vpop.xlane.xlu1 %3138  ;;  %3270 = vadd.xlane.f32.xlu1 %v13768_v57 }
 0x783   : > { %v3172_v9 = vadd.f32 1e-05, %v3156_v38  ;;  %v3157_v47 = vmul.f32 0.0078125, %v3139_v48  ;;  %v10467_v38 = vld [vmem:[#allocation10 + $0x4] ss:$12 sps:$4 sm:$0xff]  }
 0x784   : > { %v3141_v62 = vpop.xlane.xlu0 %3140  ;;  %v10470_v48 = vld [vmem:[#allocation10 + $0x1c] ss:$12 sps:$4 sm:$0xff]   ;;  %3632 = vmatprep.subr.bf16.mxu0 %v10467_v38 }
 0x785   : > { %10617 = vrsqrt.f32 %v3172_v9  ;;  %v3173_v18 = vadd.f32 1e-05, %v3157_v47  ;;  %v3158_v3 = vmul.f32 0.0078125, %v3141_v62  ;;  %v10471_v9 = vld [vmem:[#allocation10 + $0x8] ss:$12 sps:$4 sm:$0xff]   ;;  %3633 = vmatpush1.bf16.msra.mxu0 %v10465_v13 }
 0x786   : > { %v3143_v51 = vpop.xlane.xlu1 %3142  ;;  %9541 = vmatprep.subr.bf16.mxu1 %v10471_v9  ;;  %3634 = vmatprep.subr.bf16.mxu0 %v10470_v48 }
 0x787   : > { %10619 = vrsqrt.f32 %v3173_v18  ;;  %v3174_v7 = vadd.f32 1e-05, %v3158_v3  ;;  %v3159_v56 = vmul.f32 0.0078125, %v3143_v51  ;;  %9542 = vmatpush3.bf16.msra.mxu1 %v10471_v9 }
 0x789   : > { %10621 = vrsqrt.f32 %v3174_v7  ;;  %v3175_v10 = vadd.f32 1e-05, %v3159_v56 }
 0x78b   : > { %10623 = vrsqrt.f32 %v3175_v10 }
 0x78f   : > { %v10618_v59 = vpop.eup %10617 }
 0x790   : > { %v3204_v20 = vmul.f32 %v10618_v59, %v13670_v44 }
 0x791   : > { %v10620_v60 = vpop.eup %10619 }
 0x792   : > { %v3224_v42 = vmul.f32 %v13693_v30, %v3204_v20  ;;  %v3205_v2 = vmul.f32 %v10620_v60, %v13675_v1 }
 0x793   : > { %v10622_v32 = vpop.eup %10621 }
 0x794   : > { %v13775_v55 = vadd.f32 %v13698_v22, %v3224_v42  ;;  %v3225_v45 = vmul.f32 %v13693_v30, %v3205_v2  ;;  %v3206_v61 = vmul.f32 %v10622_v32, %v13680_v50 }
 0x795   : > { %v10624_v4 = vpop.eup %10623 }
 0x796   : > { %3272 = vadd.xlane.f32.xlu0 %v13775_v55  ;;  %v13781_v36 = vadd.f32 %v13698_v22, %v3225_v45  ;;  %v3226_v44 = vmul.f32 %v13693_v30, %v3206_v61  ;;  %v3207_v58 = vmul.f32 %v10624_v4, %v13685_v16  ;;  %v10468_v16 = vld [vmem:[#allocation10 + $0x18] ss:$12 sps:$4 sm:$0xff]  }
 0x797   : > { %3635 = vmatpush1.bf16.msra.mxu0 %v10468_v16  ;;  %v10472_v16 = vld [vmem:[#allocation10 + $0x30] ss:$12 sps:$4 sm:$0xff]  }
 0x798   : > { %3274 = vadd.xlane.f32.xlu1 %v13781_v36  ;;  %v13787_v1 = vadd.f32 %v13698_v22, %v3226_v44  ;;  %v3227_v5 = vmul.f32 %v13693_v30, %v3207_v58 }
 0x79a   : > { %3276 = vadd.xlane.f32.xlu0 %v13787_v1  ;;  %v13792_v50 = vadd.f32 %v13698_v22, %v3227_v5 }
 0x79c   : > { %3278 = vadd.xlane.f32.xlu1 %v13792_v50 }
 0x7d0   : > { %v3249_v47 = vpop.xlane.xlu0 %3248 }
 0x7d1   : > { %v3280_v30 = vmul.f32 0.0078125, %v3249_v47  ;;  %v10475_v47 = vld [vmem:[#allocation10 + $0x20] ss:$12 sps:$4 sm:$0xff]  }
 0x7d2   : > { %v3251_v62 = vpop.xlane.xlu1 %3250  ;;  %9543 = vmatprep.subr.bf16.mxu1 %v10475_v47 }
 0x7d3   : > { %v13796_v18 = vsub.f32 %v13703_v11, %v3280_v30  ;;  %v3281_v22 = vmul.f32 0.0078125, %v3251_v62  ;;  %9544 = vmatpush3.bf16.msra.mxu1 %v10475_v47  ;;  %v10476_v30 = vld [vmem:[#allocation10 + $0x48] ss:$12 sps:$4 sm:$0xff]   ;;  %v10478_v62 = vld [vmem:[#allocation10 + $0x4c] ss:$12 sps:$4 sm:$0xff]  }
 0x7d4   : > { %v3253_v3 = vpop.xlane.xlu0 %3252 }
 0x7d5   : > { %v13799_v51 = vsub.f32 %v13709_v29, %v3281_v22  ;;  %v3282_v7 = vmul.f32 0.0078125, %v3253_v3  ;;  %v3312_v56 = vmul.f32 %v13796_v18, %v13796_v18 }
 0x7d6   : > { %v3255_v10 = vpop.xlane.xlu1 %3254 }
 0x7d7   : > { %v13804_v59 = vsub.f32 %v13715_v54, %v3282_v7  ;;  %v3283_v20 = vmul.f32 0.0078125, %v3255_v10  ;;  %3328 = vadd.xlane.f32.xlu0 %v3312_v56  ;;  %v3313_v60 = vmul.f32 %v13799_v51, %v13799_v51 }
 0x7d9   : > { %v13809_v11 = vsub.f32 %v13720_v28, %v3283_v20  ;;  %3330 = vadd.xlane.f32.xlu1 %v3313_v60  ;;  %v3314_v29 = vmul.f32 %v13804_v59, %v13804_v59  ;;  %v10480_v20 = vld [vmem:[#allocation10 + $0x60] ss:$12 sps:$4 sm:$0xff]   ;;  %v10482_v60 = vld [vmem:[#allocation10 + $0x64] ss:$12 sps:$4 sm:$0xff]  }
 0x7db   : > { %3332 = vadd.xlane.f32.xlu0 %v3314_v29  ;;  %v3315_v42 = vmul.f32 %v13809_v11, %v13809_v11 }
 0x7dd   : > { %3334 = vadd.xlane.f32.xlu1 %v3315_v42  ;;  %v10483_v42 = vld [vmem:[#allocation10 + $0x50] ss:$12 sps:$4 sm:$0xff]  }
 0x7ed   : > { %v3257_v2 = vpop.xlane.xlu0 %3256 }
 0x7ee   : > { %v3284_v54 = vmul.f32 0.0078125, %v3257_v2 }
 0x7ef   : > { %v3259_v32 = vpop.xlane.xlu1 %3258 }
 0x7f0   : > { %v13816_v45 = vsub.f32 %v13727_v6, %v3284_v54  ;;  %v3285_v61 = vmul.f32 0.0078125, %v3259_v32 }
 0x7f1   : > { %v3261_v4 = vpop.xlane.xlu0 %3260 }
 0x7f2   : > { %v13819_v28 = vsub.f32 %v13733_v53, %v3285_v61  ;;  %v3286_v44 = vmul.f32 0.0078125, %v3261_v4  ;;  %v3316_v58 = vmul.f32 %v13816_v45, %v13816_v45 }
 0x7f3   : > { %v3263_v5 = vpop.xlane.xlu1 %3262 }
 0x7f4   : > { %v13824_v13 = vsub.f32 %v13739_v17, %v3286_v44  ;;  %v3287_v38 = vmul.f32 0.0078125, %v3263_v5  ;;  %3336 = vadd.xlane.f32.xlu0 %v3316_v58  ;;  %v3317_v48 = vmul.f32 %v13819_v28, %v13819_v28  ;;  %v10474_v17 = vld [vmem:[#allocation10 + $0x34] ss:$12 sps:$4 sm:$0xff]   ;;  %v10484_v58 = vld [vmem:[#allocation10 + $0x78] ss:$12 sps:$4 sm:$0xff]  }
 0x7f5   : > { %3636 = vmatprep.subr.bf16.mxu0 %v10474_v17  ;;  %v10487_v5 = vld [vmem:[#allocation10 + $0x68] ss:$12 sps:$4 sm:$0xff]  }
 0x7f6   : > { %v13829_v6 = vsub.f32 %v13744_v40, %v3287_v38  ;;  %3338 = vadd.xlane.f32.xlu1 %v3317_v48  ;;  %v3318_v53 = vmul.f32 %v13824_v13, %v13824_v13  ;;  %3637 = vmatpush1.bf16.msra.mxu0 %v10472_v16  ;;  %v10479_v40 = vld [vmem:[#allocation10 + $0x38] ss:$12 sps:$4 sm:$0xff]   ;;  %v10488_v16 = vld [vmem:[#allocation10 + $0x90] ss:$12 sps:$4 sm:$0xff]   ;;  %v10490_v17 = vld [vmem:[#allocation10 + $0x94] ss:$12 sps:$4 sm:$0xff]  }
 0x7f7   : > { %3638 = vmatprep.subr.bf16.mxu0 %v10478_v62  ;;  %9545 = vmatprep.subr.bf16.mxu1 %v10479_v40 }
 0x7f8   : > { %3340 = vadd.xlane.f32.xlu0 %v3318_v53  ;;  %v3319_v9 = vmul.f32 %v13829_v6, %v13829_v6  ;;  %9546 = vmatpush3.bf16.msra.mxu1 %v10479_v40 }
 0x7f9   : > { %9547 = vmatprep.subr.bf16.mxu1 %v10483_v42 }
 0x7fa   : > { %3342 = vadd.xlane.f32.xlu1 %v3319_v9  ;;  %3639 = vmatpush1.bf16.msra.mxu0 %v10476_v30 }
 0x7fb   : > { %3640 = vmatprep.subr.bf16.mxu0 %v10482_v60 }
 0x7fc   : > { %9548 = vmatpush3.bf16.msra.mxu1 %v10483_v42 }
 0x7fd   : > { %9549 = vmatprep.subr.bf16.mxu1 %v10487_v5 }
 0x7fe   : > { %3641 = vmatpush1.bf16.msra.mxu0 %v10480_v20  ;;  %v10494_v20 = vld [vmem:[#allocation10 + $0xac] ss:$12 sps:$4 sm:$0xff]  }
 0x800   : > { %9550 = vmatpush3.bf16.msra.mxu1 %v10487_v5 }
 0x809   : > { %v3265_v22 = vpop.xlane.xlu0 %3264 }
 0x80a   : > { %v3288_v3 = vmul.f32 0.0078125, %v3265_v22 }
 0x80b   : > { %v3267_v7 = vpop.xlane.xlu1 %3266 }
 0x80c   : > { %v13836_v56 = vsub.f32 %v13751_v31, %v3288_v3  ;;  %v3289_v10 = vmul.f32 0.0078125, %v3267_v7 }
 0x80d   : > { %v3269_v29 = vpop.xlane.xlu0 %3268 }
 0x80e   : > { %v13839_v2 = vsub.f32 %v13757_v21, %v3289_v10  ;;  %v3290_v54 = vmul.f32 0.0078125, %v3269_v29  ;;  %v3320_v32 = vmul.f32 %v13836_v56, %v13836_v56  ;;  %v10486_v21 = vld [vmem:[#allocation10 + $0x7c] ss:$12 sps:$4 sm:$0xff]   ;;  %v10495_v29 = vld [vmem:[#allocation10 + $0x98] ss:$12 sps:$4 sm:$0xff]  }
 0x80f   : > { %v3271_v61 = vpop.xlane.xlu1 %3270  ;;  %3642 = vmatprep.subr.bf16.mxu0 %v10486_v21  ;;  %v10492_v10 = vld [vmem:[#allocation10 + $0xa8] ss:$12 sps:$4 sm:$0xff]  }
 0x810   : > { %v13844_v4 = vsub.f32 %v13763_v14, %v3290_v54  ;;  %v3291_v31 = vmul.f32 0.0078125, %v3271_v61  ;;  %3344 = vadd.xlane.f32.xlu0 %v3320_v32  ;;  %v3321_v44 = vmul.f32 %v13839_v2, %v13839_v2  ;;  %3643 = vmatpush1.bf16.msra.mxu0 %v10484_v58  ;;  %v10496_v61 = vld [vmem:[#allocation10 + $0xb0] ss:$12 sps:$4 sm:$0xff]  }
 0x811   : > { %3644 = vmatprep.subr.bf16.mxu0 %v10490_v17 }
 0x812   : > { %v13849_v38 = vsub.f32 %v13768_v57, %v3291_v31  ;;  %3346 = vadd.xlane.f32.xlu1 %v3321_v44  ;;  %v3322_v48 = vmul.f32 %v13844_v4, %v13844_v4  ;;  %v10491_v57 = vld [vmem:[#allocation10 + $0x80] ss:$12 sps:$4 sm:$0xff]   ;;  %v11374_v31 = vmov 0  }
 0x813   : > { %9551 = vmatprep.subr.bf16.mxu1 %v10491_v57  ;;  %3664 = vmatprep.mubr.bf16.mxu0 %v11374_v31 }
 0x814   : > { %3348 = vadd.xlane.f32.xlu0 %v3322_v48  ;;  %v3323_v14 = vmul.f32 %v13849_v38, %v13849_v38  ;;  %3645 = vmatpush1.bf16.msra.mxu0 %v10488_v16 }
 0x815   : > { %9552 = vmatpush3.bf16.msra.mxu1 %v10491_v57  ;;  %3646 = vmatprep.subr.bf16.mxu0 %v10494_v20  ;;  %v18029_v20 = vld [vmem:[#allocation37_spill] sm:$0xff] }
 0x816   : > { %3350 = vadd.xlane.f32.xlu1 %v3323_v14  ;;  %9553 = vmatprep.subr.bf16.mxu1 %v10495_v29 }
 0x817   : > { %10327 = vset.pattern.permute.xlu1 %v11374_v31  ;;  %10328 = vset.pattern.permute.xlu0 %v11374_v31 }
 0x818   : > { %3647 = vmatpush1.bf16.msra.mxu0 %v10492_v10 }
 0x819   : > { %9554 = vmatpush3.bf16.msra.mxu1 %v10495_v29 }
 0x81a   : > { %9555 = vmatprep.subr.bf16.mxu1 %v10496_v61 }
 0x81d   : > { %9556 = vmatpush3.bf16.msra.mxu1 %v10496_v61 }
 0x823   : > { %v3273_v53 = vpop.xlane.xlu0 %3272 }
 0x824   : > { %v3292_v9 = vmul.f32 0.0078125, %v3273_v53 }
 0x825   : > { %v3275_v47 = vpop.xlane.xlu1 %3274 }
 0x826   : > { %v13856_v30 = vsub.f32 %v13775_v55, %v3292_v9  ;;  %v3293_v62 = vmul.f32 0.0078125, %v3275_v47 }
 0x827   : > { %v3277_v40 = vpop.xlane.xlu0 %3276 }
 0x828   : > { %v13859_v22 = vsub.f32 %v13781_v36, %v3293_v62  ;;  %v3294_v3 = vmul.f32 0.0078125, %v3277_v40  ;;  %v3324_v7 = vmul.f32 %v13856_v30, %v13856_v30  ;;  %v18028_v62 = vld [vmem:[#allocation39_spill] sm:$0xff] }
 0x829   : > { %v3279_v60 = vpop.xlane.xlu1 %3278  ;;  %v13883_v40 = vrot.slane %v13689_v41, %v18028_v62 }
 0x82a   : > { %v13864_v55 = vsub.f32 %v13787_v1, %v3294_v3  ;;  %v3295_v42 = vmul.f32 0.0078125, %v3279_v60  ;;  %3352 = vadd.xlane.f32.xlu0 %v3324_v7  ;;  %v3325_v54 = vmul.f32 %v13859_v22, %v13859_v22  ;;  %v13888_v60 = vrot.slane %v13689_v41, %v18029_v20 }
 0x82c   : > { %v13869_v36 = vsub.f32 %v13792_v50, %v3295_v42  ;;  %3354 = vadd.xlane.f32.xlu1 %v3325_v54  ;;  %v3326_v32 = vmul.f32 %v13864_v55, %v13864_v55  ;;  %v10497_v50 = vld [vmem:[%s17497_s9] sm:$0xff]  }
 0x82d   : > { %9573 = vmatprep.subr.bf16.mxu1 %v10497_v50 }
 0x82e   : > { %3356 = vadd.xlane.f32.xlu0 %v3326_v32  ;;  %v3327_v1 = vmul.f32 %v13869_v36, %v13869_v36 }
 0x830   : > { %3358 = vadd.xlane.f32.xlu1 %v3327_v1 }
 0x864   : > { %v3329_v44 = vpop.xlane.xlu0 %3328 }
 0x865   : > { %v3360_v58 = vmul.f32 0.0078125, %v3329_v44 }
 0x866   : > { %v3331_v21 = vpop.xlane.xlu1 %3330 }
 0x867   : > { %v3376_v5 = vadd.f32 1e-05, %v3360_v58  ;;  %v3361_v48 = vmul.f32 0.0078125, %v3331_v21 }
 0x868   : > { %v3333_v14 = vpop.xlane.xlu0 %3332 }
 0x869   : > { %10625 = vrsqrt.f32 %v3376_v5  ;;  %v3377_v53 = vadd.f32 1e-05, %v3361_v48  ;;  %v3362_v9 = vmul.f32 0.0078125, %v3333_v14 }
 0x86a   : > { %v3335_v16 = vpop.xlane.xlu1 %3334 }
 0x86b   : > { %10627 = vrsqrt.f32 %v3377_v53  ;;  %v3378_v17 = vadd.f32 1e-05, %v3362_v9  ;;  %v3363_v47 = vmul.f32 0.0078125, %v3335_v16 }
 0x86d   : > { %10629 = vrsqrt.f32 %v3378_v17  ;;  %v3379_v57 = vadd.f32 1e-05, %v3363_v47 }
 0x86f   : > { %10631 = vrsqrt.f32 %v3379_v57 }
 0x873   : > { %v10626_v3 = vpop.eup %10625 }
 0x874   : > { %v3408_v7 = vmul.f32 %v10626_v3, %v13796_v18  ;;  %v10498_v3 = vld [vmem:[%s17497_s9 + $0x8] sm:$0xff]  }
 0x875   : > { %v10628_v10 = vpop.eup %10627 }
 0x876   : > { %v3428_v29 = vmul.f32 %v13883_v40, %v3408_v7  ;;  %v3409_v42 = vmul.f32 %v10628_v10, %v13799_v51 }
 0x877   : > { %v10630_v54 = vpop.eup %10629 }
 0x878   : > { %v3429_v32 = vmul.f32 %v13883_v40, %v3409_v42  ;;  %v3410_v1 = vmul.f32 %v10630_v54, %v13804_v59  ;;  %v3448_v21 = vadd.f32 %v13888_v60, %v3428_v29  ;;  %v10499_v29 = vld [vmem:[%s17497_s9 + $0x10] sm:$0xff]   ;;  %v10500_v42 = vld [vmem:[%s17497_s9 + $0x18] sm:$0xff]  }
 0x879   : > { %v10632_v61 = vpop.eup %10631 }
 0x87a   : > { %v3430_v44 = vmul.f32 %v13883_v40, %v3410_v1  ;;  %v3411_v58 = vmul.f32 %v10632_v61, %v13809_v11  ;;  %v3449_v41 = vadd.f32 %v13888_v60, %v3429_v32 }
 0x87c   : > { %v3431_v48 = vmul.f32 %v13883_v40, %v3411_v58  ;;  %v3464_v51 = vpack.c.bf16 %v3449_v41, %v3448_v21  ;;  %v3450_v59 = vadd.f32 %v13888_v60, %v3430_v44  ;;  %v10501_v44 = vld [vmem:[%s17497_s9 + $0x20] sm:$0xff]  }
 0x87e   : > { %3665 = vmatmul.mubr.bf16.vlgmr.msra.gmra.mrb[16].mxu0 %v3464_v51  ;;  %9557 = vmatprep.mubr.bf16.mxu1 %v3464_v51  ;;  %v3451_v17 = vadd.f32 %v13888_v60, %v3431_v48 }
 0x87f   : > { %3674 = vmatprep.mubr.bf16.mxu0 %v11374_v31 }
 0x880   : > { %v3465_v62 = vpack.c.bf16 %v3451_v17, %v3450_v59 }
 0x881   : > { %v3337_v18 = vpop.xlane.xlu0 %3336 }
 0x882   : > { %v3364_v5 = vmul.f32 0.0078125, %v3337_v18  ;;  %9558 = vmatmul.mubr.bf16.vlgmr.msra.gmra.mrb[16].mxu1 %v3465_v62 }
 0x883   : > { %v3339_v14 = vpop.xlane.xlu1 %3338  ;;  %9574 = vmatpush3.bf16.msra.mxu1 %v10497_v50 }
 0x884   : > { %v3380_v53 = vadd.f32 1e-05, %v3364_v5  ;;  %v3365_v9 = vmul.f32 0.0078125, %v3339_v14  ;;  %9575 = vmatprep.subr.bf16.mxu1 %v10498_v3 }
 0x885   : > { %v3341_v16 = vpop.xlane.xlu0 %3340 }
 0x886   : > { %10633 = vrsqrt.f32 %v3380_v53  ;;  %v3381_v11 = vadd.f32 1e-05, %v3365_v9  ;;  %v3366_v47 = vmul.f32 0.0078125, %v3341_v16  ;;  %3675 = vmatmul.mubr.bf16.gmra.mrb[20].mxu0 %v3465_v62  ;;  %v10502_v53 = vld [vmem:[%s17497_s9 + $0x28] sm:$0xff]  }
 0x887   : > { %v3343_v57 = vpop.xlane.xlu1 %3342  ;;  %9576 = vmatpush3.bf16.msra.mxu1 %v10498_v3  ;;  %3684 = vmatprep.mubr.bf16.mxu0 %v11374_v31 }
 0x888   : > { %10635 = vrsqrt.f32 %v3381_v11  ;;  %v3382_v7 = vadd.f32 1e-05, %v3366_v47  ;;  %v3367_v10 = vmul.f32 0.0078125, %v3343_v57  ;;  %9577 = vmatprep.subr.bf16.mxu1 %v10499_v29  ;;  %v10503_v57 = vld [vmem:[%s17497_s9 + $0x30] sm:$0xff]  }
 0x88a   : > { %10637 = vrsqrt.f32 %v3382_v7  ;;  %v3383_v20 = vadd.f32 1e-05, %v3367_v10 }
 0x88b   : > { %9578 = vmatpush3.bf16.msra.mxu1 %v10499_v29 }
 0x88c   : > { %10639 = vrsqrt.f32 %v3383_v20  ;;  %9579 = vmatprep.subr.bf16.mxu1 %v10500_v42 }
 0x88f   : > { %9580 = vmatpush3.bf16.msra.mxu1 %v10500_v42  ;;  %v10504_v42 = vld [vmem:[%s17497_s9 + $0x38] sm:$0xff]  }
 0x890   : > { %v10634_v54 = vpop.eup %10633  ;;  %9581 = vmatprep.subr.bf16.mxu1 %v10501_v44 }
 0x891   : > { %v3412_v32 = vmul.f32 %v10634_v54, %v13816_v45 }
 0x892   : > { %v10636_v1 = vpop.eup %10635 }
 0x893   : > { %v3413_v50 = vmul.f32 %v10636_v1, %v13819_v28  ;;  %v3432_v61 = vmul.f32 %v13883_v40, %v3412_v32  ;;  %9582 = vmatpush3.bf16.msra.mxu1 %v10501_v44 }
 0x894   : > { %v10638_v58 = vpop.eup %10637  ;;  %9583 = vmatprep.subr.bf16.mxu1 %v10502_v53 }
 0x895   : > { %v3433_v18 = vmul.f32 %v13883_v40, %v3413_v50  ;;  %v3414_v21 = vmul.f32 %v10638_v58, %v13824_v13  ;;  %v3452_v45 = vadd.f32 %v13888_v60, %v3432_v61 }
 0x896   : > { %v10640_v41 = vpop.eup %10639 }
 0x897   : > { %v3453_v48 = vadd.f32 %v13888_v60, %v3433_v18  ;;  %v3415_v28 = vmul.f32 %v10640_v41, %v13829_v6  ;;  %v3434_v14 = vmul.f32 %v13883_v40, %v3414_v21  ;;  %9584 = vmatpush3.bf16.msra.mxu1 %v10502_v53 }
 0x898   : > { %9585 = vmatprep.subr.bf16.mxu1 %v10503_v57 }
 0x899   : > { %v3466_v16 = vpack.c.bf16 %v3453_v48, %v3452_v45  ;;  %v3435_v13 = vmul.f32 %v13883_v40, %v3415_v28  ;;  %v3454_v47 = vadd.f32 %v13888_v60, %v3434_v14 }
 0x89b   : > { %9561 = vmatprep.mubr.bf16.mxu1 %v3466_v16  ;;  %v3455_v6 = vadd.f32 %v13888_v60, %v3435_v13  ;;  %3685 = vmatmul.mubr.bf16.gmra.mrb[24].mxu0 %v3466_v16 }
 0x89c   : > { %3694 = vmatprep.mubr.bf16.mxu0 %v11374_v31  ;;  %9586 = vmatpush3.bf16.msra.mxu1 %v10503_v57 }
 0x89d   : > { %v3345_v5 = vpop.xlane.xlu0 %3344  ;;  %v3467_v10 = vpack.c.bf16 %v3455_v6, %v3454_v47  ;;  %9587 = vmatprep.subr.bf16.mxu1 %v10504_v42 }
 0x89e   : > { %v3368_v51 = vmul.f32 0.0078125, %v3345_v5 }
 0x89f   : > { %v3347_v9 = vpop.xlane.xlu1 %3346  ;;  %9562 = vmatmul.mubr.bf16.gmra.mrb[20].mxu1 %v3467_v10 }
 0x8a0   : > { %v3384_v59 = vadd.f32 1e-05, %v3368_v51  ;;  %v3369_v17 = vmul.f32 0.0078125, %v3347_v9  ;;  %9588 = vmatpush3.bf16.msra.mxu1 %v10504_v42 }
 0x8a1   : > { %v3349_v11 = vpop.xlane.xlu0 %3348 }
 0x8a2   : > { %10641 = vrsqrt.f32 %v3384_v59  ;;  %v3385_v62 = vadd.f32 1e-05, %v3369_v17  ;;  %v3370_v3 = vmul.f32 0.0078125, %v3349_v11 }
 0x8a3   : > { %v3351_v7 = vpop.xlane.xlu1 %3350  ;;  %3695 = vmatmul.mubr.bf16.gmra.mrb[28].mxu0 %v3467_v10 }
 0x8a4   : > { %10643 = vrsqrt.f32 %v3385_v62  ;;  %v3386_v20 = vadd.f32 1e-05, %v3370_v3  ;;  %v3371_v29 = vmul.f32 0.0078125, %v3351_v7  ;;  %3704 = vmatprep.mubr.bf16.mxu0 %v11374_v31 }
 0x8a6   : > { %10645 = vrsqrt.f32 %v3386_v20  ;;  %v3387_v54 = vadd.f32 1e-05, %v3371_v29 }
 0x8a8   : > { %10647 = vrsqrt.f32 %v3387_v54 }
 0x8ac   : > { %v10642_v32 = vpop.eup %10641 }
 0x8ad   : > { %v3416_v1 = vmul.f32 %v10642_v32, %v13836_v56 }
 0x8ae   : > { %v10644_v50 = vpop.eup %10643 }
 0x8af   : > { %v3417_v61 = vmul.f32 %v10644_v50, %v13839_v2  ;;  %v3436_v44 = vmul.f32 %v13883_v40, %v3416_v1 }
 0x8b0   : > { %v10646_v58 = vpop.eup %10645 }
 0x8b1   : > { %v3437_v18 = vmul.f32 %v13883_v40, %v3417_v61  ;;  %v3418_v21 = vmul.f32 %v10646_v58, %v13844_v4  ;;  %v3456_v5 = vadd.f32 %v13888_v60, %v3436_v44 }
 0x8b2   : > { %v10648_v41 = vpop.eup %10647 }
 0x8b3   : > { %v3457_v45 = vadd.f32 %v13888_v60, %v3437_v18  ;;  %v3419_v48 = vmul.f32 %v10648_v41, %v13849_v38  ;;  %v3438_v28 = vmul.f32 %v13883_v40, %v3418_v21  ;;  %v3843_v21 = vld [vmem:[#allocation11 + $0x8] sm:$0xff] }
 0x8b5   : > { %v3468_v14 = vpack.c.bf16 %v3457_v45, %v3456_v5  ;;  %v3439_v2 = vmul.f32 %v13883_v40, %v3419_v48  ;;  %v3458_v9 = vadd.f32 %v13888_v60, %v3438_v28  ;;  %v3845_v48 = vld [vmem:[#allocation11 + $0x18] sm:$0xff]  ;;  %v3846_v28 = vld [vmem:[#allocation11 + $0x20] sm:$0xff] }
 0x8b7   : > { %v3353_v56 = vpop.xlane.xlu0 %3352  ;;  %9565 = vmatprep.mubr.bf16.mxu1 %v3468_v14  ;;  %v3459_v4 = vadd.f32 %v13888_v60, %v3439_v2  ;;  %3705 = vmatmul.mubr.bf16.gmra.mrb[32].mxu0 %v3468_v14  ;;  %v3848_v2 = vld [vmem:[#allocation11 + $0x30] sm:$0xff] }
 0x8b8   : > { %v3372_v51 = vmul.f32 0.0078125, %v3353_v56  ;;  %3714 = vmatprep.mubr.bf16.mxu0 %v11374_v31  ;;  %v3847_v56 = vld [vmem:[#allocation11 + $0x28] sm:$0xff] }
 0x8b9   : > { %v3355_v53 = vpop.xlane.xlu1 %3354  ;;  %v3469_v38 = vpack.c.bf16 %v3459_v4, %v3458_v9 }
 0x8ba   : > { %v3388_v16 = vadd.f32 1e-05, %v3372_v51  ;;  %v3373_v13 = vmul.f32 0.0078125, %v3355_v53  ;;  %v3849_v51 = vld [vmem:[#allocation11 + $0x38] sm:$0xff]  ;;  %v3850_v53 = vld [vmem:[#allocation11 + $0x40] sm:$0xff] }
 0x8bb   : > { %v3357_v59 = vpop.xlane.xlu0 %3356  ;;  %9566 = vmatmul.mubr.bf16.gmra.mrb[24].mxu1 %v3469_v38  ;;  %v3861_v9 = vpack.c.bf16 %v3849_v51, %v3848_v2 }
 0x8bc   : > { %10649 = vrsqrt.f32 %v3388_v16  ;;  %v3389_v17 = vadd.f32 1e-05, %v3373_v13  ;;  %v3374_v11 = vmul.f32 0.0078125, %v3357_v59  ;;  %v3853_v16 = vld [vmem:[#allocation11 + $0x58] sm:$0xff]  ;;  %v3854_v13 = vld [vmem:[#allocation11 + $0x60] sm:$0xff]  ;;  %v3855_v59 = vld [vmem:[#allocation11 + $0x68] sm:$0xff] }
 0x8bd   : > { %v3359_v47 = vpop.xlane.xlu1 %3358 }
 0x8be   : > { %10651 = vrsqrt.f32 %v3389_v17  ;;  %v3390_v6 = vadd.f32 1e-05, %v3374_v11  ;;  %v3375_v57 = vmul.f32 0.0078125, %v3359_v47  ;;  %v3864_v17 = vpack.c.bf16 %v3855_v59, %v3854_v13  ;;  %v3856_v11 = vld [vmem:[#allocation11 + $0x70] sm:$0xff]  ;;  %v3857_v47 = vld [vmem:[#allocation11 + $0x78] sm:$0xff] }
 0x8bf   : > { %3715 = vmatmul.mubr.bf16.gmra.mrb[36].mxu0 %v3469_v38 }
 0x8c0   : > { %10653 = vrsqrt.f32 %v3390_v6  ;;  %v3391_v62 = vadd.f32 1e-05, %v3375_v57  ;;  %3724 = vmatprep.mubr.bf16.mxu0 %v11374_v31  ;;  %v3865_v6 = vpack.c.bf16 %v3857_v47, %v3856_v11 }
 0x8c2   : > { %10655 = vrsqrt.f32 %v3391_v62  ;;  %v13967_v62 = vld [vmem:[#allocation13 + $0x4] ss:$0 sm:$0xff] }
 0x8c6   : > { %v10650_v3 = vpop.eup %10649 }
 0x8c7   : > { %v3420_v7 = vmul.f32 %v10650_v3, %v13856_v30  ;;  %v13969_v3 = vld [vmem:[#allocation13] ss:$0 sm:$0xff] }
 0x8c8   : > { %v10652_v10 = vpop.eup %10651 }
 0x8c9   : > { %v3421_v20 = vmul.f32 %v10652_v10, %v13859_v22  ;;  %v3440_v29 = vmul.f32 %v13883_v40, %v3420_v7  ;;  %v3842_v22 = vld [vmem:[#allocation11] sm:$0xff] }
 0x8ca   : > { %v10654_v42 = vpop.eup %10653 }
 0x8cb   : > { %v3441_v54 = vmul.f32 %v13883_v40, %v3421_v20  ;;  %v3422_v32 = vmul.f32 %v10654_v42, %v13864_v55  ;;  %v3460_v50 = vadd.f32 %v13888_v60, %v3440_v29  ;;  %v3858_v55 = vpack.c.bf16 %v3843_v21, %v3842_v22 }
 0x8cc   : > { %v10656_v1 = vpop.eup %10655 }
 0x8cd   : > { %v3461_v61 = vadd.f32 %v13888_v60, %v3441_v54  ;;  %v3423_v44 = vmul.f32 %v10656_v1, %v13869_v36  ;;  %v3442_v58 = vmul.f32 %v13883_v40, %v3422_v32  ;;  %v3844_v36 = vld [vmem:[#allocation11 + $0x10] sm:$0xff] }
 0x8ce   : > { %v3859_v14 = vpack.c.bf16 %v3845_v48, %v3844_v36 }
 0x8cf   : > { %v3470_v30 = vpack.c.bf16 %v3461_v61, %v3460_v50  ;;  %v3443_v18 = vmul.f32 %v13883_v40, %v3423_v44  ;;  %v3462_v41 = vadd.f32 %v13888_v60, %v3442_v58  ;;  %v3860_v40 = vpack.c.bf16 %v3847_v56, %v3846_v28 }
 0x8d1   : > { %9569 = vmatprep.mubr.bf16.mxu1 %v3470_v30  ;;  %v3463_v5 = vadd.f32 %v13888_v60, %v3443_v18  ;;  %3725 = vmatmul.mubr.bf16.gmra.mrb[40].mxu0 %v3470_v30  ;;  %v3851_v60 = vld [vmem:[#allocation11 + $0x48] sm:$0xff] }
 0x8d2   : > { %3734 = vmatprep.mubr.bf16.mxu0 %v11374_v31  ;;  %v3862_v4 = vpack.c.bf16 %v3851_v60, %v3850_v53  ;;  %v3852_v31 = vld [vmem:[#allocation11 + $0x50] sm:$0xff] }
 0x8d3   : > { %v3471_v45 = vpack.c.bf16 %v3463_v5, %v3462_v41  ;;  %v3863_v38 = vpack.c.bf16 %v3853_v16, %v3852_v31 }
 0x8d5   : > { %9570 = vmatmul.mubr.bf16.gmra.mrb[28].mxu1 %v3471_v45 }
 0x8d6   : > { %9589 = vmatprep.mubr.bf16.mxu1 %v3858_v55 }
 0x8d9   : > { %3735 = vmatmul.mubr.bf16.gmra.mrb[44].mxu0 %v3471_v45 }
 0x8dd   : > { %9590 = vmatmul.mubr.bf16.vlgmr.msra.gmra.mrb[32].mxu1 %v3859_v14 }
 0x8de   : > { %9593 = vmatprep.mubr.bf16.mxu1 %v3860_v40 }
 0x8e5   : > { %9594 = vmatmul.mubr.bf16.gmra.mrb[36].mxu1 %v3861_v9 }
 0x8e6   : > { %9597 = vmatprep.mubr.bf16.mxu1 %v3862_v4 }
 0x8ed   : > { %9598 = vmatmul.mubr.bf16.gmra.mrb[40].mxu1 %v3863_v38 }
 0x8ee   : > { %9601 = vmatprep.mubr.bf16.mxu1 %v3864_v17 }
 0x8f5   : > { %9602 = vmatmul.mubr.bf16.gmra.mrb[44].mxu1 %v3865_v6  ;;  %v4051_v6 = vld [vmem:[%s14124_s1] sm:$0xff] }
 0x8f6   : > { %v4067_v26 = vsub.f32 1.0, %v4051_v6  ;;  %4644 = vperm.xlu1 %10327, %v4051_v6  }
 0x8f8   : > { %v4083_v15 = vmul.f32 -1e+30, %v4067_v26  ;;  %v4054_v26 = vld [vmem:[%s14124_s1 + $0x18] sm:$0xff] }
 0x951   : > { %v13965_v57 = vpop.f32.mrb[16].mxu0 }
 0x952   : > { %18030 = vst [vmem:[#allocation39_spill] sm:$0xff] %v13965_v57  ;;  %v3668_v7 = vpop.f32.mrb[17].mxu0  ;;  %v4183_v29 = vadd.f32 %v13967_v62, %v13965_v57  ;;  %v4154_v54 = vadd.f32 %v13969_v3, %v13965_v57 }
 0x953   : > { %v13971_v10 = vpop.f32.mrb[18].mxu0 }
 0x954   : > { %18031 = vst [vmem:[#allocation37_spill] sm:$0xff] %v13971_v10  ;;  %v3672_v20 = vpop.f32.mrb[19].mxu0  ;;  %v4184_v42 = vadd.f32 %v13967_v62, %v13971_v10  ;;  %v4155_v32 = vadd.f32 %v13969_v3, %v13971_v10 }
 0x955   : > { %v13981_v1 = vpack.c.bf16 %v3672_v20, %v3668_v7  ;;  %v9559_v50 = vpop.f32.mrb[16].mxu1 }
 0x956   : > { %v3779_v61 = vpop.f32.mrb[17].mxu1  ;;  %v4199_v44 = vpack.c.bf16 %v4184_v42, %v4183_v29  ;;  %v4170_v58 = vpack.c.bf16 %v4155_v32, %v4154_v54 }
 0x957   : > { %18032 = vst [vmem:[#allocation57_spill] sm:$0xff] %v13981_v1  ;;  %v9560_v30 = vpop.f32.mrb[18].mxu1  ;;  %10093 = vmatprep.subr.msk.bf16.mxu1 %vm4207_vm12, %v13981_v1  ;;  %v4506_v18 = vsel %vm4207_vm12, %v13981_v1, 0  ;;  %v4058_v1 = vld [vmem:[%s14124_s1 + $0x38] sm:$0xff] }
 0x958   : > { %v13987_v22 = vpack.c.bf16 %v9560_v30, %v9559_v50  ;;  %v3782_v21 = vpop.f32.mrb[19].mxu1  ;;  %9621 = vmatprep.mubr.msk.bf16.mxu0 %vm4207_vm12, %v4199_v44  ;;  %9638 = vmatpush3.bf16.xpose.msra.mxu1 %v4506_v18  ;;  %v4074_v34 = vsub.f32 1.0, %v4058_v1 }
 0x959   : > { %v13990_v41 = vpack.c.bf16 %v3782_v21, %v3779_v61  ;;  %9653 = vmatprep.mubr.msk.bf16.mxu1 %vm4207_vm12, %v4170_v58  ;;  %v13993_v5 = vpop.f32.mrb[20].mxu0 }
 0x95a   : > { %18033 = vst [vmem:[#allocation58_spill] sm:$0xff] %v13987_v22  ;;  %18035 = vst [vmem:[#allocation60_spill] sm:$0xff] %v13993_v5  ;;  %v3678_v55 = vpop.f32.mrb[21].mxu0  ;;  %v13999_v48 = vadd.f32 %v13969_v3, %v13993_v5  ;;  %v14007_v56 = vadd.f32 %v13967_v62, %v13993_v5 }
 0x95b   : > { %18034 = vst [vmem:[#allocation59_spill] sm:$0xff] %v13990_v41  ;;  %v13995_v45 = vpop.f32.mrb[22].mxu0 }
 0x95c   : > { %18036 = vst [vmem:[#allocation61_spill] sm:$0xff] %v13995_v45  ;;  %v3682_v36 = vpop.f32.mrb[23].mxu0  ;;  %v14003_v28 = vadd.f32 %v13969_v3, %v13995_v45  ;;  %v14011_v14 = vadd.f32 %v13967_v62, %v13995_v45 }
 0x95d   : > { %v14013_v40 = vpack.c.bf16 %v3682_v36, %v3678_v55 }
 0x95f   : > { %18037 = vst [vmem:[#allocation62_spill] sm:$0xff] %v14013_v40  ;;  %10094 = vmatprep.subr.msk.bf16.mxu1 %vm4207_vm12, %v14013_v40  ;;  %v4509_v53 = vsel %vm4207_vm12, %v14013_v40, 0 }
 0x960   : > { %9640 = vmatpush3.bf16.xpose.msra.mxu1 %v4509_v53 }
 0x96e   : > { %v14023_v60 = vpop.f32.mrb[24].mxu0 }
 0x96f   : > { %18038 = vst [vmem:[#allocation63_spill] sm:$0xff] %v14023_v60  ;;  %v3688_v9 = vpop.f32.mrb[25].mxu0  ;;  %v14029_v16 = vadd.f32 %v13969_v3, %v14023_v60  ;;  %v14037_v59 = vadd.f32 %v13967_v62, %v14023_v60 }
 0x970   : > { %v14025_v4 = vpop.f32.mrb[26].mxu0 }
 0x971   : > { %18039 = vst [vmem:[#allocation64_spill] sm:$0xff] %v14025_v4  ;;  %v3692_v31 = vpop.f32.mrb[27].mxu0  ;;  %v14033_v13 = vadd.f32 %v13969_v3, %v14025_v4  ;;  %v14041_v38 = vadd.f32 %v13967_v62, %v14025_v4 }
 0x972   : > { %v9563_v17 = vpop.f32.mrb[20].mxu1  ;;  %v14043_v11 = vpack.c.bf16 %v3692_v31, %v3688_v9 }
 0x973   : > { %v3795_v47 = vpop.f32.mrb[21].mxu1 }
 0x974   : > { %18040 = vst [vmem:[#allocation65_spill] sm:$0xff] %v14043_v11  ;;  %v9564_v20 = vpop.f32.mrb[22].mxu1  ;;  %10095 = vmatprep.subr.msk.bf16.mxu1 %vm4207_vm12, %v14043_v11  ;;  %v4512_v29 = vsel %vm4207_vm12, %v14043_v11, 0 }
 0x975   : > { %v14053_v42 = vpack.c.bf16 %v9564_v20, %v9563_v17  ;;  %v3798_v54 = vpop.f32.mrb[23].mxu1  ;;  %9642 = vmatpush3.bf16.xpose.msra.mxu1 %v4512_v29 }
 0x976   : > { %v14055_v32 = vpack.c.bf16 %v3798_v54, %v3795_v47  ;;  %v14057_v50 = vpop.f32.mrb[28].mxu0 }
 0x977   : > { %18041 = vst [vmem:[#allocation66_spill] sm:$0xff] %v14053_v42  ;;  %18043 = vst [vmem:[#allocation68_spill] sm:$0xff] %v14057_v50  ;;  %v3698_v61 = vpop.f32.mrb[29].mxu0  ;;  %v14063_v30 = vadd.f32 %v13969_v3, %v14057_v50  ;;  %v14071_v21 = vadd.f32 %v13967_v62, %v14057_v50 }
 0x978   : > { %18042 = vst [vmem:[#allocation67_spill] sm:$0xff] %v14055_v32  ;;  %v14059_v44 = vpop.f32.mrb[30].mxu0 }
 0x979   : > { %18044 = vst [vmem:[#allocation69_spill] sm:$0xff] %v14059_v44  ;;  %v3702_v58 = vpop.f32.mrb[31].mxu0  ;;  %v14067_v18 = vadd.f32 %v13969_v3, %v14059_v44  ;;  %v14075_v55 = vadd.f32 %v13967_v62, %v14059_v44 }
 0x97a   : > { %v14077_v36 = vpack.c.bf16 %v3702_v58, %v3698_v61 }
 0x97c   : > { %18045 = vst [vmem:[#allocation70_spill] sm:$0xff] %v14077_v36  ;;  %10096 = vmatprep.subr.msk.bf16.mxu1 %vm4207_vm12, %v14077_v36  ;;  %v4515_v31 = vsel %vm4207_vm12, %v14077_v36, 0 }
 0x97d   : > { %9644 = vmatpush3.bf16.xpose.msra.mxu1 %v4515_v31 }
 0x98a   : > { %v14087_v17 = vpop.f32.mrb[32].mxu0 }
 0x98b   : > { %18046 = vst [vmem:[#allocation71_spill] sm:$0xff] %v14087_v17  ;;  %v3708_v47 = vpop.f32.mrb[33].mxu0  ;;  %v14093_v54 = vadd.f32 %v13969_v3, %v14087_v17  ;;  %v14101_v58 = vadd.f32 %v13967_v62, %v14087_v17 }
 0x98c   : > { %v14089_v20 = vpop.f32.mrb[34].mxu0 }
 0x98d   : > { %18047 = vst [vmem:[#allocation72_spill] sm:$0xff] %v14089_v20  ;;  %v3712_v29 = vpop.f32.mrb[35].mxu0  ;;  %v14097_v61 = vadd.f32 %v13969_v3, %v14089_v20  ;;  %v14105_v31 = vadd.f32 %v13967_v62, %v14089_v20 }
 0x98e   : > { %v9567_v9 = vpop.f32.mrb[24].mxu1  ;;  %v14107_v7 = vpack.c.bf16 %v3712_v29, %v3708_v47 }
 0x98f   : > { %v3811_v51 = vpop.f32.mrb[25].mxu1 }
 0x990   : > { %18048 = vst [vmem:[#allocation73_spill] sm:$0xff] %v14107_v7  ;;  %v9568_v2 = vpop.f32.mrb[26].mxu1  ;;  %10097 = vmatprep.subr.msk.bf16.mxu1 %vm4207_vm12, %v14107_v7  ;;  %v4518_v12 = vsel %vm4207_vm12, %v14107_v7, 0 }
 0x991   : > { %v14117_v8 = vpack.c.bf16 %v9568_v2, %v9567_v9  ;;  %v3814_v52 = vpop.f32.mrb[27].mxu1  ;;  %9646 = vmatpush3.bf16.xpose.msra.mxu1 %v4518_v12  ;;  %v4053_v2 = vld [vmem:[%s14124_s1 + $0x10] sm:$0xff]  ;;  %v4052_v9 = vld [vmem:[%s14124_s1 + $0x8] sm:$0xff] }
 0x992   : > { %v14126_v47 = vpack.c.bf16 %v3814_v52, %v3811_v51  ;;  %v14128_v29 = vpop.f32.mrb[36].mxu0  ;;  %v4069_v0 = vsub.f32 1.0, %v4053_v2  ;;  %4649 = vperm.xlu0 %10328, %v4052_v9   ;;  %4654 = vperm.xlu1 %10327, %v4053_v2   ;;  %v4068_v35 = vsub.f32 1.0, %v4052_v9  ;;  %v4071_v2 = vsub.f32 1.0, %v4055_v33  ;;  %v4057_v9 = vld [vmem:[%s14124_s1 + $0x30] sm:$0xff] }
 0x993   : > { %18049 = vst [vmem:[#allocation74_spill] sm:$0xff] %v14117_v8  ;;  %18052 = vst [vmem:[#allocation76_spill] sm:$0xff] %v14128_v29  ;;  %v3718_v53 = vpop.f32.mrb[37].mxu0  ;;  %v14137_v49 = vadd.f32 %v13969_v3, %v14128_v29  ;;  %v14145_v51 = vadd.f32 %v13967_v62, %v14128_v29  ;;  %v4073_v63 = vsub.f32 1.0, %v4057_v9 }
 0x994   : > { %18051 = vst [vmem:[#allocation75_spill] sm:$0xff] %v14126_v47  ;;  %v14133_v12 = vpop.f32.mrb[38].mxu0  ;;  %v4085_v37 = vmul.f32 -1e+30, %v4069_v0  ;;  %v4056_v0 = vld [vmem:[%s14124_s1 + $0x28] sm:$0xff] }
 0x995   : > { %18053 = vst [vmem:[#allocation77_spill] sm:$0xff] %v14133_v12  ;;  %v3722_v24 = vpop.f32.mrb[39].mxu0  ;;  %v14141_v52 = vadd.f32 %v13969_v3, %v14133_v12  ;;  %v14149_v6 = vadd.f32 %v13967_v62, %v14133_v12  ;;  %v4089_v7 = vmul.f32 -1e+30, %v4073_v63 }
 0x996   : > { %v14151_v39 = vpack.c.bf16 %v3722_v24, %v3718_v53  ;;  %4740 = vperm.xlu0 %10328, %v4083_v15   ;;  %v4070_v24 = vsub.f32 1.0, %v4054_v26  ;;  %4659 = vperm.xlu1 %10327, %v4054_v26   ;;  %v4084_v53 = vmul.f32 -1e+30, %v4068_v35  ;;  %v4087_v15 = vmul.f32 -1e+30, %v4071_v2 }
 0x998   : > { %18054 = vst [vmem:[#allocation78_spill] sm:$0xff] %v14151_v39  ;;  %10098 = vmatprep.subr.msk.bf16.mxu1 %vm4207_vm12, %v14151_v39  ;;  %v4521_v23 = vsel %vm4207_vm12, %v14151_v39, 0  ;;  %v4086_v27 = vmul.f32 -1e+30, %v4070_v24  ;;  %v4072_v39 = vsub.f32 1.0, %v4056_v0 }
 0x999   : > { %9648 = vmatpush3.bf16.xpose.msra.mxu1 %v4521_v23 }
 0x99a   : > { %4750 = vperm.xlu0 %10328, %v4085_v37   ;;  %4745 = vperm.xlu1 %10327, %v4084_v53   ;;  %v4088_v11 = vmul.f32 -1e+30, %v4072_v39 }
 0x99e   : > { %4664 = vperm.xlu0 %10328, %v4055_v33   ;;  %4755 = vperm.xlu1 %10327, %v4086_v27  }
 0x9a2   : > { %4674 = vperm.xlu0 %10328, %v4057_v9   ;;  %4669 = vperm.xlu1 %10327, %v4056_v0  }
 0x9a4   : > { %v14164_v25 = vpop.f32.mrb[40].mxu0 }
 0x9a5   : > { %18055 = vst [vmem:[#allocation79_spill] sm:$0xff] %v14164_v25  ;;  %v3728_v43 = vpop.f32.mrb[41].mxu0  ;;  %v14171_v37 = vadd.f32 %v13969_v3, %v14164_v25  ;;  %v14179_v33 = vadd.f32 %v13967_v62, %v14164_v25 }
 0x9a6   : > { %v14166_v19 = vpop.f32.mrb[42].mxu0  ;;  %4760 = vperm.xlu0 %10328, %v4087_v15   ;;  %4679 = vperm.xlu1 %10327, %v4058_v1   ;;  %v4059_v1 = vld [vmem:[%s14124_s1 + $0x40] sm:$0xff] }
 0x9a7   : > { %18056 = vst [vmem:[#allocation80_spill] sm:$0xff] %v14166_v19  ;;  %v3732_v23 = vpop.f32.mrb[43].mxu0  ;;  %v14175_v35 = vadd.f32 %v13969_v3, %v14166_v19  ;;  %v14183_v27 = vadd.f32 %v13967_v62, %v14166_v19  ;;  %v4075_v12 = vsub.f32 1.0, %v4059_v1 }
 0x9a8   : > { %v9571_v26 = vpop.f32.mrb[28].mxu1  ;;  %v14185_v24 = vpack.c.bf16 %v3732_v23, %v3728_v43 }
 0x9a9   : > { %v3827_v53 = vpop.f32.mrb[29].mxu1 }
 0x9aa   : > { %18057 = vst [vmem:[#allocation81_spill] sm:$0xff] %v14185_v24  ;;  %v9572_v36 = vpop.f32.mrb[30].mxu1  ;;  %10099 = vmatprep.subr.msk.bf16.mxu1 %vm4207_vm12, %v14185_v24  ;;  %v4524_v40 = vsel %vm4207_vm12, %v14185_v24, 0  ;;  %4770 = vperm.xlu0 %10328, %v4089_v7  }
 0x9ab   : > { %v14196_v43 = vpack.c.bf16 %v9572_v36, %v9571_v26  ;;  %v3830_v23 = vpop.f32.mrb[31].mxu1  ;;  %9650 = vmatpush3.bf16.xpose.msra.mxu1 %v4524_v40  ;;  %4765 = vperm.xlu1 %10327, %v4088_v11   ;;  %v4060_v11 = vld [vmem:[%s14124_s1 + $0x48] sm:$0xff] }
 0x9ac   : > { %v14198_v2 = vpack.c.bf16 %v3830_v23, %v3827_v53  ;;  %v14200_v9 = vpop.f32.mrb[44].mxu0  ;;  %v4090_v23 = vmul.f32 -1e+30, %v4074_v34  ;;  %v4061_v53 = vld [vmem:[%s14124_s1 + $0x50] sm:$0xff] }
 0x9ad   : > { %18058 = vst [vmem:[#allocation82_spill] sm:$0xff] %v14196_v43  ;;  %18060 = vst [vmem:[#allocation84_spill] sm:$0xff] %v14200_v9  ;;  %v3738_v0 = vpop.f32.mrb[45].mxu0  ;;  %v14206_v63 = vadd.f32 %v13969_v3, %v14200_v9  ;;  %v14214_v40 = vadd.f32 %v13967_v62, %v14200_v9 }
 0x9ae   : > { %18059 = vst [vmem:[#allocation83_spill] sm:$0xff] %v14198_v2  ;;  %v14202_v19 = vpop.f32.mrb[46].mxu0  ;;  %4684 = vperm.xlu0 %10328, %v4059_v1  }
 0x9af   : > { %18061 = vst [vmem:[#allocation85_spill] sm:$0xff] %v14202_v19  ;;  %v3742_v24 = vpop.f32.mrb[47].mxu0  ;;  %v14210_v36 = vadd.f32 %v13969_v3, %v14202_v19  ;;  %v14218_v39 = vadd.f32 %v13967_v62, %v14202_v19  ;;  %4775 = vperm.xlu1 %10327, %v4090_v23   ;;  %v4091_v3 = vmul.f32 -1e+30, %v4075_v12  ;;  %v18065_v23 = vpack.c.bf16 %v14003_v28, %v13999_v48  ;;  %v4064_v28 = vld [vmem:[%s14124_s1 + $0x68] sm:$0xff] }
 0x9b0   : > { %v9591_v7 = vpop.f32.mrb[32].mxu1  ;;  %v14221_v15 = vpack.c.bf16 %v3742_v24, %v3738_v0 }
 0x9b1   : > { %v3964_v26 = vpop.f32.mrb[33].mxu1 }
 0x9b2   : > { %18062 = vst [vmem:[#allocation86_spill] sm:$0xff] %v14221_v15  ;;  %v9592_v25 = vpop.f32.mrb[34].mxu1  ;;  %10100 = vmatprep.subr.msk.bf16.mxu1 %vm4207_vm12, %v14221_v15  ;;  %v4527_v62 = vsel %vm4207_vm12, %v14221_v15, 0  ;;  %v4077_v15 = vsub.f32 1.0, %v4061_v53  ;;  %4694 = vperm.xlu0 %10328, %v4061_v53  }
 0x9b3   : > { %v14231_v24 = vpack.c.bf16 %v9592_v25, %v9591_v7  ;;  %v3967_v0 = vpop.f32.mrb[35].mxu1  ;;  %9652 = vmatpush3.bf16.xpose.msra.mxu1 %v4527_v62  ;;  %v4076_v7 = vsub.f32 1.0, %v4060_v11  ;;  %4689 = vperm.xlu1 %10327, %v4060_v11   ;;  %v4062_v62 = vld [vmem:[%s14124_s1 + $0x58] sm:$0xff] }
 0x9b4   : > { %v14234_v29 = vpack.c.bf16 %v3967_v0, %v3964_v26  ;;  %v4093_v0 = vmul.f32 -1e+30, %v4077_v15  ;;  %v4078_v9 = vsub.f32 1.0, %v4062_v62 }
 0x9b5   : > { %18063 = vst [vmem:[#allocation87_spill] sm:$0xff] %v14231_v24  ;;  %v4092_v11 = vmul.f32 -1e+30, %v4076_v7  ;;  %v4236_v48 = vsel %vm4207_vm12, %v14231_v24, 0 }
 0x9b6   : > { %18064 = vst [vmem:[#allocation88_spill] sm:$0xff] %v14234_v29  ;;  %10085 = vmatprep.subr.msk.bf16.mxu0 %vm4207_vm12, %v14234_v29  ;;  %v4233_v34 = vsel %vm4207_vm12, %v14234_v29, 0  ;;  %4780 = vperm.xlu0 %10328, %v4091_v3  }
 0x9b7   : > { %9606 = vmatpush3.bf16.xpose.msra.mxu0 %v4233_v34  ;;  %v18067_v34 = vpack.c.bf16 %v14033_v13, %v14029_v16  ;;  %4699 = vperm.xlu1 %10327, %v4062_v62   ;;  %v4094_v13 = vmul.f32 -1e+30, %v4078_v9  ;;  %v14272_v62 = vld [vmem:[%s14124_s1 + $0x78] sm:$0xff] }
 0x9b8   : > { %10086 = vmatprep.subr.msk.bf16.mxu0 %vm4207_vm12, %v14231_v24  ;;  %v9595_v25 = vpop.f32.mrb[36].mxu1 }
 0x9b9   : > { %v3980_v1 = vpop.f32.mrb[37].mxu1 }
 0x9ba   : > { %v9596_v26 = vpop.f32.mrb[38].mxu1  ;;  %9654 = vmatmul.mubr.msk.bf16.vlgmr.msra.gmra.mrb[48].mxu1 %vm4207_vm12, %v18065_v23  ;;  %4790 = vperm.xlu0 %10328, %v4093_v0   ;;  %v18071_v23 = vpack.c.bf16 %v14097_v61, %v14093_v54 }
 0x9bb   : > { %v14248_v12 = vpack.c.bf16 %v9596_v26, %v9595_v25  ;;  %v3983_v53 = vpop.f32.mrb[39].mxu1  ;;  %9657 = vmatprep.mubr.msk.bf16.mxu1 %vm4207_vm12, %v18067_v34  ;;  %4785 = vperm.xlu1 %10327, %v4092_v11   ;;  %v18069_v25 = vpack.c.bf16 %v14067_v18, %v14063_v30  ;;  %v4063_v18 = vld [vmem:[%s14124_s1 + $0x60] sm:$0xff]  ;;  %v18073_v11 = vpack.c.bf16 %v14141_v52, %v14137_v49 }
 0x9bc   : > { %v14254_v19 = vpack.c.bf16 %v3983_v53, %v3980_v1  ;;  %v4080_v1 = vsub.f32 1.0, %v4064_v28  ;;  %v4079_v53 = vsub.f32 1.0, %v4063_v18  ;;  %v18077_v52 = vpack.c.bf16 %v14210_v36, %v14206_v63 }
 0x9bd   : > { %18066 = vst [vmem:[#allocation89_spill] sm:$0xff] %v14248_v12  ;;  %v4242_v49 = vsel %vm4207_vm12, %v14248_v12, 0  ;;  %v18078_v36 = vpack.c.bf16 %v14011_v14, %v14007_v56  ;;  %v18081_v56 = vpack.c.bf16 %v14105_v31, %v14101_v58  ;;  %v18082_v14 = vpack.c.bf16 %v14149_v6, %v14145_v51 }
 0x9be   : > { %18068 = vst [vmem:[#allocation90_spill] sm:$0xff] %v14254_v19  ;;  %4709 = vperm.xlu0 %10328, %v4064_v28   ;;  %v4239_v30 = vsel %vm4207_vm12, %v14254_v19, 0  ;;  %v4096_v0 = vmul.f32 -1e+30, %v4080_v1  ;;  %v18079_v1 = vpack.c.bf16 %v14041_v38, %v14037_v59  ;;  %v18083_v59 = vpack.c.bf16 %v14183_v27, %v14179_v33 }
 0x9bf   : > { %9608 = vmatpush3.bf16.xpose.msra.mxu0 %v4236_v48  ;;  %4795 = vperm.xlu1 %10327, %v4094_v13   ;;  %v14287_v48 = vld [vmem:[%s14124_s1 + $0x70] sm:$0xff]  ;;  %v18084_v38 = vpack.c.bf16 %v14218_v39, %v14214_v40  ;;  %s11393_s1 = smov 64  }
 0x9c0   : > { %10087 = vmatprep.subr.msk.bf16.mxu0 %vm4207_vm12, %v14254_v19  ;;  %v9599_v15 = vpop.f32.mrb[40].mxu1 }
 0x9c1   : > { %v3996_v16 = vpop.f32.mrb[41].mxu1 }
 0x9c2   : > { %v9600_v3 = vpop.f32.mrb[42].mxu1  ;;  %9658 = vmatmul.mubr.msk.bf16.gmra.mrb[52].mxu1 %vm4207_vm12, %v18069_v25  ;;  %4719 = vperm.xlu0 %10328, %v14272_v62  }
 0x9c3   : > { %v14265_v7 = vpack.c.bf16 %v9600_v3, %v9599_v15  ;;  %v3999_v26 = vpop.f32.mrb[43].mxu1  ;;  %9661 = vmatprep.mubr.msk.bf16.mxu1 %vm4207_vm12, %v18071_v23  ;;  %4704 = vperm.xlu1 %10327, %v4063_v18   ;;  %v4095_v3 = vmul.f32 -1e+30, %v4079_v53  ;;  %v4082_v53 = vsub.f32 1.0, %v14272_v62 }
 0x9c4   : > { %v14274_v9 = vpack.c.bf16 %v3999_v26, %v3996_v16  ;;  %v18075_v16 = vpack.c.bf16 %v14175_v35, %v14171_v37  ;;  %v18080_v26 = vpack.c.bf16 %v14075_v55, %v14071_v21 }
 0x9c5   : > { %18070 = vst [vmem:[#allocation91_spill] sm:$0xff] %v14265_v7  ;;  %v4248_v35 = vsel %vm4207_vm12, %v14265_v7, 0 }
 0x9c6   : > { %18072 = vst [vmem:[#allocation92_spill] sm:$0xff] %v14274_v9  ;;  %4805 = vperm.xlu0 %10328, %v4096_v0   ;;  %v4245_v37 = vsel %vm4207_vm12, %v14274_v9, 0 }
 0x9c7   : > { %9610 = vmatpush3.bf16.xpose.msra.mxu0 %v4239_v30  ;;  %4714 = vperm.xlu1 %10327, %v14287_v48  }
 0x9c8   : > { %10088 = vmatprep.subr.msk.bf16.mxu0 %vm4207_vm12, %v14248_v12  ;;  %v9603_v54 = vpop.f32.mrb[44].mxu1 }
 0x9c9   : > { %v4012_v61 = vpop.f32.mrb[45].mxu1 }
 0x9ca   : > { %v9604_v34 = vpop.f32.mrb[46].mxu1  ;;  %9662 = vmatmul.mubr.msk.bf16.gmra.mrb[56].mxu1 %vm4207_vm12, %v18073_v11 }
 0x9cb   : > { %v14289_v28 = vpack.c.bf16 %v9604_v34, %v9603_v54  ;;  %v4015_v15 = vpop.f32.mrb[47].mxu1  ;;  %9665 = vmatprep.mubr.msk.bf16.mxu1 %vm4207_vm12, %v18075_v16  ;;  %4800 = vperm.xlu1 %10327, %v4095_v3  }
 0x9cc   : > { %v14295_v13 = vpack.c.bf16 %v4015_v15, %v4012_v61  ;;  %v4098_v15 = vmul.f32 -1e+30, %v4082_v53 }
 0x9cd   : > { %18074 = vst [vmem:[#allocation93_spill] sm:$0xff] %v14289_v28  ;;  %v4254_v63 = vsel %vm4207_vm12, %v14289_v28, 0 }
 0x9ce   : > { %18076 = vst [vmem:[#allocation94_spill] sm:$0xff] %v14295_v13  ;;  %v4251_v25 = vsel %vm4207_vm12, %v14295_v13, 0 }
 0x9cf   : > { %9612 = vmatpush3.bf16.xpose.msra.mxu0 %v4242_v49  ;;  %v4081_v49 = vsub.f32 1.0, %v14287_v48 }
 0x9d0   : > { %10089 = vmatprep.subr.msk.bf16.mxu0 %vm4207_vm12, %v14274_v9 }
 0x9d1   : > { %v4097_v62 = vmul.f32 -1e+30, %v4081_v49 }
 0x9d2   : > { %9666 = vmatmul.mubr.msk.bf16.gmra.mrb[60].mxu1 %vm4207_vm12, %v18077_v52  ;;  %v9086_v52 = vld [vmem:[#allocation13 + $0x5] ss:$0 sm:$0xff] }
 0x9d7   : > { %9614 = vmatpush3.bf16.xpose.msra.mxu0 %v4245_v37 }
 0x9d8   : > { %10090 = vmatprep.subr.msk.bf16.mxu0 %vm4207_vm12, %v14265_v7  ;;  %v14487_v7 = vadd.s32 8, %v11926_v46 }
 0x9da   : > { %18117 = vst [vmem:[#allocation126_spill] sm:$0xff] %v14487_v7 }
 0x9df   : > { %9616 = vmatpush3.bf16.xpose.msra.mxu0 %v4248_v35 }
 0x9e0   : > { %10091 = vmatprep.subr.msk.bf16.mxu0 %vm4207_vm12, %v14295_v13  ;;  %v18115_v13 = vlaneseq }
 0x9e7   : > { %9618 = vmatpush3.bf16.xpose.msra.mxu0 %v4251_v25 }
 0x9e8   : > { %10092 = vmatprep.subr.msk.bf16.mxu0 %vm4207_vm12, %v14289_v28  ;;  %v14481_v28 = vand.u32 127, %v18115_v13 }
 0x9ea   : > { %vm17710_vm1 = vcmp.le.s32.totalorder %v14481_v28, %v14487_v7  ;;  %vm17699_vm2 = vcmp.le.s32.totalorder %v14481_v28, %v11926_v46 }
 0x9ef   : > { %9620 = vmatpush3.bf16.xpose.msra.mxu0 %v4254_v63 }
 0x9f0   : > { %9669 = vmatprep.subr.bf16.mxu0 %v13990_v41 }
 0x9f6   : > { %9622 = vmatmul.mubr.msk.bf16.vlgmr.msra.gmra.mrb[48].mxu0 %vm4207_vm12, %v18078_v36 }
 0x9f7   : > { %9625 = vmatprep.mubr.msk.bf16.mxu0 %vm4207_vm12, %v18079_v1  ;;  %9670 = vmatpush3.bf16.msra.mxu0 %v13990_v41 }
 0x9f8   : > { %9671 = vmatprep.subr.bf16.mxu0 %v13987_v22 }
 0x9fb   : > { %9672 = vmatpush3.bf16.msra.mxu0 %v13987_v22 }
 0x9fc   : > { %9673 = vmatprep.subr.bf16.mxu0 %v14055_v32 }
 0x9fe   : > { %9626 = vmatmul.mubr.msk.bf16.gmra.mrb[52].mxu0 %vm4207_vm12, %v18080_v26 }
 0x9ff   : > { %9629 = vmatprep.mubr.msk.bf16.mxu0 %vm4207_vm12, %v18081_v56  ;;  %9674 = vmatpush3.bf16.msra.mxu0 %v14055_v32  ;;  %v14407_v56 = vpop.permute.xlu1 %4644 }
 0xa00   : > { %9675 = vmatprep.subr.bf16.mxu0 %v14053_v42  ;;  %18085 = vst [vmem:[#allocation95_spill] sm:$0xff] %v14407_v56 }
 0xa03   : > { %9676 = vmatpush3.bf16.msra.mxu0 %v14053_v42 }
 0xa04   : > { %9677 = vmatprep.subr.bf16.mxu0 %v14126_v47 }
 0xa06   : > { %9630 = vmatmul.mubr.msk.bf16.gmra.mrb[56].mxu0 %vm4207_vm12, %v18082_v14 }
 0xa07   : > { %9633 = vmatprep.mubr.msk.bf16.mxu0 %vm4207_vm12, %v18083_v59  ;;  %9678 = vmatpush3.bf16.msra.mxu0 %v14126_v47 }
 0xa08   : > { %9679 = vmatprep.subr.bf16.mxu0 %v14117_v8 }
 0xa0b   : > { %9680 = vmatpush3.bf16.msra.mxu0 %v14117_v8 }
 0xa0c   : > { %9681 = vmatprep.subr.bf16.mxu0 %v14198_v2 }
 0xa0e   : > { %9634 = vmatmul.mubr.msk.bf16.gmra.mrb[60].mxu0 %vm4207_vm12, %v18084_v38 }
 0xa0f   : > { %9682 = vmatpush3.bf16.msra.mxu0 %v14198_v2 }
 0xa10   : > { %9683 = vmatprep.subr.bf16.mxu0 %v14196_v43 }
 0xa11   : > { %v14414_v53 = vpop.permute.xlu1 %4654 }
 0xa12   : > { %18086 = vst [vmem:[#allocation96_spill] sm:$0xff] %v14414_v53 }
 0xa13   : > { %9684 = vmatpush3.bf16.msra.mxu0 %v14196_v43 }
 0xa8d   : > { %v14364_v21 = vpop.f32.mrb[48].mxu1 }
 0xa8e   : > { %v14366_v55 = vpop.f32.mrb[49].mxu1 }
 0xa8f   : > { %v14368_v58 = vpop.f32.mrb[50].mxu1 }
 0xa90   : > { %v14370_v31 = vpop.f32.mrb[51].mxu1 }
 0xa95   : > { %v14372_v51 = vpop.f32.mrb[52].mxu1 }
 0xa96   : > { %v14374_v6 = vpop.f32.mrb[53].mxu1 }
 0xa97   : > { %v14376_v33 = vpop.f32.mrb[54].mxu1 }
 0xa98   : > { %v14378_v27 = vpop.f32.mrb[55].mxu1 }
 0xa9d   : > { %v14380_v40 = vpop.f32.mrb[56].mxu1 }
 0xa9e   : > { %v14382_v39 = vpop.f32.mrb[57].mxu1 }
 0xa9f   : > { %v14384_v23 = vpop.f32.mrb[58].mxu1 }
 0xaa0   : > { %v14386_v30 = vpop.f32.mrb[59].mxu1 }
 0xaa5   : > { %v14388_v18 = vpop.f32.mrb[60].mxu1 }
 0xaa6   : > { %v14390_v0 = vpop.f32.mrb[61].mxu1 }
 0xaa7   : > { %v14392_v54 = vpop.f32.mrb[62].mxu1 }
 0xaa8   : > { %v14394_v61 = vpop.f32.mrb[63].mxu1 }
 0xac9   : > { %v9623_v34 = vpop.f32.mrb[48].mxu0 }
 0xaca   : > { %4363 = vrot.lane.b32.xlu1 %v9623_v34, %s11375_s16  ;;  %v4290_v11 = vpop.f32.mrb[49].mxu0 }
 0xacb   : > { %4355 = vrot.lane.b32.xlu0 %v4290_v11, %s11376_s18  ;;  %v9624_v16 = vpop.f32.mrb[50].mxu0  ;;  %v14418_v11 = vpop.permute.xlu1 %4659 }
 0xacc   : > { %v4293_v3 = vpop.f32.mrb[51].mxu0  ;;  %18087 = vst [vmem:[#allocation97_spill] sm:$0xff] %v14418_v11 }
 0xace   : > { %4367 = vrot.lane.b32.xlu1 %v9624_v16, %s11377_s12  ;;  %v14426_v16 = vpop.permute.xlu0 %4649 }
 0xacf   : > { %4815 = vperm.xlu0 %10328, %v4098_v15   ;;  %v14424_v15 = vpop.permute.xlu1 %4745  ;;  %18089 = vst [vmem:[#allocation99_spill] sm:$0xff] %v14426_v16 }
 0xad0   : > { %18088 = vst [vmem:[#allocation98_spill] sm:$0xff] %v14424_v15 }
 0xad1   : > { %v9627_v37 = vpop.f32.mrb[52].mxu0 }
 0xad2   : > { %4359 = vrot.lane.b32.xlu1 %v4293_v3, %s11378_s22  ;;  %v4306_v35 = vpop.f32.mrb[53].mxu0  ;;  %v14431_v49 = vpop.permute.xlu0 %4740 }
 0xad3   : > { %5122 = vrot.lane.b32.xlu0 %v9086_v52, %s11379_s0  ;;  %v9628_v25 = vpop.f32.mrb[54].mxu0  ;;  %v14429_v3 = vpop.permute.xlu1 %4755  ;;  %18091 = vst [vmem:[#allocation101_spill] sm:$0xff] %v14431_v49 }
 0xad4   : > { %v4309_v63 = vpop.f32.mrb[55].mxu0  ;;  %18090 = vst [vmem:[#allocation100_spill] sm:$0xff] %v14429_v3 }
 0xad6   : > { %4810 = vperm.xlu1 %10327, %v4097_v62  }
 0xad7   : > { %4371 = vrot.lane.b32.xlu0 %v4306_v35, %s11380_s6  ;;  %v14433_v52 = vpop.permute.xlu1 %4669 }
 0xad8   : > { %18092 = vst [vmem:[#allocation102_spill] sm:$0xff] %v14433_v52 }
 0xad9   : > { %v9631_v48 = vpop.f32.mrb[56].mxu0 }
 0xada   : > { %5181 = vrot.lane.b32.xlu1 %v14234_v29, %s11381_s29  ;;  %v4322_v36 = vpop.f32.mrb[57].mxu0 }
 0xadb   : > { %4383 = vrot.lane.b32.xlu0 %v9628_v25, %s11382_s20  ;;  %v9632_v1 = vpop.f32.mrb[58].mxu0  ;;  %v14437_v62 = vpop.permute.xlu1 %4679 }
 0xadc   : > { %v4325_v26 = vpop.f32.mrb[59].mxu0  ;;  %18094 = vst [vmem:[#allocation104_spill] sm:$0xff] %v14437_v62 }
 0xade   : > { %5183 = vrot.lane.b32.xlu1 %v14231_v24, %s11381_s29  ;;  %v14478_v24 = vadd.s32 16, %v11926_v46 }
 0xadf   : > { %4375 = vrot.lane.b32.xlu0 %v4309_v63, %s11383_s26  ;;  %v14441_v25 = vpop.permute.xlu1 %4765 }
 0xae0   : > { %18096 = vst [vmem:[#allocation106_spill] sm:$0xff] %v14441_v25  ;;  %18114 = vst [vmem:[#allocation124_spill] sm:$0xff] %v14478_v24  ;;  %v14484_v9 = vadd.s32 1, %v14478_v24  ;;  %vm17713_vm14 = vcmp.le.s32.totalorder %v14481_v28, %v14478_v24 }
 0xae1   : > { %v9635_v14 = vpop.f32.mrb[60].mxu0 }
 0xae2   : > { %4379 = vrot.lane.b32.xlu1 %v9627_v37, %s11384_s24  ;;  %v4338_v59 = vpop.f32.mrb[61].mxu0  ;;  %v14435_v37 = vpop.permute.xlu0 %4750  ;;  %18116 = vst [vmem:[#allocation125_spill] sm:$0xff] %v14484_v9  ;;  %vm17738_vm13 = vcmp.eq.s32.totalorder %v14481_v28, %v14484_v9 }
 0xae3   : > { %4399 = vrot.lane.b32.xlu0 %v9632_v1, %s11385_s27  ;;  %v9636_v38 = vpop.f32.mrb[62].mxu0  ;;  %18093 = vst [vmem:[#allocation103_spill] sm:$0xff] %v14435_v37 }
 0xae4   : > { %v4341_v34 = vpop.f32.mrb[63].mxu0 }
 0xae6   : > { %4395 = vrot.lane.b32.xlu1 %v9631_v48, %s11386_s4  ;;  %v14439_v35 = vpop.permute.xlu0 %4664  ;;  %v14445_v48 = vpop.permute.xlu1 %4775 }
 0xae7   : > { %4391 = vrot.lane.b32.xlu0 %v4325_v26, %s11387_s17  ;;  %18095 = vst [vmem:[#allocation105_spill] sm:$0xff] %v14439_v35  ;;  %18098 = vst [vmem:[#allocation108_spill] sm:$0xff] %v14445_v48 }
 0xaea   : > { %4387 = vrot.lane.b32.xlu1 %v4322_v36, %s11388_s19  ;;  %v14443_v63 = vpop.permute.xlu0 %4674  ;;  %v14449_v1 = vpop.permute.xlu1 %4689 }
 0xaeb   : > { %4415 = vrot.lane.b32.xlu0 %v9636_v38, %s11389_s30  ;;  %18097 = vst [vmem:[#allocation107_spill] sm:$0xff] %v14443_v63  ;;  %18100 = vst [vmem:[#allocation110_spill] sm:$0xff] %v14449_v1 }
 0xaee   : > { %4411 = vrot.lane.b32.xlu1 %v9635_v14, %s11390_s21  ;;  %v14447_v36 = vpop.permute.xlu0 %4760  ;;  %v14453_v14 = vpop.permute.xlu1 %4699 }
 0xaef   : > { %4407 = vrot.lane.b32.xlu0 %v4341_v34, %s11391_s28  ;;  %18099 = vst [vmem:[#allocation109_spill] sm:$0xff] %v14447_v36  ;;  %18102 = vst [vmem:[#allocation112_spill] sm:$0xff] %v14453_v14 }
 0xaf2   : > { %4403 = vrot.lane.b32.xlu1 %v4338_v59, %s11392_s23  ;;  %v14451_v26 = vpop.permute.xlu0 %4770  ;;  %v14457_v38 = vpop.permute.xlu1 %4785 }
 0xaf3   : > { %18101 = vst [vmem:[#allocation111_spill] sm:$0xff] %v14451_v26  ;;  %18104 = vst [vmem:[#allocation114_spill] sm:$0xff] %v14457_v38 }
 0xaf6   : > { %v14455_v59 = vpop.permute.xlu0 %4684  ;;  %v14461_v43 = vpop.permute.xlu1 %4795 }
 0xaf7   : > { %18103 = vst [vmem:[#allocation113_spill] sm:$0xff] %v14455_v59  ;;  %18106 = vst [vmem:[#allocation116_spill] sm:$0xff] %v14461_v43 }
 0xafa   : > { %v14459_v34 = vpop.permute.xlu0 %4694  ;;  %v14465_v8 = vpop.permute.xlu1 %4704 }
 0xafb   : > { %18105 = vst [vmem:[#allocation115_spill] sm:$0xff] %v14459_v34  ;;  %18108 = vst [vmem:[#allocation118_spill] sm:$0xff] %v14465_v8  ;;  %v14500_v8 = vadd.s32 1, %v14487_v7 }
 0xafd   : > { %18120 = vst [vmem:[#allocation129_spill] sm:$0xff] %v14500_v8  ;;  %vm17711_vm0 = vcmp.eq.s32.totalorder %v14481_v28, %v14500_v8 }
 0xafe   : > { %v14463_v2 = vpop.permute.xlu0 %4780  ;;  %v14469_v42 = vpop.permute.xlu1 %4714 }
 0xaff   : > { %18107 = vst [vmem:[#allocation117_spill] sm:$0xff] %v14463_v2  ;;  %18110 = vst [vmem:[#allocation120_spill] sm:$0xff] %v14469_v42 }
 0xb02   : > { %v14467_v47 = vpop.permute.xlu0 %4790  ;;  %v14473_v32 = vpop.permute.xlu1 %4800 }
 0xb03   : > { %18109 = vst [vmem:[#allocation119_spill] sm:$0xff] %v14467_v47  ;;  %18112 = vst [vmem:[#allocation122_spill] sm:$0xff] %v14473_v32 }
 0xb06   : > { %v14471_v41 = vpop.permute.xlu0 %4709 }
 0xb07   : > { %18111 = vst [vmem:[#allocation121_spill] sm:$0xff] %v14471_v41  ;;  %v14494_v41 = vadd.s32 1, %v11926_v46 }
 0xb09   : > { %18119 = vst [vmem:[#allocation128_spill] sm:$0xff] %v14494_v41  ;;  %vm17712_vm15 = vcmp.eq.s32.totalorder %v14481_v28, %v14494_v41 }
 0xb0a   : > { %v14475_v22 = vpop.permute.xlu0 %4719 }
 0xb0b   : > { %18113 = vst [vmem:[#allocation123_spill] sm:$0xff] %v14475_v22 }
 0xb0e   : > { %v14489_v19 = vpop.permute.xlu0 %4805 }
 0xb0f   : > { %18118 = vst [vmem:[#allocation127_spill] sm:$0xff] %v14489_v19 }
 0xb3c   : > { %v4364_v29 = vpop.permute.xlu1 %4363 }
 0xb3d   : > { %v4419_v32 = vrot.slane %v4364_v29, 1  ;;  %v14502_v22 = vpop.permute.xlu0 %4355 }
 0xb3e   : > { %v17641_v42 = vrot.slane %v14502_v22, 1 }
 0xb40   : > { %v14491_v12 = vpop.permute.xlu1 %4367 }
 0xb41   : > { %v17638_v13 = vrot.slane %v14491_v12, 1 }
 0xb43   : > { %v4445_v19 = vsel %vm1603_vm6, %v4419_v32, %v17638_v13 }
 0xb44   : > { %v4451_v43 = vsel %vm17738_vm13, 0.0, %v4445_v19  ;;  %v4360_v14 = vpop.permute.xlu1 %4359 }
 0xb45   : > { %v4418_v38 = vrot.slane %v4360_v14, 1  ;;  %v4467_v2 = vsel %vm17713_vm14, %v4364_v29, %v4451_v43 }
 0xb46   : > { %v4572_v13 = vadd.f32 %v14364_v21, %v4467_v2 }
 0xb47   : > { %v4446_v19 = vsel %vm1603_vm6, %v4418_v38, %v4419_v32  ;;  %v4447_v9 = vsel %vm1603_vm6, %v17641_v42, %v4418_v38  ;;  %v14546_v38 = vadd.s32 24, %v11926_v46 }
 0xb48   : > { %v4449_v29 = vsel %vm17712_vm15, 0.0, %v4447_v9  ;;  %v4450_v43 = vsel %vm17711_vm0, 0.0, %v4446_v19  ;;  %v4628_v2 = vmul.f32 0.17677669, %v4572_v13 }
 0xb49   : > { %v4466_v21 = vsel %vm17710_vm1, %v4360_v14, %v4450_v43  ;;  %v4465_v32 = vsel %vm17699_vm2, %v14502_v22, %v4449_v29  ;;  %18121 = vst [vmem:[#allocation130_spill] sm:$0xff] %v14546_v38  ;;  %v14555_v14 = vadd.s32 1, %v14546_v38  ;;  %vm17697_vm4 = vcmp.le.s32.totalorder %v14481_v28, %v14546_v38 }
 0xb4a   : > { %v4567_v42 = vadd.f32 %v14370_v31, %v4466_v21  ;;  %v4724_v9 = vmul.f32 %v14414_v53, %v4628_v2  ;;  %v4564_v8 = vadd.f32 %v14366_v55, %v4465_v32  ;;  %v14576_v21 = vadd.s32 40, %v11926_v46  ;;  %v18144_v53 = vld [vmem:[#allocation85_spill] sm:$0xff] }
 0xb4b   : > { %18123 = vst [vmem:[#allocation132_spill] sm:$0xff] %v14555_v14  ;;  %vm17698_vm3 = vcmp.eq.s32.totalorder %v14481_v28, %v14555_v14  ;;  %v14584_v32 = vadd.s32 80, %v11926_v46  ;;  %v14691_v14 = vadd.s32 64, %v11926_v46 }
 0xb4c   : > { %v4627_v19 = vmul.f32 0.17677669, %v4567_v42  ;;  %v14552_v13 = vadd.f32 %v14435_v37, %v4724_v9  ;;  %v4626_v7 = vmul.f32 0.17677669, %v4564_v8  ;;  %v14571_v8 = vadd.s32 32, %v11926_v46  ;;  %18128 = vst [vmem:[#allocation137_spill] sm:$0xff] %v14576_v21 }
 0xb4d   : > { %18130 = vst [vmem:[#allocation139_spill] sm:$0xff] %v14584_v32  ;;  %18162 = vst [vmem:[#allocation164_spill] sm:$0xff] %v14691_v14  ;;  %vm4111_vm10 = vcmp.le.s32.totalorder %v14481_v28, %v14584_v32  ;;  %v14718_v38 = vadd.s32 1, %v14691_v14  ;;  %vm4109_vm0 = vcmp.le.s32.totalorder %v14481_v28, %v14691_v14  ;;  %vm17732_vm14 = vcmp.le.s32.totalorder %v14481_v28, %v14576_v21 }
 0xb4e   : > { %18122 = vst [vmem:[#allocation131_spill] sm:$0xff] %v14552_v13  ;;  %4838 = vmax.xlane.f32.xlu0 %v14552_v13  ;;  %v14558_v29 = vpop.permute.xlu0 %4815  ;;  %v4723_v43 = vmul.f32 %v14426_v16, %v4627_v19  ;;  %v4722_v31 = vmul.f32 %v14407_v56, %v4626_v7  ;;  %18127 = vst [vmem:[#allocation136_spill] sm:$0xff] %v14571_v8  ;;  %v14579_v7 = vadd.s32 48, %v11926_v46 }
 0xb4f   : > { %18124 = vst [vmem:[#allocation133_spill] sm:$0xff] %v14558_v29  ;;  %18167 = vst [vmem:[#allocation169_spill] sm:$0xff] %v14718_v38  ;;  %vm17721_vm2 = vcmp.le.s32.totalorder %v14481_v28, %v14571_v8  ;;  %vm4141_vm15 = vcmp.eq.s32.totalorder %v14481_v28, %v14718_v38 }
 0xb50   : > { %v14563_v2 = vadd.f32 %v14424_v15, %v4723_v43  ;;  %v14566_v42 = vadd.f32 %v14431_v49, %v4722_v31  ;;  %18129 = vst [vmem:[#allocation138_spill] sm:$0xff] %v14579_v7  ;;  %vm17728_vm7 = vcmp.le.s32.totalorder %v14481_v28, %v14579_v7 }
 0xb52   : > { %18125 = vst [vmem:[#allocation134_spill] sm:$0xff] %v14563_v2  ;;  %18126 = vst [vmem:[#allocation135_spill] sm:$0xff] %v14566_v42  ;;  %4836 = vmax.xlane.f32.xlu0 %v14563_v2  ;;  %4834 = vmax.xlane.f32.xlu1 %v14566_v42  ;;  %v5123_v55 = vpop.permute.xlu0 %5122 }
 0xb53   : > { %v14587_v9 = vadd.f32 %v5123_v55, %v13993_v5  ;;  %v14590_v19 = vadd.f32 %v5123_v55, %v13995_v45  ;;  %v14593_v43 = vadd.f32 %v5123_v55, %v14057_v50  ;;  %v14596_v31 = vadd.f32 %v5123_v55, %v14059_v44 }
 0xb54   : > { %v14599_v15 = vadd.f32 %v5123_v55, %v13965_v57  ;;  %v14602_v49 = vadd.f32 %v5123_v55, %v13971_v10  ;;  %v14605_v16 = vadd.f32 %v5123_v55, %v14087_v17  ;;  %v14608_v56 = vadd.f32 %v5123_v55, %v14089_v20  ;;  %v18142_v10 = vld [vmem:[#allocation84_spill] sm:$0xff] }
 0xb55   : > { %18131 = vst [vmem:[#allocation140_spill] sm:$0xff] %v14587_v9  ;;  %18132 = vst [vmem:[#allocation141_spill] sm:$0xff] %v14590_v19  ;;  %v14610_v37 = vpop.permute.xlu1 %4810  ;;  %v14617_v24 = vadd.f32 %v5123_v55, %v14023_v60  ;;  %v14620_v44 = vadd.f32 %v5123_v55, %v14025_v4  ;;  %v14629_v57 = vadd.f32 %v5123_v55, %v18142_v10  ;;  %v18146_v60 = vld [vmem:[#allocation76_spill] sm:$0xff]  ;;  %v14644_v20 = vadd.s32 72, %v11926_v46  ;;  %v18151_v10 = vld [vmem:[#allocation79_spill] sm:$0xff] }
 0xb56   : > { %18133 = vst [vmem:[#allocation142_spill] sm:$0xff] %v14593_v43  ;;  %18134 = vst [vmem:[#allocation143_spill] sm:$0xff] %v14596_v31  ;;  %v14622_v50 = vpop.permute.xlu0 %4371  ;;  %v14632_v45 = vadd.f32 %v5123_v55, %v18144_v53  ;;  %v14638_v5 = vadd.f32 %v5123_v55, %v18146_v60  ;;  %v18148_v43 = vld [vmem:[#allocation77_spill] sm:$0xff]  ;;  %v14649_v53 = vadd.f32 %v5123_v55, %v18151_v10  ;;  %v18155_v4 = vrot.slane %v14491_v12, 1 }
 0xb57   : > { %18135 = vst [vmem:[#allocation144_spill] sm:$0xff] %v14599_v15  ;;  %18136 = vst [vmem:[#allocation145_spill] sm:$0xff] %v14602_v49  ;;  %v4421_v41 = vrot.slane %v14622_v50, 1  ;;  %v14641_v31 = vadd.f32 %v5123_v55, %v18148_v43  ;;  %v14661_v43 = vadd.s32 1, %v14571_v8  ;;  %v14679_v10 = vadd.s32 56, %v11926_v46 }
 0xb58   : > { %18137 = vst [vmem:[#allocation146_spill] sm:$0xff] %v14605_v16  ;;  %18138 = vst [vmem:[#allocation147_spill] sm:$0xff] %v14608_v56  ;;  %v18153_v16 = vld [vmem:[#allocation80_spill] sm:$0xff] }
 0xb59   : > { %18139 = vst [vmem:[#allocation148_spill] sm:$0xff] %v14610_v37  ;;  %18140 = vst [vmem:[#allocation149_spill] sm:$0xff] %v14617_v24  ;;  %v14652_v56 = vadd.f32 %v5123_v55, %v18153_v16  ;;  %v4444_v60 = vsel %vm1603_vm6, %v18155_v4, %v4421_v41  ;;  %v14658_v24 = vpop.permute.xlu1 %5181  ;;  %v14676_v4 = vadd.s32 1, %v14579_v7  ;;  %vm17725_vm5 = vcmp.eq.s32.totalorder %v14481_v28, %v14661_v43 }
 0xb5a   : > { %18141 = vst [vmem:[#allocation150_spill] sm:$0xff] %v14620_v44  ;;  %18143 = vst [vmem:[#allocation151_spill] sm:$0xff] %v14629_v57  ;;  %v14664_v44 = vadd.s32 1, %v14576_v21  ;;  %v4452_v55 = vsel %vm17698_vm3, 0.0, %v4444_v60  ;;  %10101 = vmatprep.subr.msk.bf16.mxu0 %vm4207_vm12, %v14658_v24  ;;  %v14673_v16 = vpop.permute.xlu0 %4383  ;;  %v14688_v60 = vadd.s32 1, %v14584_v32 }
 0xb5b   : > { %18145 = vst [vmem:[#allocation152_spill] sm:$0xff] %v14632_v45  ;;  %18147 = vst [vmem:[#allocation153_spill] sm:$0xff] %v14638_v5  ;;  %v4468_v17 = vsel %vm17697_vm4, %v14491_v12, %v4452_v55  ;;  %v14695_v5 = vadd.s32 1, %v14644_v20  ;;  %v14704_v12 = vadd.s32 112, %v11926_v46  ;;  %vm17731_vm9 = vcmp.eq.s32.totalorder %v14481_v28, %v14676_v4  ;;  %v18169_v45 = vld [vmem:[#allocation40_spill] sm:$0xff] }
 0xb5c   : > { %18149 = vst [vmem:[#allocation154_spill] sm:$0xff] %v14641_v31  ;;  %18150 = vst [vmem:[#allocation155_spill] sm:$0xff] %v14644_v20  ;;  %vm17724_vm8 = vcmp.eq.s32.totalorder %v14481_v28, %v14664_v44  ;;  %vm17739_vm11 = vcmp.eq.s32.totalorder %v14481_v28, %v14688_v60  ;;  %vm17741_vm4 = vcmp.le.s32.totalorder %v14481_v28, %v14644_v20  ;;  %v14733_v15 = vadd.s32 1, %v18169_v45 }
 0xb5d   : > { %18152 = vst [vmem:[#allocation156_spill] sm:$0xff] %v14649_v53  ;;  %18154 = vst [vmem:[#allocation157_spill] sm:$0xff] %v14652_v56  ;;  %v14697_v31 = vpop.permute.xlu1 %5183  ;;  %vm17740_vm3 = vcmp.eq.s32.totalorder %v14481_v28, %v14695_v5  ;;  %v4424_v49 = vrot.slane %v14673_v16, 1 }
 0xb5e   : > { %18156 = vst [vmem:[#allocation158_spill] sm:$0xff] %v14658_v24  ;;  %18157 = vst [vmem:[#allocation159_spill] sm:$0xff] %v14661_v43  ;;  %v4575_v24 = vadd.f32 %v14368_v58, %v4468_v17  ;;  %v4376_v55 = vpop.permute.xlu0 %4375  ;;  %v14711_v58 = vadd.s32 1, %v14679_v10 }
 0xb5f   : > { %18158 = vst [vmem:[#allocation160_spill] sm:$0xff] %v14664_v44  ;;  %18159 = vst [vmem:[#allocation161_spill] sm:$0xff] %v14676_v4  ;;  %v4422_v57 = vrot.slane %v4376_v55, 1 }
 0xb60   : > { %18160 = vst [vmem:[#allocation162_spill] sm:$0xff] %v14679_v10  ;;  %18161 = vst [vmem:[#allocation163_spill] sm:$0xff] %v14688_v60  ;;  %v4629_v17 = vmul.f32 0.17677669, %v4575_v24  ;;  %v14726_v24 = vadd.s32 104, %v11926_v46  ;;  %vm4140_vm1 = vcmp.eq.s32.totalorder %v14481_v28, %v14711_v58 }
 0xb61   : > { %18163 = vst [vmem:[#allocation165_spill] sm:$0xff] %v14695_v5  ;;  %18164 = vst [vmem:[#allocation166_spill] sm:$0xff] %v14697_v31  ;;  %v4443_v53 = vsel %vm1603_vm6, %v4421_v41, %v4422_v57  ;;  %v4380_v56 = vpop.permute.xlu1 %4379 }
 0xb62   : > { %18165 = vst [vmem:[#allocation167_spill] sm:$0xff] %v14704_v12  ;;  %18166 = vst [vmem:[#allocation168_spill] sm:$0xff] %v14711_v58  ;;  %v4725_v31 = vmul.f32 %v14418_v11, %v4629_v17  ;;  %v14736_v17 = vadd.s32 1, %v14704_v12  ;;  %v14739_v11 = vadd.s32 88, %v11926_v46  ;;  %v4453_v9 = vsel %vm17725_vm5, 0.0, %v4443_v53  ;;  %v14745_v2 = vpop.permute.xlu0 %4399 }
 0xb63   : > { %18168 = vst [vmem:[#allocation170_spill] sm:$0xff] %v14726_v24  ;;  %18170 = vst [vmem:[#allocation171_spill] sm:$0xff] %v14733_v15  ;;  %v4423_v19 = vrot.slane %v4380_v56, 1  ;;  %v14759_v53 = vadd.s32 96, %v11926_v46  ;;  %v14771_v42 = vadd.s32 1, %v14726_v24  ;;  %vm17798_vm13 = vcmp.le.s32.totalorder %v14481_v28, %v14726_v24 }
 0xb64   : > { %18171 = vst [vmem:[#allocation172_spill] sm:$0xff] %v14736_v17  ;;  %18172 = vst [vmem:[#allocation173_spill] sm:$0xff] %v14739_v11  ;;  %v14748_v41 = vadd.f32 %v14429_v3, %v4725_v31  ;;  %v4469_v31 = vsel %vm17721_vm2, %v14622_v50, %v4453_v9  ;;  %vm4148_vm2 = vcmp.eq.s32.totalorder %v14481_v28, %v14733_v15 }
 0xb65   : > { %18173 = vst [vmem:[#allocation174_spill] sm:$0xff] %v14759_v53  ;;  %v4441_v43 = vsel %vm1603_vm6, %v4423_v19, %v4424_v49  ;;  %v4442_v3 = vsel %vm1603_vm6, %v4422_v57, %v4423_v19  ;;  %18174 = vst [vmem:[#allocation175_spill] sm:$0xff] %v14771_v42  ;;  %v4580_v13 = vadd.f32 %v14374_v6, %v4469_v31  ;;  %v4396_v9 = vpop.permute.xlu1 %4395  ;;  %v14783_v57 = vadd.s32 1, %v14739_v11 }
 0xb66   : > { %4840 = vmax.xlane.f32.xlu0 %v14748_v41  ;;  %v4454_v29 = vsel %vm17724_vm8, 0.0, %v4442_v3  ;;  %v4455_v50 = vsel %vm17731_vm9, 0.0, %v4441_v43  ;;  %v17733_v6 = vrot.slane %v14745_v2, 1  ;;  %v4427_v31 = vrot.slane %v4396_v9, 1  ;;  %v4392_v8 = vpop.permute.xlu0 %4391 }
 0xb67   : > { %18175 = vst [vmem:[#allocation176_spill] sm:$0xff] %v14783_v57  ;;  %v4471_v19 = vsel %vm17728_vm7, %v4380_v56, %v4455_v50  ;;  %vm4116_vm8 = vcmp.le.s32.totalorder %v14481_v28, %v18169_v45  ;;  %vm4147_vm5 = vcmp.eq.s32.totalorder %v14481_v28, %v14736_v17  ;;  %v4470_v3 = vsel %vm17732_vm14, %v4376_v55, %v4454_v29 }
 0xb68   : > { %v4588_v43 = vadd.f32 %v14372_v51, %v4471_v19  ;;  %v4426_v44 = vrot.slane %v4392_v8, 1  ;;  %vm4115_vm7 = vcmp.le.s32.totalorder %v14481_v28, %v14704_v12  ;;  %v4583_v56 = vadd.f32 %v14378_v27, %v4470_v3 }
 0xb69   : > { %v14801_v50 = vadd.s32 1, %v14759_v53  ;;  %v4437_v7 = vsel %vm1603_vm6, %v4427_v31, %v17733_v6  ;;  %vm17744_vm9 = vcmp.eq.s32.totalorder %v14481_v28, %v14771_v42  ;;  %v4630_v29 = vmul.f32 0.17677669, %v4580_v13  ;;  %v4388_v19 = vpop.permute.xlu1 %4387  ;;  %v18227_v42 = vld [vmem:[#allocation157_spill] sm:$0xff] }
 0xb6a   : > { %vm4108_vm14 = vcmp.le.s32.totalorder %v14481_v28, %v14679_v10  ;;  %v4632_v51 = vmul.f32 0.17677669, %v4588_v43  ;;  %v4459_v27 = vsel %vm17739_vm11, 0.0, %v4437_v7  ;;  %v4438_v55 = vsel %vm1603_vm6, %v4426_v44, %v4427_v31  ;;  %v4416_v4 = vpop.permute.xlu0 %4415 }
 0xb6b   : > { %18176 = vst [vmem:[#allocation177_spill] sm:$0xff] %v14801_v50  ;;  %v4631_v3 = vmul.f32 0.17677669, %v4583_v56  ;;  %v4475_v6 = vsel %vm4111_vm10, %v4396_v9, %v4459_v27  ;;  %v4458_v13 = vsel %vm17740_vm3, 0.0, %v4438_v55  ;;  %v4425_v21 = vrot.slane %v4388_v19, 1 }
 0xb6c   : > { %vm4144_vm11 = vcmp.eq.s32.totalorder %v14481_v28, %v14783_v57  ;;  %v4604_v7 = vadd.f32 %v14380_v40, %v4475_v6  ;;  %v4474_v31 = vsel %vm17741_vm4, %v4392_v8, %v4458_v13  ;;  %v4432_v43 = vrot.slane %v4416_v4, 1 }
 0xb6d   : > { %v4728_v9 = vmul.f32 %v14443_v63, %v4632_v51  ;;  %vm17802_vm3 = vcmp.le.s32.totalorder %v14481_v28, %v14759_v53  ;;  %v4439_v56 = vsel %vm1603_vm6, %v4425_v21, %v4426_v44  ;;  %v4440_v27 = vsel %vm1603_vm6, %v4424_v49, %v4425_v21  ;;  %v4412_v13 = vpop.permute.xlu1 %4411 }
 0xb6e   : > { %v4727_v55 = vmul.f32 %v14433_v52, %v4631_v3  ;;  %v4726_v40 = vmul.f32 %v14439_v35, %v4630_v29  ;;  %v4456_v8 = vsel %vm4140_vm1, 0.0, %v4440_v27  ;;  %v4457_v6 = vsel %vm4141_vm15, 0.0, %v4439_v56  ;;  %v4408_v56 = vpop.permute.xlu0 %4407 }
 0xb6f   : > { %v18177_v51 = vrot.slane %v14502_v22, 1  ;;  %vm17808_vm4 = vcmp.eq.s32.totalorder %v14481_v28, %v14801_v50  ;;  %v4599_v49 = vadd.f32 %v14386_v30, %v4474_v31  ;;  %v4473_v21 = vsel %vm4109_vm0, %v4388_v19, %v4457_v6  ;;  %v18242_v50 = vld [vmem:[#allocation77_spill] sm:$0xff] }
 0xb70   : > { %v4431_v3 = vrot.slane %v4412_v13, 1  ;;  %v4636_v22 = vmul.f32 0.17677669, %v4604_v7  ;;  %v4596_v27 = vadd.f32 %v14382_v39, %v4473_v21  ;;  %v14860_v52 = vadd.f32 %v14451_v26, %v4728_v9  ;;  %v18244_v26 = vld [vmem:[#allocation72_spill] sm:$0xff] }
 0xb71   : > { %v4448_v44 = vsel %vm1603_vm6, %v4432_v43, %v18177_v51  ;;  %v4430_v51 = vrot.slane %v4408_v56, 1  ;;  %v14865_v31 = vadd.f32 %v14441_v25, %v4727_v55  ;;  %v14868_v19 = vadd.f32 %v14447_v36, %v4726_v40  ;;  %v4404_v55 = vpop.permute.xlu1 %4403  ;;  %v18234_v36 = vld [vmem:[#allocation61_spill] sm:$0xff] }
 0xb72   : > { %v4464_v29 = vsel %vm4148_vm2, 0.0, %v4448_v44  ;;  %v4433_v30 = vsel %vm1603_vm6, %v4431_v3, %v4432_v43  ;;  %v4472_v7 = vsel %vm4108_vm14, %v14673_v16, %v4456_v8  ;;  %4846 = vmax.xlane.f32.xlu1 %v14860_v52  ;;  %v4634_v6 = vmul.f32 0.17677669, %v4596_v27 }
 0xb73   : > { %v4480_v39 = vsel %vm4116_vm8, %v4416_v4, %v4464_v29  ;;  %v4463_v9 = vsel %vm4147_vm5, 0.0, %v4433_v30  ;;  %v4434_v43 = vsel %vm1603_vm6, %v4430_v51, %v4431_v3  ;;  %v4591_v40 = vadd.f32 %v14376_v33, %v4472_v7  ;;  %4844 = vmax.xlane.f32.xlu0 %v14865_v31 }
 0xb74   : > { %v4479_v16 = vsel %vm4115_vm7, %v4412_v13, %v4463_v9  ;;  %v4462_v4 = vsel %vm17744_vm9, 0.0, %v4434_v43  ;;  %v4429_v8 = vrot.slane %v4404_v55, 1  ;;  %v4635_v44 = vmul.f32 0.17677669, %v4599_v49 }
 0xb75   : > { %v4620_v21 = vadd.f32 %v14388_v18, %v4479_v16  ;;  %v4633_v29 = vmul.f32 0.17677669, %v4591_v40  ;;  %v4732_v3 = vmul.f32 %v14459_v34, %v4636_v22  ;;  %v4623_v33 = vadd.f32 %v14392_v54, %v4480_v39 }
 0xb76   : > { %v4435_v27 = vsel %vm1603_vm6, %v4429_v8, %v4430_v51  ;;  %v18178_v13 = vrot.slane %v14745_v2, 1  ;;  %vm17807_vm9 = vcmp.le.s32.totalorder %v14481_v28, %v14739_v11  ;;  %v4478_v18 = vsel %vm17798_vm13, %v4408_v56, %v4462_v4  ;;  %4842 = vmax.xlane.f32.xlu1 %v14868_v19  ;;  %v18236_v11 = vld [vmem:[#allocation37_spill] sm:$0xff] }
 0xb77   : > { %v4461_v54 = vsel %vm17808_vm4, 0.0, %v4435_v27  ;;  %v4729_v22 = vmul.f32 %v14437_v62, %v4633_v29  ;;  %v4640_v51 = vmul.f32 0.17677669, %v4620_v21  ;;  %v14917_v39 = vadd.f32 %v14467_v47, %v4732_v3  ;;  %v18179_v21 = vld [vmem:[#allocation117_spill] sm:$0xff]  ;;  %v18181_v27 = vld [vmem:[#allocation120_spill] sm:$0xff] }
 0xb78   : > { %v4436_v30 = vsel %vm1603_vm6, %v18178_v13, %v4429_v8  ;;  %v4477_v7 = vsel %vm17802_vm3, %v4404_v55, %v4461_v54  ;;  %v4730_v56 = vmul.f32 %v14455_v59, %v4634_v6  ;;  %v4731_v40 = vmul.f32 %v14449_v1, %v4635_v44  ;;  %v18180_v44 = vld [vmem:[#allocation114_spill] sm:$0xff]  ;;  %v18228_v47 = vld [vmem:[#allocation156_spill] sm:$0xff] }
 0xb79   : > { %v4460_v49 = vsel %vm4144_vm11, 0.0, %v4436_v30  ;;  %v4612_v9 = vadd.f32 %v14390_v0, %v4477_v7  ;;  %v14922_v43 = vadd.f32 %v14445_v48, %v4729_v22  ;;  %v4641_v55 = vmul.f32 0.17677669, %v4623_v33  ;;  %v18185_v22 = vld [vmem:[#allocation118_spill] sm:$0xff] }
 0xb7a   : > { %v4476_v16 = vsel %vm17807_vm9, %v14745_v2, %v4460_v49  ;;  %4854 = vmax.xlane.f32.xlu1 %v14917_v39  ;;  %v4615_v6 = vadd.f32 %v14394_v61, %v4478_v18  ;;  %v14934_v29 = vadd.f32 %v18179_v21, %v4730_v56  ;;  %v14937_v3 = vadd.f32 %v18180_v44, %v4731_v40  ;;  %v18182_v2 = vld [vmem:[#allocation112_spill] sm:$0xff]  ;;  %v18184_v49 = vld [vmem:[#allocation123_spill] sm:$0xff] }
 0xb7b   : > { %v4607_v4 = vadd.f32 %v14384_v23, %v4476_v16  ;;  %4848 = vmax.xlane.f32.xlu0 %v14922_v43  ;;  %v4638_v8 = vmul.f32 0.17677669, %v4612_v9  ;;  %v4736_v13 = vmul.f32 %v18181_v27, %v4640_v51  ;;  %v18183_v23 = vld [vmem:[#allocation116_spill] sm:$0xff]  ;;  %v4737_v54 = vmul.f32 %v18184_v49, %v4641_v55  ;;  %v18186_v51 = vld [vmem:[#allocation133_spill] sm:$0xff]  ;;  %v18187_v9 = vld [vmem:[#allocation122_spill] sm:$0xff] }
 0xb7c   : > { %v4639_v61 = vmul.f32 0.17677669, %v4615_v6  ;;  %v18188_v16 = vld [vmem:[#allocation121_spill] sm:$0xff]  ;;  %v18189_v6 = vld [vmem:[#allocation127_spill] sm:$0xff]  ;;  %v18194_v49 = vld [vmem:[#allocation134_spill] sm:$0xff]  ;;  %vm18293_vm4 = vcmp.le.s32.totalorder %v14481_v28, %v11926_v46 }
 0xb7d   : > { %v4637_v0 = vmul.f32 0.17677669, %v4607_v4  ;;  %v14947_v18 = vadd.f32 %v14610_v37, %v4736_v13  ;;  %v4734_v7 = vmul.f32 %v18185_v22, %v4638_v8  ;;  %v14954_v56 = vadd.f32 %v18186_v51, %v4737_v54  ;;  %v18191_v8 = vld [vmem:[#allocation90_spill] sm:$0xff]  ;;  %v18193_v51 = vld [vmem:[#allocation135_spill] sm:$0xff] }
 0xb7e   : > { %4850 = vmax.xlane.f32.xlu1 %v14934_v29  ;;  %v4735_v4 = vmul.f32 %v18188_v16, %v4639_v61 }
 0xb7f   : > { %v4733_v30 = vmul.f32 %v18182_v2, %v4637_v0  ;;  %4852 = vmax.xlane.f32.xlu0 %v14937_v3  ;;  %v14957_v40 = vadd.f32 %v18187_v9, %v4734_v7  ;;  %v18190_v0 = vld [vmem:[#allocation89_spill] sm:$0xff] }
 0xb80   : > { %v14963_v55 = vadd.f32 %v18189_v6, %v4735_v4 }
 0xb81   : > { %v14944_v33 = vadd.f32 %v18183_v23, %v4733_v30  ;;  %v18192_v30 = vld [vmem:[#allocation131_spill] sm:$0xff] }
 0xb82   : > { %4862 = vmax.xlane.f32.xlu1 %v14947_v18 }
 0xb83   : > { %4856 = vmax.xlane.f32.xlu0 %v14944_v33 }
 0xb86   : > { %4858 = vmax.xlane.f32.xlu1 %v14957_v40 }
 0xb87   : > { %4864 = vmax.xlane.f32.xlu0 %v14954_v56 }
 0xb8b   : > { %4860 = vmax.xlane.f32.xlu0 %v14963_v55 }
 0xb97   : > { %5187 = vrot.lane.b32.xlu1 %v18190_v0, %s11381_s29 }
 0xba1   : > { %5185 = vrot.lane.b32.xlu0 %v18191_v8, %s11381_s29 }
 0xbdb   : > { %v4839_v13 = vpop.xlane.xlu0 %4838 }
 0xbdc   : > { %v4868_v54 = vsub.f32 %v18192_v30, %v4839_v13 }
 0xbde   : > { %v4886_v7 = vmul.f32 1.442695, %v4868_v54 }
 0xbdf   : > { %v4835_v61 = vpop.xlane.xlu1 %4834  ;;  %v4837_v16 = vpop.xlane.xlu0 %4836 }
 0xbe0   : > { %10657 = vpow2.f32 %v4886_v7  ;;  %v4866_v9 = vsub.f32 %v18193_v51, %v4835_v61  ;;  %v4867_v4 = vsub.f32 %v18194_v49, %v4837_v16 }
 0xbe2   : > { %v4882_v6 = vmul.f32 1.442695, %v4866_v9  ;;  %v4884_v23 = vmul.f32 1.442695, %v4867_v4 }
 0xbe4   : > { %10659 = vpow2.f32 %v4882_v6 }
 0xbe5   : > { %10661 = vpow2.f32 %v4884_v23  ;;  %v18195_v23 = vld [vmem:[#allocation91_spill] sm:$0xff] }
 0xbea   : > { %v14973_v22 = vpop.eup %10657 }
 0xbeb   : > { %4918 = vadd.xlane.f32.xlu1 %v14973_v22 }
 0xbee   : > { %v14976_v37 = vpop.eup %10659 }
 0xbef   : > { %v14978_v2 = vpop.eup %10661  ;;  %4914 = vadd.xlane.f32.xlu1 %v14976_v37 }
 0xbf0   : > { %4916 = vadd.xlane.f32.xlu0 %v14978_v2 }
 0xbf3   : > { %v4841_v13 = vpop.xlane.xlu0 %4840 }
 0xbf4   : > { %v4869_v51 = vsub.f32 %v14748_v41, %v4841_v13  ;;  %v18196_v13 = vld [vmem:[#allocation92_spill] sm:$0xff] }
 0xbf6   : > { %v4888_v49 = vmul.f32 1.442695, %v4869_v51 }
 0xbf8   : > { %10663 = vpow2.f32 %v4888_v49 }
 0xbff   : > { %v4847_v16 = vpop.xlane.xlu1 %4846 }
 0xc00   : > { %5191 = vrot.lane.b32.xlu1 %v18195_v23, %s11381_s29  ;;  %v4845_v6 = vpop.xlane.xlu0 %4844 }
 0xc02   : > { %v14983_v9 = vpop.eup %10663 }
 0xc03   : > { %4920 = vadd.xlane.f32.xlu0 %v14983_v9  ;;  %v4843_v30 = vpop.xlane.xlu1 %4842 }
 0xc04   : > { %v4870_v7 = vsub.f32 %v14868_v19, %v4843_v30 }
 0xc06   : > { %v4890_v44 = vmul.f32 1.442695, %v4870_v7 }
 0xc07   : > { %v4855_v61 = vpop.xlane.xlu1 %4854 }
 0xc08   : > { %v4849_v54 = vpop.xlane.xlu0 %4848  ;;  %10665 = vpow2.f32 %v4890_v44  ;;  %v4876_v51 = vsub.f32 %v14917_v39, %v4855_v61 }
 0xc09   : > { %v4873_v41 = vsub.f32 %v14922_v43, %v4849_v54  ;;  %v4872_v43 = vsub.f32 %v14860_v52, %v4847_v16 }
 0xc0a   : > { %v4902_v24 = vmul.f32 1.442695, %v4876_v51 }
 0xc0b   : > { %v4896_v49 = vmul.f32 1.442695, %v4873_v41  ;;  %v4851_v27 = vpop.xlane.xlu1 %4850  ;;  %v4894_v41 = vmul.f32 1.442695, %v4872_v43 }
 0xc0c   : > { %v4853_v4 = vpop.xlane.xlu0 %4852  ;;  %v4874_v1 = vsub.f32 %v14934_v29, %v4851_v27  ;;  %v4871_v29 = vsub.f32 %v14865_v31, %v4845_v6 }
 0xc0d   : > { %10667 = vpow2.f32 %v4896_v49  ;;  %v4875_v30 = vsub.f32 %v14937_v3, %v4853_v4 }
 0xc0e   : > { %10669 = vpow2.f32 %v4902_v24  ;;  %v4898_v19 = vmul.f32 1.442695, %v4874_v1  ;;  %v4892_v27 = vmul.f32 1.442695, %v4871_v29 }
 0xc0f   : > { %v4900_v39 = vmul.f32 1.442695, %v4875_v30  ;;  %v4863_v24 = vpop.xlane.xlu1 %4862 }
 0xc10   : > { %v4857_v21 = vpop.xlane.xlu0 %4856  ;;  %10671 = vpow2.f32 %v4898_v19  ;;  %v4880_v16 = vsub.f32 %v14947_v18, %v4863_v24  ;;  %v9085_v24 = vld [vmem:[#allocation13 + $0x1] ss:$0 sm:$0xff] }
 0xc11   : > { %v4877_v44 = vsub.f32 %v14944_v33, %v4857_v21  ;;  %10673 = vpow2.f32 %v4900_v39 }
 0xc12   : > { %v14995_v7 = vpop.eup %10665  ;;  %10675 = vpow2.f32 %v4894_v41  ;;  %v4910_v31 = vmul.f32 1.442695, %v4880_v16  ;;  %v18199_v41 = vld [vmem:[#allocation140_spill] sm:$0xff]  ;;  %v18204_v16 = vld [vmem:[#allocation94_spill] sm:$0xff] }
 0xc13   : > { %v4904_v1 = vmul.f32 1.442695, %v4877_v44  ;;  %v4859_v4 = vpop.xlane.xlu1 %4858  ;;  %v18197_v44 = vld [vmem:[#allocation93_spill] sm:$0xff] }
 0xc14   : > { %v4865_v48 = vpop.xlane.xlu0 %4864  ;;  %v4878_v51 = vsub.f32 %v14957_v40, %v4859_v4 }
 0xc15   : > { %10677 = vpow2.f32 %v4904_v1  ;;  %v4881_v6 = vsub.f32 %v14954_v56, %v4865_v48  ;;  %v18201_v1 = vld [vmem:[#allocation143_spill] sm:$0xff] }
 0xc16   : > { %10679 = vpow2.f32 %v4892_v27  ;;  %v4906_v30 = vmul.f32 1.442695, %v4878_v51  ;;  %v18209_v51 = vld [vmem:[#allocation73_spill] sm:$0xff] }
 0xc17   : > { %v15000_v61 = vpop.eup %10667  ;;  %v4912_v18 = vmul.f32 1.442695, %v4881_v6  ;;  %v18207_v6 = vld [vmem:[#allocation144_spill] sm:$0xff] }
 0xc18   : > { %v4861_v54 = vpop.xlane.xlu0 %4860  ;;  %v15005_v52 = vpop.eup %10669 }
 0xc19   : > { %5189 = vrot.lane.b32.xlu0 %v18196_v13, %s11381_s29  ;;  %v4879_v3 = vsub.f32 %v14963_v55, %v4861_v54  ;;  %v18198_v54 = vld [vmem:[#allocation141_spill] sm:$0xff] }
 0xc1a   : > { %v15009_v33 = vpop.eup %10671  ;;  %v18200_v29 = vpack.c.bf16 %v18198_v54, %v18199_v41  ;;  %v18212_v54 = vld [vmem:[#allocation146_spill] sm:$0xff] }
 0xc1b   : > { %v4908_v21 = vmul.f32 1.442695, %v4879_v3  ;;  %v15013_v55 = vpop.eup %10673  ;;  %v18202_v3 = vld [vmem:[#allocation142_spill] sm:$0xff] }
 0xc1c   : > { %v15017_v49 = vpop.eup %10675  ;;  %v18203_v27 = vpack.c.bf16 %v18201_v1, %v18202_v3  ;;  %v18217_v3 = vld [vmem:[#allocation81_spill] sm:$0xff] }
 0xc1d   : > { %10681 = vpow2.f32 %v4908_v21  ;;  %v18205_v21 = vld [vmem:[#allocation65_spill] sm:$0xff] }
 0xc1e   : > { %10683 = vpow2.f32 %v4910_v31  ;;  %v18206_v31 = vld [vmem:[#allocation145_spill] sm:$0xff] }
 0xc1f   : > { %v15020_v19 = vpop.eup %10677  ;;  %10685 = vpow2.f32 %v4912_v18  ;;  %v18208_v4 = vpack.c.bf16 %v18206_v31, %v18207_v6  ;;  %v18210_v18 = vld [vmem:[#allocation57_spill] sm:$0xff]  ;;  %v18219_v31 = vld [vmem:[#allocation152_spill] sm:$0xff]  ;;  %v18220_v6 = vld [vmem:[#allocation151_spill] sm:$0xff] }
 0xc20   : > { %v15023_v48 = vpop.eup %10679  ;;  %10687 = vpow2.f32 %v4906_v30  ;;  %v18211_v30 = vld [vmem:[#allocation147_spill] sm:$0xff] }
 0xc21   : > { %v18213_v41 = vpack.c.bf16 %v18211_v30, %v18212_v54  ;;  %v5188_v30 = vpop.permute.xlu1 %5187  ;;  %v18223_v54 = vld [vmem:[#allocation78_spill] sm:$0xff] }
 0xc24   : > { %4922 = vadd.xlane.f32.xlu1 %v14995_v7 }
 0xc27   : > { %v15026_v56 = vpop.eup %10681 }
 0xc28   : > { %4928 = vadd.xlane.f32.xlu1 %v15000_v61  ;;  %v15029_v40 = vpop.eup %10683 }
 0xc29   : > { %v15032_v43 = vpop.eup %10685 }
 0xc2a   : > { %v15035_v39 = vpop.eup %10687 }
 0xc2c   : > { %4934 = vadd.xlane.f32.xlu1 %v15005_v52 }
 0xc30   : > { %4930 = vadd.xlane.f32.xlu1 %v15009_v33 }
 0xc34   : > { %4932 = vadd.xlane.f32.xlu1 %v15013_v55 }
 0xc38   : > { %4926 = vadd.xlane.f32.xlu0 %v15017_v49  ;;  %4936 = vadd.xlane.f32.xlu1 %v15020_v19 }
 0xc3c   : > { %4924 = vadd.xlane.f32.xlu0 %v15023_v48  ;;  %4940 = vadd.xlane.f32.xlu1 %v15026_v56 }
 0xc40   : > { %4942 = vadd.xlane.f32.xlu0 %v15029_v40 }
 0xc44   : > { %4944 = vadd.xlane.f32.xlu0 %v15032_v43 }
 0xc48   : > { %4938 = vadd.xlane.f32.xlu0 %v15035_v39 }
 0xc4d   : > { %5195 = vrot.lane.b32.xlu1 %v18197_v44, %s11381_s29 }
 0xc51   : > { %5159 = vrot.lane.b32.xlu1 %v18200_v29, %s11381_s29  ;;  %v18214_v29 = vld [vmem:[#allocation150_spill] sm:$0xff] }
 0xc55   : > { %5089 = vrot.lane.b32.xlu1 %v9085_v24, %s11379_s0  ;;  %v18215_v24 = vld [vmem:[#allocation149_spill] sm:$0xff] }
 0xc56   : > { %v18216_v1 = vpack.c.bf16 %v18214_v29, %v18215_v24  ;;  %v18224_v29 = vld [vmem:[#allocation154_spill] sm:$0xff]  ;;  %v18225_v24 = vld [vmem:[#allocation153_spill] sm:$0xff] }
 0xc59   : > { %5163 = vrot.lane.b32.xlu1 %v18203_v27, %s11381_s29  ;;  %v18218_v27 = vld [vmem:[#allocation62_spill] sm:$0xff] }
 0xc5d   : > { %5506 = vrot.lane.b32.xlu1 %v18205_v21, %s11381_s29 }
 0xc5e   : > { %5193 = vrot.lane.b32.xlu0 %v18204_v16, %s11381_s29 }
 0xc61   : > { %5510 = vrot.lane.b32.xlu1 %v18209_v51, %s11381_s29  ;;  %v18222_v51 = vld [vmem:[#allocation70_spill] sm:$0xff] }
 0xc62   : > { %5157 = vrot.lane.b32.xlu0 %v18208_v4, %s11381_s29  ;;  %v18221_v4 = vpack.c.bf16 %v18219_v31, %v18220_v6  ;;  %v18229_v31 = vpack.c.bf16 %v18227_v42, %v18228_v47 }
 0xc65   : > { %5165 = vrot.lane.b32.xlu1 %v18213_v41, %s11381_s29 }
 0xc66   : > { %5502 = vrot.lane.b32.xlu0 %v18210_v18, %s11381_s29 }
 0xc69   : > { %5514 = vrot.lane.b32.xlu1 %v18217_v3, %s11381_s29  ;;  %v5186_v3 = vpop.permute.xlu0 %5185 }
 0xc6a   : > { %5161 = vrot.lane.b32.xlu0 %v18216_v1, %s11381_s29  ;;  %v18226_v1 = vpack.c.bf16 %v18224_v29, %v18225_v24 }
 0xc6d   : > { %5171 = vrot.lane.b32.xlu1 %v18221_v4, %s11381_s29  ;;  %v18230_v4 = vld [vmem:[#allocation86_spill] sm:$0xff] }
 0xc6e   : > { %5504 = vrot.lane.b32.xlu0 %v18218_v27, %s11381_s29 }
 0xc72   : > { %5508 = vrot.lane.b32.xlu0 %v18222_v51, %s11381_s29 }
 0xc76   : > { %5512 = vrot.lane.b32.xlu0 %v18223_v54, %s11381_s29 }
 0xc78   : > { %v4919_v41 = vpop.xlane.xlu1 %4918 }
 0xc7a   : > { %5167 = vrot.lane.b32.xlu0 %v18226_v1, %s11381_s29 }
 0xc7c   : > { %v4915_v59 = vpop.xlane.xlu1 %4914 }
 0xc7d   : > { %10689 = vrcp.f32 %v4915_v59  ;;  %v4917_v6 = vpop.xlane.xlu0 %4916 }
 0xc7e   : > { %5169 = vrot.lane.b32.xlu0 %v18229_v31, %s11381_s29  ;;  %10691 = vrcp.f32 %v4917_v6  ;;  %v18231_v6 = vld [vmem:[#allocation158_spill] sm:$0xff] }
 0xc7f   : > { %10693 = vrcp.f32 %v4919_v41 }
 0xc82   : > { %5516 = vrot.lane.b32.xlu0 %v18230_v4, %s11381_s29  ;;  %v5222_v4 = vsel %vm4207_vm12, %v18231_v6, 0 }
 0xc87   : > { %v10690_v54 = vpop.eup %10689 }
 0xc88   : > { %v10692_v51 = vpop.eup %10691  ;;  %v4962_v62 = vmul.f32 %v10690_v54, %v14976_v37  ;;  %v18232_v37 = vld [vmem:[#allocation166_spill] sm:$0xff] }
 0xc89   : > { %v4963_v29 = vmul.f32 %v10692_v51, %v14978_v2  ;;  %v10694_v25 = vpop.eup %10693  ;;  %v5192_v2 = vpop.permute.xlu1 %5191  ;;  %v5231_v51 = vsel %vm4207_vm12, %v5188_v30, 0 }
 0xc8a   : > { %v4964_v59 = vmul.f32 %v10694_v25, %v14973_v22  ;;  %v5228_v25 = vsel %vm4207_vm12, %v5186_v3, 0 }
 0xc8b   : > { %v4978_v24 = vpack.c.bf16 %v4963_v29, %v4962_v62  ;;  %v5225_v62 = vsel %vm4207_vm12, %v18232_v37, 0 }
 0xc8d   : > { %9685 = vmatprep.mubr.bf16.mxu0 %v4978_v24 }
 0xc90   : > { %v4921_v1 = vpop.xlane.xlu0 %4920 }
 0xc91   : > { %10695 = vrcp.f32 %v4921_v1 }
 0xc94   : > { %v5190_v54 = vpop.permute.xlu0 %5189 }
 0xc95   : > { %v5234_v29 = vsel %vm4207_vm12, %v5190_v54, 0 }
 0xc9b   : > { %v10696_v47 = vpop.eup %10695 }
 0xc9c   : > { %v4965_v42 = vmul.f32 %v10696_v47, %v14983_v9 }
 0xc9e   : > { %v4979_v31 = vpack.c.bf16 %v4965_v42, %v4964_v59 }
 0xca0   : > { %9686 = vmatmul.mubr.bf16.vlgmr.msra.gmra.mrb[64].mxu0 %v4979_v31 }
 0xca1   : > { %9702 = vmatpush3.bf16.xpose.msra.mxu0 %v5222_v4 }
 0xca2   : > { %10102 = vmatprep.subr.msk.bf16.mxu0 %vm4207_vm12, %v18232_v37 }
 0xca9   : > { %9704 = vmatpush3.bf16.xpose.msra.mxu0 %v5225_v62 }
 0xcaa   : > { %10103 = vmatprep.subr.msk.bf16.mxu0 %vm4207_vm12, %v5186_v3 }
 0xcb1   : > { %9706 = vmatpush3.bf16.xpose.msra.mxu0 %v5228_v25  ;;  %v4923_v22 = vpop.xlane.xlu1 %4922 }
 0xcb2   : > { %10104 = vmatprep.subr.msk.bf16.mxu0 %vm4207_vm12, %v5188_v30  ;;  %10697 = vrcp.f32 %v4923_v22  ;;  %v5237_v30 = vsel %vm4207_vm12, %v5192_v2, 0 }
 0xcb5   : > { %v4929_v9 = vpop.xlane.xlu1 %4928 }
 0xcb9   : > { %9708 = vmatpush3.bf16.xpose.msra.mxu0 %v5231_v51  ;;  %v4935_v41 = vpop.xlane.xlu1 %4934 }
 0xcba   : > { %10105 = vmatprep.subr.msk.bf16.mxu0 %vm4207_vm12, %v5190_v54 }
 0xcbc   : > { %v10698_v31 = vpop.eup %10697 }
 0xcbd   : > { %v4931_v4 = vpop.xlane.xlu1 %4930 }
 0xcc1   : > { %9710 = vmatpush3.bf16.xpose.msra.mxu0 %v5234_v29  ;;  %v4933_v24 = vpop.xlane.xlu1 %4932 }
 0xcc2   : > { %10106 = vmatprep.subr.msk.bf16.mxu0 %vm4207_vm12, %v5192_v2  ;;  %10699 = vrcp.f32 %v4933_v24 }
 0xcc5   : > { %v4927_v3 = vpop.xlane.xlu0 %4926  ;;  %v4937_v1 = vpop.xlane.xlu1 %4936 }
 0xcc6   : > { %10701 = vrcp.f32 %v4927_v3 }
 0xcc7   : > { %10703 = vrcp.f32 %v4931_v4 }
 0xcc8   : > { %10705 = vrcp.f32 %v4929_v9 }
 0xcc9   : > { %10707 = vrcp.f32 %v4937_v1  ;;  %9712 = vmatpush3.bf16.xpose.msra.mxu0 %v5237_v30  ;;  %v4925_v47 = vpop.xlane.xlu0 %4924  ;;  %v4941_v59 = vpop.xlane.xlu1 %4940  ;;  %v4966_v1 = vmul.f32 %v10698_v31, %v14995_v7  ;;  %v18237_v31 = vld [vmem:[#allocation68_spill] sm:$0xff] }
 0xcca   : > { %10709 = vrcp.f32 %v4925_v47 }
 0xccb   : > { %10711 = vrcp.f32 %v4935_v41 }
 0xccc   : > { %v10700_v6 = vpop.eup %10699  ;;  %10713 = vrcp.f32 %v4941_v59 }
 0xccd   : > { %v4943_v42 = vpop.xlane.xlu0 %4942  ;;  %v15109_v37 = vpop.permute.xlu1 %5195  ;;  %v4971_v54 = vmul.f32 %v10700_v6, %v15013_v55 }
 0xcce   : > { %10715 = vrcp.f32 %v4943_v42  ;;  %v18235_v42 = vld [vmem:[#allocation39_spill] sm:$0xff] }
 0xcd0   : > { %v10702_v62 = vpop.eup %10701 }
 0xcd1   : > { %v10704_v25 = vpop.eup %10703  ;;  %v4945_v22 = vpop.xlane.xlu0 %4944  ;;  %v4968_v2 = vmul.f32 %v10702_v62, %v15017_v49  ;;  %v18233_v62 = vld [vmem:[#allocation60_spill] sm:$0xff] }
 0xcd2   : > { %v10706_v51 = vpop.eup %10705  ;;  %v15112_v4 = vpop.permute.xlu1 %5159  ;;  %v4970_v24 = vmul.f32 %v10704_v25, %v15009_v33 }
 0xcd3   : > { %v10708_v9 = vpop.eup %10707  ;;  %v4969_v41 = vmul.f32 %v10706_v51, %v15000_v61  ;;  %v18238_v51 = vld [vmem:[#allocation69_spill] sm:$0xff] }
 0xcd4   : > { %v10710_v29 = vpop.eup %10709  ;;  %v4982_v47 = vpack.c.bf16 %v4971_v54, %v4970_v24  ;;  %v4973_v49 = vmul.f32 %v10708_v9, %v15020_v19  ;;  %v18240_v24 = vld [vmem:[#allocation64_spill] sm:$0xff] }
 0xcd5   : > { %v4939_v3 = vpop.xlane.xlu0 %4938  ;;  %v4967_v30 = vmul.f32 %v10710_v29, %v15023_v48  ;;  %v4981_v53 = vpack.c.bf16 %v4969_v41, %v4968_v2  ;;  %v10712_v41 = vpop.eup %10711 }
 0xcd6   : > { %10717 = vrcp.f32 %v4939_v3  ;;  %v5090_v55 = vpop.permute.xlu1 %5089 }
 0xcd7   : > { %10719 = vrcp.f32 %v4945_v22  ;;  %v4980_v6 = vpack.c.bf16 %v4967_v30, %v4966_v1  ;;  %v5094_v59 = vadd.f32 %v5090_v55, %v18233_v62  ;;  %v5095_v33 = vadd.f32 %v5090_v55, %v18234_v36  ;;  %v18239_v22 = vld [vmem:[#allocation63_spill] sm:$0xff]  ;;  %v18241_v1 = vld [vmem:[#allocation76_spill] sm:$0xff] }
 0xcd8   : > { %v5092_v25 = vadd.f32 %v5090_v55, %v18235_v42  ;;  %v5093_v7 = vadd.f32 %v5090_v55, %v18236_v11  ;;  %v5098_v61 = vadd.f32 %v5090_v55, %v18237_v31  ;;  %v5099_v54 = vadd.f32 %v5090_v55, %v18238_v51 }
 0xcd9   : > { %9689 = vmatprep.mubr.bf16.mxu0 %v4980_v6  ;;  %v5194_v48 = vpop.permute.xlu0 %5193  ;;  %v5096_v29 = vadd.f32 %v5090_v55, %v18239_v22  ;;  %v5097_v2 = vadd.f32 %v5090_v55, %v18240_v24  ;;  %v5109_v9 = vpack.c.bf16 %v5095_v33, %v5094_v59  ;;  %v5102_v30 = vadd.f32 %v5090_v55, %v18241_v1 }
 0xcda   : > { %9690 = vmatmul.mubr.bf16.gmra.mrb[68].mxu0 %v4981_v53  ;;  %10107 = vmatprep.subr.msk.bf16.mxu0 %vm4207_vm12, %v5194_v48  ;;  %v5240_v19 = vsel %vm4207_vm12, %v5194_v48, 0  ;;  %v5108_v3 = vpack.c.bf16 %v5093_v7, %v5092_v25  ;;  %v5111_v6 = vpack.c.bf16 %v5099_v54, %v5098_v61  ;;  %v5103_v12 = vadd.f32 %v5090_v55, %v18242_v50  ;;  %v18243_v53 = vld [vmem:[#allocation71_spill] sm:$0xff]  ;;  %v18245_v48 = vld [vmem:[#allocation84_spill] sm:$0xff]  ;;  %v18246_v25 = vld [vmem:[#allocation85_spill] sm:$0xff] }
 0xcdb   : > { %9693 = vmatprep.mubr.bf16.mxu0 %v4982_v47  ;;  %9714 = vmatpush3.bf16.xpose.msra.mxu0 %v5240_v19  ;;  %v5110_v34 = vpack.c.bf16 %v5097_v2, %v5096_v29  ;;  %v5100_v35 = vadd.f32 %v5090_v55, %v18243_v53  ;;  %v5101_v57 = vadd.f32 %v5090_v55, %v18244_v26  ;;  %v18247_v61 = vld [vmem:[#allocation79_spill] sm:$0xff]  ;;  %v18248_v29 = vld [vmem:[#allocation80_spill] sm:$0xff]  ;;  %v10714_v19 = vpop.eup %10713 }
 0xcdc   : > { %5480 = vrot.lane.b32.xlu0 %v5109_v9, %s11381_s29  ;;  %5478 = vrot.lane.b32.xlu1 %v5108_v3, %s11381_s29  ;;  %v5106_v59 = vadd.f32 %v5090_v55, %v18245_v48  ;;  %v5113_v47 = vpack.c.bf16 %v5103_v12, %v5102_v30  ;;  %v5107_v7 = vadd.f32 %v5090_v55, %v18246_v25  ;;  %v10716_v20 = vpop.eup %10715 }
 0xcdd   : > { %10108 = vmatprep.subr.msk.bf16.mxu0 %vm4207_vm12, %v15109_v37  ;;  %v5158_v33 = vpop.permute.xlu0 %5157  ;;  %v5104_v54 = vadd.f32 %v5090_v55, %v18247_v61  ;;  %v5105_v2 = vadd.f32 %v5090_v55, %v18248_v29  ;;  %v4972_v9 = vmul.f32 %v10712_v41, %v15005_v52  ;;  %v5112_v3 = vpack.c.bf16 %v5101_v57, %v5100_v35  ;;  %v9104_v55 = vld [vmem:[#allocation13 + $0x6] ss:$0 sm:$0xff] }
 0xcde   : > { %v5115_v17 = vpack.c.bf16 %v5107_v7, %v5106_v59  ;;  %v4975_v38 = vmul.f32 %v10714_v19, %v15026_v56  ;;  %v5243_v35 = vsel %vm4207_vm12, %v15109_v37, 0  ;;  %v5164_v56 = vpop.permute.xlu1 %5163  ;;  %v18254_v7 = vld [vmem:[#allocation66_spill] sm:$0xff] }
 0xcdf   : > { %v5114_v14 = vpack.c.bf16 %v5105_v2, %v5104_v54  ;;  %v4983_v5 = vpack.c.bf16 %v4973_v49, %v4972_v9  ;;  %v18251_v49 = vld [vmem:[#allocation58_spill] sm:$0xff]  ;;  %v18255_v54 = vld [vmem:[#allocation75_spill] sm:$0xff] }
 0xce0   : > { %v10718_v63 = vpop.eup %10717  ;;  %5484 = vrot.lane.b32.xlu0 %v5111_v6, %s11381_s29  ;;  %5482 = vrot.lane.b32.xlu1 %v5110_v34, %s11381_s29  ;;  %v18252_v6 = vld [vmem:[#allocation67_spill] sm:$0xff] }
 0xce1   : > { %v10720_v12 = vpop.eup %10719  ;;  %v5503_v30 = vpop.permute.xlu0 %5502  ;;  %v4974_v10 = vmul.f32 %v10718_v63, %v15035_v39 }
 0xce2   : > { %9694 = vmatmul.mubr.bf16.gmra.mrb[72].mxu0 %v4983_v5  ;;  %10109 = vmatprep.subr.msk.bf16.mxu1 %vm4207_vm12, %v5503_v30  ;;  %v5543_v57 = vsel %vm4207_vm12, %v5503_v30, 0  ;;  %v4977_v34 = vmul.f32 %v10720_v12, %v15032_v43  ;;  %v4976_v5 = vmul.f32 %v10716_v20, %v15029_v40  ;;  %v18249_v20 = vld [vmem:[#allocation88_spill] sm:$0xff] }
 0xce3   : > { %9716 = vmatpush3.bf16.xpose.msra.mxu0 %v5243_v35  ;;  %9734 = vmatpush3.bf16.xpose.msra.mxu1 %v5543_v57  ;;  %v4984_v52 = vpack.c.bf16 %v4975_v38, %v4974_v10  ;;  %v5507_v38 = vpop.permute.xlu1 %5506 }
 0xce4   : > { %5488 = vrot.lane.b32.xlu0 %v5113_v47, %s11381_s29  ;;  %5486 = vrot.lane.b32.xlu1 %v5112_v3, %s11381_s29  ;;  %v4985_v39 = vpack.c.bf16 %v4977_v34, %v4976_v5  ;;  %v5549_v40 = vsel %vm4207_vm12, %v5507_v38, 0  ;;  %v18256_v3 = vld [vmem:[#allocation74_spill] sm:$0xff] }
 0xce5   : > { %9697 = vmatprep.mubr.bf16.mxu0 %v4984_v52  ;;  %v5162_v63 = vpop.permute.xlu0 %5161 }
 0xce7   : > { %v5511_v43 = vpop.permute.xlu1 %5510 }
 0xce8   : > { %5492 = vrot.lane.b32.xlu0 %v5115_v17, %s11381_s29  ;;  %5490 = vrot.lane.b32.xlu1 %v5114_v14, %s11381_s29  ;;  %v18250_v17 = vld [vmem:[#allocation87_spill] sm:$0xff]  ;;  %v5555_v19 = vsel %vm4207_vm12, %v5511_v43, 0 }
 0xce9   : > { %v5505_v37 = vpop.permute.xlu0 %5504 }
 0xcea   : > { %9698 = vmatmul.mubr.bf16.gmra.mrb[76].mxu0 %v4985_v39  ;;  %10110 = vmatprep.subr.msk.bf16.mxu1 %vm4207_vm12, %v5505_v37  ;;  %v5546_v10 = vsel %vm4207_vm12, %v5505_v37, 0 }
 0xceb   : > { %9717 = vmatprep.mubr.msk.bf16.mxu0 %vm4207_vm12, %v5158_v33  ;;  %9736 = vmatpush3.bf16.xpose.msra.mxu1 %v5546_v10  ;;  %v5166_v59 = vpop.permute.xlu1 %5165 }
 0xcec   : > { %6031 = vrot.lane.b32.xlu0 %v9104_v55, %s11393_s1  ;;  %6082 = vrot.lane.b32.xlu1 %v18249_v20, %s11393_s1 }
 0xced   : > { %10111 = vmatprep.subr.msk.bf16.mxu1 %vm4207_vm12, %v5507_v38  ;;  %v5509_v14 = vpop.permute.xlu0 %5508 }
 0xcee   : > { %v5552_v33 = vsel %vm4207_vm12, %v5509_v14, 0 }
 0xcef   : > { %v5515_v9 = vpop.permute.xlu1 %5514 }
 0xcf0   : > { %6086 = vrot.lane.b32.xlu0 %v18191_v8, %s11393_s1  ;;  %6084 = vrot.lane.b32.xlu1 %v18250_v17, %s11393_s1  ;;  %v5561_v35 = vsel %vm4207_vm12, %v5515_v9, 0 }
 0xcf1   : > { %v5513_v41 = vpop.permute.xlu0 %5512 }
 0xcf2   : > { %9718 = vmatmul.mubr.msk.bf16.vlgmr.msra.gmra.mrb[80].mxu0 %vm4207_vm12, %v15112_v4  ;;  %v18253_v4 = vld [vmem:[#allocation59_spill] sm:$0xff]  ;;  %v5558_v30 = vsel %vm4207_vm12, %v5513_v41, 0 }
 0xcf3   : > { %9721 = vmatprep.mubr.msk.bf16.mxu0 %vm4207_vm12, %v5162_v63  ;;  %9738 = vmatpush3.bf16.xpose.msra.mxu1 %v5549_v40  ;;  %v5172_v12 = vpop.permute.xlu1 %5171 }
 0xcf4   : > { %5873 = vrot.lane.b32.xlu0 %v18251_v49, %s11381_s29  ;;  %6088 = vrot.lane.b32.xlu1 %v18190_v0, %s11393_s1  ;;  %v18285_v0 = vld [vmem:[#allocation124_spill] sm:$0xff] }
 0xcf5   : > { %10112 = vmatprep.subr.msk.bf16.mxu1 %vm4207_vm12, %v5509_v14  ;;  %v5168_v47 = vpop.permute.xlu0 %5167  ;;  %vm18286_vm3 = vcmp.le.s32.totalorder %v14481_v28, %v18285_v0 }
 0xcf8   : > { %5875 = vrot.lane.b32.xlu0 %v18252_v6, %s11381_s29  ;;  %5871 = vrot.lane.b32.xlu1 %v18253_v4, %s11381_s29 }
 0xcf9   : > { %v5170_v2 = vpop.permute.xlu0 %5169 }
 0xcfa   : > { %9722 = vmatmul.mubr.msk.bf16.gmra.mrb[84].mxu0 %vm4207_vm12, %v5164_v56 }
 0xcfb   : > { %9725 = vmatprep.mubr.msk.bf16.mxu0 %vm4207_vm12, %v5166_v59  ;;  %9740 = vmatpush3.bf16.xpose.msra.mxu1 %v5552_v33 }
 0xcfc   : > { %5877 = vrot.lane.b32.xlu0 %v18254_v7, %s11381_s29  ;;  %6090 = vrot.lane.b32.xlu1 %v18196_v13, %s11393_s1 }
 0xcfd   : > { %10113 = vmatprep.subr.msk.bf16.mxu1 %vm4207_vm12, %v5511_v43  ;;  %v5517_v57 = vpop.permute.xlu0 %5516 }
 0xcfe   : > { %v5564_v52 = vsel %vm4207_vm12, %v5517_v57, 0 }
 0xd00   : > { %5879 = vrot.lane.b32.xlu0 %v18255_v54, %s11381_s29  ;;  %6092 = vrot.lane.b32.xlu1 %v18195_v23, %s11393_s1 }
 0xd02   : > { %9726 = vmatmul.mubr.msk.bf16.gmra.mrb[88].mxu0 %vm4207_vm12, %v5168_v47 }
 0xd03   : > { %9729 = vmatprep.mubr.msk.bf16.mxu0 %vm4207_vm12, %v5170_v2  ;;  %9742 = vmatpush3.bf16.xpose.msra.mxu1 %v5555_v19 }
 0xd04   : > { %5881 = vrot.lane.b32.xlu0 %v18256_v3, %s11381_s29  ;;  %6094 = vrot.lane.b32.xlu1 %v18204_v16, %s11393_s1 }
 0xd05   : > { %10114 = vmatprep.subr.msk.bf16.mxu1 %vm4207_vm12, %v5513_v41 }
 0xd0a   : > { %9730 = vmatmul.mubr.msk.bf16.gmra.mrb[92].mxu0 %vm4207_vm12, %v5172_v12 }
 0xd0b   : > { %9744 = vmatpush3.bf16.xpose.msra.mxu1 %v5558_v30 }
 0xd0c   : > { %10115 = vmatprep.subr.msk.bf16.mxu1 %vm4207_vm12, %v5515_v9 }
 0xd13   : > { %9746 = vmatpush3.bf16.xpose.msra.mxu1 %v5561_v35 }
 0xd14   : > { %10116 = vmatprep.subr.msk.bf16.mxu1 %vm4207_vm12, %v5517_v57 }
 0xd1b   : > { %9748 = vmatpush3.bf16.xpose.msra.mxu1 %v5564_v52 }
 0xd4e   : > { %v5479_v34 = vpop.permute.xlu1 %5478  ;;  %v5481_v63 = vpop.permute.xlu0 %5480 }
 0xd4f   : > { %9749 = vmatprep.mubr.msk.bf16.mxu1 %vm4207_vm12, %v5479_v34 }
 0xd50   : > { %9750 = vmatmul.mubr.msk.bf16.vlgmr.msra.gmra.mrb[64].mxu1 %vm4207_vm12, %v5481_v63 }
 0xd52   : > { %v5483_v56 = vpop.permute.xlu1 %5482  ;;  %v5485_v5 = vpop.permute.xlu0 %5484 }
 0xd53   : > { %9753 = vmatprep.mubr.msk.bf16.mxu1 %vm4207_vm12, %v5483_v56 }
 0xd56   : > { %v5487_v39 = vpop.permute.xlu1 %5486  ;;  %v5489_v37 = vpop.permute.xlu0 %5488 }
 0xd58   : > { %9754 = vmatmul.mubr.msk.bf16.gmra.mrb[68].mxu1 %vm4207_vm12, %v5485_v5 }
 0xd59   : > { %9757 = vmatprep.mubr.msk.bf16.mxu1 %vm4207_vm12, %v5487_v39 }
 0xd5a   : > { %v5491_v55 = vpop.permute.xlu1 %5490  ;;  %v5493_v10 = vpop.permute.xlu0 %5492 }
 0xd5e   : > { %v6083_v38 = vpop.permute.xlu1 %6082  ;;  %v6032_v14 = vpop.permute.xlu0 %6031 }
 0xd5f   : > { %10117 = vmatprep.subr.msk.bf16.mxu1 %vm4207_vm12, %v6083_v38  ;;  %v6123_v40 = vsel %vm4207_vm12, %v6083_v38, 0  ;;  %v15215_v43 = vadd.f32 %v6032_v14, %v18235_v42  ;;  %v15218_v41 = vadd.f32 %v6032_v14, %v18236_v11  ;;  %v15221_v59 = vadd.f32 %v6032_v14, %v18239_v22 }
 0xd60   : > { %9758 = vmatmul.mubr.msk.bf16.gmra.mrb[72].mxu1 %vm4207_vm12, %v5489_v37  ;;  %v15225_v33 = vadd.f32 %v6032_v14, %v18240_v24  ;;  %v15228_v47 = vadd.f32 %v6032_v14, %v18233_v62  ;;  %v15231_v2 = vadd.f32 %v6032_v14, %v18234_v36  ;;  %v15234_v19 = vadd.f32 %v6032_v14, %v18237_v31 }
 0xd61   : > { %9798 = vmatpush3.bf16.xpose.msra.mxu1 %v6123_v40  ;;  %9761 = vmatprep.mubr.msk.bf16.mxu1 %vm4207_vm12, %v5491_v55  ;;  %v15240_v12 = vadd.f32 %v6032_v14, %v18238_v51  ;;  %v15243_v30 = vadd.f32 %v6032_v14, %v18243_v53  ;;  %v15250_v63 = vadd.f32 %v6032_v14, %v18244_v26 }
 0xd62   : > { %v6085_v35 = vpop.permute.xlu1 %6084  ;;  %v6087_v57 = vpop.permute.xlu0 %6086  ;;  %v15253_v56 = vadd.f32 %v6032_v14, %v18241_v1  ;;  %v15259_v39 = vadd.f32 %v6032_v14, %v18242_v50  ;;  %v15264_v55 = vadd.f32 %v6032_v14, %v18247_v61  ;;  %v15267_v38 = vadd.f32 %v6032_v14, %v18248_v29 }
 0xd63   : > { %10118 = vmatprep.subr.msk.bf16.mxu1 %vm4207_vm12, %v6085_v35  ;;  %v15270_v40 = vadd.f32 %v6032_v14, %v18245_v48  ;;  %v15275_v5 = vadd.f32 %v6032_v14, %v18246_v25  ;;  %v6126_v54 = vsel %vm4207_vm12, %v6085_v35, 0  ;;  %v6129_v16 = vsel %vm4207_vm12, %v6087_v57, 0 }
 0xd64   : > { %18257 = vst [vmem:[#allocation131_spill] sm:$0xff] %v15264_v55  ;;  %18258 = vst [vmem:[#allocation135_spill] sm:$0xff] %v15267_v38  ;;  %v18289_v55 = vld [vmem:[#allocation129_spill] sm:$0xff] }
 0xd65   : > { %18259 = vst [vmem:[#allocation134_spill] sm:$0xff] %v15270_v40  ;;  %18260 = vst [vmem:[#allocation141_spill] sm:$0xff] %v15275_v5  ;;  %vm18290_vm9 = vcmp.eq.s32.totalorder %v14481_v28, %v18289_v55 }
 0xd66   : > { %v6089_v52 = vpop.permute.xlu1 %6088  ;;  %v5874_v9 = vpop.permute.xlu0 %5873 }
 0xd68   : > { %9762 = vmatmul.mubr.msk.bf16.gmra.mrb[76].mxu1 %vm4207_vm12, %v5493_v10 }
 0xd69   : > { %9800 = vmatpush3.bf16.xpose.msra.mxu1 %v6126_v54 }
 0xd6a   : > { %10119 = vmatprep.subr.msk.bf16.mxu1 %vm4207_vm12, %v6087_v57  ;;  %v5872_v7 = vpop.permute.xlu1 %5871  ;;  %v5876_v34 = vpop.permute.xlu0 %5875 }
 0xd6b   : > { %9765 = vmatprep.subr.bf16.mxu0 %v5872_v7 }
 0xd6c   : > { %9766 = vmatpush3.bf16.msra.mxu0 %v5872_v7  ;;  %v6132_v7 = vsel %vm4207_vm12, %v6089_v52, 0 }
 0xd6d   : > { %9767 = vmatprep.subr.bf16.mxu0 %v5874_v9 }
 0xd6e   : > { %v5878_v14 = vpop.permute.xlu0 %5877 }
 0xd70   : > { %9768 = vmatpush3.bf16.msra.mxu0 %v5874_v9  ;;  %v6091_v9 = vpop.permute.xlu1 %6090 }
 0xd71   : > { %9802 = vmatpush3.bf16.xpose.msra.mxu1 %v6129_v16  ;;  %9769 = vmatprep.subr.bf16.mxu0 %v5876_v34  ;;  %v6135_v57 = vsel %vm4207_vm12, %v6091_v9, 0 }
 0xd72   : > { %10120 = vmatprep.subr.msk.bf16.mxu1 %vm4207_vm12, %v6089_v52  ;;  %v5880_v35 = vpop.permute.xlu0 %5879 }
 0xd73   : > { %v15286_v3 = vpop.f32.mrb[64].mxu0 }
 0xd74   : > { %18261 = vst [vmem:[#allocation140_spill] sm:$0xff] %v15286_v3  ;;  %v15288_v10 = vpop.f32.mrb[65].mxu0  ;;  %9770 = vmatpush3.bf16.msra.mxu0 %v5876_v34  ;;  %v6093_v34 = vpop.permute.xlu1 %6092 }
 0xd75   : > { %18262 = vst [vmem:[#allocation143_spill] sm:$0xff] %v15288_v10  ;;  %v15290_v54 = vpop.f32.mrb[66].mxu0  ;;  %9771 = vmatprep.subr.bf16.mxu0 %v5878_v14  ;;  %v6138_v10 = vsel %vm4207_vm12, %v6093_v34, 0 }
 0xd76   : > { %18263 = vst [vmem:[#allocation142_spill] sm:$0xff] %v15290_v54  ;;  %v15292_v37 = vpop.f32.mrb[67].mxu0  ;;  %v5882_v16 = vpop.permute.xlu0 %5881  ;;  %v9103_v54 = vld [vmem:[#allocation13 + $0x2] ss:$0 sm:$0xff] }
 0xd77   : > { %18264 = vst [vmem:[#allocation145_spill] sm:$0xff] %v15292_v37 }
 0xd78   : > { %9772 = vmatpush3.bf16.msra.mxu0 %v5878_v14  ;;  %v6095_v14 = vpop.permute.xlu1 %6094 }
 0xd79   : > { %9804 = vmatpush3.bf16.xpose.msra.mxu1 %v6132_v7  ;;  %9773 = vmatprep.subr.bf16.mxu0 %v5880_v35  ;;  %v6141_v52 = vsel %vm4207_vm12, %v6095_v14, 0 }
 0xd7a   : > { %10121 = vmatprep.subr.msk.bf16.mxu1 %vm4207_vm12, %v6091_v9 }
 0xd7c   : > { %9774 = vmatpush3.bf16.msra.mxu0 %v5880_v35 }
 0xd7d   : > { %9775 = vmatprep.subr.bf16.mxu0 %v5882_v16 }
 0xd80   : > { %9776 = vmatpush3.bf16.msra.mxu0 %v5882_v16 }
 0xd81   : > { %9806 = vmatpush3.bf16.xpose.msra.mxu1 %v6135_v57 }
 0xd82   : > { %10122 = vmatprep.subr.msk.bf16.mxu1 %vm4207_vm12, %v6093_v34 }
 0xd89   : > { %9808 = vmatpush3.bf16.xpose.msra.mxu1 %v6138_v10 }
 0xd8a   : > { %10123 = vmatprep.subr.msk.bf16.mxu1 %vm4207_vm12, %v6095_v14 }
 0xd91   : > { %9810 = vmatpush3.bf16.xpose.msra.mxu1 %v6141_v52 }
 0xdad   : > { %v15301_v7 = vpop.f32.mrb[68].mxu0 }
 0xdae   : > { %18265 = vst [vmem:[#allocation144_spill] sm:$0xff] %v15301_v7  ;;  %v15303_v35 = vpop.f32.mrb[69].mxu0 }
 0xdaf   : > { %18266 = vst [vmem:[#allocation147_spill] sm:$0xff] %v15303_v35  ;;  %v15305_v16 = vpop.f32.mrb[70].mxu0 }
 0xdb0   : > { %18267 = vst [vmem:[#allocation146_spill] sm:$0xff] %v15305_v16  ;;  %v15307_v9 = vpop.f32.mrb[71].mxu0 }
 0xdb1   : > { %18268 = vst [vmem:[#allocation150_spill] sm:$0xff] %v15307_v9 }
 0xdb5   : > { %v15309_v57 = vpop.f32.mrb[72].mxu0 }
 0xdb6   : > { %18269 = vst [vmem:[#allocation149_spill] sm:$0xff] %v15309_v57  ;;  %v15311_v37 = vpop.f32.mrb[73].mxu0 }
 0xdb7   : > { %18270 = vst [vmem:[#allocation152_spill] sm:$0xff] %v15311_v37  ;;  %v15313_v34 = vpop.f32.mrb[74].mxu0  ;;  %v18279_v37 = vld [vmem:[#allocation82_spill] sm:$0xff] }
 0xdb8   : > { %18271 = vst [vmem:[#allocation151_spill] sm:$0xff] %v15313_v34  ;;  %v15315_v10 = vpop.f32.mrb[75].mxu0 }
 0xdb9   : > { %18272 = vst [vmem:[#allocation154_spill] sm:$0xff] %v15315_v10 }
 0xdbd   : > { %v15317_v3 = vpop.f32.mrb[76].mxu0 }
 0xdbe   : > { %18273 = vst [vmem:[#allocation153_spill] sm:$0xff] %v15317_v3  ;;  %v15319_v14 = vpop.f32.mrb[77].mxu0 }
 0xdbf   : > { %18274 = vst [vmem:[#allocation157_spill] sm:$0xff] %v15319_v14  ;;  %v15321_v52 = vpop.f32.mrb[78].mxu0 }
 0xdc0   : > { %18275 = vst [vmem:[#allocation156_spill] sm:$0xff] %v15321_v52  ;;  %v15323_v7 = vpop.f32.mrb[79].mxu0 }
 0xdc1   : > { %18276 = vst [vmem:[#allocation158_spill] sm:$0xff] %v15323_v7 }
 0xdc5   : > { %v9719_v35 = vpop.f32.mrb[80].mxu0 }
 0xdc6   : > { %5352 = vrot.lane.b32.xlu1 %v9719_v35, %s11375_s16  ;;  %v5279_v16 = vpop.f32.mrb[81].mxu0  ;;  %v18277_v35 = vpack.c.bf16 %v15218_v41, %v15215_v43 }
 0xdc7   : > { %v9720_v9 = vpop.f32.mrb[82].mxu0 }
 0xdc8   : > { %5356 = vrot.lane.b32.xlu0 %v9720_v9, %s11377_s12  ;;  %v5282_v57 = vpop.f32.mrb[83].mxu0 }
 0xdca   : > { %5344 = vrot.lane.b32.xlu1 %v5279_v16, %s11376_s18  ;;  %v18278_v16 = vld [vmem:[#allocation83_spill] sm:$0xff] }
 0xdcc   : > { %5348 = vrot.lane.b32.xlu0 %v5282_v57, %s11378_s22 }
 0xdcd   : > { %v9723_v34 = vpop.f32.mrb[84].mxu0 }
 0xdce   : > { %5368 = vrot.lane.b32.xlu1 %v9723_v34, %s11384_s24  ;;  %v5295_v14 = vpop.f32.mrb[85].mxu0 }
 0xdcf   : > { %v9724_v3 = vpop.f32.mrb[86].mxu0 }
 0xdd0   : > { %6096 = vrot.lane.b32.xlu0 %v18197_v44, %s11393_s1  ;;  %v5298_v7 = vpop.f32.mrb[87].mxu0 }
 0xdd2   : > { %5360 = vrot.lane.b32.xlu1 %v5295_v14, %s11380_s6  ;;  %v18280_v14 = vpack.c.bf16 %v15225_v33, %v15221_v59  ;;  %v18282_v59 = vpack.c.bf16 %v15240_v12, %v15234_v19 }
 0xdd4   : > { %6066 = vrot.lane.b32.xlu0 %v18277_v35, %s11393_s1  ;;  %v18281_v35 = vpack.c.bf16 %v15231_v2, %v15228_v47 }
 0xdd5   : > { %v9727_v9 = vpop.f32.mrb[88].mxu0 }
 0xdd6   : > { %5883 = vrot.lane.b32.xlu1 %v18278_v16, %s11381_s29  ;;  %v5311_v57 = vpop.f32.mrb[89].mxu0  ;;  %v18283_v16 = vld [vmem:[#allocation125_spill] sm:$0xff] }
 0xdd7   : > { %v9728_v52 = vpop.f32.mrb[90].mxu0  ;;  %vm18284_vm13 = vcmp.eq.s32.totalorder %v14481_v28, %v18283_v16  ;;  %v18287_v16 = vld [vmem:[#allocation128_spill] sm:$0xff] }
 0xdd8   : > { %v5314_v34 = vpop.f32.mrb[91].mxu0  ;;  %6395 = vrot.lane.b32.xlu0 %v18210_v18, %s11393_s1 }
 0xdda   : > { %5885 = vrot.lane.b32.xlu1 %v18279_v37, %s11381_s29 }
 0xddc   : > { %6070 = vrot.lane.b32.xlu0 %v18280_v14, %s11393_s1 }
 0xddd   : > { %v9731_v43 = vpop.f32.mrb[92].mxu0 }
 0xdde   : > { %v5327_v41 = vpop.f32.mrb[93].mxu0  ;;  %6068 = vrot.lane.b32.xlu1 %v18281_v35, %s11393_s1 }
 0xddf   : > { %v9732_v10 = vpop.f32.mrb[94].mxu0 }
 0xde0   : > { %v5330_v44 = vpop.f32.mrb[95].mxu0  ;;  %5372 = vrot.lane.b32.xlu0 %v9724_v3, %s11382_s20 }
 0xde2   : > { %5998 = vrot.lane.b32.xlu1 %v9103_v54, %s11393_s1 }
 0xde4   : > { %5364 = vrot.lane.b32.xlu0 %v5298_v7, %s11383_s26 }
 0xde6   : > { %6072 = vrot.lane.b32.xlu1 %v18282_v59, %s11393_s1 }
 0xde8   : > { %5388 = vrot.lane.b32.xlu0 %v9728_v52, %s11385_s27 }
 0xdea   : > { %5384 = vrot.lane.b32.xlu1 %v9727_v9, %s11386_s4 }
 0xdec   : > { %5380 = vrot.lane.b32.xlu0 %v5314_v34, %s11387_s17 }
 0xdee   : > { %5376 = vrot.lane.b32.xlu1 %v5311_v57, %s11388_s19 }
 0xdf0   : > { %5404 = vrot.lane.b32.xlu0 %v9732_v10, %s11389_s30 }
 0xdf2   : > { %5400 = vrot.lane.b32.xlu1 %v9731_v43, %s11390_s21 }
 0xdf4   : > { %5396 = vrot.lane.b32.xlu0 %v5330_v44, %s11391_s28 }
 0xdf6   : > { %5392 = vrot.lane.b32.xlu1 %v5327_v41, %s11392_s23 }
 0xe23   : > { %v9751_v3 = vpop.f32.mrb[64].mxu1 }
 0xe24   : > { %v5600_v33 = vpop.f32.mrb[65].mxu1 }
 0xe25   : > { %v9752_v47 = vpop.f32.mrb[66].mxu1 }
 0xe26   : > { %v5603_v2 = vpop.f32.mrb[67].mxu1 }
 0xe2b   : > { %v15366_v19 = vpop.f32.mrb[68].mxu1 }
 0xe2c   : > { %v15368_v12 = vpop.f32.mrb[69].mxu1 }
 0xe2d   : > { %v15370_v54 = vpop.f32.mrb[70].mxu1 }
 0xe2e   : > { %v15372_v7 = vpop.f32.mrb[71].mxu1 }
 0xe33   : > { %v15374_v52 = vpop.f32.mrb[72].mxu1 }
 0xe34   : > { %v15376_v10 = vpop.f32.mrb[73].mxu1 }
 0xe35   : > { %v15378_v9 = vpop.f32.mrb[74].mxu1 }
 0xe36   : > { %v15380_v44 = vpop.f32.mrb[75].mxu1 }
 0xe38   : > { %v5353_v57 = vpop.permute.xlu1 %5352 }
 0xe39   : > { %v5408_v14 = vrot.slane %v5353_v57, 1 }
 0xe3a   : > { %v5357_v34 = vpop.permute.xlu0 %5356 }
 0xe3b   : > { %v5409_v43 = vrot.slane %v5357_v34, 1  ;;  %v15382_v41 = vpop.f32.mrb[76].mxu1 }
 0xe3c   : > { %v15384_v35 = vpop.permute.xlu1 %5344  ;;  %v15386_v59 = vpop.f32.mrb[77].mxu1 }
 0xe3d   : > { %v5434_v18 = vsel %vm1603_vm6, %v5408_v14, %v5409_v43  ;;  %v15390_v37 = vpop.f32.mrb[78].mxu1  ;;  %v17809_v13 = vrot.slane %v15384_v35, 1 }
 0xe3e   : > { %v5440_v6 = vsel %vm18284_vm13, 0.0, %v5434_v18  ;;  %v15395_v23 = vpop.f32.mrb[79].mxu1  ;;  %v5349_v49 = vpop.permute.xlu0 %5348  ;;  %vm18288_vm13 = vcmp.eq.s32.totalorder %v14481_v28, %v18287_v16 }
 0xe3f   : > { %v5407_v4 = vrot.slane %v5349_v49, 1  ;;  %v5456_v17 = vsel %vm18286_vm3, %v5353_v57, %v5440_v6 }
 0xe40   : > { %v15401_v8 = vpop.permute.xlu1 %5368  ;;  %v5609_v20 = vadd.f32 %v9751_v3, %v5456_v17  ;;  %v18291_v17 = vld [vmem:[#allocation126_spill] sm:$0xff] }
 0xe41   : > { %v5435_v40 = vsel %vm1603_vm6, %v5407_v4, %v5408_v14  ;;  %v5436_v18 = vsel %vm1603_vm6, %v17809_v13, %v5407_v4  ;;  %vm18292_vm3 = vcmp.le.s32.totalorder %v14481_v28, %v18291_v17 }
 0xe42   : > { %v5438_v5 = vsel %vm18288_vm13, 0.0, %v5436_v18  ;;  %v5439_v0 = vsel %vm18290_vm9, 0.0, %v5435_v40  ;;  %v6097_v6 = vpop.permute.xlu0 %6096  ;;  %v5665_v57 = vmul.f32 0.17677669, %v5609_v20  ;;  %v18294_v40 = vld [vmem:[#allocation96_spill] sm:$0xff] }
 0xe43   : > { %v5455_v3 = vsel %vm18292_vm3, %v5349_v49, %v5439_v0  ;;  %10124 = vmatprep.subr.msk.bf16.mxu1 %vm4207_vm12, %v6097_v6  ;;  %v6144_v14 = vsel %vm4207_vm12, %v6097_v6, 0  ;;  %v5454_v4 = vsel %vm18293_vm4, %v15384_v35, %v5438_v5  ;;  %v18295_v49 = vld [vmem:[#allocation103_spill] sm:$0xff] }
 0xe44   : > { %v5604_v18 = vadd.f32 %v5603_v2, %v5455_v3  ;;  %v15424_v13 = vpop.permute.xlu1 %5360  ;;  %9812 = vmatpush3.bf16.xpose.msra.mxu1 %v6144_v14  ;;  %v5681_v16 = vmul.f32 %v5665_v57, %v18294_v40  ;;  %v5601_v20 = vadd.f32 %v5600_v33, %v5454_v4  ;;  %v18296_v2 = vld [vmem:[#allocation132_spill] sm:$0xff]  ;;  %v18298_v3 = vld [vmem:[#allocation95_spill] sm:$0xff] }
 0xe45   : > { %v17811_v55 = vrot.slane %v15424_v13, 1  ;;  %vm18297_vm4 = vcmp.eq.s32.totalorder %v14481_v28, %v18296_v2  ;;  %v18299_v4 = vld [vmem:[#allocation99_spill] sm:$0xff] }
 0xe46   : > { %v5664_v17 = vmul.f32 0.17677669, %v5604_v18  ;;  %v6067_v0 = vpop.permute.xlu0 %6066  ;;  %v15429_v38 = vadd.f32 %v5681_v16, %v18295_v49  ;;  %v5663_v6 = vmul.f32 0.17677669, %v5601_v20  ;;  %v18300_v18 = vld [vmem:[#allocation130_spill] sm:$0xff] }
 0xe47   : > { %v5433_v5 = vsel %vm1603_vm6, %v5409_v43, %v17811_v55  ;;  %9813 = vmatprep.mubr.msk.bf16.mxu1 %vm4207_vm12, %v6067_v0  ;;  %vm18301_vm9 = vcmp.le.s32.totalorder %v14481_v28, %v18300_v18  ;;  %v18303_v0 = vld [vmem:[#allocation101_spill] sm:$0xff]  ;;  %v18304_v49 = vld [vmem:[#allocation98_spill] sm:$0xff] }
 0xe48   : > { %v5441_v57 = vsel %vm18297_vm4, 0.0, %v5433_v5  ;;  %v5884_v33 = vpop.permute.xlu1 %5883  ;;  %5715 = vmax.xlane.f32.xlu0 %v15429_v38  ;;  %v5679_v14 = vmul.f32 %v5663_v6, %v18298_v3  ;;  %v5680_v16 = vmul.f32 %v5664_v17, %v18299_v4  ;;  %v5412_v3 = vrot.slane %v15401_v8, 1 }
 0xe49   : > { %9777 = vmatprep.subr.bf16.mxu0 %v5884_v33  ;;  %v5457_v20 = vsel %vm18301_vm9, %v5357_v34, %v5441_v57  ;;  %v18305_v34 = vld [vmem:[#allocation97_spill] sm:$0xff] }
 0xe4a   : > { %9778 = vmatpush3.bf16.msra.mxu0 %v5884_v33  ;;  %v15445_v43 = vpop.permute.xlu0 %6395  ;;  %v15448_v55 = vadd.f32 %v5679_v14, %v18303_v0  ;;  %v15451_v5 = vadd.f32 %v5680_v16, %v18304_v49  ;;  %v5612_v40 = vadd.f32 %v9752_v47, %v5457_v20  ;;  %v18306_v14 = vld [vmem:[#allocation100_spill] sm:$0xff] }
 0xe4b   : > { %18302 = vst [vmem:[#allocation166_spill] sm:$0xff] %v15445_v43 }
 0xe4c   : > { %v5886_v2 = vpop.permute.xlu1 %5885  ;;  %5711 = vmax.xlane.f32.xlu1 %v15448_v55  ;;  %5713 = vmax.xlane.f32.xlu0 %v15451_v5  ;;  %v5666_v17 = vmul.f32 0.17677669, %v5612_v40 }
 0xe4d   : > { %9779 = vmatprep.subr.bf16.mxu0 %v5886_v2 }
 0xe4e   : > { %9780 = vmatpush3.bf16.msra.mxu0 %v5886_v2  ;;  %v6071_v6 = vpop.permute.xlu0 %6070  ;;  %v5682_v57 = vmul.f32 %v5666_v17, %v18305_v34 }
 0xe4f   : > { %10125 = vmatprep.subr.msk.bf16.mxu0 %vm4207_vm12, %v15445_v43 }
 0xe50   : > { %v6069_v33 = vpop.permute.xlu1 %6068  ;;  %v15459_v0 = vadd.f32 %v5682_v57, %v18306_v14 }
 0xe51   : > { %9814 = vmatmul.mubr.msk.bf16.vlgmr.msra.gmra.mrb[80].mxu1 %vm4207_vm12, %v6069_v33 }
 0xe52   : > { %5717 = vmax.xlane.f32.xlu0 %v15459_v0  ;;  %9817 = vmatprep.mubr.msk.bf16.mxu1 %vm4207_vm12, %v6071_v6  ;;  %v15464_v47 = vpop.permute.xlu0 %5372 }
 0xe54   : > { %v5999_v40 = vpop.permute.xlu1 %5998 }
 0xe55   : > { %v15467_v2 = vadd.f32 %v5999_v40, %v18235_v42  ;;  %v15470_v16 = vadd.f32 %v5999_v40, %v18236_v11  ;;  %v15473_v20 = vadd.f32 %v5999_v40, %v18239_v22  ;;  %v15476_v57 = vadd.f32 %v5999_v40, %v18240_v24 }
 0xe56   : > { %v5365_v17 = vpop.permute.xlu0 %5364  ;;  %v15479_v33 = vadd.f32 %v5999_v40, %v18243_v53  ;;  %v15482_v6 = vadd.f32 %v5999_v40, %v18244_v26  ;;  %v15487_v34 = vadd.f32 %v5999_v40, %v18247_v61  ;;  %v15494_v18 = vadd.f32 %v5999_v40, %v18248_v29 }
 0xe57   : > { %v15498_v26 = vadd.f32 %v5999_v40, %v18233_v62  ;;  %v15501_v14 = vadd.f32 %v5999_v40, %v18234_v36  ;;  %v15510_v4 = vadd.f32 %v5999_v40, %v18237_v31  ;;  %v15518_v29 = vadd.f32 %v5999_v40, %v18241_v1 }
 0xe58   : > { %v6073_v49 = vpop.permute.xlu1 %6072  ;;  %v15521_v24 = vadd.f32 %v5999_v40, %v18242_v50  ;;  %v5413_v1 = vrot.slane %v15464_v47, 1  ;;  %v5411_v62 = vrot.slane %v5365_v17, 1  ;;  %v15547_v15 = vadd.f32 %v5999_v40, %v18245_v48 }
 0xe59   : > { %9818 = vmatmul.mubr.msk.bf16.gmra.mrb[84].mxu1 %vm4207_vm12, %v6073_v49  ;;  %18307 = vst [vmem:[#allocation178_spill] sm:$0xff] %v15510_v4  ;;  %v15515_v49 = vadd.f32 %v5999_v40, %v18238_v51  ;;  %18308 = vst [vmem:[#allocation179_spill] sm:$0xff] %v15518_v29  ;;  %v18317_v29 = vld [vmem:[#allocation159_spill] sm:$0xff]  ;;  %v18319_v4 = vld [vmem:[#allocation160_spill] sm:$0xff] }
 0xe5a   : > { %v15503_v61 = vpop.permute.xlu0 %5388  ;;  %18309 = vst [vmem:[#allocation180_spill] sm:$0xff] %v15521_v24  ;;  %18311 = vst [vmem:[#allocation181_spill] sm:$0xff] %v15547_v15  ;;  %vm18318_vm4 = vcmp.eq.s32.totalorder %v14481_v28, %v18317_v29  ;;  %vm18320_vm9 = vcmp.eq.s32.totalorder %v14481_v28, %v18319_v4 }
 0xe5c   : > { %v5385_v11 = vpop.permute.xlu1 %5384 }
 0xe5d   : > { %6399 = vrot.lane.b32.xlu1 %v18205_v21, %s11393_s1  ;;  %v18310_v21 = vrot.slane %v15384_v35, 1 }
 0xe5e   : > { %v5381_v22 = vpop.permute.xlu0 %5380 }
 0xe60   : > { %v5377_v35 = vpop.permute.xlu1 %5376 }
 0xe62   : > { %v5405_v31 = vpop.permute.xlu0 %5404 }
 0xe63   : > { %v5421_v42 = vrot.slane %v5405_v31, 1 }
 0xe64   : > { %v5401_v43 = vpop.permute.xlu1 %5400 }
 0xe65   : > { %v5437_v51 = vsel %vm1603_vm6, %v5421_v42, %v18310_v21  ;;  %v5430_v21 = vsel %vm1603_vm6, %v5412_v3, %v5413_v1 }
 0xe66   : > { %v5453_v50 = vsel %vm4148_vm2, 0.0, %v5437_v51  ;;  %v15550_v51 = vadd.f32 %v5999_v40, %v18246_v25  ;;  %v5431_v40 = vsel %vm1603_vm6, %v5411_v62, %v5412_v3  ;;  %v5414_v25 = vrot.slane %v5377_v35, 1 }
 0xe67   : > { %v5469_v53 = vsel %vm4116_vm8, %v5405_v31, %v5453_v50  ;;  %v18312_v50 = vld [vmem:[#allocation161_spill] sm:$0xff]  ;;  %v5443_v48 = vsel %vm18320_vm9, 0.0, %v5431_v40  ;;  %v5415_v3 = vrot.slane %v5381_v22, 1 }
 0xe68   : > { %v15540_v36 = vadd.f32 %v15390_v37, %v5469_v53  ;;  %6397 = vrot.lane.b32.xlu0 %v18218_v27, %s11393_s1  ;;  %vm18313_vm13 = vcmp.eq.s32.totalorder %v14481_v28, %v18312_v50  ;;  %v5416_v53 = vrot.slane %v5385_v11, 1  ;;  %v18314_v37 = vrot.slane %v15424_v13, 1  ;;  %v18315_v50 = vld [vmem:[#allocation138_spill] sm:$0xff]  ;;  %v5393_v29 = vpop.permute.xlu1 %5392 }
 0xe69   : > { %v5444_v31 = vsel %vm18313_vm13, 0.0, %v5430_v21  ;;  %v5417_v27 = vrot.slane %v15503_v61, 1  ;;  %vm18316_vm3 = vcmp.le.s32.totalorder %v14481_v28, %v18315_v50  ;;  %vm18321_vm13 = vcmp.eq.s32.totalorder %v14481_v28, %v14688_v60  ;;  %v18324_v50 = vld [vmem:[#allocation137_spill] sm:$0xff] }
 0xe6a   : > { %v5432_v45 = vsel %vm1603_vm6, %v18314_v37, %v5411_v62  ;;  %v5460_v21 = vsel %vm18316_vm3, %v15401_v8, %v5444_v31  ;;  %v5429_v8 = vsel %vm1603_vm6, %v5413_v1, %v5414_v25 }
 0xe6b   : > { %v5442_v24 = vsel %vm18318_vm4, 0.0, %v5432_v45  ;;  %v5426_v37 = vsel %vm1603_vm6, %v5416_v53, %v5417_v27  ;;  %v5625_v15 = vadd.f32 %v15366_v19, %v5460_v21  ;;  %v18322_v45 = vld [vmem:[#allocation136_spill] sm:$0xff]  ;;  %vm18325_vm4 = vcmp.le.s32.totalorder %v14481_v28, %v18324_v50 }
 0xe6c   : > { %v5448_v62 = vsel %vm18321_vm13, 0.0, %v5426_v37  ;;  %vm18323_vm3 = vcmp.le.s32.totalorder %v14481_v28, %v18322_v45  ;;  %v5459_v40 = vsel %vm18325_vm4, %v5365_v17, %v5443_v48  ;;  %v5428_v19 = vsel %vm1603_vm6, %v5414_v25, %v5415_v3  ;;  %v5397_v45 = vpop.permute.xlu0 %5396 }
 0xe6d   : > { %v5458_v31 = vsel %vm18323_vm3, %v15424_v13, %v5442_v24  ;;  %v5420_v21 = vrot.slane %v5401_v43, 1  ;;  %v5464_v37 = vsel %vm4111_vm10, %v5385_v11, %v5448_v62  ;;  %v5445_v1 = vsel %vm4140_vm1, 0.0, %v5429_v8 }
 0xe6e   : > { %v5669_v4 = vmul.f32 0.17677669, %v5625_v15  ;;  %v5617_v13 = vadd.f32 %v15368_v12, %v5458_v31  ;;  %v5427_v24 = vsel %vm1603_vm6, %v5415_v3, %v5416_v53  ;;  %v5418_v50 = vrot.slane %v5393_v29, 1  ;;  %v18328_v53 = vld [vmem:[#allocation165_spill] sm:$0xff] }
 0xe6f   : > { %v5620_v48 = vadd.f32 %v15372_v7, %v5459_v40  ;;  %v5446_v17 = vsel %vm4141_vm15, 0.0, %v5428_v19  ;;  %v5641_v11 = vadd.f32 %v15374_v52, %v5464_v37  ;;  %v5422_v62 = vsel %vm1603_vm6, %v5420_v21, %v5421_v42  ;;  %v18330_v7 = vld [vmem:[#allocation107_spill] sm:$0xff]  ;;  %v18486_v15 = vld [vmem:[#allocation97_spill] sm:$0xff] }
 0xe70   : > { %v5461_v12 = vsel %vm4108_vm14, %v15464_v47, %v5445_v1  ;;  %vm18329_vm9 = vcmp.eq.s32.totalorder %v14481_v28, %v18328_v53  ;;  %v5685_v8 = vmul.f32 %v5669_v4, %v18330_v7  ;;  %v5667_v31 = vmul.f32 0.17677669, %v5617_v13 }
 0xe71   : > { %v5447_v3 = vsel %vm18329_vm9, 0.0, %v5427_v24  ;;  %v5462_v19 = vsel %vm4109_vm0, %v5377_v35, %v5446_v17  ;;  %v5419_v52 = vrot.slane %v5397_v45, 1  ;;  %v5425_v42 = vsel %vm1603_vm6, %v5417_v27, %v5418_v50  ;;  %v18333_v24 = vld [vmem:[#allocation155_spill] sm:$0xff] }
 0xe72   : > { %v5668_v37 = vmul.f32 0.17677669, %v5620_v48  ;;  %v5452_v47 = vsel %vm4147_vm5, 0.0, %v5422_v62  ;;  %v5628_v1 = vadd.f32 %v15370_v54, %v5461_v12  ;;  %v5673_v53 = vmul.f32 0.17677669, %v5641_v11  ;;  %v18336_v48 = vld [vmem:[#allocation111_spill] sm:$0xff] }
 0xe73   : > { %vm18334_vm13 = vcmp.le.s32.totalorder %v14481_v28, %v18333_v24  ;;  %v5424_v13 = vsel %vm1603_vm6, %v5418_v50, %v5419_v52  ;;  %v5633_v35 = vadd.f32 %v15376_v10, %v5462_v19  ;;  %v5449_v27 = vsel %vm4144_vm11, 0.0, %v5425_v42  ;;  %v18337_v62 = vld [vmem:[#allocation105_spill] sm:$0xff]  ;;  %v18341_v10 = vld [vmem:[#allocation102_spill] sm:$0xff]  ;;  %v18342_v42 = vld [vmem:[#allocation115_spill] sm:$0xff] }
 0xe74   : > { %v5463_v4 = vsel %vm18334_vm13, %v5381_v22, %v5447_v3  ;;  %v15634_v40 = vadd.f32 %v5685_v8, %v18336_v48  ;;  %v5683_v25 = vmul.f32 %v5667_v31, %v18337_v62  ;;  %v5468_v11 = vsel %vm4115_vm7, %v5401_v43, %v5452_v47  ;;  %v18339_v12 = vld [vmem:[#allocation177_spill] sm:$0xff]  ;;  %v18546_v17 = vld [vmem:[#allocation71_spill] sm:$0xff] }
 0xe75   : > { %v5636_v22 = vadd.f32 %v15380_v44, %v5463_v4  ;;  %vm18340_vm3 = vcmp.eq.s32.totalorder %v14481_v28, %v18339_v12  ;;  %v5684_v3 = vmul.f32 %v5668_v37, %v18341_v10  ;;  %v5670_v19 = vmul.f32 0.17677669, %v5628_v1  ;;  %v18343_v31 = vld [vmem:[#allocation173_spill] sm:$0xff] }
 0xe76   : > { %v5450_v50 = vsel %vm18340_vm3, 0.0, %v5424_v13  ;;  %v5689_v8 = vmul.f32 %v5673_v53, %v18342_v42  ;;  %vm18344_vm4 = vcmp.le.s32.totalorder %v14481_v28, %v18343_v31  ;;  %v5671_v54 = vmul.f32 0.17677669, %v5633_v35  ;;  %v18345_v44 = vld [vmem:[#allocation109_spill] sm:$0xff]  ;;  %v18346_v13 = vld [vmem:[#allocation174_spill] sm:$0xff] }
 0xe77   : > { %v5465_v24 = vsel %vm18344_vm4, %v15503_v61, %v5449_v27  ;;  %v5657_v43 = vadd.f32 %v15382_v41, %v5468_v11  ;;  %v15653_v47 = vadd.f32 %v5683_v25, %v18345_v44  ;;  %v5423_v4 = vsel %vm1603_vm6, %v5419_v52, %v5420_v21  ;;  %v18348_v53 = vld [vmem:[#allocation106_spill] sm:$0xff]  ;;  %v18349_v61 = vld [vmem:[#allocation104_spill] sm:$0xff]  ;;  %v18350_v27 = vld [vmem:[#allocation119_spill] sm:$0xff] }
 0xe78   : > { %vm18347_vm9 = vcmp.le.s32.totalorder %v14481_v28, %v18346_v13  ;;  %v5672_v1 = vmul.f32 0.17677669, %v5636_v22  ;;  %v15662_v10 = vadd.f32 %v5684_v3, %v18348_v53  ;;  %v5686_v35 = vmul.f32 %v5670_v19, %v18349_v61  ;;  %v18351_v21 = vld [vmem:[#allocation175_spill] sm:$0xff]  ;;  %v18353_v22 = vld [vmem:[#allocation113_spill] sm:$0xff]  ;;  %v18354_v3 = vld [vmem:[#allocation108_spill] sm:$0xff] }
 0xe79   : > { %v5466_v37 = vsel %vm18347_vm9, %v5393_v29, %v5450_v50  ;;  %v5644_v41 = vadd.f32 %v15378_v9, %v5465_v24  ;;  %v15667_v25 = vadd.f32 %v5689_v8, %v18350_v27  ;;  %v5677_v11 = vmul.f32 0.17677669, %v5657_v43  ;;  %v18355_v9 = vld [vmem:[#allocation110_spill] sm:$0xff] }
 0xe7a   : > { %vm18352_vm13 = vcmp.eq.s32.totalorder %v14481_v28, %v18351_v21  ;;  %v5649_v29 = vadd.f32 %v15386_v59, %v5466_v37  ;;  %v5687_v50 = vmul.f32 %v5671_v54, %v18353_v22  ;;  %v15677_v19 = vadd.f32 %v5686_v35, %v18354_v3  ;;  %v18356_v43 = vld [vmem:[#allocation170_spill] sm:$0xff]  ;;  %v18358_v59 = vld [vmem:[#allocation117_spill] sm:$0xff]  ;;  %v18359_v37 = vld [vmem:[#allocation120_spill] sm:$0xff] }
 0xe7b   : > { %v5451_v52 = vsel %vm18352_vm13, 0.0, %v5423_v4  ;;  %v5688_v24 = vmul.f32 %v5672_v1, %v18355_v9  ;;  %v5674_v8 = vmul.f32 0.17677669, %v5644_v41  ;;  %vm18357_vm3 = vcmp.le.s32.totalorder %v14481_v28, %v18356_v43  ;;  %v18360_v1 = vld [vmem:[#allocation114_spill] sm:$0xff]  ;;  %v18361_v9 = vld [vmem:[#allocation112_spill] sm:$0xff] }
 0xe7c   : > { %v5467_v53 = vsel %vm18357_vm3, %v5397_v45, %v5451_v52  ;;  %v5675_v13 = vmul.f32 0.17677669, %v5649_v29  ;;  %v15685_v4 = vadd.f32 %v5687_v50, %v18358_v59  ;;  %v5693_v54 = vmul.f32 %v5677_v11, %v18359_v37  ;;  %v18362_v45 = vld [vmem:[#allocation148_spill] sm:$0xff]  ;;  %v18363_v29 = vld [vmem:[#allocation118_spill] sm:$0xff] }
 0xe7d   : > { %v5678_v22 = vmul.f32 0.17677669, %v15540_v36  ;;  %v5652_v35 = vadd.f32 %v15395_v23, %v5467_v53  ;;  %v15692_v41 = vadd.f32 %v5688_v24, %v18360_v1  ;;  %v5690_v3 = vmul.f32 %v5674_v8, %v18361_v9  ;;  %v18364_v36 = vld [vmem:[#allocation116_spill] sm:$0xff]  ;;  %v18365_v23 = vld [vmem:[#allocation123_spill] sm:$0xff]  ;;  %v18366_v24 = vld [vmem:[#allocation122_spill] sm:$0xff] }
 0xe7e   : > { %v15697_v52 = vadd.f32 %v5693_v54, %v18362_v45  ;;  %v5691_v50 = vmul.f32 %v5675_v13, %v18363_v29  ;;  %v18367_v8 = vld [vmem:[#allocation133_spill] sm:$0xff] }
 0xe7f   : > { %v5676_v59 = vmul.f32 0.17677669, %v5652_v35  ;;  %v15702_v11 = vadd.f32 %v5690_v3, %v18364_v36  ;;  %v5694_v53 = vmul.f32 %v5678_v22, %v18365_v23  ;;  %v18368_v45 = vld [vmem:[#allocation121_spill] sm:$0xff]  ;;  %v18369_v35 = vld [vmem:[#allocation127_spill] sm:$0xff] }
 0xe80   : > { %v15707_v1 = vadd.f32 %v5691_v50, %v18366_v24 }
 0xe81   : > { %5723 = vmax.xlane.f32.xlu1 %v15634_v40  ;;  %v15711_v54 = vadd.f32 %v5694_v53, %v18367_v8  ;;  %v5692_v13 = vmul.f32 %v5676_v59, %v18368_v45 }
 0xe83   : > { %v15716_v29 = vadd.f32 %v5692_v13, %v18369_v35 }
 0xe85   : > { %5719 = vmax.xlane.f32.xlu1 %v15653_v47 }
 0xe87   : > { %5721 = vmax.xlane.f32.xlu0 %v15662_v10 }
 0xe89   : > { %5731 = vmax.xlane.f32.xlu1 %v15667_v25 }
 0xe8b   : > { %5725 = vmax.xlane.f32.xlu0 %v15677_v19 }
 0xe8d   : > { %5727 = vmax.xlane.f32.xlu1 %v15685_v4 }
 0xe8f   : > { %5729 = vmax.xlane.f32.xlu0 %v15692_v41 }
 0xe91   : > { %5739 = vmax.xlane.f32.xlu1 %v15697_v52 }
 0xe93   : > { %5733 = vmax.xlane.f32.xlu0 %v15702_v11 }
 0xe95   : > { %5735 = vmax.xlane.f32.xlu1 %v15707_v1 }
 0xe97   : > { %5741 = vmax.xlane.f32.xlu0 %v15711_v54 }
 0xe9b   : > { %5737 = vmax.xlane.f32.xlu0 %v15716_v29 }
 0xed5   : > { %v5716_v22 = vpop.xlane.xlu0 %5715 }
 0xed6   : > { %v5745_v3 = vsub.f32 %v15429_v38, %v5716_v22 }
 0xed8   : > { %v5763_v23 = vmul.f32 1.442695, %v5745_v3 }
 0xed9   : > { %v5712_v50 = vpop.xlane.xlu1 %5711  ;;  %v5714_v24 = vpop.xlane.xlu0 %5713 }
 0xeda   : > { %10721 = vpow2.f32 %v5763_v23  ;;  %v5743_v36 = vsub.f32 %v15448_v55, %v5712_v50  ;;  %v5744_v53 = vsub.f32 %v15451_v5, %v5714_v24  ;;  %v18371_v5 = vld [vmem:[#allocation70_spill] sm:$0xff] }
 0xedc   : > { %v5759_v8 = vmul.f32 1.442695, %v5743_v36  ;;  %v5761_v59 = vmul.f32 1.442695, %v5744_v53 }
 0xedd   : > { %v15741_v36 = vpop.permute.xlu1 %6399 }
 0xede   : > { %10723 = vpow2.f32 %v5759_v8 }
 0xedf   : > { %10725 = vpow2.f32 %v5761_v59  ;;  %v5718_v45 = vpop.xlane.xlu0 %5717 }
 0xee0   : > { %v5746_v13 = vsub.f32 %v15459_v0, %v5718_v45  ;;  %v18370_v0 = vld [vmem:[#allocation73_spill] sm:$0xff]  ;;  %v18372_v45 = vld [vmem:[#allocation78_spill] sm:$0xff] }
 0xee2   : > { %v5765_v35 = vmul.f32 1.442695, %v5746_v13 }
 0xee3   : > { %v15743_v8 = vpop.permute.xlu0 %6397 }
 0xee4   : > { %v15723_v9 = vpop.eup %10721  ;;  %10727 = vpow2.f32 %v5765_v35 }
 0xee5   : > { %5795 = vadd.xlane.f32.xlu1 %v15723_v9 }
 0xee8   : > { %v15726_v38 = vpop.eup %10723 }
 0xee9   : > { %v15728_v23 = vpop.eup %10725  ;;  %5791 = vadd.xlane.f32.xlu1 %v15726_v38 }
 0xeea   : > { %5793 = vadd.xlane.f32.xlu0 %v15728_v23 }
 0xeee   : > { %v15732_v55 = vpop.eup %10727 }
 0xeef   : > { %5797 = vadd.xlane.f32.xlu1 %v15732_v55 }
 0xf00   : > { %6403 = vrot.lane.b32.xlu0 %v18370_v0, %s11393_s1  ;;  %6401 = vrot.lane.b32.xlu1 %v18371_v5, %s11393_s1 }
 0xf04   : > { %6405 = vrot.lane.b32.xlu0 %v18372_v45, %s11393_s1 }
 0xf0e   : > { %v5724_v24 = vpop.xlane.xlu1 %5723 }
 0xf0f   : > { %v5749_v35 = vsub.f32 %v15634_v40, %v5724_v24 }
 0xf11   : > { %v5771_v50 = vmul.f32 1.442695, %v5749_v35 }
 0xf12   : > { %v5720_v22 = vpop.xlane.xlu1 %5719 }
 0xf13   : > { %v5747_v3 = vsub.f32 %v15653_v47, %v5720_v22  ;;  %10729 = vpow2.f32 %v5771_v50 }
 0xf14   : > { %v5722_v53 = vpop.xlane.xlu0 %5721 }
 0xf15   : > { %v5767_v59 = vmul.f32 1.442695, %v5747_v3  ;;  %v5748_v13 = vsub.f32 %v15662_v10, %v5722_v53 }
 0xf16   : > { %v5732_v0 = vpop.xlane.xlu1 %5731 }
 0xf17   : > { %v5769_v5 = vmul.f32 1.442695, %v5748_v13  ;;  %10731 = vpow2.f32 %v5767_v59  ;;  %v5753_v27 = vsub.f32 %v15667_v25, %v5732_v0 }
 0xf18   : > { %v5726_v37 = vpop.xlane.xlu0 %5725 }
 0xf19   : > { %v5750_v45 = vsub.f32 %v15677_v19, %v5726_v37  ;;  %10733 = vpow2.f32 %v5769_v5  ;;  %v5779_v12 = vmul.f32 1.442695, %v5753_v27 }
 0xf1a   : > { %v5728_v24 = vpop.xlane.xlu1 %5727 }
 0xf1b   : > { %v5773_v43 = vmul.f32 1.442695, %v5750_v45  ;;  %v5751_v47 = vsub.f32 %v15685_v4, %v5728_v24 }
 0xf1c   : > { %v5730_v40 = vpop.xlane.xlu0 %5729 }
 0xf1d   : > { %10735 = vpow2.f32 %v5773_v43  ;;  %v15751_v22 = vpop.eup %10729  ;;  %v5775_v3 = vmul.f32 1.442695, %v5751_v47  ;;  %v5752_v19 = vsub.f32 %v15692_v41, %v5730_v40 }
 0xf1e   : > { %10737 = vpow2.f32 %v5779_v12  ;;  %v5740_v50 = vpop.xlane.xlu1 %5739 }
 0xf1f   : > { %10739 = vpow2.f32 %v5775_v3  ;;  %v5777_v5 = vmul.f32 1.442695, %v5752_v19  ;;  %v5757_v13 = vsub.f32 %v15697_v52, %v5740_v50 }
 0xf20   : > { %v5734_v35 = vpop.xlane.xlu0 %5733 }
 0xf21   : > { %v15753_v10 = vpop.eup %10731  ;;  %v5754_v12 = vsub.f32 %v15702_v11, %v5734_v35  ;;  %10741 = vpow2.f32 %v5777_v5 }
 0xf23   : > { %5803 = vadd.xlane.f32.xlu0 %v15751_v22  ;;  %v15758_v27 = vpop.eup %10733  ;;  %v5781_v40 = vmul.f32 1.442695, %v5754_v12 }
 0xf24   : > { %v9815_v37 = vpop.f32.mrb[80].mxu1  ;;  %5799 = vadd.xlane.f32.xlu1 %v15753_v10  ;;  %v5742_v25 = vpop.xlane.xlu0 %5741 }
 0xf25   : > { %v6180_v0 = vpop.f32.mrb[81].mxu1  ;;  %v5758_v35 = vsub.f32 %v15711_v54, %v5742_v25 }
 0xf26   : > { %v15760_v43 = vpop.f32.mrb[82].mxu1 }
 0xf27   : > { %5801 = vadd.xlane.f32.xlu0 %v15758_v27  ;;  %v15763_v4 = vpop.f32.mrb[83].mxu1  ;;  %v15767_v53 = vpop.eup %10735  ;;  %v5789_v12 = vmul.f32 1.442695, %v5758_v35  ;;  %v18375_v35 = vpack.c.bf16 %v15476_v57, %v15473_v20  ;;  %v18381_v20 = vld [vmem:[#allocation131_spill] sm:$0xff] }
 0xf28   : > { %v5738_v45 = vpop.xlane.xlu0 %5737  ;;  %v15771_v3 = vpop.eup %10737 }
 0xf29   : > { %v5756_v41 = vsub.f32 %v15716_v29, %v5738_v45  ;;  %v5787_v29 = vmul.f32 1.442695, %v5757_v13  ;;  %v5736_v45 = vpop.xlane.xlu1 %5735  ;;  %v15779_v5 = vpop.eup %10739 }
 0xf2a   : > { %v5755_v52 = vsub.f32 %v15707_v1, %v5736_v45  ;;  %v18376_v45 = vpack.c.bf16 %v15482_v6, %v15479_v33 }
 0xf2b   : > { %v5785_v59 = vmul.f32 1.442695, %v5756_v41  ;;  %5805 = vadd.xlane.f32.xlu0 %v15767_v53  ;;  %v15783_v50 = vpop.eup %10741 }
 0xf2c   : > { %v9819_v24 = vpop.f32.mrb[84].mxu1 }
 0xf2d   : > { %10743 = vpow2.f32 %v5785_v59  ;;  %v6196_v47 = vpop.f32.mrb[85].mxu1  ;;  %v5783_v59 = vmul.f32 1.442695, %v5755_v52 }
 0xf2e   : > { %v15773_v19 = vpop.f32.mrb[86].mxu1  ;;  %10745 = vpow2.f32 %v5781_v40  ;;  %v18373_v40 = vpack.c.bf16 %v15250_v63, %v15243_v30  ;;  %v18377_v30 = vpack.c.bf16 %v15494_v18, %v15487_v34  ;;  %v18378_v63 = vpack.c.bf16 %v15259_v39, %v15253_v56  ;;  %v18383_v18 = vld [vmem:[#allocation141_spill] sm:$0xff]  ;;  %v18384_v34 = vld [vmem:[#allocation134_spill] sm:$0xff] }
 0xf2f   : > { %5811 = vadd.xlane.f32.xlu0 %v15771_v3  ;;  %v15776_v11 = vpop.f32.mrb[87].mxu1  ;;  %10747 = vpow2.f32 %v5787_v29  ;;  %v18374_v29 = vpack.c.bf16 %v15470_v16, %v15467_v2  ;;  %v18379_v2 = vld [vmem:[#allocation81_spill] sm:$0xff]  ;;  %v18380_v16 = vld [vmem:[#allocation135_spill] sm:$0xff]  ;;  %v18385_v33 = vpack.c.bf16 %v18383_v18, %v18384_v34  ;;  %v18386_v56 = vld [vmem:[#allocation86_spill] sm:$0xff]  ;;  %v18387_v39 = vpack.c.bf16 %v15501_v14, %v15498_v26 }
 0xf30   : > { %10749 = vpow2.f32 %v5789_v12  ;;  %v18382_v57 = vpack.c.bf16 %v18380_v16, %v18381_v20  ;;  %v18391_v12 = vld [vmem:[#allocation179_spill] sm:$0xff]  ;;  %v18393_v26 = vld [vmem:[#allocation181_spill] sm:$0xff] }
 0xf31   : > { %10751 = vpow2.f32 %v5783_v59  ;;  %v18394_v14 = vpack.c.bf16 %v15550_v51, %v18393_v26 }
 0xf33   : > { %5807 = vadd.xlane.f32.xlu0 %v15779_v5 }
 0xf37   : > { %v15785_v41 = vpop.eup %10743  ;;  %5809 = vadd.xlane.f32.xlu0 %v15783_v50 }
 0xf38   : > { %5817 = vadd.xlane.f32.xlu1 %v15785_v41  ;;  %v15789_v54 = vpop.eup %10745 }
 0xf39   : > { %v15792_v25 = vpop.eup %10747 }
 0xf3a   : > { %v15795_v1 = vpop.eup %10749 }
 0xf3b   : > { %5813 = vadd.xlane.f32.xlu0 %v15789_v54  ;;  %v15798_v13 = vpop.eup %10751 }
 0xf3f   : > { %5819 = vadd.xlane.f32.xlu0 %v15792_v25 }
 0xf43   : > { %5821 = vadd.xlane.f32.xlu0 %v15795_v1 }
 0xf47   : > { %5815 = vadd.xlane.f32.xlu0 %v15798_v13 }
 0xf49   : > { %6074 = vrot.lane.b32.xlu1 %v18373_v40, %s11393_s1 }
 0xf4d   : > { %6379 = vrot.lane.b32.xlu1 %v18374_v29, %s11393_s1 }
 0xf51   : > { %6383 = vrot.lane.b32.xlu1 %v18375_v35, %s11393_s1 }
 0xf55   : > { %6387 = vrot.lane.b32.xlu1 %v18376_v45, %s11393_s1 }
 0xf59   : > { %6391 = vrot.lane.b32.xlu1 %v18377_v30, %s11393_s1 }
 0xf5d   : > { %6076 = vrot.lane.b32.xlu0 %v18378_v63, %s11393_s1  ;;  %6245 = vrot.lane.b32.xlu1 %v6180_v0, %s11376_s18 }
 0xf61   : > { %6407 = vrot.lane.b32.xlu0 %v18379_v2, %s11393_s1  ;;  %6253 = vrot.lane.b32.xlu1 %v9815_v37, %s11375_s16  ;;  %v18388_v37 = vld [vmem:[#allocation178_spill] sm:$0xff]  ;;  %v18439_v2 = vld [vmem:[#allocation69_spill] sm:$0xff] }
 0xf62   : > { %v18389_v0 = vpack.c.bf16 %v15515_v49, %v18388_v37 }
 0xf65   : > { %6078 = vrot.lane.b32.xlu0 %v18382_v57, %s11393_s1  ;;  %6261 = vrot.lane.b32.xlu1 %v6196_v47, %s11380_s6  ;;  %v18395_v57 = vld [vmem:[#allocation166_spill] sm:$0xff] }
 0xf69   : > { %6080 = vrot.lane.b32.xlu0 %v18385_v33, %s11393_s1  ;;  %6269 = vrot.lane.b32.xlu1 %v9819_v24, %s11384_s24  ;;  %v18390_v24 = vld [vmem:[#allocation180_spill] sm:$0xff] }
 0xf6a   : > { %v18392_v59 = vpack.c.bf16 %v18390_v24, %v18391_v12 }
 0xf6d   : > { %6409 = vrot.lane.b32.xlu0 %v18386_v56, %s11393_s1 }
 0xf71   : > { %6381 = vrot.lane.b32.xlu0 %v18387_v39, %s11393_s1 }
 0xf72   : > { %v5796_v6 = vpop.xlane.xlu1 %5795 }
 0xf75   : > { %6385 = vrot.lane.b32.xlu0 %v18389_v0, %s11393_s1 }
 0xf76   : > { %v5792_v47 = vpop.xlane.xlu1 %5791 }
 0xf77   : > { %10753 = vrcp.f32 %v5792_v47  ;;  %v5794_v52 = vpop.xlane.xlu0 %5793 }
 0xf78   : > { %10755 = vrcp.f32 %v5794_v52 }
 0xf79   : > { %6389 = vrot.lane.b32.xlu0 %v18392_v59, %s11393_s1  ;;  %10757 = vrcp.f32 %v5796_v6 }
 0xf7c   : > { %v5798_v40 = vpop.xlane.xlu1 %5797 }
 0xf7d   : > { %10759 = vrcp.f32 %v5798_v40  ;;  %6393 = vrot.lane.b32.xlu0 %v18394_v14, %s11393_s1 }
 0xf81   : > { %v10754_v29 = vpop.eup %10753  ;;  %6249 = vrot.lane.b32.xlu0 %v15763_v4, %s11378_s22 }
 0xf82   : > { %v10756_v49 = vpop.eup %10755  ;;  %v5839_v35 = vmul.f32 %v10754_v29, %v15726_v38  ;;  %v6436_v38 = vsel %vm4207_vm12, %v18395_v57, 0 }
 0xf83   : > { %v5840_v45 = vmul.f32 %v10756_v49, %v15728_v23  ;;  %v10758_v30 = vpop.eup %10757  ;;  %v6442_v23 = vsel %vm4207_vm12, %v15741_v36, 0 }
 0xf84   : > { %v5841_v20 = vmul.f32 %v10758_v30, %v15723_v9  ;;  %v6439_v9 = vsel %vm4207_vm12, %v15743_v8, 0 }
 0xf85   : > { %6257 = vrot.lane.b32.xlu0 %v15760_v43, %s11377_s12  ;;  %v5855_v63 = vpack.c.bf16 %v5840_v45, %v5839_v35 }
 0xf87   : > { %v10760_v16 = vpop.eup %10759  ;;  %9781 = vmatprep.mubr.bf16.mxu0 %v5855_v63 }
 0xf88   : > { %v5842_v51 = vmul.f32 %v10760_v16, %v15732_v55  ;;  %v6402_v55 = vpop.permute.xlu1 %6401 }
 0xf89   : > { %6265 = vrot.lane.b32.xlu0 %v15776_v11, %s11383_s26  ;;  %v6445_v43 = vsel %vm4207_vm12, %v6402_v55, 0 }
 0xf8a   : > { %v5856_v4 = vpack.c.bf16 %v5842_v51, %v5841_v20 }
 0xf8c   : > { %9782 = vmatmul.mubr.bf16.vlgmr.msra.gmra.mrb[96].mxu0 %v5856_v4 }
 0xf8d   : > { %6273 = vrot.lane.b32.xlu0 %v15773_v19, %s11382_s20  ;;  %9830 = vmatpush3.bf16.xpose.msra.mxu0 %v6436_v38  ;;  %v6404_v19 = vpop.permute.xlu0 %6403 }
 0xf8e   : > { %10126 = vmatprep.subr.msk.bf16.mxu0 %vm4207_vm12, %v15743_v8  ;;  %v6448_v8 = vsel %vm4207_vm12, %v6404_v19, 0 }
 0xf91   : > { %v6406_v11 = vpop.permute.xlu0 %6405 }
 0xf92   : > { %v6451_v33 = vsel %vm4207_vm12, %v6406_v11, 0 }
 0xf95   : > { %9832 = vmatpush3.bf16.xpose.msra.mxu0 %v6439_v9 }
 0xf96   : > { %10127 = vmatprep.subr.msk.bf16.mxu0 %vm4207_vm12, %v15741_v36 }
 0xf9d   : > { %9834 = vmatpush3.bf16.xpose.msra.mxu0 %v6442_v23 }
 0xf9e   : > { %10128 = vmatprep.subr.msk.bf16.mxu0 %vm4207_vm12, %v6402_v55 }
 0xfa5   : > { %9836 = vmatpush3.bf16.xpose.msra.mxu0 %v6445_v43 }
 0xfa6   : > { %10129 = vmatprep.subr.msk.bf16.mxu0 %vm4207_vm12, %v6404_v19 }
 0xfad   : > { %9838 = vmatpush3.bf16.xpose.msra.mxu0 %v6448_v8 }
 0xfae   : > { %10130 = vmatprep.subr.msk.bf16.mxu0 %vm4207_vm12, %v6406_v11 }
 0xfb0   : > { %v5804_v18 = vpop.xlane.xlu0 %5803 }
 0xfb1   : > { %v5800_v34 = vpop.xlane.xlu1 %5799 }
 0xfb2   : > { %10761 = vrcp.f32 %v5800_v34 }
 0xfb4   : > { %v5802_v36 = vpop.xlane.xlu0 %5801 }
 0xfb5   : > { %10763 = vrcp.f32 %v5802_v36  ;;  %9840 = vmatpush3.bf16.xpose.msra.mxu0 %v6451_v33 }
 0xfb6   : > { %10765 = vrcp.f32 %v5804_v18 }
 0xfb8   : > { %v5806_v39 = vpop.xlane.xlu0 %5805 }
 0xfb9   : > { %10767 = vrcp.f32 %v5806_v39 }
 0xfbc   : > { %v5812_v6 = vpop.xlane.xlu0 %5811  ;;  %v10762_v37 = vpop.eup %10761 }
 0xfbd   : > { %v5843_v52 = vmul.f32 %v10762_v37, %v15753_v10 }
 0xfbf   : > { %v10764_v0 = vpop.eup %10763 }
 0xfc0   : > { %v5808_v47 = vpop.xlane.xlu0 %5807  ;;  %v5844_v24 = vmul.f32 %v10764_v0, %v15758_v27  ;;  %v10766_v12 = vpop.eup %10765 }
 0xfc1   : > { %10769 = vrcp.f32 %v5808_v47  ;;  %v5845_v14 = vmul.f32 %v10766_v12, %v15751_v22 }
 0xfc2   : > { %v5857_v59 = vpack.c.bf16 %v5844_v24, %v5843_v52 }
 0xfc3   : > { %v10768_v40 = vpop.eup %10767 }
 0xfc4   : > { %9785 = vmatprep.mubr.bf16.mxu0 %v5857_v59  ;;  %v5810_v26 = vpop.xlane.xlu0 %5809  ;;  %v5846_v29 = vmul.f32 %v10768_v40, %v15767_v53 }
 0xfc5   : > { %10771 = vrcp.f32 %v5810_v26  ;;  %v5818_v49 = vpop.xlane.xlu1 %5817 }
 0xfc6   : > { %v5858_v35 = vpack.c.bf16 %v5846_v29, %v5845_v14  ;;  %10773 = vrcp.f32 %v5812_v6 }
 0xfc8   : > { %9786 = vmatmul.mubr.bf16.gmra.mrb[100].mxu0 %v5858_v35  ;;  %v5814_v45 = vpop.xlane.xlu0 %5813 }
 0xfc9   : > { %10775 = vrcp.f32 %v5814_v45  ;;  %v6075_v10 = vpop.permute.xlu1 %6074 }
 0xfca   : > { %9821 = vmatprep.mubr.msk.bf16.mxu1 %vm4207_vm12, %v6075_v10 }
 0xfcb   : > { %v10770_v30 = vpop.eup %10769 }
 0xfcc   : > { %v5820_v27 = vpop.xlane.xlu0 %5819  ;;  %v5847_v20 = vmul.f32 %v10770_v30, %v15779_v5 }
 0xfcd   : > { %v6380_v37 = vpop.permute.xlu1 %6379 }
 0xfcf   : > { %v10772_v63 = vpop.eup %10771 }
 0xfd0   : > { %v5822_v16 = vpop.xlane.xlu0 %5821  ;;  %v5848_v22 = vmul.f32 %v10772_v63, %v15783_v50  ;;  %v10774_v51 = vpop.eup %10773 }
 0xfd1   : > { %10777 = vrcp.f32 %v5822_v16  ;;  %v5849_v38 = vmul.f32 %v10774_v51, %v15771_v3  ;;  %v6384_v0 = vpop.permute.xlu1 %6383 }
 0xfd2   : > { %v5859_v53 = vpack.c.bf16 %v5848_v22, %v5847_v20  ;;  %10779 = vrcp.f32 %v5818_v49 }
 0xfd3   : > { %v10776_v4 = vpop.eup %10775  ;;  %10781 = vrcp.f32 %v5820_v27 }
 0xfd4   : > { %9789 = vmatprep.mubr.bf16.mxu0 %v5859_v53  ;;  %v5816_v57 = vpop.xlane.xlu0 %5815  ;;  %v5850_v9 = vmul.f32 %v10776_v4, %v15789_v54 }
 0xfd5   : > { %10783 = vrcp.f32 %v5816_v57  ;;  %v6388_v47 = vpop.permute.xlu1 %6387 }
 0xfd6   : > { %v5860_v23 = vpack.c.bf16 %v5850_v9, %v5849_v38 }
 0xfd8   : > { %9790 = vmatmul.mubr.bf16.gmra.mrb[104].mxu0 %v5860_v23  ;;  %v6077_v55 = vpop.permute.xlu0 %6076 }
 0xfd9   : > { %9822 = vmatmul.mubr.msk.bf16.gmra.mrb[88].mxu1 %vm4207_vm12, %v6077_v55  ;;  %v6392_v24 = vpop.permute.xlu1 %6391 }
 0xfdb   : > { %v10778_v5 = vpop.eup %10777 }
 0xfdc   : > { %v6408_v50 = vpop.permute.xlu0 %6407  ;;  %v10780_v43 = vpop.eup %10779  ;;  %v5854_v3 = vmul.f32 %v10778_v5, %v15795_v1 }
 0xfdd   : > { %10131 = vmatprep.subr.msk.bf16.mxu0 %vm4207_vm12, %v6408_v50  ;;  %v6454_v19 = vsel %vm4207_vm12, %v6408_v50, 0  ;;  %v10782_v11 = vpop.eup %10781  ;;  %v5852_v34 = vmul.f32 %v10780_v43, %v15785_v41  ;;  %v16034_v4 = vpop.permute.xlu1 %6245 }
 0xfde   : > { %9842 = vmatpush3.bf16.xpose.msra.mxu0 %v6454_v19  ;;  %v5853_v36 = vmul.f32 %v10782_v11, %v15792_v25 }
 0xfdf   : > { %v10784_v8 = vpop.eup %10783 }
 0xfe0   : > { %v6079_v18 = vpop.permute.xlu0 %6078  ;;  %v5851_v54 = vmul.f32 %v10784_v8, %v15798_v13  ;;  %v5862_v39 = vpack.c.bf16 %v5854_v3, %v5853_v36  ;;  %v18412_v36 = vld [vmem:[#allocation88_spill] sm:$0xff]  ;;  %v18433_v8 = vld [vmem:[#allocation93_spill] sm:$0xff] }
 0xfe1   : > { %9825 = vmatprep.mubr.msk.bf16.mxu1 %vm4207_vm12, %v6079_v18  ;;  %v16038_v49 = vpop.permute.xlu1 %6253 }
 0xfe2   : > { %v5861_v33 = vpack.c.bf16 %v5852_v34, %v5851_v54  ;;  %v9122_v34 = vld [vmem:[#allocation13 + $0x7] ss:$0 sm:$0xff]  ;;  %v18432_v54 = vld [vmem:[#allocation74_spill] sm:$0xff] }
 0xfe4   : > { %9793 = vmatprep.mubr.bf16.mxu0 %v5861_v33  ;;  %v6081_v6 = vpop.permute.xlu0 %6080 }
 0xfe5   : > { %9794 = vmatmul.mubr.bf16.gmra.mrb[108].mxu0 %v5862_v39  ;;  %9826 = vmatmul.mubr.msk.bf16.gmra.mrb[92].mxu1 %vm4207_vm12, %v6081_v6  ;;  %v18413_v6 = vld [vmem:[#allocation90_spill] sm:$0xff]  ;;  %v16042_v63 = vpop.permute.xlu1 %6261 }
 0xfe6   : > { %9845 = vmatprep.mubr.msk.bf16.mxu0 %vm4207_vm12, %v6380_v37 }
 0xfe8   : > { %v6410_v1 = vpop.permute.xlu0 %6409 }
 0xfe9   : > { %10132 = vmatprep.subr.msk.bf16.mxu0 %vm4207_vm12, %v6410_v1  ;;  %v6457_v13 = vsel %vm4207_vm12, %v6410_v1, 0 }
 0xfea   : > { %9844 = vmatpush3.bf16.xpose.msra.mxu0 %v6457_v13  ;;  %v18414_v13 = vld [vmem:[#allocation87_spill] sm:$0xff] }
 0xfec   : > { %v6382_v41 = vpop.permute.xlu0 %6381 }
 0xff0   : > { %v6386_v25 = vpop.permute.xlu0 %6385 }
 0xff1   : > { %9846 = vmatmul.mubr.msk.bf16.vlgmr.msra.gmra.mrb[112].mxu0 %vm4207_vm12, %v6382_v41  ;;  %v18415_v41 = vld [vmem:[#allocation89_spill] sm:$0xff] }
 0xff2   : > { %9849 = vmatprep.mubr.msk.bf16.mxu0 %vm4207_vm12, %v6384_v0  ;;  %v18416_v0 = vld [vmem:[#allocation59_spill] sm:$0xff] }
 0xff4   : > { %v6390_v52 = vpop.permute.xlu0 %6389 }
 0xff8   : > { %v6394_v12 = vpop.permute.xlu0 %6393 }
 0xff9   : > { %9850 = vmatmul.mubr.msk.bf16.gmra.mrb[116].mxu0 %vm4207_vm12, %v6386_v25 }
 0xffa   : > { %9853 = vmatprep.mubr.msk.bf16.mxu0 %vm4207_vm12, %v6388_v47 }
 0xffc   : > { %v16036_v27 = vpop.permute.xlu0 %6249 }
0x1000   : > { %v16040_v9 = vpop.permute.xlu0 %6257 }
0x1001   : > { %9854 = vmatmul.mubr.msk.bf16.gmra.mrb[120].mxu0 %vm4207_vm12, %v6390_v52  ;;  %v18417_v52 = vld [vmem:[#allocation92_spill] sm:$0xff] }
0x1002   : > { %9857 = vmatprep.mubr.msk.bf16.mxu0 %vm4207_vm12, %v6392_v24 }
0x1004   : > { %v16044_v14 = vpop.permute.xlu0 %6265 }
0x1009   : > { %9858 = vmatmul.mubr.msk.bf16.gmra.mrb[124].mxu0 %vm4207_vm12, %v6394_v12 }
0x105f   : > { %v15913_v59 = vpop.f32.mrb[96].mxu0 }
0x1060   : > { %18396 = vst [vmem:[#allocation135_spill] sm:$0xff] %v15913_v59  ;;  %v15915_v40 = vpop.f32.mrb[97].mxu0 }
0x1061   : > { %18397 = vst [vmem:[#allocation131_spill] sm:$0xff] %v15915_v40  ;;  %v15917_v26 = vpop.f32.mrb[98].mxu0 }
0x1062   : > { %18398 = vst [vmem:[#allocation141_spill] sm:$0xff] %v15917_v26  ;;  %v15921_v29 = vpop.f32.mrb[99].mxu0  ;;  %v18436_v26 = vld [vmem:[#allocation39_spill] sm:$0xff] }
0x1063   : > { %18399 = vst [vmem:[#allocation134_spill] sm:$0xff] %v15921_v29 }
0x109b   : > { %v15925_v35 = vpop.f32.mrb[100].mxu0 }
0x109c   : > { %18400 = vst [vmem:[#allocation178_spill] sm:$0xff] %v15925_v35  ;;  %v15927_v45 = vpop.f32.mrb[101].mxu0 }
0x109d   : > { %18401 = vst [vmem:[#allocation180_spill] sm:$0xff] %v15927_v45  ;;  %v15929_v10 = vpop.f32.mrb[102].mxu0  ;;  %v18435_v45 = vld [vmem:[#allocation61_spill] sm:$0xff] }
0x109e   : > { %18402 = vst [vmem:[#allocation179_spill] sm:$0xff] %v15929_v10  ;;  %v15933_v30 = vpop.f32.mrb[103].mxu0 }
0x109f   : > { %18403 = vst [vmem:[#allocation181_spill] sm:$0xff] %v15933_v30 }
0x10ab   : > { %v15937_v16 = vpop.f32.mrb[104].mxu0 }
0x10ac   : > { %18404 = vst [vmem:[#allocation166_spill] sm:$0xff] %v15937_v16  ;;  %v15939_v20 = vpop.f32.mrb[105].mxu0  ;;  %v9823_v22 = vpop.f32.mrb[88].mxu1 }
0x10ad   : > { %18405 = vst [vmem:[#allocation182_spill] sm:$0xff] %v15939_v20  ;;  %v15941_v51 = vpop.f32.mrb[106].mxu0  ;;  %v6212_v53 = vpop.f32.mrb[89].mxu1  ;;  %v18434_v20 = vld [vmem:[#allocation60_spill] sm:$0xff] }
0x10ae   : > { %18406 = vst [vmem:[#allocation183_spill] sm:$0xff] %v15941_v51  ;;  %v15945_v57 = vpop.f32.mrb[107].mxu0  ;;  %6277 = vrot.lane.b32.xlu1 %v6212_v53, %s11388_s19  ;;  %v9824_v38 = vpop.f32.mrb[90].mxu1  ;;  %v18419_v53 = vld [vmem:[#allocation91_spill] sm:$0xff] }
0x10af   : > { %18407 = vst [vmem:[#allocation184_spill] sm:$0xff] %v15945_v57  ;;  %v6215_v23 = vpop.f32.mrb[91].mxu1 }
0x10b0   : > { %6281 = vrot.lane.b32.xlu0 %v6215_v23, %s11387_s17 }
0x10b2   : > { %6285 = vrot.lane.b32.xlu1 %v9823_v22, %s11386_s4  ;;  %v18418_v22 = vld [vmem:[#allocation58_spill] sm:$0xff] }
0x10b4   : > { %6289 = vrot.lane.b32.xlu0 %v9824_v38, %s11385_s27  ;;  %v18420_v38 = vld [vmem:[#allocation67_spill] sm:$0xff] }
0x10b8   : > { %v15953_v55 = vpop.f32.mrb[108].mxu0  ;;  %v9827_v5 = vpop.f32.mrb[92].mxu1 }
0x10b9   : > { %18408 = vst [vmem:[#allocation185_spill] sm:$0xff] %v15953_v55  ;;  %v15955_v50 = vpop.f32.mrb[109].mxu0  ;;  %v6228_v43 = vpop.f32.mrb[93].mxu1 }
0x10ba   : > { %18409 = vst [vmem:[#allocation186_spill] sm:$0xff] %v15955_v50  ;;  %v15957_v19 = vpop.f32.mrb[110].mxu0  ;;  %6293 = vrot.lane.b32.xlu1 %v6228_v43, %s11392_s23  ;;  %v9828_v11 = vpop.f32.mrb[94].mxu1  ;;  %v18421_v43 = vld [vmem:[#allocation94_spill] sm:$0xff] }
0x10bb   : > { %18410 = vst [vmem:[#allocation187_spill] sm:$0xff] %v15957_v19  ;;  %v15962_v3 = vpop.f32.mrb[111].mxu0  ;;  %v6231_v18 = vpop.f32.mrb[95].mxu1 }
0x10bc   : > { %18411 = vst [vmem:[#allocation188_spill] sm:$0xff] %v15962_v3  ;;  %6297 = vrot.lane.b32.xlu0 %v6231_v18, %s11391_s28  ;;  %v16046_v50 = vpop.permute.xlu1 %6269  ;;  %v16048_v3 = vpop.permute.xlu0 %6273 }
0x10be   : > { %6301 = vrot.lane.b32.xlu1 %v9827_v5, %s11390_s21 }
0x10c0   : > { %6305 = vrot.lane.b32.xlu0 %v9828_v11, %s11389_s30 }
0x10c2   : > { %6916 = vrot.lane.b32.xlu1 %v9122_v34, %s11381_s29  ;;  %v18424_v34 = vld [vmem:[#allocation66_spill] sm:$0xff] }
0x10c4   : > { %6967 = vrot.lane.b32.xlu0 %v18412_v36, %s11379_s0  ;;  %v15972_v33 = vpop.f32.mrb[112].mxu0  ;;  %v18425_v36 = vld [vmem:[#allocation83_spill] sm:$0xff] }
0x10c5   : > { %v15974_v39 = vpop.f32.mrb[113].mxu0 }
0x10c6   : > { %6971 = vrot.lane.b32.xlu1 %v18413_v6, %s11379_s0  ;;  %v15978_v37 = vpop.f32.mrb[114].mxu0  ;;  %v18426_v6 = vld [vmem:[#allocation75_spill] sm:$0xff] }
0x10c7   : > { %v15980_v1 = vpop.f32.mrb[115].mxu0 }
0x10c8   : > { %6969 = vrot.lane.b32.xlu0 %v18414_v13, %s11379_s0 }
0x10ca   : > { %6973 = vrot.lane.b32.xlu1 %v18415_v41, %s11379_s0 }
0x10cc   : > { %6756 = vrot.lane.b32.xlu0 %v18416_v0, %s11393_s1  ;;  %v15988_v25 = vpop.f32.mrb[116].mxu0 }
0x10cd   : > { %v15990_v47 = vpop.f32.mrb[117].mxu0 }
0x10ce   : > { %6975 = vrot.lane.b32.xlu1 %v18417_v52, %s11379_s0  ;;  %v15994_v24 = vpop.f32.mrb[118].mxu0  ;;  %v18429_v52 = vld [vmem:[#allocation82_spill] sm:$0xff] }
0x10cf   : > { %v15996_v12 = vpop.f32.mrb[119].mxu0 }
0x10d0   : > { %6758 = vrot.lane.b32.xlu0 %v18418_v22, %s11393_s1 }
0x10d2   : > { %6977 = vrot.lane.b32.xlu1 %v18419_v53, %s11379_s0 }
0x10d4   : > { %6760 = vrot.lane.b32.xlu0 %v18420_v38, %s11393_s1  ;;  %v16004_v23 = vpop.f32.mrb[120].mxu0 }
0x10d5   : > { %v16006_v5 = vpop.f32.mrb[121].mxu0 }
0x10d6   : > { %6979 = vrot.lane.b32.xlu1 %v18421_v43, %s11379_s0  ;;  %v16010_v11 = vpop.f32.mrb[122].mxu0 }
0x10d7   : > { %18422 = vst [vmem:[#allocation88_spill] sm:$0xff] %v16010_v11  ;;  %v16012_v18 = vpop.f32.mrb[123].mxu0 }
0x10d8   : > { %18423 = vst [vmem:[#allocation90_spill] sm:$0xff] %v16012_v18  ;;  %6762 = vrot.lane.b32.xlu0 %v18424_v34, %s11393_s1  ;;  %v18443_v18 = vld [vmem:[#allocation77_spill] sm:$0xff] }
0x10da   : > { %6768 = vrot.lane.b32.xlu1 %v18425_v36, %s11393_s1 }
0x10dc   : > { %6764 = vrot.lane.b32.xlu0 %v18426_v6, %s11393_s1  ;;  %v16020_v13 = vpop.f32.mrb[124].mxu0  ;;  %v18438_v6 = vld [vmem:[#allocation68_spill] sm:$0xff] }
0x10dd   : > { %18427 = vst [vmem:[#allocation87_spill] sm:$0xff] %v16020_v13  ;;  %v16022_v41 = vpop.f32.mrb[125].mxu0 }
0x10de   : > { %18428 = vst [vmem:[#allocation89_spill] sm:$0xff] %v16022_v41  ;;  %6770 = vrot.lane.b32.xlu1 %v18429_v52, %s11393_s1  ;;  %v16026_v53 = vpop.f32.mrb[126].mxu0 }
0x10df   : > { %18430 = vst [vmem:[#allocation92_spill] sm:$0xff] %v16026_v53  ;;  %v16028_v43 = vpop.f32.mrb[127].mxu0 }
0x10e0   : > { %18431 = vst [vmem:[#allocation91_spill] sm:$0xff] %v16028_v43  ;;  %6766 = vrot.lane.b32.xlu0 %v18432_v54, %s11393_s1  ;;  %v18437_v54 = vld [vmem:[#allocation37_spill] sm:$0xff]  ;;  %v18442_v43 = vld [vmem:[#allocation76_spill] sm:$0xff] }
0x10e4   : > { %6981 = vrot.lane.b32.xlu0 %v18433_v8, %s11379_s0 }
0x1120   : > { %v16050_v55 = vpop.permute.xlu1 %6277 }
0x1122   : > { %v16052_v19 = vpop.permute.xlu0 %6281 }
0x1124   : > { %v16054_v8 = vpop.permute.xlu1 %6285 }
0x1126   : > { %v16056_v16 = vpop.permute.xlu0 %6289 }
0x112c   : > { %v16058_v51 = vpop.permute.xlu1 %6293 }
0x112e   : > { %v16060_v35 = vpop.permute.xlu0 %6297 }
0x1130   : > { %v16062_v10 = vpop.permute.xlu1 %6301 }
0x1132   : > { %v16064_v40 = vpop.permute.xlu0 %6305 }
0x1134   : > { %v6917_v29 = vpop.permute.xlu1 %6916 }
0x1135   : > { %v6921_v57 = vadd.f32 %v6917_v29, %v18434_v20  ;;  %v6922_v30 = vadd.f32 %v6917_v29, %v18435_v45  ;;  %v6919_v52 = vadd.f32 %v6917_v29, %v18436_v26  ;;  %v6920_v36 = vadd.f32 %v6917_v29, %v18437_v54  ;;  %v18440_v20 = vld [vmem:[#allocation63_spill] sm:$0xff]  ;;  %v18441_v45 = vld [vmem:[#allocation64_spill] sm:$0xff] }
0x1136   : > { %v6968_v59 = vpop.permute.xlu0 %6967  ;;  %v6925_v0 = vadd.f32 %v6917_v29, %v18438_v6  ;;  %v6926_v53 = vadd.f32 %v6917_v29, %v18439_v2  ;;  %v6923_v41 = vadd.f32 %v6917_v29, %v18440_v20  ;;  %v6924_v26 = vadd.f32 %v6917_v29, %v18441_v45  ;;  %v18444_v6 = vld [vmem:[#allocation71_spill] sm:$0xff] }
0x1137   : > { %10133 = vmatprep.subr.msk.bf16.mxu0 %vm4207_vm12, %v6968_v59  ;;  %v7008_v34 = vsel %vm4207_vm12, %v6968_v59, 0  ;;  %v6936_v38 = vpack.c.bf16 %v6922_v30, %v6921_v57  ;;  %v6935_v56 = vpack.c.bf16 %v6920_v36, %v6919_v52  ;;  %v6929_v54 = vadd.f32 %v6917_v29, %v18442_v43  ;;  %v9121_v30 = vld [vmem:[#allocation13 + $0x3] ss:$0 sm:$0xff]  ;;  %v18445_v36 = vld [vmem:[#allocation72_spill] sm:$0xff] }
0x1138   : > { %v6972_v22 = vpop.permute.xlu1 %6971  ;;  %9894 = vmatpush3.bf16.xpose.msra.mxu0 %v7008_v34  ;;  %v6930_v11 = vadd.f32 %v6917_v29, %v18443_v18  ;;  %v6938_v57 = vpack.c.bf16 %v6926_v53, %v6925_v0  ;;  %v6927_v34 = vadd.f32 %v6917_v29, %v18444_v6  ;;  %v6928_v52 = vadd.f32 %v6917_v29, %v18445_v36  ;;  %v18447_v43 = vld [vmem:[#allocation80_spill] sm:$0xff] }
0x1139   : > { %6953 = vrot.lane.b32.xlu1 %v6936_v38, %s11379_s0  ;;  %6951 = vrot.lane.b32.xlu0 %v6935_v56, %s11379_s0  ;;  %v6937_v20 = vpack.c.bf16 %v6924_v26, %v6923_v41  ;;  %v18446_v38 = vld [vmem:[#allocation79_spill] sm:$0xff]  ;;  %v6932_v61 = vadd.f32 %v6917_v29, %v18447_v43  ;;  %v18448_v56 = vld [vmem:[#allocation57_spill] sm:$0xff]  ;;  %v18449_v6 = vld [vmem:[#allocation84_spill] sm:$0xff]  ;;  %v6313_v41 = vrot.slane %v16046_v50, 1 }
0x113a   : > { %v6970_v59 = vpop.permute.xlu0 %6969  ;;  %v6940_v2 = vpack.c.bf16 %v6930_v11, %v6929_v54  ;;  %v6931_v13 = vadd.f32 %v6917_v29, %v18446_v38  ;;  %v6939_v44 = vpack.c.bf16 %v6928_v52, %v6927_v34  ;;  %v16090_v18 = vadd.f32 %v6917_v29, %v18449_v6  ;;  %v18450_v26 = vld [vmem:[#allocation85_spill] sm:$0xff] }
0x113b   : > { %10134 = vmatprep.subr.msk.bf16.mxu0 %vm4207_vm12, %v6970_v59  ;;  %v7011_v36 = vsel %vm4207_vm12, %v6970_v59, 0  ;;  %v16093_v54 = vadd.f32 %v6917_v29, %v18450_v26  ;;  %v18451_v29 = vld [vmem:[#allocation62_spill] sm:$0xff]  ;;  %v6310_v34 = vrot.slane %v16040_v9, 1  ;;  %v6309_v52 = vrot.slane %v16038_v49, 1 }
0x113c   : > { %v6974_v45 = vpop.permute.xlu1 %6973  ;;  %v6941_v53 = vpack.c.bf16 %v6932_v61, %v6931_v13 }
0x113d   : > { %6883 = vrot.lane.b32.xlu1 %v9121_v30, %s11381_s29  ;;  %7280 = vrot.lane.b32.xlu0 %v18448_v56, %s11379_s0  ;;  %v7014_v30 = vsel %vm4207_vm12, %v6972_v22, 0  ;;  %v6335_v56 = vsel %vm1603_vm6, %v6309_v52, %v6310_v34 }
0x113e   : > { %v6757_v0 = vpop.permute.xlu0 %6756 }
0x113f   : > { %9861 = vmatprep.subr.bf16.mxu1 %v6757_v0 }
0x1140   : > { %v6976_v11 = vpop.permute.xlu1 %6975  ;;  %9862 = vmatpush3.bf16.msra.mxu1 %v6757_v0  ;;  %9896 = vmatpush3.bf16.xpose.msra.mxu0 %v7011_v36 }
0x1141   : > { %6957 = vrot.lane.b32.xlu1 %v6938_v57, %s11379_s0  ;;  %10135 = vmatprep.subr.msk.bf16.mxu0 %vm4207_vm12, %v6972_v22  ;;  %v18452_v57 = vld [vmem:[#allocation65_spill] sm:$0xff]  ;;  %v7017_v22 = vsel %vm4207_vm12, %v6974_v45, 0 }
0x1142   : > { %6955 = vrot.lane.b32.xlu0 %v6937_v20, %s11379_s0  ;;  %v6759_v61 = vpop.permute.xlu0 %6758 }
0x1143   : > { %9863 = vmatprep.subr.bf16.mxu1 %v6759_v61 }
0x1144   : > { %9864 = vmatpush3.bf16.msra.mxu1 %v6759_v61  ;;  %v6978_v13 = vpop.permute.xlu1 %6977 }
0x1145   : > { %6961 = vrot.lane.b32.xlu1 %v6940_v2, %s11379_s0 }
0x1146   : > { %7282 = vrot.lane.b32.xlu0 %v18451_v29, %s11379_s0  ;;  %v6761_v59 = vpop.permute.xlu0 %6760 }
0x1147   : > { %9865 = vmatprep.subr.bf16.mxu1 %v6761_v59 }
0x1148   : > { %9866 = vmatpush3.bf16.msra.mxu1 %v6761_v59  ;;  %9898 = vmatpush3.bf16.xpose.msra.mxu0 %v7014_v30  ;;  %v16108_v2 = vpop.permute.xlu1 %6979  ;;  %v7020_v30 = vsel %vm4207_vm12, %v6976_v11, 0 }
0x1149   : > { %7284 = vrot.lane.b32.xlu1 %v18452_v57, %s11379_s0  ;;  %10136 = vmatprep.subr.msk.bf16.mxu0 %vm4207_vm12, %v6974_v45  ;;  %v17854_v45 = vrot.slane %v16034_v4, 1  ;;  %v6314_v57 = vrot.slane %v16048_v3, 1 }
0x114a   : > { %6959 = vrot.lane.b32.xlu0 %v6939_v44, %s11379_s0  ;;  %v6763_v20 = vpop.permute.xlu0 %6762  ;;  %v6308_v44 = vrot.slane %v16036_v27, 1 }
0x114b   : > { %9867 = vmatprep.subr.bf16.mxu1 %v6763_v20 }
0x114c   : > { %9868 = vmatpush3.bf16.msra.mxu1 %v6763_v20  ;;  %v6769_v0 = vpop.permute.xlu1 %6768  ;;  %v6336_v59 = vsel %vm1603_vm6, %v6308_v44, %v6309_v52  ;;  %v18455_v20 = vld [vmem:[#allocation124_spill] sm:$0xff]  ;;  %v18457_v52 = vld [vmem:[#allocation129_spill] sm:$0xff] }
0x114d   : > { %6963 = vrot.lane.b32.xlu1 %v6941_v53, %s11379_s0  ;;  %v18453_v53 = vld [vmem:[#allocation125_spill] sm:$0xff]  ;;  %vm18456_vm9 = vcmp.le.s32.totalorder %v14481_v28, %v18455_v20  ;;  %vm18458_vm13 = vcmp.eq.s32.totalorder %v14481_v28, %v18457_v52  ;;  %v6315_v52 = vrot.slane %v16050_v55, 1  ;;  %v6318_v20 = vrot.slane %v16056_v16, 1 }
0x114e   : > { %v6765_v36 = vpop.permute.xlu0 %6764  ;;  %vm18454_vm4 = vcmp.eq.s32.totalorder %v14481_v28, %v18453_v53  ;;  %v18466_v53 = vld [vmem:[#allocation132_spill] sm:$0xff] }
0x114f   : > { %9869 = vmatprep.subr.bf16.mxu1 %v6765_v36  ;;  %v6341_v29 = vsel %vm18454_vm4, 0.0, %v6335_v56 }
0x1150   : > { %9870 = vmatpush3.bf16.msra.mxu1 %v6765_v36  ;;  %9900 = vmatpush3.bf16.xpose.msra.mxu0 %v7017_v22  ;;  %v6357_v36 = vsel %vm18456_vm9, %v16038_v49, %v6341_v29  ;;  %v6337_v22 = vsel %vm1603_vm6, %v17854_v45, %v6308_v44  ;;  %v6771_v56 = vpop.permute.xlu1 %6770  ;;  %v6311_v49 = vrot.slane %v16042_v63, 1  ;;  %v6312_v29 = vrot.slane %v16044_v14, 1  ;;  %v18459_v44 = vld [vmem:[#allocation128_spill] sm:$0xff] }
0x1151   : > { %10137 = vmatprep.subr.msk.bf16.mxu0 %vm4207_vm12, %v6976_v11  ;;  %v6340_v11 = vsel %vm18458_vm13, 0.0, %v6336_v59  ;;  %vm18460_vm3 = vcmp.eq.s32.totalorder %v14481_v28, %v18459_v44  ;;  %v6331_v59 = vsel %vm1603_vm6, %v6313_v41, %v6314_v57  ;;  %vm18463_vm9 = vcmp.le.s32.totalorder %v14481_v28, %v11926_v46 }
0x1152   : > { %v6767_v61 = vpop.permute.xlu0 %6766  ;;  %v6334_v45 = vsel %vm1603_vm6, %v6310_v34, %v6311_v49  ;;  %v6317_v34 = vrot.slane %v16054_v8, 1 }
0x1153   : > { %9871 = vmatprep.subr.bf16.mxu1 %v6767_v61 }
0x1154   : > { %9872 = vmatpush3.bf16.msra.mxu1 %v6767_v61  ;;  %v6502_v61 = vadd.f32 %v15972_v33, %v6357_v36  ;;  %v18461_v33 = vld [vmem:[#allocation126_spill] sm:$0xff] }
0x1155   : > { %9873 = vmatprep.subr.bf16.mxu1 %v6769_v0  ;;  %vm18462_vm4 = vcmp.le.s32.totalorder %v14481_v28, %v18461_v33 }
0x1156   : > { %v6558_v36 = vmul.f32 0.17677669, %v6502_v61  ;;  %v7023_v61 = vsel %vm4207_vm12, %v6978_v13, 0 }
0x1158   : > { %9874 = vmatpush3.bf16.msra.mxu1 %v6769_v0  ;;  %9902 = vmatpush3.bf16.xpose.msra.mxu0 %v7020_v30  ;;  %v6339_v0 = vsel %vm18460_vm3, 0.0, %v6337_v22  ;;  %v6356_v30 = vsel %vm18462_vm4, %v16036_v27, %v6340_v11  ;;  %v18464_v27 = vld [vmem:[#allocation161_spill] sm:$0xff]  ;;  %vm18467_vm3 = vcmp.eq.s32.totalorder %v14481_v28, %v18466_v53 }
0x1159   : > { %9875 = vmatprep.subr.bf16.mxu1 %v6771_v56  ;;  %10138 = vmatprep.subr.msk.bf16.mxu0 %vm4207_vm12, %v6978_v13  ;;  %v6355_v22 = vsel %vm18463_vm9, %v16034_v4, %v6339_v0  ;;  %v6497_v33 = vadd.f32 %v15980_v1, %v6356_v30  ;;  %vm18465_vm13 = vcmp.eq.s32.totalorder %v14481_v28, %v18464_v27  ;;  %v6342_v43 = vsel %vm18467_vm3, 0.0, %v6334_v45  ;;  %v18468_v0 = vld [vmem:[#allocation96_spill] sm:$0xff] }
0x115a   : > { %v6345_v11 = vsel %vm18465_vm13, 0.0, %v6331_v59  ;;  %v6494_v44 = vadd.f32 %v15974_v39, %v6355_v22  ;;  %v6574_v1 = vmul.f32 %v6558_v36, %v18468_v0  ;;  %v6330_v30 = vsel %vm1603_vm6, %v6314_v57, %v6315_v52  ;;  %v18469_v39 = vld [vmem:[#allocation138_spill] sm:$0xff]  ;;  %v18471_v22 = vld [vmem:[#allocation159_spill] sm:$0xff] }
0x115b   : > { %v6316_v59 = vrot.slane %v16052_v19, 1  ;;  %v6557_v13 = vmul.f32 0.17677669, %v6497_v33  ;;  %vm18470_vm4 = vcmp.le.s32.totalorder %v14481_v28, %v18469_v39  ;;  %vm18472_vm9 = vcmp.eq.s32.totalorder %v14481_v28, %v18471_v22  ;;  %v18473_v57 = vld [vmem:[#allocation130_spill] sm:$0xff]  ;;  %v18476_v39 = vld [vmem:[#allocation136_spill] sm:$0xff] }
0x115c   : > { %9876 = vmatpush3.bf16.msra.mxu1 %v6771_v56  ;;  %v6333_v56 = vsel %vm1603_vm6, %v6311_v49, %v6312_v29  ;;  %v6327_v49 = vsel %vm1603_vm6, %v6317_v34, %v6318_v20  ;;  %v6361_v45 = vsel %vm18470_vm4, %v16046_v50, %v6345_v11  ;;  %vm18474_vm13 = vcmp.le.s32.totalorder %v14481_v28, %v18473_v57 }
0x115d   : > { %v6343_v36 = vsel %vm18472_vm9, 0.0, %v6333_v56  ;;  %v6518_v0 = vadd.f32 %v15988_v25, %v6361_v45  ;;  %v6332_v33 = vsel %vm1603_vm6, %v6312_v29, %v6313_v41  ;;  %v6346_v50 = vsel %vm4140_vm1, 0.0, %v6330_v30  ;;  %v18478_v25 = vld [vmem:[#allocation103_spill] sm:$0xff] }
0x115e   : > { %vm18475_vm3 = vcmp.eq.s32.totalorder %v14481_v28, %v14688_v60  ;;  %v6556_v56 = vmul.f32 0.17677669, %v6494_v44  ;;  %vm18477_vm4 = vcmp.le.s32.totalorder %v14481_v28, %v18476_v39  ;;  %v18479_v41 = vld [vmem:[#allocation99_spill] sm:$0xff]  ;;  %v6319_v45 = vrot.slane %v16058_v51, 1  ;;  %v18482_v60 = vld [vmem:[#allocation160_spill] sm:$0xff]  ;;  %v18487_v39 = vld [vmem:[#allocation137_spill] sm:$0xff] }
0x115f   : > { %v6349_v11 = vsel %vm18475_vm3, 0.0, %v6327_v49  ;;  %v6573_v29 = vmul.f32 %v6557_v13, %v18479_v41  ;;  %v6322_v49 = vrot.slane %v16064_v40, 1  ;;  %v6562_v44 = vmul.f32 0.17677669, %v6518_v0 }
0x1160   : > { %9904 = vmatpush3.bf16.xpose.msra.mxu0 %v7023_v61  ;;  %v6358_v61 = vsel %vm18474_vm13, %v16040_v9, %v6342_v43  ;;  %v6359_v9 = vsel %vm18477_vm4, %v16042_v63, %v6343_v36  ;;  %v16207_v43 = vadd.f32 %v6574_v1, %v18478_v25  ;;  %v6365_v63 = vsel %vm4111_vm10, %v16054_v8, %v6349_v11  ;;  %v6982_v36 = vpop.permute.xlu0 %6981 }
0x1161   : > { %10139 = vmatprep.subr.msk.bf16.mxu0 %vm4207_vm12, %v16108_v2  ;;  %v6505_v27 = vadd.f32 %v15978_v37, %v6358_v61  ;;  %v6329_v37 = vsel %vm1603_vm6, %v6315_v52, %v6316_v59  ;;  %v6510_v30 = vadd.f32 %v15990_v47, %v6359_v9  ;;  %v7026_v61 = vsel %vm4207_vm12, %v16108_v2, 0  ;;  %v18481_v2 = vld [vmem:[#allocation95_spill] sm:$0xff] }
0x1162   : > { %v6362_v52 = vsel %vm4108_vm14, %v16048_v3, %v6346_v50  ;;  %v6347_v13 = vsel %vm4141_vm15, 0.0, %v6329_v37  ;;  %v6321_v0 = vrot.slane %v16062_v10, 1  ;;  %v6572_v9 = vmul.f32 %v6556_v56, %v18481_v2 }
0x1163   : > { %v6559_v1 = vmul.f32 0.17677669, %v6505_v27  ;;  %vm18483_vm9 = vcmp.eq.s32.totalorder %v14481_v28, %v18482_v60  ;;  %v6326_v3 = vsel %vm1603_vm6, %v6318_v20, %v6319_v45  ;;  %v6534_v50 = vadd.f32 %v16004_v23, %v6365_v63 }
0x1164   : > { %v6344_v8 = vsel %vm18483_vm9, 0.0, %v6332_v33  ;;  %v6323_v27 = vsel %vm1603_vm6, %v6321_v0, %v6322_v49  ;;  %v6521_v11 = vadd.f32 %v15994_v24, %v6362_v52  ;;  %v6578_v56 = vmul.f32 %v6562_v44, %v18330_v7 }
0x1165   : > { %v6560_v37 = vmul.f32 0.17677669, %v6510_v30  ;;  %v6363_v47 = vsel %vm4109_vm0, %v16050_v55, %v6347_v13  ;;  %v6575_v20 = vmul.f32 %v6559_v1, %v18486_v15  ;;  %vm18488_vm13 = vcmp.le.s32.totalorder %v14481_v28, %v18487_v39 }
0x1166   : > { %v6360_v23 = vsel %vm18488_vm13, %v16044_v14, %v6344_v8  ;;  %v6320_v24 = vrot.slane %v16060_v35, 1  ;;  %v6350_v30 = vsel %vm4144_vm11, 0.0, %v6326_v3  ;;  %v6353_v63 = vsel %vm4147_vm5, 0.0, %v6323_v27  ;;  %v18490_v8 = vld [vmem:[#allocation101_spill] sm:$0xff] }
0x1167   : > { %v6513_v44 = vadd.f32 %v15996_v12, %v6360_v23  ;;  %v6566_v52 = vmul.f32 0.17677669, %v6534_v50  ;;  %v6563_v1 = vmul.f32 0.17677669, %v6521_v11  ;;  %v6526_v12 = vadd.f32 %v16006_v5, %v6363_v47  ;;  %v18491_v27 = vld [vmem:[#allocation165_spill] sm:$0xff]  ;;  %v18496_v11 = vld [vmem:[#allocation100_spill] sm:$0xff] }
0x1168   : > { %9906 = vmatpush3.bf16.xpose.msra.mxu0 %v7026_v61  ;;  %v18484_v61 = vld [vmem:[#allocation98_spill] sm:$0xff]  ;;  %v6324_v14 = vsel %vm1603_vm6, %v6320_v24, %v6321_v0  ;;  %v6576_v13 = vmul.f32 %v6560_v37, %v18337_v62  ;;  %v16272_v3 = vadd.f32 %v6572_v9, %v18490_v8  ;;  %vm18492_vm3 = vcmp.eq.s32.totalorder %v14481_v28, %v18491_v27  ;;  %v18497_v37 = vld [vmem:[#allocation104_spill] sm:$0xff] }
0x1169   : > { %6608 = vmax.xlane.f32.xlu0 %v16207_v43  ;;  %10140 = vmatprep.subr.msk.bf16.mxu0 %vm4207_vm12, %v6982_v36  ;;  %v16241_v32 = vadd.f32 %v6573_v29, %v18484_v61  ;;  %v6328_v29 = vsel %vm1603_vm6, %v6316_v59, %v6317_v34  ;;  %v16268_v34 = vadd.f32 %v6578_v56, %v18336_v48  ;;  %v7029_v59 = vsel %vm4207_vm12, %v6982_v36, 0  ;;  %v18547_v48 = vld [vmem:[#allocation72_spill] sm:$0xff] }
0x116a   : > { %v6348_v23 = vsel %vm18492_vm3, 0.0, %v6328_v29  ;;  %v6369_v5 = vsel %vm4115_vm7, %v16062_v10, %v6353_v63  ;;  %vm18494_vm4 = vcmp.le.s32.totalorder %v14481_v28, %v18343_v31  ;;  %v6561_v50 = vmul.f32 0.17677669, %v6513_v44  ;;  %v18498_v44 = vld [vmem:[#allocation109_spill] sm:$0xff]  ;;  %v18500_v63 = vld [vmem:[#allocation88_spill] sm:$0xff] }
0x116b   : > { %v6366_v47 = vsel %vm18494_vm4, %v16056_v16, %v6350_v30  ;;  %v6325_v36 = vsel %vm1603_vm6, %v6319_v45, %v6320_v24  ;;  %vm18495_vm9 = vcmp.eq.s32.totalorder %v14481_v28, %v18351_v21  ;;  %v16293_v56 = vadd.f32 %v6575_v20, %v18496_v11  ;;  %v18499_v45 = vld [vmem:[#allocation87_spill] sm:$0xff]  ;;  %v18503_v20 = vld [vmem:[#allocation177_spill] sm:$0xff] }
0x116c   : > { %v6352_v9 = vsel %vm18495_vm9, 0.0, %v6324_v14  ;;  %v6582_v10 = vmul.f32 %v6566_v52, %v18342_v42  ;;  %v6579_v29 = vmul.f32 %v6563_v1, %v18497_v37  ;;  %v6564_v16 = vmul.f32 0.17677669, %v6526_v12  ;;  %v18501_v14 = vld [vmem:[#allocation155_spill] sm:$0xff]  ;;  %v18505_v52 = vld [vmem:[#allocation170_spill] sm:$0xff] }
0x116d   : > { %6606 = vmax.xlane.f32.xlu0 %v16241_v32  ;;  %v16298_v30 = vadd.f32 %v6576_v13, %v18498_v44  ;;  %v6550_v24 = vadd.f32 %v18499_v45, %v6369_v5  ;;  %vm18502_vm13 = vcmp.le.s32.totalorder %v14481_v28, %v18501_v14  ;;  %vm18504_vm3 = vcmp.eq.s32.totalorder %v14481_v28, %v18503_v20  ;;  %v18507_v12 = vld [vmem:[#allocation102_spill] sm:$0xff] }
0x116e   : > { %v6364_v21 = vsel %vm18502_vm13, %v16052_v19, %v6348_v23  ;;  %v6351_v31 = vsel %vm18504_vm3, 0.0, %v6325_v36  ;;  %vm18506_vm4 = vcmp.le.s32.totalorder %v14481_v28, %v18505_v52  ;;  %v6577_v13 = vmul.f32 %v6561_v50, %v18507_v12  ;;  %v18509_v19 = vld [vmem:[#allocation119_spill] sm:$0xff]  ;;  %v18510_v36 = vld [vmem:[#allocation108_spill] sm:$0xff] }
0x116f   : > { %v6368_v1 = vsel %vm18506_vm4, %v16060_v35, %v6352_v9  ;;  %v18508_v5 = vrot.slane %v16034_v4, 1  ;;  %v16321_v23 = vadd.f32 %v6582_v10, %v18509_v19  ;;  %v16324_v45 = vadd.f32 %v6579_v29, %v18510_v36  ;;  %v18512_v35 = vld [vmem:[#allocation90_spill] sm:$0xff]  ;;  %v18513_v4 = vld [vmem:[#allocation91_spill] sm:$0xff]  ;;  %v18517_v29 = vld [vmem:[#allocation117_spill] sm:$0xff] }
0x1170   : > { %9908 = vmatpush3.bf16.xpose.msra.mxu0 %v7029_v59  ;;  %v6537_v59 = vadd.f32 %v18500_v63, %v6366_v47  ;;  %v18511_v63 = vld [vmem:[#allocation113_spill] sm:$0xff]  ;;  %v6529_v9 = vadd.f32 %v18512_v35, %v6364_v21  ;;  %v6570_v50 = vmul.f32 0.17677669, %v6550_v24  ;;  %v6545_v42 = vadd.f32 %v18513_v4, %v6368_v1  ;;  %v18518_v21 = vld [vmem:[#allocation106_spill] sm:$0xff]  ;;  %v18521_v4 = vld [vmem:[#allocation120_spill] sm:$0xff] }
0x1171   : > { %6616 = vmax.xlane.f32.xlu0 %v16268_v34  ;;  %6604 = vmax.xlane.f32.xlu1 %v16272_v3  ;;  %v6338_v47 = vsel %vm1603_vm6, %v6322_v49, %v18508_v5  ;;  %v6580_v52 = vmul.f32 %v6564_v16, %v18511_v63  ;;  %v18514_v49 = vld [vmem:[#allocation174_spill] sm:$0xff]  ;;  %v16342_v24 = vadd.f32 %v6577_v13, %v18518_v21  ;;  %v18519_v1 = vld [vmem:[#allocation89_spill] sm:$0xff]  ;;  %v18525_v21 = vld [vmem:[#allocation148_spill] sm:$0xff] }
0x1172   : > { %v6567_v20 = vmul.f32 0.17677669, %v6537_v59  ;;  %vm18515_vm9 = vcmp.le.s32.totalorder %v14481_v28, %v18514_v49  ;;  %v6354_v10 = vsel %vm4148_vm2, 0.0, %v6338_v47  ;;  %v6565_v59 = vmul.f32 0.17677669, %v6529_v9  ;;  %v18522_v49 = vld [vmem:[#allocation112_spill] sm:$0xff] }
0x1173   : > { %v6367_v5 = vsel %vm18515_vm9, %v16058_v51, %v6351_v31  ;;  %v16339_v16 = vadd.f32 %v6580_v52, %v18517_v29  ;;  %v6370_v51 = vsel %vm4116_vm8, %v16064_v40, %v6354_v10  ;;  %v6586_v47 = vmul.f32 %v6570_v50, %v18521_v4  ;;  %v18523_v52 = vld [vmem:[#allocation92_spill] sm:$0xff]  ;;  %v18524_v29 = vld [vmem:[#allocation110_spill] sm:$0xff]  ;;  %v18527_v40 = vld [vmem:[#allocation121_spill] sm:$0xff] }
0x1174   : > { %v6542_v35 = vadd.f32 %v18519_v1, %v6367_v5  ;;  %v6583_v19 = vmul.f32 %v6567_v20, %v18522_v49  ;;  %v6569_v63 = vmul.f32 0.17677669, %v6545_v42  ;;  %v6553_v13 = vadd.f32 %v18523_v52, %v6370_v51  ;;  %v18526_v1 = vld [vmem:[#allocation116_spill] sm:$0xff]  ;;  %v18528_v20 = vld [vmem:[#allocation127_spill] sm:$0xff]  ;;  %v18529_v51 = vld [vmem:[#allocation114_spill] sm:$0xff] }
0x1175   : > { %6612 = vmax.xlane.f32.xlu0 %v16298_v30  ;;  %6610 = vmax.xlane.f32.xlu1 %v16293_v56  ;;  %v6581_v9 = vmul.f32 %v6565_v59, %v18524_v29  ;;  %v16356_v5 = vadd.f32 %v6586_v47, %v18525_v21  ;;  %v18530_v59 = vld [vmem:[#allocation118_spill] sm:$0xff]  ;;  %v18544_v36 = vld [vmem:[#allocation63_spill] sm:$0xff]  ;;  %vm18572_vm3 = vcmp.le.s32.totalorder %v14481_v28, %v11926_v46 }
0x1176   : > { %v16359_v14 = vadd.f32 %v6583_v19, %v18526_v1  ;;  %v6585_v10 = vmul.f32 %v6569_v63, %v18527_v40  ;;  %v6568_v50 = vmul.f32 0.17677669, %v6542_v35  ;;  %v6571_v42 = vmul.f32 0.17677669, %v6553_v13  ;;  %v18531_v19 = vld [vmem:[#allocation122_spill] sm:$0xff]  ;;  %v18532_v35 = vld [vmem:[#allocation123_spill] sm:$0xff] }
0x1177   : > { %v16368_v52 = vadd.f32 %v6581_v9, %v18529_v51  ;;  %v18533_v13 = vld [vmem:[#allocation133_spill] sm:$0xff]  ;;  %v18534_v9 = vpack.c.bf16 %v16093_v54, %v16090_v18  ;;  %v18538_v18 = vld [vmem:[#allocation68_spill] sm:$0xff]  ;;  %v18542_v1 = vld [vmem:[#allocation39_spill] sm:$0xff]  ;;  %vm18573_vm4 = vcmp.le.s32.totalorder %v14481_v28, %v18473_v57 }
0x1178   : > { %v16365_v4 = vadd.f32 %v6585_v10, %v18528_v20  ;;  %v6584_v47 = vmul.f32 %v6568_v50, %v18530_v59  ;;  %v6587_v40 = vmul.f32 %v6571_v42, %v18532_v35  ;;  %v18535_v10 = vld [vmem:[#allocation70_spill] sm:$0xff]  ;;  %v18537_v35 = vld [vmem:[#allocation61_spill] sm:$0xff] }
0x1179   : > { %6624 = vmax.xlane.f32.xlu0 %v16321_v23  ;;  %6618 = vmax.xlane.f32.xlu1 %v16324_v45  ;;  %v18541_v59 = vld [vmem:[#allocation77_spill] sm:$0xff] }
0x117a   : > { %v16374_v63 = vadd.f32 %v6584_v47, %v18531_v19  ;;  %v16379_v21 = vadd.f32 %v6587_v40, %v18533_v13  ;;  %v18536_v40 = vld [vmem:[#allocation60_spill] sm:$0xff]  ;;  %v18576_v57 = vld [vmem:[#allocation161_spill] sm:$0xff] }
0x117d   : > { %6620 = vmax.xlane.f32.xlu0 %v16339_v16  ;;  %6614 = vmax.xlane.f32.xlu1 %v16342_v24 }
0x1181   : > { %6632 = vmax.xlane.f32.xlu0 %v16356_v5  ;;  %6626 = vmax.xlane.f32.xlu1 %v16359_v14 }
0x1185   : > { %6630 = vmax.xlane.f32.xlu0 %v16365_v4  ;;  %6622 = vmax.xlane.f32.xlu1 %v16368_v52 }
0x1189   : > { %6628 = vmax.xlane.f32.xlu1 %v16374_v63 }
0x118d   : > { %6634 = vmax.xlane.f32.xlu1 %v16379_v21 }
0x119b   : > { %6965 = vrot.lane.b32.xlu0 %v18534_v9, %s11379_s0  ;;  %v18539_v9 = vld [vmem:[#allocation69_spill] sm:$0xff] }
0x119e   : > { %7286 = vrot.lane.b32.xlu1 %v18535_v10, %s11379_s0 }
0x11ab   : > { %v6954_v50 = vpop.permute.xlu1 %6953  ;;  %v6952_v47 = vpop.permute.xlu0 %6951 }
0x11ac   : > { %9909 = vmatprep.mubr.msk.bf16.mxu0 %vm4207_vm12, %v6952_v47  ;;  %v18540_v47 = vld [vmem:[#allocation76_spill] sm:$0xff] }
0x11ad   : > { %9910 = vmatmul.mubr.msk.bf16.vlgmr.msra.gmra.mrb[128].mxu0 %vm4207_vm12, %v6954_v50 }
0x11af   : > { %v6884_v42 = vpop.permute.xlu1 %6883  ;;  %v16390_v20 = vpop.permute.xlu0 %7280 }
0x11b0   : > { %v16393_v13 = vadd.f32 %v6884_v42, %v18536_v40  ;;  %v16396_v19 = vadd.f32 %v6884_v42, %v18537_v35  ;;  %v16399_v54 = vadd.f32 %v6884_v42, %v18538_v18  ;;  %v16402_v10 = vadd.f32 %v6884_v42, %v18539_v9  ;;  %10141 = vmatprep.subr.msk.bf16.mxu1 %vm4207_vm12, %v16390_v20  ;;  %v18545_v18 = vld [vmem:[#allocation64_spill] sm:$0xff] }
0x11b1   : > { %v16407_v50 = vadd.f32 %v6884_v42, %v18540_v47  ;;  %v16410_v51 = vadd.f32 %v6884_v42, %v18541_v59  ;;  %v16413_v40 = vadd.f32 %v6884_v42, %v18449_v6  ;;  %v16416_v35 = vadd.f32 %v6884_v42, %v18450_v26  ;;  %v18543_v47 = vld [vmem:[#allocation37_spill] sm:$0xff] }
0x11b2   : > { %v16423_v29 = vadd.f32 %v6884_v42, %v18542_v1  ;;  %v16426_v49 = vadd.f32 %v6884_v42, %v18543_v47  ;;  %v16433_v33 = vadd.f32 %v6884_v42, %v18544_v36  ;;  %v16436_v12 = vadd.f32 %v6884_v42, %v18545_v18  ;;  %v18548_v18 = vld [vmem:[#allocation80_spill] sm:$0xff] }
0x11b3   : > { %v6958_v59 = vpop.permute.xlu1 %6957  ;;  %v16441_v47 = vadd.f32 %v6884_v42, %v18546_v17  ;;  %v16444_v37 = vadd.f32 %v6884_v42, %v18547_v48  ;;  %v16447_v6 = vadd.f32 %v6884_v42, %v18446_v38  ;;  %v16453_v26 = vadd.f32 %v6884_v42, %v18548_v18 }
0x11b4   : > { %v6956_v9 = vpop.permute.xlu0 %6955 }
0x11b5   : > { %9913 = vmatprep.mubr.msk.bf16.mxu0 %vm4207_vm12, %v6956_v9 }
0x11b6   : > { %9914 = vmatmul.mubr.msk.bf16.gmra.mrb[132].mxu0 %vm4207_vm12, %v6958_v59 }
0x11b7   : > { %v6962_v1 = vpop.permute.xlu1 %6961 }
0x11b8   : > { %v16460_v62 = vpop.permute.xlu0 %7282 }
0x11bb   : > { %v16462_v38 = vpop.permute.xlu1 %7284 }
0x11bc   : > { %v6960_v9 = vpop.permute.xlu0 %6959 }
0x11bd   : > { %9917 = vmatprep.mubr.msk.bf16.mxu0 %vm4207_vm12, %v6960_v9 }
0x11be   : > { %9918 = vmatmul.mubr.msk.bf16.gmra.mrb[136].mxu0 %vm4207_vm12, %v6962_v1 }
0x11bf   : > { %v6964_v42 = vpop.permute.xlu1 %6963 }
0x11c0   : > { %9921 = vmatprep.mubr.msk.bf16.mxu0 %vm4207_vm12, %v6964_v42 }
0x11f6   : > { %v6609_v59 = vpop.xlane.xlu0 %6608 }
0x11f7   : > { %v6638_v18 = vsub.f32 %v16207_v43, %v6609_v59 }
0x11f9   : > { %v6656_v17 = vmul.f32 1.442695, %v6638_v18 }
0x11fa   : > { %v6607_v36 = vpop.xlane.xlu0 %6606 }
0x11fb   : > { %10785 = vpow2.f32 %v6656_v17  ;;  %v6637_v48 = vsub.f32 %v16241_v32, %v6607_v36 }
0x11fd   : > { %v6654_v27 = vmul.f32 1.442695, %v6637_v48  ;;  %v18550_v48 = vld [vmem:[#allocation78_spill] sm:$0xff] }
0x11fe   : > { %v6617_v7 = vpop.xlane.xlu0 %6616  ;;  %v6605_v11 = vpop.xlane.xlu1 %6604 }
0x11ff   : > { %10787 = vpow2.f32 %v6654_v27  ;;  %v6636_v61 = vsub.f32 %v16272_v3, %v6605_v11  ;;  %v6642_v18 = vsub.f32 %v16268_v34, %v6617_v7 }
0x1201   : > { %v6652_v9 = vmul.f32 1.442695, %v6636_v61 }
0x1202   : > { %v6613_v39 = vpop.xlane.xlu0 %6612  ;;  %v6611_v1 = vpop.xlane.xlu1 %6610 }
0x1203   : > { %v6639_v8 = vsub.f32 %v16293_v56, %v6611_v1  ;;  %10789 = vpow2.f32 %v6652_v9  ;;  %v18549_v56 = vld [vmem:[#allocation73_spill] sm:$0xff]  ;;  %v6664_v1 = vmul.f32 1.442695, %v6642_v18  ;;  %v18553_v18 = vpack.c.bf16 %v16396_v19, %v16393_v13 }
0x1204   : > { %v18556_v19 = vpack.c.bf16 %v16416_v35, %v16413_v40 }
0x1205   : > { %v16471_v42 = vpop.eup %10785  ;;  %v6658_v43 = vmul.f32 1.442695, %v6639_v8 }
0x1206   : > { %6688 = vadd.xlane.f32.xlu1 %v16471_v42  ;;  %v6625_v17 = vpop.xlane.xlu0 %6624  ;;  %v6619_v59 = vpop.xlane.xlu1 %6618 }
0x1207   : > { %10791 = vpow2.f32 %v6658_v43  ;;  %v6646_v41 = vsub.f32 %v16321_v23, %v6625_v17 }
0x1208   : > { %10793 = vpow2.f32 %v6664_v1 }
0x1209   : > { %v16474_v32 = vpop.eup %10787  ;;  %v6672_v25 = vmul.f32 1.442695, %v6646_v41 }
0x120a   : > { %6686 = vadd.xlane.f32.xlu0 %v16474_v32  ;;  %v6621_v27 = vpop.xlane.xlu0 %6620  ;;  %v6615_v9 = vpop.xlane.xlu1 %6614 }
0x120b   : > { %v6641_v43 = vsub.f32 %v16342_v24, %v6615_v9 }
0x120d   : > { %v16477_v36 = vpop.eup %10789  ;;  %v6662_v15 = vmul.f32 1.442695, %v6641_v43  ;;  %v18554_v43 = vpack.c.bf16 %v16402_v10, %v16399_v54 }
0x120e   : > { %v6633_v61 = vpop.xlane.xlu0 %6632  ;;  %6684 = vadd.xlane.f32.xlu1 %v16477_v36  ;;  %v6627_v58 = vpop.xlane.xlu1 %6626 }
0x120f   : > { %10795 = vpow2.f32 %v6662_v15  ;;  %v6647_v34 = vsub.f32 %v16359_v14, %v6627_v58 }
0x1210   : > { %10797 = vpow2.f32 %v6672_v25 }
0x1211   : > { %v16480_v3 = vpop.eup %10791  ;;  %v6674_v15 = vmul.f32 1.442695, %v6647_v34 }
0x1212   : > { %v6631_v11 = vpop.xlane.xlu0 %6630  ;;  %6690 = vadd.xlane.f32.xlu1 %v16480_v3  ;;  %v6623_v2 = vpop.xlane.xlu1 %6622 }
0x1213   : > { %v6645_v23 = vsub.f32 %v16368_v52, %v6623_v2  ;;  %v16496_v17 = vpop.eup %10793 }
0x1215   : > { %v6670_v41 = vmul.f32 1.442695, %v6645_v23 }
0x1216   : > { %v6966_v8 = vpop.permute.xlu0 %6965 }
0x1217   : > { %9922 = vmatmul.mubr.msk.bf16.gmra.mrb[140].mxu0 %vm4207_vm12, %v6966_v8  ;;  %v6640_v8 = vsub.f32 %v16298_v30, %v6613_v39  ;;  %v6650_v39 = vsub.f32 %v16356_v5, %v6633_v61  ;;  %v18551_v61 = vld [vmem:[#allocation81_spill] sm:$0xff] }
0x1219   : > { %v6660_v60 = vmul.f32 1.442695, %v6640_v8  ;;  %v16500_v30 = vpop.eup %10795  ;;  %v6680_v25 = vmul.f32 1.442695, %v6650_v39 }
0x121a   : > { %v16504_v58 = vpop.eup %10797 }
0x121b   : > { %10799 = vpow2.f32 %v6660_v60  ;;  %v6649_v60 = vsub.f32 %v16365_v4, %v6631_v11  ;;  %v6629_v11 = vpop.xlane.xlu1 %6628 }
0x121c   : > { %v6648_v9 = vsub.f32 %v16374_v63, %v6629_v11  ;;  %v18558_v11 = vpack.c.bf16 %v16436_v12, %v16433_v33 }
0x121d   : > { %v6678_v14 = vmul.f32 1.442695, %v6649_v60 }
0x121e   : > { %v6676_v8 = vmul.f32 1.442695, %v6648_v9 }
0x121f   : > { %v6635_v1 = vpop.xlane.xlu1 %6634 }
0x1220   : > { %7288 = vrot.lane.b32.xlu0 %v18549_v56, %s11379_s0  ;;  %v6644_v56 = vsub.f32 %v16339_v16, %v6621_v27 }
0x1222   : > { %v6668_v7 = vmul.f32 1.442695, %v6644_v56  ;;  %v6651_v56 = vsub.f32 %v16379_v21, %v6635_v1 }
0x1223   : > { %7290 = vrot.lane.b32.xlu1 %v18550_v48, %s11379_s0  ;;  %v6643_v48 = vsub.f32 %v16324_v45, %v6619_v59  ;;  %v18552_v59 = vld [vmem:[#allocation86_spill] sm:$0xff] }
0x1224   : > { %10801 = vpow2.f32 %v6668_v7  ;;  %v6682_v7 = vmul.f32 1.442695, %v6651_v56 }
0x1225   : > { %v6666_v24 = vmul.f32 1.442695, %v6643_v48  ;;  %v16506_v2 = vpop.eup %10799  ;;  %v18555_v48 = vpack.c.bf16 %v16410_v51, %v16407_v50 }
0x1227   : > { %10803 = vpow2.f32 %v6666_v24 }
0x1228   : > { %10805 = vpow2.f32 %v6674_v15  ;;  %v7287_v15 = vpop.permute.xlu1 %7286 }
0x1229   : > { %10807 = vpow2.f32 %v6670_v41 }
0x122a   : > { %10809 = vpow2.f32 %v6680_v25 }
0x122b   : > { %10811 = vpow2.f32 %v6678_v14  ;;  %v18557_v14 = vpack.c.bf16 %v16426_v49, %v16423_v29  ;;  %v18560_v49 = vpack.c.bf16 %v16453_v26, %v16447_v6  ;;  %v7321_v6 = vsel %vm4207_vm12, %v16390_v20, 0 }
0x122c   : > { %10813 = vpow2.f32 %v6676_v8  ;;  %v7324_v26 = vsel %vm4207_vm12, %v16460_v62, 0  ;;  %v7327_v20 = vsel %vm4207_vm12, %v16462_v38, 0 }
0x122d   : > { %10815 = vpow2.f32 %v6682_v7 }
0x122e   : > { %v16510_v45 = vpop.eup %10801 }
0x1231   : > { %v16512_v16 = vpop.eup %10803 }
0x1232   : > { %v16516_v4 = vpop.eup %10805 }
0x1233   : > { %v16518_v5 = vpop.eup %10807 }
0x1234   : > { %v16522_v52 = vpop.eup %10809 }
0x1235   : > { %v16525_v27 = vpop.eup %10811 }
0x1236   : > { %v16550_v10 = vpop.eup %10813 }
0x1237   : > { %v16554_v21 = vpop.eup %10815 }
0x123f   : > { %6696 = vadd.xlane.f32.xlu0 %v16496_v17 }
0x1243   : > { %6694 = vadd.xlane.f32.xlu0 %v16500_v30 }
0x1247   : > { %6704 = vadd.xlane.f32.xlu0 %v16504_v58  ;;  %6692 = vadd.xlane.f32.xlu1 %v16506_v2 }
0x124b   : > { %6700 = vadd.xlane.f32.xlu0 %v16510_v45  ;;  %6698 = vadd.xlane.f32.xlu1 %v16512_v16 }
0x124f   : > { %6706 = vadd.xlane.f32.xlu0 %v16516_v4  ;;  %6702 = vadd.xlane.f32.xlu1 %v16518_v5 }
0x1253   : > { %6712 = vadd.xlane.f32.xlu0 %v16522_v52 }
0x1257   : > { %6710 = vadd.xlane.f32.xlu0 %v16525_v27 }
0x1260   : > { %7292 = vrot.lane.b32.xlu1 %v18551_v61, %s11379_s0 }
0x126d   : > { %7294 = vrot.lane.b32.xlu0 %v18552_v59, %s11379_s0 }
0x1271   : > { %7266 = vrot.lane.b32.xlu0 %v18553_v18, %s11379_s0  ;;  %v18559_v18 = vpack.c.bf16 %v16444_v37, %v16441_v47 }
0x1275   : > { %7270 = vrot.lane.b32.xlu0 %v18554_v43, %s11379_s0 }
0x1279   : > { %7274 = vrot.lane.b32.xlu0 %v18555_v48, %s11379_s0 }
0x127d   : > { %7278 = vrot.lane.b32.xlu0 %v18556_v19, %s11379_s0 }
0x1280   : > { %v9911_v63 = vpop.f32.mrb[128].mxu0 }
0x1281   : > { %v7065_v13 = vpop.f32.mrb[129].mxu0 }
0x1282   : > { %v9912_v54 = vpop.f32.mrb[130].mxu0 }
0x1283   : > { %v7068_v34 = vpop.f32.mrb[131].mxu0 }
0x1284   : > { %6708 = vadd.xlane.f32.xlu1 %v16550_v10  ;;  %7134 = vrot.lane.b32.xlu0 %v7068_v34, %s11378_s22  ;;  %s18707_s22 = sld [smem:[#allocation29_spill]] }
0x1288   : > { %6714 = vadd.xlane.f32.xlu1 %v16554_v21  ;;  %7142 = vrot.lane.b32.xlu0 %v9912_v54, %s11377_s12  ;;  %s18704_s12 = sld [smem:[#allocation193_spill]] }
0x1289   : > { %v9915_v51 = vpop.f32.mrb[132].mxu0 }
0x128a   : > { %v7081_v50 = vpop.f32.mrb[133].mxu0 }
0x128b   : > { %v9916_v40 = vpop.f32.mrb[134].mxu0 }
0x128c   : > { %v7084_v35 = vpop.f32.mrb[135].mxu0 }
0x128d   : > { %7150 = vrot.lane.b32.xlu0 %v7084_v35, %s11383_s26 }
0x1291   : > { %v9919_v24 = vpop.f32.mrb[136].mxu0  ;;  %7158 = vrot.lane.b32.xlu0 %v9916_v40, %s11382_s20  ;;  %s9172_s20 = sshll.u32 %s11503_s25, 11 }
0x1292   : > { %v7097_v23 = vpop.f32.mrb[137].mxu0 }
0x1293   : > { %v9920_v39 = vpop.f32.mrb[138].mxu0  ;;  %v6689_v25 = vpop.xlane.xlu1 %6688 }
0x1294   : > { %v7100_v41 = vpop.f32.mrb[139].mxu0 }
0x1295   : > { %7166 = vrot.lane.b32.xlu0 %v7100_v41, %s11387_s17  ;;  %s18709_s17 = sld [smem:[#allocation194_spill]] }
0x1297   : > { %v6687_v60 = vpop.xlane.xlu0 %6686 }
0x1298   : > { %10817 = vrcp.f32 %v6687_v60 }
0x1299   : > { %7174 = vrot.lane.b32.xlu0 %v9920_v39, %s11385_s27  ;;  %7264 = vrot.lane.b32.xlu1 %v18557_v14, %s11379_s0 }
0x129b   : > { %v6685_v61 = vpop.xlane.xlu1 %6684 }
0x129c   : > { %10819 = vrcp.f32 %v6685_v61 }
0x129d   : > { %7268 = vrot.lane.b32.xlu1 %v18558_v11, %s11379_s0  ;;  %10821 = vrcp.f32 %v6689_v25 }
0x129f   : > { %v6691_v59 = vpop.xlane.xlu1 %6690 }
0x12a0   : > { %10823 = vrcp.f32 %v6691_v59 }
0x12a1   : > { %7272 = vrot.lane.b32.xlu1 %v18559_v18, %s11379_s0 }
0x12a2   : > { %v10818_v9 = vpop.eup %10817 }
0x12a3   : > { %v6733_v33 = vmul.f32 %v10818_v9, %v16474_v32  ;;  %v7330_v32 = vsel %vm4207_vm12, %v7287_v15, 0  ;;  %v7291_v48 = vpop.permute.xlu1 %7290 }
0x12a4   : > { %v7336_v19 = vsel %vm4207_vm12, %v7291_v48, 0 }
0x12a5   : > { %7276 = vrot.lane.b32.xlu1 %v18560_v49, %s11379_s0 }
0x12a6   : > { %v10820_v29 = vpop.eup %10819 }
0x12a7   : > { %v6732_v1 = vmul.f32 %v10820_v29, %v16477_v36  ;;  %v10822_v12 = vpop.eup %10821 }
0x12a8   : > { %v6734_v56 = vmul.f32 %v10822_v12, %v16471_v42  ;;  %v7289_v42 = vpop.permute.xlu0 %7288 }
0x12a9   : > { %7130 = vrot.lane.b32.xlu1 %v7065_v13, %s11376_s18  ;;  %v6748_v43 = vpack.c.bf16 %v6733_v33, %v6732_v1  ;;  %v7333_v36 = vsel %vm4207_vm12, %v7289_v42, 0 }
0x12aa   : > { %v10824_v8 = vpop.eup %10823 }
0x12ab   : > { %v6735_v37 = vmul.f32 %v10824_v8, %v16480_v3  ;;  %9877 = vmatprep.mubr.bf16.mxu1 %v6748_v43 }
0x12ad   : > { %7138 = vrot.lane.b32.xlu1 %v9911_v63, %s11375_s16  ;;  %v6749_v47 = vpack.c.bf16 %v6735_v37, %v6734_v56 }
0x12af   : > { %9878 = vmatmul.mubr.bf16.vlgmr.msra.gmra.mrb[96].mxu1 %v6749_v47 }
0x12b0   : > { %9926 = vmatpush3.bf16.xpose.msra.mxu1 %v7321_v6 }
0x12b1   : > { %10142 = vmatprep.subr.msk.bf16.mxu1 %vm4207_vm12, %v16460_v62  ;;  %7146 = vrot.lane.b32.xlu1 %v7081_v50, %s11380_s6 }
0x12b5   : > { %7154 = vrot.lane.b32.xlu1 %v9915_v51, %s11384_s24  ;;  %s18708_s24 = sld [smem:[#allocation34_spill]] }
0x12b8   : > { %9928 = vmatpush3.bf16.xpose.msra.mxu1 %v7324_v26 }
0x12b9   : > { %10143 = vmatprep.subr.msk.bf16.mxu1 %vm4207_vm12, %v16462_v38  ;;  %7162 = vrot.lane.b32.xlu1 %v7097_v23, %s11388_s19  ;;  %s17437_s19 = scalar_lea.hbm %s18709_s17, %s9172_s20 }
0x12bb   : > { %p18710_p0 = scmp.ne.s32.totalorder %s18708_s24, 0 }
0x12bd   : > { %7170 = vrot.lane.b32.xlu1 %v9919_v24, %s11386_s4 }
0x12c0   : > { %9930 = vmatpush3.bf16.xpose.msra.mxu1 %v7327_v20 }
0x12c1   : > { %10144 = vmatprep.subr.msk.bf16.mxu1 %vm4207_vm12, %v7287_v15 }
0x12c8   : > { %9932 = vmatpush3.bf16.xpose.msra.mxu1 %v7330_v32 }
0x12c9   : > { %10145 = vmatprep.subr.msk.bf16.mxu1 %vm4207_vm12, %v7289_v42 }
0x12cc   : > { %v6697_v62 = vpop.xlane.xlu0 %6696 }
0x12d0   : > { %v6695_v3 = vpop.xlane.xlu0 %6694  ;;  %9934 = vmatpush3.bf16.xpose.msra.mxu1 %v7333_v36 }
0x12d1   : > { %10146 = vmatprep.subr.msk.bf16.mxu1 %vm4207_vm12, %v7291_v48  ;;  %10825 = vrcp.f32 %v6695_v3 }
0x12d4   : > { %v6705_v7 = vpop.xlane.xlu0 %6704  ;;  %v6693_v38 = vpop.xlane.xlu1 %6692 }
0x12d5   : > { %10827 = vrcp.f32 %v6693_v38 }
0x12d6   : > { %10829 = vrcp.f32 %v6697_v62 }
0x12d8   : > { %v6701_v63 = vpop.xlane.xlu0 %6700  ;;  %9936 = vmatpush3.bf16.xpose.msra.mxu1 %v7336_v19  ;;  %v6699_v13 = vpop.xlane.xlu1 %6698 }
0x12d9   : > { %10831 = vrcp.f32 %v6699_v13 }
0x12da   : > { %10833 = vrcp.f32 %v6701_v63 }
0x12db   : > { %v10826_v51 = vpop.eup %10825 }
0x12dc   : > { %v6707_v54 = vpop.xlane.xlu0 %6706  ;;  %v6703_v34 = vpop.xlane.xlu1 %6702  ;;  %v6737_v23 = vmul.f32 %v10826_v51, %v16500_v30 }
0x12dd   : > { %10835 = vrcp.f32 %v6707_v54 }
0x12de   : > { %10837 = vrcp.f32 %v6703_v34 }
0x12df   : > { %v10828_v50 = vpop.eup %10827  ;;  %10839 = vrcp.f32 %v6705_v7 }
0x12e0   : > { %v6713_v40 = vpop.xlane.xlu0 %6712  ;;  %v7293_v35 = vpop.permute.xlu1 %7292  ;;  %v6736_v24 = vmul.f32 %v10828_v50, %v16506_v2 }
0x12e1   : > { %v10830_v39 = vpop.eup %10829  ;;  %10147 = vmatprep.subr.msk.bf16.mxu1 %vm4207_vm12, %v7293_v35  ;;  %v7339_v15 = vsel %vm4207_vm12, %v7293_v35, 0 }
0x12e2   : > { %9938 = vmatpush3.bf16.xpose.msra.mxu1 %v7339_v15  ;;  %v6750_v41 = vpack.c.bf16 %v6737_v23, %v6736_v24  ;;  %v6738_v14 = vmul.f32 %v10830_v39, %v16496_v17 }
0x12e3   : > { %v10832_v25 = vpop.eup %10831 }
0x12e4   : > { %v6711_v60 = vpop.xlane.xlu0 %6710  ;;  %9881 = vmatprep.mubr.bf16.mxu1 %v6750_v41  ;;  %v6739_v61 = vmul.f32 %v10832_v25, %v16512_v16  ;;  %v10834_v11 = vpop.eup %10833 }
0x12e5   : > { %v6740_v49 = vmul.f32 %v10834_v11, %v16510_v45  ;;  %v18561_v45 = vld [vmem:[#allocation58_spill] sm:$0xff]  ;;  %10841 = vrcp.f32 %v6711_v60 }
0x12e6   : > { %v6751_v18 = vpack.c.bf16 %v6739_v61, %v6738_v14 }
0x12e7   : > { %v10836_v59 = vpop.eup %10835 }
0x12e8   : > { %v10838_v2 = vpop.eup %10837  ;;  %v7295_v9 = vpop.permute.xlu0 %7294  ;;  %9882 = vmatmul.mubr.bf16.gmra.mrb[100].mxu1 %v6751_v18  ;;  %v6743_v16 = vmul.f32 %v10836_v59, %v16516_v4  ;;  %v18562_v4 = vld [vmem:[#allocation59_spill] sm:$0xff] }
0x12e9   : > { %10148 = vmatprep.subr.msk.bf16.mxu1 %vm4207_vm12, %v7295_v9  ;;  %v7342_v30 = vsel %vm4207_vm12, %v7295_v9, 0  ;;  %v6741_v29 = vmul.f32 %v10838_v2, %v16518_v5  ;;  %v10840_v1 = vpop.eup %10839 }
0x12ea   : > { %v9923_v33 = vpop.f32.mrb[140].mxu0  ;;  %9940 = vmatpush3.bf16.xpose.msra.mxu1 %v7342_v30  ;;  %v6742_v56 = vmul.f32 %v10840_v1, %v16504_v58 }
0x12eb   : > { %v7113_v12 = vpop.f32.mrb[141].mxu0  ;;  %v6752_v17 = vpack.c.bf16 %v6741_v29, %v6740_v49 }
0x12ec   : > { %7178 = vrot.lane.b32.xlu1 %v7113_v12, %s11392_s23  ;;  %v9924_v43 = vpop.f32.mrb[142].mxu0  ;;  %v6753_v37 = vpack.c.bf16 %v6743_v16, %v6742_v56  ;;  %v7267_v38 = vpop.permute.xlu0 %7266 }
0x12ed   : > { %9885 = vmatprep.mubr.bf16.mxu1 %v6752_v17  ;;  %v7116_v8 = vpop.f32.mrb[143].mxu0 }
0x12ee   : > { %7182 = vrot.lane.b32.xlu0 %v7116_v8, %s11391_s28 }
0x12ef   : > { %v10842_v58 = vpop.eup %10841 }
0x12f0   : > { %7186 = vrot.lane.b32.xlu1 %v9923_v33, %s11390_s21  ;;  %9886 = vmatmul.mubr.bf16.gmra.mrb[104].mxu1 %v6753_v37  ;;  %v6745_v20 = vmul.f32 %v10842_v58, %v16525_v27  ;;  %v7271_v63 = vpop.permute.xlu0 %7270  ;;  %s11394_s21 = smov [#allocation20]  }
0x12f1   : > { %s11273_s28 = sshll.u32 %s11394_s21, 4  ;;  %s11274_s28 = int_to_ptr.vmem [resolvable:$false] %s11273_s28 }
0x12f2   : > { %7190 = vrot.lane.b32.xlu0 %v9924_v43, %s11389_s30  ;;  %s11275_s23 = scalar_lea.vmem %s11274_s28, 4096 }
0x12f4   : > { %7643 = vrot.lane.b32.xlu1 %v18561_v45, %s11379_s0 }
0x12f6   : > { %7641 = vrot.lane.b32.xlu0 %v18562_v4, %s11379_s0 }
0x1311   : > { %v6709_v5 = vpop.xlane.xlu1 %6708 }
0x1312   : > { %10843 = vrcp.f32 %v6709_v5 }
0x1313   : > { %10845 = vrcp.f32 %v6713_v40 }
0x1315   : > { %v6715_v47 = vpop.xlane.xlu1 %6714 }
0x1316   : > { %10847 = vrcp.f32 %v6715_v47 }
0x1319   : > { %v7265_v48 = vpop.permute.xlu1 %7264 }
0x131c   : > { %v10844_v6 = vpop.eup %10843 }
0x131d   : > { %v6744_v26 = vmul.f32 %v10844_v6, %v16550_v10  ;;  %v10846_v42 = vpop.eup %10845  ;;  %v7269_v19 = vpop.permute.xlu1 %7268 }
0x131e   : > { %v6746_v36 = vmul.f32 %v10846_v42, %v16522_v52  ;;  %v7275_v10 = vpop.permute.xlu0 %7274 }
0x131f   : > { %v6754_v32 = vpack.c.bf16 %v6745_v20, %v6744_v26 }
0x1320   : > { %v10848_v62 = vpop.eup %10847 }
0x1321   : > { %9889 = vmatprep.mubr.bf16.mxu1 %v6754_v32  ;;  %v6747_v3 = vmul.f32 %v10848_v62, %v16554_v21  ;;  %v7273_v27 = vpop.permute.xlu1 %7272 }
0x1322   : > { %v7279_v52 = vpop.permute.xlu0 %7278 }
0x1323   : > { %v6755_v7 = vpack.c.bf16 %v6747_v3, %v6746_v36 }
0x1325   : > { %9890 = vmatmul.mubr.bf16.gmra.mrb[108].mxu1 %v6755_v7  ;;  %v7277_v13 = vpop.permute.xlu1 %7276 }
0x1326   : > { %9941 = vmatprep.mubr.msk.bf16.mxu1 %vm4207_vm12, %v7265_v48  ;;  %v16635_v54 = vpop.permute.xlu0 %7134 }
0x1327   : > { %v7193_v3 = vrot.slane %v16635_v54, 1 }
0x1329   : > { %v16633_v21 = vpop.permute.xlu1 %7130 }
0x132a   : > { %v16641_v51 = vpop.permute.xlu0 %7142  ;;  %v7192_v11 = vrot.slane %v16633_v21, 1 }
0x132b   : > { %v7195_v32 = vrot.slane %v16641_v51, 1 }
0x132d   : > { %9942 = vmatmul.mubr.msk.bf16.vlgmr.msra.gmra.mrb[112].mxu1 %vm4207_vm12, %v7267_v38  ;;  %v16639_v34 = vpop.permute.xlu1 %7138 }
0x132e   : > { %9945 = vmatprep.mubr.msk.bf16.mxu1 %vm4207_vm12, %v7269_v19  ;;  %v16646_v40 = vpop.permute.xlu0 %7150  ;;  %v7194_v42 = vrot.slane %v16639_v34, 1 }
0x1330   : > { %v7220_v38 = vsel %vm1603_vm6, %v7194_v42, %v7195_v32 }
0x1331   : > { %v16644_v50 = vpop.permute.xlu1 %7146 }
0x1332   : > { %v16650_v24 = vpop.permute.xlu0 %7158  ;;  %v7196_v62 = vrot.slane %v16644_v50, 1 }
0x1335   : > { %9946 = vmatmul.mubr.msk.bf16.gmra.mrb[116].mxu1 %vm4207_vm12, %v7271_v63  ;;  %v16648_v35 = vpop.permute.xlu1 %7154 }
0x1336   : > { %9949 = vmatprep.mubr.msk.bf16.mxu1 %vm4207_vm12, %v7273_v27  ;;  %v16654_v39 = vpop.permute.xlu0 %7166  ;;  %v7222_v27 = vsel %vm1603_vm6, %v7192_v11, %v7193_v3 }
0x1339   : > { %v16652_v23 = vpop.permute.xlu1 %7162 }
0x133a   : > { %v16658_v41 = vpop.permute.xlu0 %7174 }
0x133d   : > { %9950 = vmatmul.mubr.msk.bf16.gmra.mrb[120].mxu1 %vm4207_vm12, %v7275_v10  ;;  %v16656_v15 = vpop.permute.xlu1 %7170 }
0x133e   : > { %9953 = vmatprep.mubr.msk.bf16.mxu1 %vm4207_vm12, %v7277_v13  ;;  %v7219_v13 = vsel %vm1603_vm6, %v7195_v32, %v7196_v62  ;;  %v18568_v32 = vld [vmem:[#allocation124_spill] sm:$0xff] }
0x1345   : > { %9954 = vmatmul.mubr.msk.bf16.gmra.mrb[124].mxu1 %vm4207_vm12, %v7279_v52  ;;  %v7198_v52 = vrot.slane %v16648_v35, 1 }
0x135e   : > { %v16660_v25 = vpop.permute.xlu1 %7178 }
0x1360   : > { %v16662_v60 = vpop.permute.xlu0 %7182 }
0x1362   : > { %v16664_v14 = vpop.permute.xlu1 %7186 }
0x1363   : > { %v7206_v59 = vrot.slane %v16664_v14, 1 }
0x1364   : > { %v7191_v61 = vpop.permute.xlu0 %7190 }
0x1365   : > { %v7207_v18 = vrot.slane %v7191_v61, 1 }
0x1366   : > { %v7644_v12 = vpop.permute.xlu1 %7643 }
0x1367   : > { %v7208_v2 = vsel %vm1603_vm6, %v7206_v59, %v7207_v18  ;;  %v7223_v9 = vsel %vm1603_vm6, %v7207_v18, %v7192_v11  ;;  %v7199_v11 = vrot.slane %v16650_v24, 1 }
0x1368   : > { %v7642_v30 = vpop.permute.xlu0 %7641  ;;  %v7238_v49 = vsel %vm4147_vm5, 0.0, %v7208_v2  ;;  %v7239_v29 = vsel %vm4148_vm2, 0.0, %v7223_v9  ;;  %v7221_v2 = vsel %vm1603_vm6, %v7193_v3, %v7194_v42  ;;  %v18565_v9 = vld [vmem:[#allocation128_spill] sm:$0xff]  ;;  %v18570_v3 = vld [vmem:[#allocation129_spill] sm:$0xff] }
0x1369   : > { %9957 = vmatprep.subr.bf16.mxu0 %v7642_v30  ;;  %v16684_v1 = vsel %vm4115_vm7, %v16664_v14, %v7238_v49  ;;  %v16689_v33 = vsel %vm4116_vm8, %v7191_v61, %v7239_v29  ;;  %v18563_v61 = vld [vmem:[#allocation125_spill] sm:$0xff]  ;;  %vm18566_vm5 = vcmp.eq.s32.totalorder %v14481_v28, %v18565_v9  ;;  %vm18567_vm7 = vcmp.eq.s32.totalorder %v14481_v28, %v18466_v53  ;;  %v18623_v14 = vld [vmem:[#allocation175_spill] sm:$0xff] }
0x136a   : > { %9958 = vmatpush3.bf16.msra.mxu0 %v7642_v30  ;;  %vm18564_vm2 = vcmp.eq.s32.totalorder %v14481_v28, %v18563_v61  ;;  %v7224_v30 = vsel %vm18566_vm5, 0.0, %v7222_v27  ;;  %v7227_v49 = vsel %vm18567_vm7, 0.0, %v7219_v13  ;;  %v7197_v29 = vrot.slane %v16646_v40, 1 }
0x136b   : > { %9959 = vmatprep.subr.bf16.mxu0 %v7644_v12  ;;  %v7226_v18 = vsel %vm18564_vm2, 0.0, %v7220_v38  ;;  %vm18569_vm8 = vcmp.le.s32.totalorder %v14481_v28, %v18568_v32  ;;  %vm18571_vm13 = vcmp.eq.s32.totalorder %v14481_v28, %v18570_v3  ;;  %v7240_v53 = vsel %vm18572_vm3, %v16633_v21, %v7224_v30 }
0x136c   : > { %v7242_v38 = vsel %vm18569_vm8, %v16639_v34, %v7226_v18  ;;  %v7225_v27 = vsel %vm18571_vm13, 0.0, %v7221_v2  ;;  %v7216_v9 = vsel %vm1603_vm6, %v7198_v52, %v7199_v11  ;;  %v7243_v34 = vsel %vm18573_vm4, %v16641_v51, %v7227_v49  ;;  %v18578_v49 = vld [vmem:[#allocation96_spill] sm:$0xff] }
0x136d   : > { %v7218_v2 = vsel %vm1603_vm6, %v7196_v62, %v7197_v29  ;;  %v7217_v3 = vsel %vm1603_vm6, %v7197_v29, %v7198_v52  ;;  %vm18577_vm2 = vcmp.eq.s32.totalorder %v14481_v28, %v18576_v57  ;;  %vm18579_vm5 = vcmp.eq.s32.totalorder %v14481_v28, %v18471_v22  ;;  %v18581_v29 = vld [vmem:[#allocation160_spill] sm:$0xff]  ;;  %v18588_v57 = vld [vmem:[#allocation99_spill] sm:$0xff] }
0x136e   : > { %9960 = vmatpush3.bf16.msra.mxu0 %v7644_v12  ;;  %v7200_v12 = vrot.slane %v16652_v23, 1  ;;  %v7230_v51 = vsel %vm18577_vm2, 0.0, %v7216_v9  ;;  %vm18582_vm7 = vcmp.eq.s32.totalorder %v14481_v28, %v18581_v29  ;;  %v7203_v9 = vrot.slane %v16658_v41, 1 }
0x136f   : > { %vm7987_vm2 = vcmask 785408  }
0x1370   : > { %v7215_v62 = vsel %vm1603_vm6, %v7199_v11, %v7200_v12  ;;  %v18583_v11 = vld [vmem:[#allocation138_spill] sm:$0xff] }
0x1371   : > { %vm18584_vm8 = vcmp.le.s32.totalorder %v14481_v28, %v18583_v11  ;;  %v7201_v11 = vrot.slane %v16654_v39, 1 }
0x1382   : > { %v16691_v55 = vpop.f32.mrb[96].mxu1 }
0x1383   : > { %v16693_v44 = vpop.f32.mrb[97].mxu1 }
0x1384   : > { %v16695_v17 = vpop.f32.mrb[98].mxu1 }
0x1385   : > { %v10344_v0 = vpack.i.bf16 %v16695_v17, %v16691_v55  ;;  %v16699_v16 = vpop.f32.mrb[99].mxu1 }
0x1386   : > { %v10339_v31 = vpack.i.bf16 %v16699_v16, %v16693_v44  ;;  %v18653_v44 = vld [vmem:[#allocation184_spill] sm:$0xff]  ;;  %v18654_v16 = vld [vmem:[#allocation182_spill] sm:$0xff] }
0x13bb   : > { %v16703_v43 = vpop.f32.mrb[100].mxu1 }
0x13bc   : > { %v16705_v8 = vpop.f32.mrb[101].mxu1 }
0x13bd   : > { %v16707_v56 = vpop.f32.mrb[102].mxu1 }
0x13be   : > { %v10364_v37 = vpack.i.bf16 %v16707_v56, %v16703_v43  ;;  %v16711_v45 = vpop.f32.mrb[103].mxu1 }
0x13bf   : > { %v10359_v4 = vpack.i.bf16 %v16711_v45, %v16705_v8 }
0x13c3   : > { %v16715_v5 = vpop.f32.mrb[104].mxu1 }
0x13c4   : > { %v16717_v47 = vpop.f32.mrb[105].mxu1 }
0x13c5   : > { %v16719_v58 = vpop.f32.mrb[106].mxu1 }
0x13c6   : > { %v10394_v6 = vpack.i.bf16 %v16719_v58, %v16715_v5  ;;  %v16723_v26 = vpop.f32.mrb[107].mxu1 }
0x13c7   : > { %v10389_v20 = vpack.i.bf16 %v16723_v26, %v16717_v47 }
0x13f8   : > { %v16730_v36 = vpop.f32.mrb[108].mxu1 }
0x13f9   : > { %v16733_v48 = vpop.f32.mrb[109].mxu1 }
0x13fa   : > { %v16735_v7 = vpop.f32.mrb[110].mxu1 }
0x13fb   : > { %v10434_v19 = vpack.i.bf16 %v16735_v7, %v16730_v36  ;;  %v16741_v63 = vpop.f32.mrb[111].mxu1 }
0x1400   : > { %v9943_v42 = vpop.f32.mrb[112].mxu1 }
0x1401   : > { %v7387_v61 = vadd.f32 %v9943_v42, %v7242_v38  ;;  %v7378_v13 = vpop.f32.mrb[113].mxu1  ;;  %v18574_v42 = vld [vmem:[#allocation126_spill] sm:$0xff] }
0x1402   : > { %v7379_v10 = vadd.f32 %v7378_v13, %v7240_v53  ;;  %v9944_v18 = vpop.f32.mrb[114].mxu1  ;;  %vm18575_vm9 = vcmp.le.s32.totalorder %v14481_v28, %v18574_v42  ;;  %v7229_v42 = vsel %vm18582_vm7, 0.0, %v7217_v3 }
0x1403   : > { %v7443_v32 = vmul.f32 0.17677669, %v7387_v61  ;;  %v7390_v38 = vadd.f32 %v9944_v18, %v7243_v34  ;;  %v7241_v21 = vsel %vm18575_vm9, %v16635_v54, %v7225_v27  ;;  %v7381_v30 = vpop.f32.mrb[115].mxu1  ;;  %v7228_v54 = vsel %vm18579_vm5, 0.0, %v7218_v2  ;;  %v18580_v18 = vld [vmem:[#allocation95_spill] sm:$0xff] }
0x1404   : > { %v7441_v53 = vmul.f32 0.17677669, %v7379_v10  ;;  %v7382_v13 = vadd.f32 %v7381_v30, %v7241_v21  ;;  %v7202_v27 = vrot.slane %v16656_v15, 1  ;;  %v7231_v2 = vsel %vm4140_vm1, 0.0, %v7215_v62  ;;  %v18592_v62 = vld [vmem:[#allocation137_spill] sm:$0xff] }
0x1405   : > { %v7459_v61 = vmul.f32 %v7443_v32, %v18578_v49  ;;  %v7444_v34 = vmul.f32 0.17677669, %v7390_v38  ;;  %v7246_v32 = vsel %vm18584_vm8, %v16648_v35, %v7230_v51  ;;  %v18585_v38 = vld [vmem:[#allocation103_spill] sm:$0xff]  ;;  %v7204_v30 = vrot.slane %v16660_v25, 1  ;;  %v18590_v51 = vld [vmem:[#allocation136_spill] sm:$0xff] }
0x1406   : > { %v7457_v52 = vmul.f32 %v7441_v53, %v18580_v18  ;;  %v7442_v10 = vmul.f32 0.17677669, %v7382_v13  ;;  %v18587_v53 = vld [vmem:[#allocation97_spill] sm:$0xff]  ;;  %vm18591_vm13 = vcmp.le.s32.totalorder %v14481_v28, %v18590_v51  ;;  %vm18593_vm1 = vcmp.le.s32.totalorder %v14481_v28, %v18592_v62 }
0x1407   : > { %v16809_v21 = vadd.f32 %v7459_v61, %v18585_v38  ;;  %v7460_v13 = vmul.f32 %v7444_v34, %v18587_v53  ;;  %v18589_v18 = vld [vmem:[#allocation101_spill] sm:$0xff]  ;;  %v7244_v61 = vsel %vm18591_vm13, %v16644_v50, %v7228_v54  ;;  %v7245_v34 = vsel %vm18593_vm1, %v16646_v40, %v7229_v42  ;;  %v18595_v53 = vld [vmem:[#allocation98_spill] sm:$0xff] }
0x1408   : > { %v7458_v3 = vmul.f32 %v7442_v10, %v18588_v57  ;;  %v9947_v49 = vpop.f32.mrb[116].mxu1  ;;  %v16818_v29 = vadd.f32 %v7457_v52, %v18589_v18  ;;  %v7247_v22 = vsel %vm4108_vm14, %v16650_v24, %v7231_v2  ;;  %v7212_v50 = vsel %vm1603_vm6, %v7202_v27, %v7203_v9  ;;  %v18596_v2 = vld [vmem:[#allocation100_spill] sm:$0xff] }
0x1409   : > { %v7403_v35 = vadd.f32 %v9947_v49, %v7246_v32  ;;  %v7394_v38 = vpop.f32.mrb[117].mxu1  ;;  %7493 = vmax.xlane.f32.xlu0 %v16809_v21  ;;  %v7214_v40 = vsel %vm1603_vm6, %v7200_v12, %v7201_v11  ;;  %v7213_v42 = vsel %vm1603_vm6, %v7201_v11, %v7202_v27  ;;  %vm7970_vm9 = vcmask 523264  }
0x140a   : > { %v7395_v10 = vadd.f32 %v7394_v38, %v7244_v61  ;;  %v9948_v32 = vpop.f32.mrb[118].mxu1  ;;  %7489 = vmax.xlane.f32.xlu1 %v16818_v29  ;;  %v16836_v57 = vadd.f32 %v7458_v3, %v18595_v53  ;;  %v16845_v61 = vadd.f32 %v7460_v13, %v18596_v2  ;;  %v7211_v3 = vsel %vm1603_vm6, %v7203_v9, %v7204_v30  ;;  %v18597_v38 = vld [vmem:[#allocation107_spill] sm:$0xff]  ;;  %v18601_v9 = vld [vmem:[#allocation165_spill] sm:$0xff]  ;;  %v18604_v53 = vld [vmem:[#allocation104_spill] sm:$0xff] }
0x140b   : > { %v7447_v54 = vmul.f32 0.17677669, %v7403_v35  ;;  %v7406_v49 = vadd.f32 %v9948_v32, %v7247_v22  ;;  %v7397_v18 = vpop.f32.mrb[119].mxu1  ;;  %v18598_v35 = vld [vmem:[#allocation163_spill] sm:$0xff]  ;;  %v7205_v22 = vrot.slane %v16662_v60, 1  ;;  %v7232_v11 = vsel %vm4141_vm15, 0.0, %v7214_v40 }
0x140c   : > { %v7445_v51 = vmul.f32 0.17677669, %v7395_v10  ;;  %v7398_v24 = vadd.f32 %v7397_v18, %v7245_v34  ;;  %vm18599_vm14 = vcmp.eq.s32.totalorder %v14481_v28, %v18598_v35  ;;  %vm18602_vm3 = vcmp.eq.s32.totalorder %v14481_v28, %v18601_v9  ;;  %v18603_v10 = vld [vmem:[#allocation105_spill] sm:$0xff]  ;;  %v18608_v35 = vld [vmem:[#allocation102_spill] sm:$0xff]  ;;  %v18610_v9 = vld [vmem:[#allocation108_spill] sm:$0xff] }
0x140d   : > { %v7463_v62 = vmul.f32 %v7447_v54, %v18597_v38  ;;  %v7448_v52 = vmul.f32 0.17677669, %v7406_v49  ;;  %7491 = vmax.xlane.f32.xlu0 %v16836_v57  ;;  %v7234_v12 = vsel %vm18599_vm14, 0.0, %v7212_v50  ;;  %v7233_v34 = vsel %vm18602_vm3, 0.0, %v7213_v42  ;;  %v18605_v49 = vld [vmem:[#allocation111_spill] sm:$0xff]  ;;  %v18615_v2 = vld [vmem:[#allocation109_spill] sm:$0xff] }
0x140e   : > { %v7446_v27 = vmul.f32 0.17677669, %v7398_v24  ;;  %7495 = vmax.xlane.f32.xlu1 %v16845_v61  ;;  %v7461_v32 = vmul.f32 %v7445_v51, %v18603_v10  ;;  %v7235_v24 = vsel %vm4144_vm11, 0.0, %v7211_v3  ;;  %v7250_v40 = vsel %vm4111_vm10, %v16656_v15, %v7234_v12 }
0x140f   : > { %v7464_v54 = vmul.f32 %v7448_v52, %v18604_v53  ;;  %v16865_v18 = vadd.f32 %v7463_v62, %v18605_v49  ;;  %v7248_v52 = vsel %vm4109_vm0, %v16652_v23, %v7232_v11  ;;  %v18611_v53 = vld [vmem:[#allocation173_spill] sm:$0xff]  ;;  %vm18624_vm11 = vcmp.eq.s32.totalorder %v14481_v28, %v18623_v14  ;;  %v18638_v14 = vld [vmem:[#allocation67_spill] sm:$0xff] }
0x1410   : > { %v9951_v38 = vpop.f32.mrb[120].mxu1  ;;  %v7462_v13 = vmul.f32 %v7446_v27, %v18608_v35  ;;  %vm18612_vm15 = vcmp.le.s32.totalorder %v14481_v28, %v18611_v53  ;;  %v18613_v27 = vld [vmem:[#allocation155_spill] sm:$0xff] }
0x1411   : > { %v7419_v42 = vadd.f32 %v9951_v38, %v7250_v40  ;;  %v7410_v62 = vpop.f32.mrb[121].mxu1  ;;  %7501 = vmax.xlane.f32.xlu0 %v16865_v18  ;;  %v16881_v10 = vadd.f32 %v7464_v54, %v18610_v9  ;;  %v7251_v15 = vsel %vm18612_vm15, %v16658_v41, %v7235_v24  ;;  %vm18614_vm10 = vcmp.le.s32.totalorder %v14481_v28, %v18613_v27  ;;  %v18616_v41 = vld [vmem:[#allocation115_spill] sm:$0xff] }
0x1412   : > { %v7411_v3 = vadd.f32 %v7410_v62, %v7248_v52  ;;  %v9952_v12 = vpop.f32.mrb[122].mxu1  ;;  %v7249_v49 = vsel %vm18614_vm10, %v16654_v39, %v7233_v34  ;;  %v16893_v54 = vadd.f32 %v7461_v32, %v18615_v2  ;;  %v7210_v40 = vsel %vm1603_vm6, %v7204_v30, %v7205_v22  ;;  %v18617_v52 = vld [vmem:[#allocation106_spill] sm:$0xff]  ;;  %v18620_v62 = vld [vmem:[#allocation113_spill] sm:$0xff] }
0x1413   : > { %v7451_v50 = vmul.f32 0.17677669, %v7419_v42  ;;  %v7422_v23 = vadd.f32 %v9952_v12, %v7251_v15  ;;  %v7413_v11 = vpop.f32.mrb[123].mxu1  ;;  %7503 = vmax.xlane.f32.xlu1 %v16881_v10  ;;  %v16900_v39 = vadd.f32 %v7462_v13, %v18617_v52  ;;  %v7209_v34 = vsel %vm1603_vm6, %v7205_v22, %v7206_v59  ;;  %v18618_v42 = vld [vmem:[#allocation177_spill] sm:$0xff]  ;;  %v18622_v15 = vld [vmem:[#allocation119_spill] sm:$0xff]  ;;  %v18625_v59 = vld [vmem:[#allocation110_spill] sm:$0xff] }
0x1414   : > { %v7449_v38 = vmul.f32 0.17677669, %v7411_v3  ;;  %v7414_v35 = vadd.f32 %v7413_v11, %v7249_v49  ;;  %vm18619_vm0 = vcmp.eq.s32.totalorder %v14481_v28, %v18618_v42  ;;  %v18621_v3 = vld [vmem:[#allocation112_spill] sm:$0xff]  ;;  %v7237_v46 = vsel %vm18624_vm11, 0.0, %v7209_v34  ;;  %v18626_v49 = vld [vmem:[#allocation174_spill] sm:$0xff] }
0x1415   : > { %v7467_v24 = vmul.f32 %v7451_v50, %v18616_v41  ;;  %v7452_v51 = vmul.f32 0.17677669, %v7422_v23  ;;  %7497 = vmax.xlane.f32.xlu0 %v16893_v54  ;;  %v7236_v30 = vsel %vm18619_vm0, 0.0, %v7210_v40  ;;  %vm18627_vm6 = vcmp.le.s32.totalorder %v14481_v28, %v18626_v49  ;;  %v18628_v11 = vld [vmem:[#allocation116_spill] sm:$0xff] }
0x1416   : > { %v7450_v32 = vmul.f32 0.17677669, %v7414_v35  ;;  %v7465_v9 = vmul.f32 %v7449_v38, %v18620_v62  ;;  %v7252_v50 = vsel %vm18627_vm6, %v16660_v25, %v7236_v30  ;;  %v18631_v25 = vld [vmem:[#allocation117_spill] sm:$0xff]  ;;  %v18632_v42 = vld [vmem:[#allocation120_spill] sm:$0xff]  ;;  %v18633_v62 = vld [vmem:[#allocation114_spill] sm:$0xff] }
0x1417   : > { %v7468_v53 = vmul.f32 %v7452_v51, %v18621_v3  ;;  %7499 = vmax.xlane.f32.xlu1 %v16900_v39  ;;  %v16913_v12 = vadd.f32 %v7467_v24, %v18622_v15  ;;  %v18629_v24 = vld [vmem:[#allocation170_spill] sm:$0xff] }
0x1418   : > { %v9955_v13 = vpop.f32.mrb[124].mxu1  ;;  %v7466_v22 = vmul.f32 %v7450_v32, %v18625_v59  ;;  %vm18630_vm4 = vcmp.le.s32.totalorder %v14481_v28, %v18629_v24  ;;  %v16935_v52 = vadd.f32 %v7465_v9, %v18631_v25  ;;  %v18635_v28 = vld [vmem:[#allocation148_spill] sm:$0xff]  ;;  %v18636_v9 = vld [vmem:[#allocation122_spill] sm:$0xff]  ;;  %v18640_v59 = vld [vmem:[#allocation83_spill] sm:$0xff] }
0x1419   : > { %v7435_v27 = vadd.f32 %v9955_v13, %v16684_v1  ;;  %v7426_v23 = vpop.f32.mrb[125].mxu1  ;;  %7509 = vmax.xlane.f32.xlu0 %v16913_v12  ;;  %v16926_v2 = vadd.f32 %v7468_v53, %v18628_v11  ;;  %v7253_v1 = vsel %vm18630_vm4, %v16662_v60, %v7237_v46  ;;  %v18637_v13 = vld [vmem:[#allocation75_spill] sm:$0xff]  ;;  %v18639_v46 = vld [vmem:[#allocation66_spill] sm:$0xff] }
0x141a   : > { %v7427_v40 = vadd.f32 %v7426_v23, %v7252_v50  ;;  %v9956_v38 = vpop.f32.mrb[126].mxu1  ;;  %v16940_v3 = vadd.f32 %v7466_v22, %v18633_v62  ;;  %v18642_v23 = vld [vmem:[#allocation121_spill] sm:$0xff] }
0x141b   : > { %v7455_v35 = vmul.f32 0.17677669, %v7435_v27  ;;  %v7438_v41 = vadd.f32 %v9956_v38, %v16689_v33  ;;  %v7429_v51 = vpop.f32.mrb[127].mxu1  ;;  %7511 = vmax.xlane.f32.xlu1 %v16926_v2  ;;  %v18634_v33 = vld [vmem:[#allocation118_spill] sm:$0xff]  ;;  %v18641_v27 = vld [vmem:[#allocation123_spill] sm:$0xff] }
0x141c   : > { %v7453_v34 = vmul.f32 0.17677669, %v7427_v40  ;;  %v7430_v32 = vadd.f32 %v7429_v51, %v7253_v1  ;;  %v18643_v40 = vld [vmem:[#allocation133_spill] sm:$0xff]  ;;  %v18645_v1 = vld [vmem:[#allocation74_spill] sm:$0xff] }
0x141d   : > { %v7471_v30 = vmul.f32 %v7455_v35, %v18632_v42  ;;  %7505 = vmax.xlane.f32.xlu0 %v16935_v52  ;;  %v7456_v22 = vmul.f32 0.17677669, %v7438_v41  ;;  %v18644_v35 = vld [vmem:[#allocation127_spill] sm:$0xff] }
0x141e   : > { %v7469_v53 = vmul.f32 %v7453_v34, %v18634_v33  ;;  %v7454_v50 = vmul.f32 0.17677669, %v7430_v32 }
0x141f   : > { %7507 = vmax.xlane.f32.xlu1 %v16940_v3  ;;  %v16945_v60 = vadd.f32 %v7471_v30, %v18635_v28  ;;  %v7472_v49 = vmul.f32 %v7456_v22, %v18641_v27 }
0x1420   : > { %v16949_v15 = vadd.f32 %v7469_v53, %v18636_v9  ;;  %v7470_v11 = vmul.f32 %v7454_v50, %v18642_v23 }
0x1421   : > { %7517 = vmax.xlane.f32.xlu0 %v16945_v60  ;;  %v16963_v38 = vadd.f32 %v7472_v49, %v18643_v40 }
0x1422   : > { %v16967_v24 = vadd.f32 %v7470_v11, %v18644_v35 }
0x1425   : > { %7513 = vmax.xlane.f32.xlu0 %v16949_v15 }
0x1430   : > { %7649 = vrot.lane.b32.xlu1 %v18637_v13, %s11379_s0 }
0x143b   : > { %7645 = vrot.lane.b32.xlu0 %v18638_v14, %s11379_s0 }
0x143f   : > { %7647 = vrot.lane.b32.xlu0 %v18639_v46, %s11379_s0 }
0x1443   : > { %7653 = vrot.lane.b32.xlu0 %v18640_v59, %s11379_s0 }
0x1454   : > { %7519 = vmax.xlane.f32.xlu1 %v16963_v38 }
0x1458   : > { %7515 = vmax.xlane.f32.xlu1 %v16967_v24 }
0x1469   : > { %7651 = vrot.lane.b32.xlu1 %v18645_v1, %s11379_s0 }
0x1496   : > { %v7494_v51 = vpop.xlane.xlu0 %7493 }
0x1497   : > { %v7523_v41 = vsub.f32 %v16809_v21, %v7494_v51  ;;  %v7490_v25 = vpop.xlane.xlu1 %7489 }
0x1498   : > { %v7521_v34 = vsub.f32 %v16818_v29, %v7490_v25 }
0x1499   : > { %v7541_v32 = vmul.f32 1.442695, %v7523_v41 }
0x149a   : > { %v7492_v42 = vpop.xlane.xlu0 %7491  ;;  %v7537_v30 = vmul.f32 1.442695, %v7521_v34 }
0x149b   : > { %10849 = vpow2.f32 %v7541_v32  ;;  %v7496_v62 = vpop.xlane.xlu1 %7495  ;;  %v7522_v53 = vsub.f32 %v16836_v57, %v7492_v42 }
0x149c   : > { %v7524_v33 = vsub.f32 %v16845_v61, %v7496_v62  ;;  %10851 = vpow2.f32 %v7537_v30 }
0x149d   : > { %v7539_v21 = vmul.f32 1.442695, %v7522_v53 }
0x149e   : > { %v7543_v28 = vmul.f32 1.442695, %v7524_v33  ;;  %v7502_v9 = vpop.xlane.xlu0 %7501 }
0x149f   : > { %v7527_v13 = vsub.f32 %v16865_v18, %v7502_v9 }
0x14a0   : > { %v7504_v14 = vpop.xlane.xlu1 %7503  ;;  %10853 = vpow2.f32 %v7543_v28 }
0x14a1   : > { %v7549_v46 = vmul.f32 1.442695, %v7527_v13  ;;  %v7528_v29 = vsub.f32 %v16881_v10, %v7504_v14 }
0x14a2   : > { %v7498_v59 = vpop.xlane.xlu0 %7497 }
0x14a3   : > { %10855 = vpow2.f32 %v7549_v46  ;;  %v7525_v22 = vsub.f32 %v16893_v54, %v7498_v59  ;;  %v7551_v50 = vmul.f32 1.442695, %v7528_v29 }
0x14a4   : > { %v7500_v27 = vpop.xlane.xlu1 %7499  ;;  %10857 = vpow2.f32 %v7539_v21 }
0x14a5   : > { %v16979_v49 = vpop.eup %10849  ;;  %v7545_v61 = vmul.f32 1.442695, %v7525_v22  ;;  %v7526_v57 = vsub.f32 %v16900_v39, %v7500_v27 }
0x14a6   : > { %7573 = vadd.xlane.f32.xlu1 %v16979_v49  ;;  %v7510_v18 = vpop.xlane.xlu0 %7509  ;;  %v16984_v40 = vpop.eup %10851 }
0x14a7   : > { %10859 = vpow2.f32 %v7545_v61  ;;  %v7547_v23 = vmul.f32 1.442695, %v7526_v57  ;;  %v7531_v11 = vsub.f32 %v16913_v12, %v7510_v18  ;;  %v18646_v61 = vld [vmem:[#allocation82_spill] sm:$0xff]  ;;  %v18647_v57 = vld [vmem:[#allocation141_spill] sm:$0xff] }
0x14a8   : > { %v7512_v10 = vpop.xlane.xlu1 %7511  ;;  %10861 = vpow2.f32 %v7551_v50  ;;  %v18648_v50 = vld [vmem:[#allocation135_spill] sm:$0xff] }
0x14a9   : > { %10863 = vpow2.f32 %v7547_v23  ;;  %v7557_v35 = vmul.f32 1.442695, %v7531_v11  ;;  %v7532_v12 = vsub.f32 %v16926_v2, %v7512_v10  ;;  %v18649_v18 = vpack.i.bf16 %v18647_v57, %v18648_v50  ;;  %v18650_v11 = vld [vmem:[#allocation181_spill] sm:$0xff]  ;;  %v18651_v10 = vld [vmem:[#allocation180_spill] sm:$0xff] }
0x14aa   : > { %7569 = vadd.xlane.f32.xlu1 %v16984_v40  ;;  %v7506_v54 = vpop.xlane.xlu0 %7505  ;;  %v16988_v1 = vpop.eup %10853 }
0x14ab   : > { %v7529_v39 = vsub.f32 %v16935_v52, %v7506_v54  ;;  %10865 = vpow2.f32 %v7557_v35  ;;  %v18652_v54 = vpack.i.bf16 %v18650_v11, %v18651_v10 }
0x14ac   : > { %v7508_v51 = vpop.xlane.xlu1 %7507 }
0x14ad   : > { %v16990_v41 = vpop.eup %10855  ;;  %v7530_v25 = vsub.f32 %v16940_v3, %v7508_v51  ;;  %v7553_v32 = vmul.f32 1.442695, %v7529_v39  ;;  %v7559_v3 = vmul.f32 1.442695, %v7532_v12 }
0x14ae   : > { %7575 = vadd.xlane.f32.xlu1 %v16988_v1  ;;  %7581 = vadd.xlane.f32.xlu0 %v16990_v41  ;;  %v7518_v34 = vpop.xlane.xlu0 %7517  ;;  %v16997_v52 = vpop.eup %10857 }
0x14af   : > { %v7555_v42 = vmul.f32 1.442695, %v7530_v25  ;;  %v7535_v30 = vsub.f32 %v16945_v60, %v7518_v34 }
0x14b0   : > { %v7650_v21 = vpop.permute.xlu1 %7649 }
0x14b1   : > { %v16999_v62 = vpop.eup %10859  ;;  %10867 = vpow2.f32 %v7555_v42  ;;  %v7565_v33 = vmul.f32 1.442695, %v7535_v30  ;;  %v18659_v42 = vld [vmem:[#allocation179_spill] sm:$0xff]  ;;  %v18660_v30 = vld [vmem:[#allocation178_spill] sm:$0xff] }
0x14b2   : > { %7571 = vadd.xlane.f32.xlu1 %v16997_v52  ;;  %7577 = vadd.xlane.f32.xlu0 %v16999_v62  ;;  %v7514_v2 = vpop.xlane.xlu0 %7513  ;;  %10869 = vpow2.f32 %v7553_v32  ;;  %v17004_v28 = vpop.eup %10861 }
0x14b3   : > { %v7533_v53 = vsub.f32 %v16949_v15, %v7514_v2  ;;  %v17006_v9 = vpop.eup %10863  ;;  %10871 = vpow2.f32 %v7565_v33  ;;  %v18661_v33 = vpack.i.bf16 %v18659_v42, %v18660_v30  ;;  %v18662_v2 = vld [vmem:[#allocation183_spill] sm:$0xff] }
0x14b4   : > { %10873 = vpow2.f32 %v7559_v3  ;;  %v18663_v3 = vld [vmem:[#allocation166_spill] sm:$0xff] }
0x14b5   : > { %v7561_v60 = vmul.f32 1.442695, %v7533_v53  ;;  %v17010_v14 = vpop.eup %10865  ;;  %v18664_v53 = vpack.i.bf16 %v18662_v2, %v18663_v3 }
0x14b6   : > { %7579 = vadd.xlane.f32.xlu1 %v17006_v9  ;;  %7583 = vadd.xlane.f32.xlu0 %v17004_v28  ;;  %v7646_v13 = vpop.permute.xlu0 %7645 }
0x14b7   : > { %9961 = vmatprep.subr.bf16.mxu0 %v7646_v13  ;;  %10875 = vpow2.f32 %v7561_v60 }
0x14b8   : > { %9962 = vmatpush3.bf16.msra.mxu0 %v7646_v13 }
0x14ba   : > { %7589 = vadd.xlane.f32.xlu0 %v17010_v14  ;;  %v7648_v15 = vpop.permute.xlu0 %7647 }
0x14bb   : > { %v17013_v46 = vpop.eup %10867  ;;  %9963 = vmatprep.subr.bf16.mxu0 %v7648_v15 }
0x14bc   : > { %7587 = vadd.xlane.f32.xlu1 %v17013_v46  ;;  %9964 = vmatpush3.bf16.msra.mxu0 %v7648_v15  ;;  %v17016_v29 = vpop.eup %10869 }
0x14bd   : > { %9965 = vmatprep.subr.bf16.mxu0 %v7650_v21  ;;  %v17019_v59 = vpop.eup %10871 }
0x14be   : > { %7585 = vadd.xlane.f32.xlu0 %v17016_v29  ;;  %v17022_v22 = vpop.eup %10873  ;;  %v7654_v32 = vpop.permute.xlu0 %7653 }
0x14c0   : > { %7597 = vadd.xlane.f32.xlu1 %v17019_v59  ;;  %9966 = vmatpush3.bf16.msra.mxu0 %v7650_v21 }
0x14c1   : > { %v17025_v27 = vpop.eup %10875 }
0x14c2   : > { %7591 = vadd.xlane.f32.xlu0 %v17022_v22 }
0x14c4   : > { %7593 = vadd.xlane.f32.xlu1 %v17025_v27 }
0x14d5   : > { %7655 = vrot.lane.b32.xlu1 %v18646_v61, %s11379_s0 }
0x14d9   : > { %10335 = vrot.lane.b32.xlu1 %v18649_v18, %s11379_s0 }
0x14dd   : > { %10340 = vrot.lane.b32.xlu1 %v10339_v31, %s11393_s1  ;;  %v18655_v31 = vpack.i.bf16 %v18653_v44, %v18654_v16 }
0x14e1   : > { %v7520_v23 = vpop.xlane.xlu1 %7519  ;;  %10350 = vrot.lane.b32.xlu1 %v18652_v54, %s11379_s0 }
0x14e2   : > { %v7536_v39 = vsub.f32 %v16963_v38, %v7520_v23  ;;  %v18657_v38 = vld [vmem:[#allocation131_spill] sm:$0xff] }
0x14e4   : > { %v7567_v34 = vmul.f32 1.442695, %v7536_v39 }
0x14e5   : > { %v7516_v35 = vpop.xlane.xlu1 %7515  ;;  %10360 = vrot.lane.b32.xlu1 %v10359_v4, %s11393_s1  ;;  %v18656_v4 = vld [vmem:[#allocation134_spill] sm:$0xff] }
0x14e6   : > { %v7534_v51 = vsub.f32 %v16967_v24, %v7516_v35  ;;  %v18658_v24 = vpack.i.bf16 %v18656_v4, %v18657_v38 }
0x14e8   : > { %v7563_v25 = vmul.f32 1.442695, %v7534_v51 }
0x14e9   : > { %v7652_v12 = vpop.permute.xlu1 %7651  ;;  %10370 = vrot.lane.b32.xlu1 %v18655_v31, %s11379_s0 }
0x14ea   : > { %10877 = vpow2.f32 %v7563_v25  ;;  %9967 = vmatprep.subr.bf16.mxu0 %v7652_v12 }
0x14eb   : > { %9968 = vmatpush3.bf16.msra.mxu0 %v7652_v12  ;;  %10879 = vpow2.f32 %v7567_v34 }
0x14ec   : > { %9969 = vmatprep.subr.bf16.mxu0 %v7654_v32 }
0x14ef   : > { %9970 = vmatpush3.bf16.msra.mxu0 %v7654_v32 }
0x14f4   : > { %v17052_v8 = vpop.eup %10877 }
0x14f5   : > { %7595 = vadd.xlane.f32.xlu0 %v17052_v8  ;;  %v17055_v45 = vpop.eup %10879 }
0x14f9   : > { %7599 = vadd.xlane.f32.xlu0 %v17055_v45 }
0x150f   : > { %10330 = vrot.lane.b32.xlu0 %v18658_v24, %s11379_s0 }
0x1513   : > { %10345 = vrot.lane.b32.xlu0 %v10344_v0, %s11393_s1 }
0x1517   : > { %10355 = vrot.lane.b32.xlu0 %v18661_v33, %s11379_s0 }
0x151b   : > { %10365 = vrot.lane.b32.xlu0 %v10364_v37, %s11393_s1 }
0x151f   : > { %10375 = vrot.lane.b32.xlu0 %v18664_v53, %s11379_s0 }
0x1533   : > { %v7574_v60 = vpop.xlane.xlu1 %7573 }
0x1537   : > { %v7570_v13 = vpop.xlane.xlu1 %7569 }
0x1538   : > { %10881 = vrcp.f32 %v7570_v13 }
0x153b   : > { %v7576_v15 = vpop.xlane.xlu1 %7575  ;;  %v7582_v55 = vpop.xlane.xlu0 %7581 }
0x153f   : > { %v7572_v17 = vpop.xlane.xlu1 %7571  ;;  %v7578_v0 = vpop.xlane.xlu0 %7577 }
0x1540   : > { %10883 = vrcp.f32 %v7572_v17 }
0x1541   : > { %10885 = vrcp.f32 %v7576_v15 }
0x1542   : > { %v10882_v50 = vpop.eup %10881 }
0x1543   : > { %v7584_v21 = vpop.xlane.xlu0 %7583  ;;  %v7580_v61 = vpop.xlane.xlu1 %7579  ;;  %v7617_v37 = vmul.f32 %v10882_v50, %v16984_v40  ;;  %v10506_v50 = vld [vmem:[#allocation14 + $0x8] sm:$0xff]  }
0x1544   : > { %10887 = vrcp.f32 %v7580_v61 }
0x1545   : > { %10889 = vrcp.f32 %v7574_v60 }
0x1546   : > { %10891 = vrcp.f32 %v7578_v0 }
0x1547   : > { %v7590_v57 = vpop.xlane.xlu0 %7589  ;;  %10893 = vrcp.f32 %v7584_v21 }
0x1549   : > { %v7588_v43 = vpop.xlane.xlu1 %7587 }
0x154a   : > { %v10884_v56 = vpop.eup %10883 }
0x154b   : > { %v7618_v18 = vmul.f32 %v10884_v56, %v16997_v52  ;;  %v7586_v23 = vpop.xlane.xlu0 %7585  ;;  %v10886_v54 = vpop.eup %10885  ;;  %v10510_v56 = vld [vmem:[#allocation14 + $0x28] sm:$0xff]  }
0x154c   : > { %10895 = vrcp.f32 %v7586_v23  ;;  %v7620_v12 = vmul.f32 %v10886_v54, %v16988_v1 }
0x154d   : > { %v7598_v11 = vpop.xlane.xlu1 %7597  ;;  %v7633_v10 = vpack.c.bf16 %v7618_v18, %v7617_v37  ;;  %10897 = vrcp.f32 %v7582_v55 }
0x154e   : > { %v10888_v39 = vpop.eup %10887  ;;  %10899 = vrcp.f32 %v7588_v43  ;;  %v10507_v43 = vld [vmem:[#allocation14 + $0x10] sm:$0xff]  }
0x154f   : > { %9973 = vmatprep.mubr.bf16.mxu0 %v7633_v10  ;;  %v10890_v51 = vpop.eup %10889  ;;  %v7592_v44 = vpop.xlane.xlu0 %7591  ;;  %v7622_v40 = vmul.f32 %v10888_v39, %v17006_v9 }
0x1550   : > { %v10892_v25 = vpop.eup %10891  ;;  %v7619_v52 = vmul.f32 %v10890_v51, %v16979_v49  ;;  %10901 = vrcp.f32 %v7592_v44 }
0x1551   : > { %v7594_v35 = vpop.xlane.xlu1 %7593  ;;  %v7621_v31 = vmul.f32 %v10892_v25, %v16999_v62  ;;  %v10894_v32 = vpop.eup %10893  ;;  %10903 = vrcp.f32 %v7590_v57  ;;  %v10505_v57 = vld [vmem:[#allocation14] sm:$0xff]  }
0x1552   : > { %v7634_v34 = vpack.c.bf16 %v7620_v12, %v7619_v52  ;;  %v7624_v42 = vmul.f32 %v10894_v32, %v17004_v28  ;;  %10905 = vrcp.f32 %v7594_v35  ;;  %9989 = vmatprep.subr.bf16.mxu1 %v10505_v57  ;;  %v18666_v52 = vld [vmem:[#allocation185_spill] sm:$0xff] }
0x1553   : > { %v7635_v4 = vpack.c.bf16 %v7622_v40, %v7621_v31  ;;  %9990 = vmatpush3.bf16.msra.mxu1 %v10505_v57  ;;  %v18665_v40 = vld [vmem:[#allocation187_spill] sm:$0xff]  ;;  %v18669_v31 = vld [vmem:[#allocation186_spill] sm:$0xff] }
0x1554   : > { %9991 = vmatprep.subr.bf16.mxu1 %v10506_v50  ;;  %v18667_v5 = vpack.i.bf16 %v18665_v40, %v18666_v52 }
0x1555   : > { %v7656_v16 = vpop.permute.xlu1 %7655 }
0x1556   : > { %9971 = vmatprep.subr.bf16.mxu0 %v7656_v16  ;;  %v10896_v38 = vpop.eup %10895 }
0x1557   : > { %9972 = vmatpush3.bf16.msra.mxu0 %v7656_v16  ;;  %v10898_v24 = vpop.eup %10897  ;;  %v7625_v9 = vmul.f32 %v10896_v38, %v17016_v29  ;;  %9992 = vmatpush3.bf16.msra.mxu1 %v10506_v50 }
0x1558   : > { %v10900_v1 = vpop.eup %10899  ;;  %v7623_v49 = vmul.f32 %v10898_v24, %v16990_v41  ;;  %9993 = vmatprep.subr.bf16.mxu1 %v10507_v43 }
0x1559   : > { %v7626_v30 = vmul.f32 %v10900_v1, %v17013_v46 }
0x155a   : > { %9974 = vmatmul.mubr.bf16.vlgmr.msra.gmra.mrb[144].mxu0 %v7634_v34  ;;  %v7636_v33 = vpack.c.bf16 %v7624_v42, %v7623_v49  ;;  %v10902_v2 = vpop.eup %10901 }
0x155b   : > { %9977 = vmatprep.mubr.bf16.mxu0 %v7635_v4  ;;  %v7637_v62 = vpack.c.bf16 %v7626_v30, %v7625_v9  ;;  %v10904_v3 = vpop.eup %10903  ;;  %v7628_v53 = vmul.f32 %v10902_v2, %v17022_v22  ;;  %9994 = vmatpush3.bf16.msra.mxu1 %v10507_v43  ;;  %v18671_v4 = vpack.i.bf16 %v16741_v63, %v16733_v48 }
0x155c   : > { %v7627_v60 = vmul.f32 %v10904_v3, %v17010_v14  ;;  %v10906_v41 = vpop.eup %10905 }
0x155d   : > { %v7629_v15 = vmul.f32 %v10906_v41, %v17025_v27  ;;  %v10508_v27 = vld [vmem:[#allocation14 + $0x18] sm:$0xff]  }
0x155e   : > { %v7638_v13 = vpack.c.bf16 %v7628_v53, %v7627_v60  ;;  %9995 = vmatprep.subr.bf16.mxu1 %v10508_v27 }
0x155f   : > { %9996 = vmatpush3.bf16.msra.mxu1 %v10508_v27 }
0x1562   : > { %9978 = vmatmul.mubr.bf16.gmra.mrb[148].mxu0 %v7636_v33  ;;  %v10336_v33 = vpop.permute.xlu1 %10335 }
0x1563   : > { %9981 = vmatprep.mubr.bf16.mxu0 %v7637_v62  ;;  %v10338_v48 = vunpack.i.h.bf16 %v10336_v33  ;;  %v10337_v63 = vunpack.i.l.bf16 %v10336_v33 }
0x1566   : > { %v10341_v36 = vpop.permute.xlu1 %10340 }
0x156a   : > { %9982 = vmatmul.mubr.bf16.gmra.mrb[152].mxu0 %v7638_v13 }
0x1582   : > { %v7596_v28 = vpop.xlane.xlu0 %7595 }
0x1583   : > { %10907 = vrcp.f32 %v7596_v28 }
0x1584   : > { %10909 = vrcp.f32 %v7598_v11 }
0x1586   : > { %v7600_v29 = vpop.xlane.xlu0 %7599 }
0x1587   : > { %10911 = vrcp.f32 %v7600_v29 }
0x158a   : > { %v10331_v30 = vpop.permute.xlu0 %10330 }
0x158b   : > { %v10333_v53 = vunpack.i.h.bf16 %v10331_v30  ;;  %v10332_v60 = vunpack.i.l.bf16 %v10331_v30 }
0x158d   : > { %v10908_v46 = vpop.eup %10907 }
0x158e   : > { %v7630_v55 = vmul.f32 %v10908_v46, %v17052_v8  ;;  %v10910_v17 = vpop.eup %10909  ;;  %v10509_v8 = vld [vmem:[#allocation14 + $0x20] sm:$0xff]   ;;  %v10346_v2 = vpop.permute.xlu0 %10345  ;;  %v18672_v46 = vld [vmem:[#allocation142_spill] sm:$0xff] }
0x158f   : > { %v7631_v14 = vmul.f32 %v10910_v17, %v17019_v59  ;;  %9997 = vmatprep.subr.bf16.mxu1 %v10509_v8  ;;  %v10511_v59 = vld [vmem:[#allocation14 + $0x30] sm:$0xff]   ;;  %v10348_v29 = vunpack.i.h.bf16 %v10346_v2  ;;  %v10347_v41 = vunpack.i.l.bf16 %v10346_v2 }
0x1590   : > { %v7639_v0 = vpack.c.bf16 %v7630_v55, %v7629_v15  ;;  %9998 = vmatpush3.bf16.msra.mxu1 %v10509_v8  ;;  %v7957_v15 = vsel %vm4207_vm12, %v18672_v46, %v10338_v48  ;;  %v18673_v55 = vld [vmem:[#allocation140_spill] sm:$0xff] }
0x1591   : > { %v10912_v21 = vpop.eup %10911  ;;  %9999 = vmatprep.subr.bf16.mxu1 %v10510_v56  ;;  %v7956_v17 = vsel %vm4207_vm12, %v18673_v55, %v10337_v63 }
0x1592   : > { %9985 = vmatprep.mubr.bf16.mxu0 %v7639_v0  ;;  %v7632_v22 = vmul.f32 %v10912_v21, %v17055_v45  ;;  %v10512_v45 = vld [vmem:[#allocation14 + $0x38] sm:$0xff]   ;;  %v10356_v7 = vpop.permute.xlu0 %10355  ;;  %v10343_v0 = vunpack.i.h.bf16 %v10341_v36  ;;  %v10342_v21 = vunpack.i.l.bf16 %v10341_v36 }
0x1593   : > { %v10357_v40 = vunpack.i.l.bf16 %v10356_v7 }
0x1594   : > { %v7640_v61 = vpack.c.bf16 %v7632_v22, %v7631_v14  ;;  %10000 = vmatpush3.bf16.msra.mxu1 %v10510_v56  ;;  %v18674_v14 = vld [vmem:[#allocation145_spill] sm:$0xff] }
0x1595   : > { %10001 = vmatprep.subr.bf16.mxu1 %v10511_v59  ;;  %v7955_v22 = vsel %vm4207_vm12, %v18674_v14, %v10333_v53 }
0x1596   : > { %9986 = vmatmul.mubr.bf16.gmra.mrb[156].mxu0 %v7640_v61  ;;  %v10366_v62 = vpop.permute.xlu0 %10365  ;;  %v18675_v61 = vld [vmem:[#allocation143_spill] sm:$0xff] }
0x1597   : > { %v7954_v57 = vsel %vm4207_vm12, %v18675_v61, %v10332_v60  ;;  %v18680_v61 = vld [vmem:[#allocation154_spill] sm:$0xff] }
0x1598   : > { %10002 = vmatpush3.bf16.msra.mxu1 %v10511_v59 }
0x1599   : > { %10003 = vmatprep.subr.bf16.mxu1 %v10512_v45 }
0x159a   : > { %v17126_v13 = vpop.permute.xlu0 %10375 }
0x159b   : > { %v10378_v46 = vunpack.i.h.bf16 %v17126_v13 }
0x159c   : > { %10004 = vmatpush3.bf16.msra.mxu1 %v10512_v45  ;;  %v7974_v45 = vsel %vm7970_vm9, %v7957_v15, %v10348_v29  ;;  %v10377_v15 = vunpack.i.l.bf16 %v17126_v13 }
0x162d   : > { %v9975_v37 = vpop.f32.mrb[144].mxu0 }
0x162e   : > { %v7699_v18 = vpop.f32.mrb[145].mxu0 }
0x162f   : > { %v9976_v23 = vpop.f32.mrb[146].mxu0 }
0x1630   : > { %v10379_v11 = vpack.i.bf16 %v9976_v23, %v9975_v37  ;;  %v7702_v10 = vpop.f32.mrb[147].mxu0  ;;  %v7973_v37 = vsel %vm7970_vm9, %v7956_v17, %v10347_v41 }
0x1631   : > { %v10384_v54 = vpack.i.bf16 %v7702_v10, %v7699_v18 }
0x1632   : > { %10380 = vrot.lane.b32.xlu0 %v10379_v11, %s11381_s29 }
0x1633   : > { %10385 = vrot.lane.b32.xlu1 %v10384_v54, %s11381_s29  ;;  %v7971_v54 = vsel %vm7970_vm9, %v7954_v57, %v10342_v21  ;;  %v18681_v57 = vld [vmem:[#allocation152_spill] sm:$0xff] }
0x1635   : > { %v9979_v35 = vpop.f32.mrb[148].mxu0 }
0x1636   : > { %10395 = vrot.lane.b32.xlu0 %v10394_v6, %s11393_s1  ;;  %v7715_v39 = vpop.f32.mrb[149].mxu0  ;;  %v18668_v6 = vld [vmem:[#allocation188_spill] sm:$0xff] }
0x1637   : > { %10390 = vrot.lane.b32.xlu1 %v10389_v20, %s11393_s1  ;;  %v9980_v51 = vpop.f32.mrb[150].mxu0  ;;  %v18670_v47 = vpack.i.bf16 %v18668_v6, %v18669_v31  ;;  %v10367_v6 = vunpack.i.l.bf16 %v10366_v62  ;;  %v18676_v31 = vld [vmem:[#allocation147_spill] sm:$0xff] }
0x1638   : > { %v10399_v25 = vpack.i.bf16 %v9980_v51, %v9979_v35  ;;  %v7718_v12 = vpop.f32.mrb[151].mxu0  ;;  %v7972_v35 = vsel %vm7970_vm9, %v7955_v22, %v10343_v0 }
0x1639   : > { %v10404_v44 = vpack.i.bf16 %v7718_v12, %v7715_v39 }
0x163a   : > { %10400 = vrot.lane.b32.xlu0 %v10399_v25, %s11381_s29 }
0x163b   : > { %10405 = vrot.lane.b32.xlu1 %v10404_v44, %s11381_s29 }
0x163d   : > { %v9983_v16 = vpop.f32.mrb[152].mxu0 }
0x163e   : > { %10415 = vrot.lane.b32.xlu0 %v18667_v5, %s11379_s0  ;;  %v7731_v58 = vpop.f32.mrb[153].mxu0 }
0x163f   : > { %10410 = vrot.lane.b32.xlu1 %v18670_v47, %s11379_s0  ;;  %v9984_v26 = vpop.f32.mrb[154].mxu0  ;;  %s677_s0 = sand.u32 1, %s18707_s22  }
0x1640   : > { %v10419_v20 = vpack.i.bf16 %v9984_v26, %v9983_v16  ;;  %v7734_v34 = vpop.f32.mrb[155].mxu0  ;;  %v10358_v16 = vunpack.i.h.bf16 %v10356_v7  ;;  %s9007_s6 = sshll.u32 %s677_s0, 7  ;;  %s17447_s25 = scalar_lea.sflag [#allocation4], %s677_s0 }
0x1641   : > { %v10424_v32 = vpack.i.bf16 %v7734_v34, %v7731_v58  ;;  %v10368_v58 = vunpack.i.h.bf16 %v10366_v62 }
0x1642   : > { %10420 = vrot.lane.b32.xlu0 %v10419_v20, %s11381_s29  ;;  %v18677_v20 = vld [vmem:[#allocation150_spill] sm:$0xff] }
0x1643   : > { %10425 = vrot.lane.b32.xlu1 %v10424_v32, %s11381_s29 }
0x1646   : > { %10435 = vrot.lane.b32.xlu0 %v10434_v19, %s11393_s1  ;;  %v10351_v19 = vpop.permute.xlu1 %10350 }
0x1647   : > { %10430 = vrot.lane.b32.xlu1 %v18671_v4, %s11393_s1  ;;  %v10353_v43 = vunpack.i.h.bf16 %v10351_v19  ;;  %v10352_v27 = vunpack.i.l.bf16 %v10351_v19 }
0x1649   : > { %v7958_v47 = vsel %vm4207_vm12, %v18676_v31, %v10352_v27  ;;  %v7959_v34 = vsel %vm4207_vm12, %v18677_v20, %v10353_v43  ;;  %v18682_v27 = vld [vmem:[#allocation151_spill] sm:$0xff] }
0x164a   : > { %v10361_v3 = vpop.permute.xlu1 %10360 }
0x164b   : > { %v10362_v39 = vunpack.i.l.bf16 %v10361_v3  ;;  %v10363_v26 = vunpack.i.h.bf16 %v10361_v3 }
0x164d   : > { %v7975_v32 = vsel %vm7970_vm9, %v7958_v47, %v10362_v39  ;;  %v7976_v19 = vsel %vm7970_vm9, %v7959_v34, %v10363_v26 }
0x164e   : > { %v17128_v28 = vpop.permute.xlu1 %10370 }
0x164f   : > { %v10373_v62 = vunpack.i.h.bf16 %v17128_v28  ;;  %v10372_v63 = vunpack.i.l.bf16 %v17128_v28 }
0x1651   : > { %v7963_v28 = vsel %vm4207_vm12, %v18680_v61, %v10373_v62  ;;  %v18689_v61 = vld [vmem:[#allocation50_spill] sm:$0xff] }
0x1669   : > { %v9987_v38 = vpop.f32.mrb[156].mxu0 }
0x166a   : > { %v7747_v24 = vpop.f32.mrb[157].mxu0 }
0x166b   : > { %v9988_v1 = vpop.f32.mrb[158].mxu0 }
0x166c   : > { %v10444_v42 = vpack.i.bf16 %v9988_v1, %v9987_v38  ;;  %v7750_v9 = vpop.f32.mrb[159].mxu0  ;;  %v18678_v38 = vld [vmem:[#allocation146_spill] sm:$0xff]  ;;  %v18679_v1 = vld [vmem:[#allocation144_spill] sm:$0xff] }
0x166d   : > { %v10439_v49 = vpack.i.bf16 %v7750_v9, %v7747_v24  ;;  %v7961_v24 = vsel %vm4207_vm12, %v18678_v38, %v10358_v16  ;;  %v18685_v38 = vld [vmem:[#allocation153_spill] sm:$0xff] }
0x166e   : > { %10445 = vrot.lane.b32.xlu0 %v10444_v42, %s11381_s29  ;;  %v7960_v42 = vsel %vm4207_vm12, %v18679_v1, %v10357_v40  ;;  %v7978_v2 = vsel %vm7970_vm9, %v7961_v24, %v10368_v58 }
0x166f   : > { %10440 = vrot.lane.b32.xlu1 %v10439_v49, %s11381_s29  ;;  %v7977_v33 = vsel %vm7970_vm9, %v7960_v42, %v10367_v6  ;;  %v18686_v42 = vld [vmem:[#allocation158_spill] sm:$0xff]  ;;  %s17404_s29 = scalar_lea.vmem [#allocation20], %s9007_s6 }
0x1670   : > { %s8800_s26 = sshll.u32 %s17404_s29, 4  ;;  %s17439_s26 = int_to_ptr.vmem [resolvable:$true] %s8800_s26 }
0x1671   : > { %s11269_s30 = scalar_lea.vmem %s17439_s26, 2048  ;;  %p11276_p3 = scmp.lt.s32.totalorder %s17439_s26, %s11274_s28 }
0x1672   : > { %p11270_p5 = scmp.ne.s32.totalorder %s17439_s26, %s11269_s30  ;;  %p11277_p4 = scmp.lt.s32.totalorder %s11275_s23, %s11269_s30 }
0x1674   : > { %p11271_p10 = pnand %p11270_p5, %p18710_p0  ;;  %p11278_p12 = por %p11277_p4, %p11276_p3 }
0x1676   : > { %p11272_p2 = pneg %p11271_p10 }
0x1678   : > { %p11279_p7 = pnand %p11278_p12, %p11272_p2 }
0x16a4   : > { %v10381_v50 = vpop.permute.xlu0 %10380 }
0x16a5   : > { %v10383_v8 = vunpack.i.h.bf16 %v10381_v50  ;;  %v10382_v56 = vunpack.i.l.bf16 %v10381_v50  ;;  %v10386_v59 = vpop.permute.xlu1 %10385  ;;  %v7962_v50 = vsel %vm4207_vm12, %v18681_v57, %v10372_v63  ;;  %v18690_v57 = vld [vmem:[#allocation52_spill] sm:$0xff] }
0x16a6   : > { %v10388_v18 = vunpack.i.h.bf16 %v10386_v59  ;;  %v10387_v23 = vunpack.i.l.bf16 %v10386_v59 }
0x16a7   : > { %v7990_v11 = vsel %vm7987_vm2, %v7973_v37, %v10382_v56  ;;  %v7991_v10 = vsel %vm7987_vm2, %v7974_v45, %v10383_v8  ;;  %v7965_v8 = vsel %vm4207_vm12, %v18682_v27, %v10378_v46  ;;  %v18683_v56 = vld [vmem:[#allocation149_spill] sm:$0xff] }
0x16a8   : > { %v8005_v51 = vpack.c.bf16 %v7991_v10, %v7990_v11  ;;  %v10396_v25 = vpop.permute.xlu0 %10395  ;;  %v7988_v12 = vsel %vm7987_vm2, %v7971_v54, %v10387_v23  ;;  %v7989_v44 = vsel %vm7987_vm2, %v7972_v35, %v10388_v18  ;;  %v7964_v13 = vsel %vm4207_vm12, %v18683_v56, %v10377_v15 }
0x16a9   : > { %v10391_v52 = vpop.permute.xlu1 %10390  ;;  %v8004_v5 = vpack.c.bf16 %v7989_v44, %v7988_v12  ;;  %v10398_v0 = vunpack.i.h.bf16 %v10396_v25  ;;  %v10397_v21 = vunpack.i.l.bf16 %v10396_v25 }
0x16aa   : > { %v10393_v14 = vunpack.i.h.bf16 %v10391_v52  ;;  %v10392_v22 = vunpack.i.l.bf16 %v10391_v52 }
0x16ab   : > { %10005 = vmatprep.mubr.bf16.mxu1 %v8004_v5  ;;  %v7981_v18 = vsel %vm7970_vm9, %v7964_v13, %v10397_v21  ;;  %v7982_v23 = vsel %vm7970_vm9, %v7965_v8, %v10398_v0  ;;  %v18688_v0 = vld [vmem:[#allocation49_spill] sm:$0xff] }
0x16ac   : > { %v10401_v4 = vpop.permute.xlu0 %10400  ;;  %10006 = vmatmul.mubr.bf16.vlgmr.msra.gmra.mrb[128].mxu1 %v8005_v51  ;;  %v7980_v54 = vsel %vm7970_vm9, %v7963_v28, %v10393_v14  ;;  %v7979_v35 = vsel %vm7970_vm9, %v7962_v50, %v10392_v22 }
0x16ad   : > { %v10403_v9 = vunpack.i.h.bf16 %v10401_v4  ;;  %v10402_v49 = vunpack.i.l.bf16 %v10401_v4  ;;  %v10406_v30 = vpop.permute.xlu1 %10405 }
0x16ae   : > { %v10408_v36 = vunpack.i.h.bf16 %v10406_v30  ;;  %v10407_v7 = vunpack.i.l.bf16 %v10406_v30 }
0x16af   : > { %v7994_v3 = vsel %vm7987_vm2, %v7977_v33, %v10402_v49  ;;  %v7995_v48 = vsel %vm7987_vm2, %v7978_v2, %v10403_v9  ;;  %v18687_v49 = vld [vmem:[#allocation157_spill] sm:$0xff] }
0x16b0   : > { %v10416_v53 = vpop.permute.xlu0 %10415  ;;  %v7992_v60 = vsel %vm7987_vm2, %v7975_v32, %v10407_v7  ;;  %v7993_v29 = vsel %vm7987_vm2, %v7976_v19, %v10408_v36  ;;  %v8007_v41 = vpack.c.bf16 %v7995_v48, %v7994_v3  ;;  %v18684_v32 = vld [vmem:[#allocation156_spill] sm:$0xff] }
0x16b1   : > { %v10411_v55 = vpop.permute.xlu1 %10410  ;;  %v8006_v17 = vpack.c.bf16 %v7993_v29, %v7992_v60  ;;  %v10418_v52 = vunpack.i.h.bf16 %v10416_v53  ;;  %v10417_v5 = vunpack.i.l.bf16 %v10416_v53 }
0x16b2   : > { %v10413_v6 = vunpack.i.h.bf16 %v10411_v55  ;;  %v10412_v31 = vunpack.i.l.bf16 %v10411_v55 }
0x16b3   : > { %10009 = vmatprep.mubr.bf16.mxu1 %v8006_v17  ;;  %v7969_v4 = vsel %vm4207_vm12, %v18684_v32, %v10418_v52  ;;  %v7968_v24 = vsel %vm4207_vm12, %v18685_v38, %v10417_v5  ;;  %v18698_v5 = vld [vmem:[#allocation46_spill] sm:$0xff]  ;;  %v18701_v38 = vld [vmem:[#allocation44_spill] sm:$0xff] }
0x16b4   : > { %v10421_v43 = vpop.permute.xlu0 %10420  ;;  %10010 = vmatmul.mubr.bf16.gmra.mrb[132].mxu1 %v8007_v41  ;;  %v7967_v9 = vsel %vm4207_vm12, %v18686_v42, %v10413_v6  ;;  %v7966_v30 = vsel %vm4207_vm12, %v18687_v49, %v10412_v31  ;;  %v18699_v6 = vld [vmem:[#allocation42_spill] sm:$0xff] }
0x16b5   : > { %v10423_v59 = vunpack.i.h.bf16 %v10421_v43  ;;  %v10422_v45 = vunpack.i.l.bf16 %v10421_v43  ;;  %v10426_v37 = vpop.permute.xlu1 %10425  ;;  %v18691_v43 = vld [vmem:[#allocation51_spill] sm:$0xff] }
0x16b6   : > { %v10428_v11 = vunpack.i.h.bf16 %v10426_v37  ;;  %v10427_v10 = vunpack.i.l.bf16 %v10426_v37 }
0x16b7   : > { %v7998_v39 = vsel %vm7987_vm2, %v7981_v18, %v10422_v45  ;;  %v7999_v51 = vsel %vm7987_vm2, %v7982_v23, %v10423_v59  ;;  %v18692_v45 = vld [vmem:[#allocation53_spill] sm:$0xff]  ;;  %v18693_v18 = vld [vmem:[#allocation54_spill] sm:$0xff] }
0x16b8   : > { %v7996_v25 = vsel %vm7987_vm2, %v7979_v35, %v10427_v10  ;;  %v7997_v12 = vsel %vm7987_vm2, %v7980_v54, %v10428_v11  ;;  %v8009_v44 = vpack.c.bf16 %v7999_v51, %v7998_v39  ;;  %v10436_v40 = vpop.permute.xlu0 %10435  ;;  %v18694_v11 = vld [vmem:[#allocation55_spill] sm:$0xff]  ;;  %v18695_v54 = vld [vmem:[#allocation56_spill] sm:$0xff] }
0x16b9   : > { %v8008_v16 = vpack.c.bf16 %v7997_v12, %v7996_v25  ;;  %v10431_v58 = vpop.permute.xlu1 %10430  ;;  %v10438_v47 = vunpack.i.h.bf16 %v10436_v40  ;;  %v10437_v26 = vunpack.i.l.bf16 %v10436_v40  ;;  %v18697_v40 = vld [vmem:[#allocation41_spill] sm:$0xff] }
0x16ba   : > { %v10433_v20 = vunpack.i.h.bf16 %v10431_v58  ;;  %v10432_v34 = vunpack.i.l.bf16 %v10431_v58 }
0x16bb   : > { %10013 = vmatprep.mubr.bf16.mxu1 %v8008_v16  ;;  %v7985_v7 = vsel %vm7970_vm9, %v7968_v24, %v10437_v26  ;;  %v7986_v19 = vsel %vm7970_vm9, %v7969_v4, %v10438_v47 }
0x16bc   : > { %10014 = vmatmul.mubr.bf16.gmra.mrb[136].mxu1 %v8009_v44  ;;  %v7984_v48 = vsel %vm7970_vm9, %v7967_v9, %v10433_v20  ;;  %v7983_v63 = vsel %vm7970_vm9, %v7966_v30, %v10432_v34  ;;  %v18696_v44 = vld [vmem:[#allocation45_spill] sm:$0xff]  ;;  %v18700_v20 = vld [vmem:[#allocation47_spill] sm:$0xff] }
0x16bd   : > { %v18703_v9 = vld [vmem:[#allocation43_spill] sm:$0xff] }
0x16be   : > { %v10513_v30 = vld [vmem:[#allocation16] sm:$0xff]  }
0x16bf   : > { %10021 = vmatprep.subr.bf16.mxu0 %v10513_v30 }
0x16c0   : > { %10022 = vmatpush3.bf16.msra.mxu0 %v10513_v30 }
0x16e0   : > { %v10446_v1 = vpop.permute.xlu0 %10445 }
0x16e1   : > { %v10448_v33 = vunpack.i.h.bf16 %v10446_v1  ;;  %v10447_v2 = vunpack.i.l.bf16 %v10446_v1  ;;  %v10441_v36 = vpop.permute.xlu1 %10440  ;;  %v18702_v1 = vld [vmem:[#allocation48_spill] sm:$0xff] }
0x16e2   : > { %v10443_v62 = vunpack.i.h.bf16 %v10441_v36  ;;  %v10442_v3 = vunpack.i.l.bf16 %v10441_v36 }
0x16e3   : > { %v8002_v53 = vsel %vm7987_vm2, %v7985_v7, %v10447_v2  ;;  %v8003_v60 = vsel %vm7987_vm2, %v7986_v19, %v10448_v33 }
0x16e4   : > { %v8000_v29 = vsel %vm7987_vm2, %v7983_v63, %v10442_v3  ;;  %v8001_v41 = vsel %vm7987_vm2, %v7984_v48, %v10443_v62  ;;  %v8011_v46 = vpack.c.bf16 %v8003_v60, %v8002_v53 }
0x16e5   : > { %v8010_v15 = vpack.c.bf16 %v8001_v41, %v8000_v29 }
0x16e7   : > { %10017 = vmatprep.mubr.bf16.mxu1 %v8010_v15 }
0x16e8   : > { %10018 = vmatmul.mubr.bf16.gmra.mrb[140].mxu1 %v8011_v46 }
0x177f   : > { %v10007_v55 = vpop.f32.mrb[128].mxu1 }
0x1780   : > { %v8110_v17 = vpop.f32.mrb[129].mxu1  ;;  %v17210_v27 = vadd.f32 %v10007_v55, %v18691_v43 }
0x1781   : > { %v17199_v21 = vadd.f32 %v8110_v17, %v18688_v0  ;;  %v10008_v14 = vpop.f32.mrb[130].mxu1 }
0x1782   : > { %v8113_v22 = vpop.f32.mrb[131].mxu1  ;;  %v17206_v50 = vadd.f32 %v10008_v14, %v18690_v57 }
0x1783   : > { %v17202_v28 = vadd.f32 %v8113_v22, %v18689_v61  ;;  %8174 = vadd.xlane.f32.xlu1 %v17199_v21 }
0x1785   : > { %8176 = vadd.xlane.f32.xlu0 %v17202_v28 }
0x1787   : > { %v10011_v8 = vpop.f32.mrb[132].mxu1  ;;  %8180 = vadd.xlane.f32.xlu1 %v17206_v50 }
0x1788   : > { %v8126_v56 = vpop.f32.mrb[133].mxu1  ;;  %v17223_v10 = vadd.f32 %v10011_v8, %v18694_v11 }
0x1789   : > { %v10012_v13 = vpop.f32.mrb[134].mxu1  ;;  %8178 = vadd.xlane.f32.xlu0 %v17210_v27  ;;  %v17215_v37 = vadd.f32 %v8126_v56, %v18692_v45 }
0x178a   : > { %v8129_v59 = vpop.f32.mrb[135].mxu1  ;;  %v17226_v35 = vadd.f32 %v10012_v13, %v18695_v54 }
0x178b   : > { %v17218_v23 = vadd.f32 %v8129_v59, %v18693_v18 }
0x178d   : > { %8182 = vadd.xlane.f32.xlu0 %v17215_v37  ;;  %8184 = vadd.xlane.f32.xlu1 %v17218_v23 }
0x178f   : > { %v10015_v39 = vpop.f32.mrb[136].mxu1 }
0x1790   : > { %v8142_v51 = vpop.f32.mrb[137].mxu1  ;;  %v17239_v58 = vadd.f32 %v10015_v39, %v18698_v5 }
0x1791   : > { %v10016_v25 = vpop.f32.mrb[138].mxu1  ;;  %8186 = vadd.xlane.f32.xlu0 %v17223_v10  ;;  %8188 = vadd.xlane.f32.xlu1 %v17226_v35  ;;  %v17231_v16 = vadd.f32 %v8142_v51, %v18696_v44 }
0x1792   : > { %v8145_v12 = vpop.f32.mrb[139].mxu1  ;;  %v17242_v31 = vadd.f32 %v10016_v25, %v18699_v6 }
0x1793   : > { %v17234_v52 = vadd.f32 %v8145_v12, %v18697_v40 }
0x1795   : > { %8190 = vadd.xlane.f32.xlu0 %v17231_v16  ;;  %8192 = vadd.xlane.f32.xlu1 %v17234_v52 }
0x1799   : > { %8194 = vadd.xlane.f32.xlu0 %v17239_v58  ;;  %8196 = vadd.xlane.f32.xlu1 %v17242_v31 }
0x17bb   : > { %v10019_v47 = vpop.f32.mrb[140].mxu1 }
0x17bc   : > { %v8158_v26 = vpop.f32.mrb[141].mxu1  ;;  %v17254_v42 = vadd.f32 %v10019_v47, %v18702_v1 }
0x17bd   : > { %v17247_v34 = vadd.f32 %v8158_v26, %v18700_v20  ;;  %v10020_v32 = vpop.f32.mrb[142].mxu1 }
0x17be   : > { %v8161_v4 = vpop.f32.mrb[143].mxu1  ;;  %v17258_v49 = vadd.f32 %v10020_v32, %v18703_v9  ;;  %v10514_v9 = vld [vmem:[#allocation16 + $0x8] sm:$0xff]  }
0x17bf   : > { %v17250_v24 = vadd.f32 %v8161_v4, %v18701_v38  ;;  %8198 = vadd.xlane.f32.xlu0 %v17247_v34  ;;  %10023 = vmatprep.subr.bf16.mxu0 %v10514_v9 }
0x17c0   : > { %10024 = vmatpush3.bf16.msra.mxu0 %v10514_v9 }
0x17c1   : > { %8200 = vadd.xlane.f32.xlu1 %v17250_v24 }
0x17c3   : > { %8202 = vadd.xlane.f32.xlu0 %v17254_v42 }
0x17c5   : > { %8204 = vadd.xlane.f32.xlu1 %v17258_v49 }
0x1810   : > { %v8175_v33 = vpop.xlane.xlu1 %8174 }
0x1811   : > { %v8206_v2 = vmul.f32 0.0078125, %v8175_v33 }
0x1812   : > { %v8177_v36 = vpop.xlane.xlu0 %8176 }
0x1813   : > { %v17263_v7 = vsub.f32 %v17199_v21, %v8206_v2  ;;  %v8207_v19 = vmul.f32 0.0078125, %v8177_v36  ;;  %v10515_v2 = vld [vmem:[#allocation16 + $0x10] sm:$0xff]   ;;  %v10516_v36 = vld [vmem:[#allocation16 + $0x18] sm:$0xff]  }
0x1814   : > { %v8181_v62 = vpop.xlane.xlu1 %8180  ;;  %10025 = vmatprep.subr.bf16.mxu0 %v10515_v2 }
0x1815   : > { %v17266_v3 = vsub.f32 %v17202_v28, %v8207_v19  ;;  %v8209_v48 = vmul.f32 0.0078125, %v8181_v62  ;;  %v8238_v63 = vmul.f32 %v17263_v7, %v17263_v7  ;;  %10026 = vmatpush3.bf16.msra.mxu0 %v10515_v2  ;;  %v10517_v19 = vld [vmem:[#allocation16 + $0x20] sm:$0xff]   ;;  %v10518_v62 = vld [vmem:[#allocation16 + $0x28] sm:$0xff]  }
0x1816   : > { %v8179_v53 = vpop.xlane.xlu0 %8178  ;;  %10027 = vmatprep.subr.bf16.mxu0 %v10516_v36 }
0x1817   : > { %v17271_v60 = vsub.f32 %v17206_v50, %v8209_v48  ;;  %v8208_v29 = vmul.f32 0.0078125, %v8179_v53  ;;  %8254 = vadd.xlane.f32.xlu0 %v8238_v63  ;;  %v8239_v41 = vmul.f32 %v17266_v3, %v17266_v3  ;;  %v10519_v48 = vld [vmem:[#allocation16 + $0x30] sm:$0xff]   ;;  %v10520_v63 = vld [vmem:[#allocation16 + $0x38] sm:$0xff]  }
0x1819   : > { %v17276_v46 = vsub.f32 %v17210_v27, %v8208_v29  ;;  %8256 = vadd.xlane.f32.xlu1 %v8239_v41  ;;  %v8241_v22 = vmul.f32 %v17271_v60, %v17271_v60  ;;  %10028 = vmatpush3.bf16.msra.mxu0 %v10516_v36 }
0x181a   : > { %v8183_v15 = vpop.xlane.xlu0 %8182  ;;  %v8185_v55 = vpop.xlane.xlu1 %8184  ;;  %10029 = vmatprep.subr.bf16.mxu0 %v10517_v19 }
0x181b   : > { %v8210_v17 = vmul.f32 0.0078125, %v8183_v15  ;;  %v8211_v0 = vmul.f32 0.0078125, %v8185_v55  ;;  %v8240_v14 = vmul.f32 %v17276_v46, %v17276_v46 }
0x181d   : > { %v17283_v61 = vsub.f32 %v17215_v37, %v8210_v17  ;;  %v17286_v57 = vsub.f32 %v17218_v23, %v8211_v0  ;;  %8258 = vadd.xlane.f32.xlu0 %v8240_v14  ;;  %8260 = vadd.xlane.f32.xlu1 %v8241_v22 }
0x181e   : > { %v8187_v43 = vpop.xlane.xlu0 %8186  ;;  %v8189_v8 = vpop.xlane.xlu1 %8188  ;;  %10030 = vmatpush3.bf16.msra.mxu0 %v10517_v19 }
0x181f   : > { %v8212_v56 = vmul.f32 0.0078125, %v8187_v43  ;;  %v8213_v13 = vmul.f32 0.0078125, %v8189_v8  ;;  %v8242_v59 = vmul.f32 %v17283_v61, %v17283_v61  ;;  %v8243_v45 = vmul.f32 %v17286_v57, %v17286_v57  ;;  %10031 = vmatprep.subr.bf16.mxu0 %v10518_v62 }
0x1821   : > { %v17293_v18 = vsub.f32 %v17223_v10, %v8212_v56  ;;  %v17296_v11 = vsub.f32 %v17226_v35, %v8213_v13  ;;  %8262 = vadd.xlane.f32.xlu0 %v8242_v59  ;;  %8264 = vadd.xlane.f32.xlu1 %v8243_v45 }
0x1822   : > { %v8191_v54 = vpop.xlane.xlu0 %8190  ;;  %v8193_v39 = vpop.xlane.xlu1 %8192  ;;  %10032 = vmatpush3.bf16.msra.mxu0 %v10518_v62 }
0x1823   : > { %v8214_v51 = vmul.f32 0.0078125, %v8191_v54  ;;  %v8215_v25 = vmul.f32 0.0078125, %v8193_v39  ;;  %v8244_v12 = vmul.f32 %v17293_v18, %v17293_v18  ;;  %v8245_v44 = vmul.f32 %v17296_v11, %v17296_v11  ;;  %10033 = vmatprep.subr.bf16.mxu0 %v10519_v48  ;;  %v10521_v39 = vld [vmem:[#allocation19] sm:$0xff]  }
0x1824   : > { %10053 = vmatprep.subr.bf16.mxu1 %v10521_v39 }
0x1825   : > { %v17303_v40 = vsub.f32 %v17231_v16, %v8214_v51  ;;  %v17306_v5 = vsub.f32 %v17234_v52, %v8215_v25  ;;  %8266 = vadd.xlane.f32.xlu0 %v8244_v12  ;;  %8268 = vadd.xlane.f32.xlu1 %v8245_v44  ;;  %v10522_v51 = vld [vmem:[#allocation19 + $0x8] sm:$0xff]   ;;  %v10523_v25 = vld [vmem:[#allocation19 + $0x10] sm:$0xff]   ;;  %v10524_v12 = vld [vmem:[#allocation19 + $0x18] sm:$0xff]  }
0x1826   : > { %v8195_v6 = vpop.xlane.xlu0 %8194  ;;  %v8197_v47 = vpop.xlane.xlu1 %8196  ;;  %10034 = vmatpush3.bf16.msra.mxu0 %v10519_v48  ;;  %10054 = vmatpush3.bf16.msra.mxu1 %v10521_v39  ;;  %v10525_v44 = vld [vmem:[#allocation19 + $0x20] sm:$0xff]  }
0x1827   : > { %v8216_v26 = vmul.f32 0.0078125, %v8195_v6  ;;  %v8217_v20 = vmul.f32 0.0078125, %v8197_v47  ;;  %v8246_v32 = vmul.f32 %v17303_v40, %v17303_v40  ;;  %v8247_v4 = vmul.f32 %v17306_v5, %v17306_v5  ;;  %10035 = vmatprep.subr.bf16.mxu0 %v10520_v63  ;;  %10055 = vmatprep.subr.bf16.mxu1 %v10522_v51  ;;  %v10526_v6 = vld [vmem:[#allocation19 + $0x28] sm:$0xff]  }
0x1829   : > { %v17313_v38 = vsub.f32 %v17239_v58, %v8216_v26  ;;  %v17316_v1 = vsub.f32 %v17242_v31, %v8217_v20  ;;  %8270 = vadd.xlane.f32.xlu0 %v8246_v32  ;;  %8272 = vadd.xlane.f32.xlu1 %v8247_v4 }
0x182a   : > { %10036 = vmatpush3.bf16.msra.mxu0 %v10520_v63  ;;  %10056 = vmatpush3.bf16.msra.mxu1 %v10522_v51 }
0x182b   : > { %v8248_v30 = vmul.f32 %v17313_v38, %v17313_v38  ;;  %v8249_v33 = vmul.f32 %v17316_v1, %v17316_v1  ;;  %10057 = vmatprep.subr.bf16.mxu1 %v10523_v25 }
0x182d   : > { %8274 = vadd.xlane.f32.xlu0 %v8248_v30  ;;  %8276 = vadd.xlane.f32.xlu1 %v8249_v33 }
0x182e   : > { %10058 = vmatpush3.bf16.msra.mxu1 %v10523_v25 }
0x182f   : > { %10059 = vmatprep.subr.bf16.mxu1 %v10524_v12 }
0x1832   : > { %10060 = vmatpush3.bf16.msra.mxu1 %v10524_v12 }
0x1833   : > { %10061 = vmatprep.subr.bf16.mxu1 %v10525_v44 }
0x1836   : > { %10062 = vmatpush3.bf16.msra.mxu1 %v10525_v44 }
0x1837   : > { %10063 = vmatprep.subr.bf16.mxu1 %v10526_v6 }
0x183a   : > { %10064 = vmatpush3.bf16.msra.mxu1 %v10526_v6 }
0x184c   : > { %v8199_v53 = vpop.xlane.xlu0 %8198 }
0x184d   : > { %v8218_v29 = vmul.f32 0.0078125, %v8199_v53  ;;  %v8173_v53 = vld [vmem:[%s18704_s12] sm:$0x3] }
0x184e   : > { %v8201_v41 = vpop.xlane.xlu1 %8200 }
0x184f   : > { %v17323_v15 = vsub.f32 %v17247_v34, %v8218_v29  ;;  %v8219_v55 = vmul.f32 0.0078125, %v8201_v41 }
0x1850   : > { %v8203_v17 = vpop.xlane.xlu0 %8202 }
0x1851   : > { %v17326_v0 = vsub.f32 %v17250_v24, %v8219_v55  ;;  %v8220_v14 = vmul.f32 0.0078125, %v8203_v17  ;;  %v8250_v22 = vmul.f32 %v17323_v15, %v17323_v15 }
0x1852   : > { %v8205_v43 = vpop.xlane.xlu1 %8204 }
0x1853   : > { %v17331_v8 = vsub.f32 %v17254_v42, %v8220_v14  ;;  %v8221_v56 = vmul.f32 0.0078125, %v8205_v43  ;;  %8278 = vadd.xlane.f32.xlu0 %v8250_v22  ;;  %v8251_v13 = vmul.f32 %v17326_v0, %v17326_v0  ;;  %v18705_v14 = vld [vmem:[#allocation36_spill] sm:$0xff] }
0x1854   : > { %v17346_v22 = vrot.slane %v8173_v53, %v18705_v14 }
0x1855   : > { %v17336_v59 = vsub.f32 %v17258_v49, %v8221_v56  ;;  %8280 = vadd.xlane.f32.xlu1 %v8251_v13  ;;  %v8252_v45 = vmul.f32 %v17331_v8, %v17331_v8 }
0x1857   : > { %8282 = vadd.xlane.f32.xlu0 %v8252_v45  ;;  %v8253_v54 = vmul.f32 %v17336_v59, %v17336_v59 }
0x1859   : > { %8284 = vadd.xlane.f32.xlu1 %v8253_v54 }
0x18a4   : > { %v8255_v47 = vpop.xlane.xlu0 %8254 }
0x18a5   : > { %v8286_v26 = vmul.f32 0.0078125, %v8255_v47 }
0x18a6   : > { %v8257_v20 = vpop.xlane.xlu1 %8256 }
0x18a7   : > { %v8302_v32 = vadd.f32 1e-05, %v8286_v26  ;;  %v8287_v4 = vmul.f32 0.0078125, %v8257_v20  ;;  %v18706_v20 = vld [vmem:[#allocation38_spill] sm:$0xff] }
0x18a9   : > { %10913 = vrsqrt.f32 %v8302_v32  ;;  %v8303_v9 = vadd.f32 1e-05, %v8287_v4  ;;  %v17352_v32 = vrot.slane %v8173_v53, %v18706_v20 }
0x18aa   : > { %v8259_v30 = vpop.xlane.xlu0 %8258  ;;  %v8261_v33 = vpop.xlane.xlu1 %8260 }
0x18ab   : > { %10915 = vrsqrt.f32 %v8303_v9  ;;  %v8288_v2 = vmul.f32 0.0078125, %v8259_v30  ;;  %v8289_v36 = vmul.f32 0.0078125, %v8261_v33 }
0x18ad   : > { %v8304_v19 = vadd.f32 1e-05, %v8288_v2  ;;  %v8305_v62 = vadd.f32 1e-05, %v8289_v36 }
0x18ae   : > { %v8263_v48 = vpop.xlane.xlu0 %8262  ;;  %v8265_v63 = vpop.xlane.xlu1 %8264 }
0x18af   : > { %10917 = vrsqrt.f32 %v8304_v19  ;;  %v8290_v29 = vmul.f32 0.0078125, %v8263_v48  ;;  %v8291_v41 = vmul.f32 0.0078125, %v8265_v63 }
0x18b0   : > { %10919 = vrsqrt.f32 %v8305_v62 }
0x18b1   : > { %v8306_v55 = vadd.f32 1e-05, %v8290_v29  ;;  %v8307_v17 = vadd.f32 1e-05, %v8291_v41 }
0x18b2   : > { %v8267_v43 = vpop.xlane.xlu0 %8266  ;;  %v8269_v56 = vpop.xlane.xlu1 %8268 }
0x18b3   : > { %v10914_v13 = vpop.eup %10913  ;;  %10921 = vrsqrt.f32 %v8306_v55  ;;  %v8292_v45 = vmul.f32 0.0078125, %v8267_v43  ;;  %v8293_v54 = vmul.f32 0.0078125, %v8269_v56 }
0x18b4   : > { %10923 = vrsqrt.f32 %v8307_v17  ;;  %v8334_v39 = vmul.f32 %v10914_v13, %v17263_v7 }
0x18b5   : > { %v10916_v51 = vpop.eup %10915  ;;  %v8308_v25 = vadd.f32 1e-05, %v8292_v45  ;;  %v8309_v12 = vadd.f32 1e-05, %v8293_v54 }
0x18b6   : > { %v8271_v44 = vpop.xlane.xlu0 %8270  ;;  %v8273_v6 = vpop.xlane.xlu1 %8272  ;;  %v8335_v47 = vmul.f32 %v10916_v51, %v17266_v3  ;;  %v8354_v26 = vmul.f32 %v17346_v22, %v8334_v39 }
0x18b7   : > { %10925 = vrsqrt.f32 %v8308_v25  ;;  %v8294_v4 = vmul.f32 0.0078125, %v8271_v44  ;;  %v8295_v9 = vmul.f32 0.0078125, %v8273_v6 }
0x18b8   : > { %10927 = vrsqrt.f32 %v8309_v12  ;;  %v8355_v30 = vmul.f32 %v17346_v22, %v8335_v47  ;;  %v8374_v3 = vadd.f32 %v17352_v32, %v8354_v26 }
0x18b9   : > { %v10918_v33 = vpop.eup %10917  ;;  %v8310_v7 = vadd.f32 1e-05, %v8294_v4  ;;  %v8311_v2 = vadd.f32 1e-05, %v8295_v9 }
0x18ba   : > { %v10920_v36 = vpop.eup %10919  ;;  %v8336_v19 = vmul.f32 %v10918_v33, %v17276_v46  ;;  %v8275_v62 = vpop.xlane.xlu0 %8274  ;;  %v8375_v63 = vadd.f32 %v17352_v32, %v8355_v30 }
0x18bb   : > { %v8277_v48 = vpop.xlane.xlu1 %8276  ;;  %v8337_v53 = vmul.f32 %v10920_v36, %v17271_v60  ;;  %10929 = vrsqrt.f32 %v8310_v7  ;;  %v8296_v29 = vmul.f32 0.0078125, %v8275_v62 }
0x18bc   : > { %v8297_v41 = vmul.f32 0.0078125, %v8277_v48  ;;  %v8356_v55 = vmul.f32 %v17346_v22, %v8336_v19  ;;  %10931 = vrsqrt.f32 %v8311_v2  ;;  %v8390_v17 = vpack.c.bf16 %v8375_v63, %v8374_v3 }
0x18bd   : > { %v10922_v14 = vpop.eup %10921  ;;  %v8357_v43 = vmul.f32 %v17346_v22, %v8337_v53  ;;  %v8312_v56 = vadd.f32 1e-05, %v8296_v29 }
0x18be   : > { %v8313_v46 = vadd.f32 1e-05, %v8297_v41  ;;  %v10924_v13 = vpop.eup %10923  ;;  %10037 = vmatprep.mubr.bf16.mxu0 %v8390_v17  ;;  %v8376_v45 = vadd.f32 %v17352_v32, %v8356_v55  ;;  %v8338_v54 = vmul.f32 %v10922_v14, %v17283_v61 }
0x18bf   : > { %10933 = vrsqrt.f32 %v8312_v56  ;;  %v8377_v60 = vadd.f32 %v17352_v32, %v8357_v43  ;;  %v8339_v39 = vmul.f32 %v10924_v13, %v17286_v57 }
0x18c0   : > { %10935 = vrsqrt.f32 %v8313_v46  ;;  %v8358_v51 = vmul.f32 %v17346_v22, %v8338_v54 }
0x18c1   : > { %v10926_v25 = vpop.eup %10925  ;;  %v8391_v12 = vpack.c.bf16 %v8377_v60, %v8376_v45  ;;  %v8359_v44 = vmul.f32 %v17346_v22, %v8339_v39 }
0x18c2   : > { %v10928_v6 = vpop.eup %10927  ;;  %v8378_v47 = vadd.f32 %v17352_v32, %v8358_v51  ;;  %v8340_v26 = vmul.f32 %v10926_v25, %v17293_v18 }
0x18c3   : > { %10038 = vmatmul.mubr.bf16.vlgmr.msra.gmra.mrb[160].mxu0 %v8391_v12  ;;  %v8379_v61 = vadd.f32 %v17352_v32, %v8359_v44  ;;  %v8341_v20 = vmul.f32 %v10928_v6, %v17296_v11 }
0x18c4   : > { %v8360_v4 = vmul.f32 %v17346_v22, %v8340_v26 }
0x18c5   : > { %v10930_v57 = vpop.eup %10929  ;;  %v8392_v9 = vpack.c.bf16 %v8379_v61, %v8378_v47  ;;  %v8361_v30 = vmul.f32 %v17346_v22, %v8341_v20 }
0x18c6   : > { %v10932_v33 = vpop.eup %10931  ;;  %v8380_v7 = vadd.f32 %v17352_v32, %v8360_v4  ;;  %v8342_v2 = vmul.f32 %v10930_v57, %v17303_v40 }
0x18c7   : > { %10041 = vmatprep.mubr.bf16.mxu0 %v8392_v9  ;;  %v8381_v36 = vadd.f32 %v17352_v32, %v8361_v30  ;;  %v8343_v18 = vmul.f32 %v10932_v33, %v17306_v5 }
0x18c8   : > { %v8362_v19 = vmul.f32 %v17346_v22, %v8342_v2 }
0x18c9   : > { %v10934_v62 = vpop.eup %10933  ;;  %v8393_v11 = vpack.c.bf16 %v8381_v36, %v8380_v7  ;;  %v8363_v48 = vmul.f32 %v17346_v22, %v8343_v18 }
0x18ca   : > { %v10936_v3 = vpop.eup %10935  ;;  %v8382_v63 = vadd.f32 %v17352_v32, %v8362_v19  ;;  %v8344_v53 = vmul.f32 %v10934_v62, %v17313_v38  ;;  %v10528_v62 = vld [vmem:[#allocation19 + $0x38] sm:$0xff]  }
0x18cb   : > { %10042 = vmatmul.mubr.bf16.gmra.mrb[164].mxu0 %v8393_v11  ;;  %v8383_v29 = vadd.f32 %v17352_v32, %v8363_v48  ;;  %v8345_v40 = vmul.f32 %v10936_v3, %v17316_v1  ;;  %v9147_v11 = vld [vmem:[#allocation17] ss:$0 sm:$0xff] }
0x18cc   : > { %v8364_v41 = vmul.f32 %v17346_v22, %v8344_v53 }
0x18cd   : > { %v8394_v55 = vpack.c.bf16 %v8383_v29, %v8382_v63  ;;  %v8365_v5 = vmul.f32 %v17346_v22, %v8345_v40 }
0x18ce   : > { %v8384_v17 = vadd.f32 %v17352_v32, %v8364_v41 }
0x18cf   : > { %10045 = vmatprep.mubr.bf16.mxu0 %v8394_v55  ;;  %v8385_v14 = vadd.f32 %v17352_v32, %v8365_v5 }
0x18d1   : > { %v8395_v43 = vpack.c.bf16 %v8385_v14, %v8384_v17 }
0x18d3   : > { %10046 = vmatmul.mubr.bf16.gmra.mrb[168].mxu0 %v8395_v43 }
0x18e0   : > { %v8279_v56 = vpop.xlane.xlu0 %8278 }
0x18e1   : > { %v8298_v46 = vmul.f32 0.0078125, %v8279_v56 }
0x18e2   : > { %v8281_v38 = vpop.xlane.xlu1 %8280 }
0x18e3   : > { %v8314_v13 = vadd.f32 1e-05, %v8298_v46  ;;  %v8299_v45 = vmul.f32 0.0078125, %v8281_v38 }
0x18e4   : > { %v8283_v54 = vpop.xlane.xlu0 %8282 }
0x18e5   : > { %10937 = vrsqrt.f32 %v8314_v13  ;;  %v8315_v1 = vadd.f32 1e-05, %v8299_v45  ;;  %v8300_v60 = vmul.f32 0.0078125, %v8283_v54 }
0x18e6   : > { %v8285_v39 = vpop.xlane.xlu1 %8284 }
0x18e7   : > { %10939 = vrsqrt.f32 %v8315_v1  ;;  %v8316_v51 = vadd.f32 1e-05, %v8300_v60  ;;  %v8301_v25 = vmul.f32 0.0078125, %v8285_v39 }
0x18e9   : > { %10941 = vrsqrt.f32 %v8316_v51  ;;  %v8317_v12 = vadd.f32 1e-05, %v8301_v25 }
0x18eb   : > { %10943 = vrsqrt.f32 %v8317_v12 }
0x18ef   : > { %v10938_v44 = vpop.eup %10937 }
0x18f0   : > { %v8346_v6 = vmul.f32 %v10938_v44, %v17323_v15 }
0x18f1   : > { %v10940_v47 = vpop.eup %10939 }
0x18f2   : > { %v8347_v26 = vmul.f32 %v10940_v47, %v17326_v0  ;;  %v8366_v61 = vmul.f32 %v17346_v22, %v8346_v6 }
0x18f3   : > { %v10942_v20 = vpop.eup %10941 }
0x18f4   : > { %v8367_v4 = vmul.f32 %v17346_v22, %v8347_v26  ;;  %v8348_v57 = vmul.f32 %v10942_v20, %v17331_v8  ;;  %v8386_v30 = vadd.f32 %v17352_v32, %v8366_v61  ;;  %v10527_v8 = vld [vmem:[#allocation19 + $0x30] sm:$0xff]  }
0x18f5   : > { %v10944_v9 = vpop.eup %10943  ;;  %10065 = vmatprep.subr.bf16.mxu1 %v10527_v8 }
0x18f6   : > { %v8387_v33 = vadd.f32 %v17352_v32, %v8367_v4  ;;  %v8349_v7 = vmul.f32 %v10944_v9, %v17336_v59  ;;  %v8368_v2 = vmul.f32 %v17346_v22, %v8348_v57  ;;  %10066 = vmatpush3.bf16.msra.mxu1 %v10527_v8 }
0x18f7   : > { %10067 = vmatprep.subr.bf16.mxu1 %v10528_v62 }
0x18f8   : > { %v8396_v15 = vpack.c.bf16 %v8387_v33, %v8386_v30  ;;  %v8369_v36 = vmul.f32 %v17346_v22, %v8349_v7  ;;  %v8388_v0 = vadd.f32 %v17352_v32, %v8368_v2 }
0x18fa   : > { %10049 = vmatprep.mubr.bf16.mxu0 %v8396_v15  ;;  %v8389_v18 = vadd.f32 %v17352_v32, %v8369_v36  ;;  %10068 = vmatpush3.bf16.msra.mxu1 %v10528_v62 }
0x18fc   : > { %v8397_v19 = vpack.c.bf16 %v8389_v18, %v8388_v0 }
0x18fe   : > { %10050 = vmatmul.mubr.bf16.gmra.mrb[172].mxu0 %v8397_v19 }
0x1996   : > { %v10039_v59 = vpop.f32.mrb[160].mxu0 }
0x1997   : > { %v8510_v48 = vadd.f32 %v10039_v59, %v9147_v11  ;;  %v8501_v3 = vpop.f32.mrb[161].mxu0 }
0x1998   : > { %v8502_v63 = vadd.f32 %v9147_v11, %v8501_v3  ;;  %v10040_v53 = vpop.f32.mrb[162].mxu0 }
0x1999   : > { %v8513_v22 = vadd.f32 %v10040_v53, %v9147_v11  ;;  %v8504_v29 = vpop.f32.mrb[163].mxu0  ;;  %v8566_v41 = vmax.f32 %v8510_v48, 0.0 }
0x199a   : > { %v8505_v40 = vadd.f32 %v9147_v11, %v8504_v29  ;;  %v8564_v32 = vmax.f32 %v8502_v63, 0.0 }
0x199b   : > { %v8567_v55 = vmax.f32 %v8513_v22, 0.0 }
0x199c   : > { %v8565_v5 = vmax.f32 %v8505_v40, 0.0 }
0x199d   : > { %v8581_v17 = vpack.c.bf16 %v8567_v55, %v8566_v41  ;;  %v9156_v55 = vld [vmem:[#allocation17 + $0x1] ss:$0 sm:$0xff] }
0x199e   : > { %v8580_v14 = vpack.c.bf16 %v8565_v5, %v8564_v32  ;;  %v10043_v43 = vpop.f32.mrb[164].mxu0 }
0x199f   : > { %v8526_v56 = vadd.f32 %v10043_v43, %v9147_v11  ;;  %v8517_v46 = vpop.f32.mrb[165].mxu0 }
0x19a0   : > { %v8518_v38 = vadd.f32 %v9147_v11, %v8517_v46  ;;  %v10044_v13 = vpop.f32.mrb[166].mxu0  ;;  %10069 = vmatprep.mubr.bf16.mxu1 %v8580_v14 }
0x19a1   : > { %v8529_v45 = vadd.f32 %v10044_v13, %v9147_v11  ;;  %v8520_v54 = vpop.f32.mrb[167].mxu0  ;;  %10070 = vmatmul.mubr.bf16.vlgmr.msra.gmra.mrb[144].mxu1 %v8581_v17  ;;  %v8570_v60 = vmax.f32 %v8526_v56, 0.0 }
0x19a2   : > { %v8521_v1 = vadd.f32 %v9147_v11, %v8520_v54  ;;  %v8568_v51 = vmax.f32 %v8518_v38, 0.0 }
0x19a3   : > { %v8571_v39 = vmax.f32 %v8529_v45, 0.0 }
0x19a4   : > { %v8569_v25 = vmax.f32 %v8521_v1, 0.0 }
0x19a5   : > { %v8583_v12 = vpack.c.bf16 %v8571_v39, %v8570_v60 }
0x19a6   : > { %v8582_v44 = vpack.c.bf16 %v8569_v25, %v8568_v51  ;;  %v10047_v6 = vpop.f32.mrb[168].mxu0 }
0x19a7   : > { %v8542_v47 = vadd.f32 %v10047_v6, %v9147_v11  ;;  %v8533_v26 = vpop.f32.mrb[169].mxu0 }
0x19a8   : > { %v8534_v61 = vadd.f32 %v9147_v11, %v8533_v26  ;;  %v10048_v20 = vpop.f32.mrb[170].mxu0  ;;  %10073 = vmatprep.mubr.bf16.mxu1 %v8582_v44 }
0x19a9   : > { %v8545_v4 = vadd.f32 %v10048_v20, %v9147_v11  ;;  %v8536_v57 = vpop.f32.mrb[171].mxu0  ;;  %10074 = vmatmul.mubr.bf16.gmra.mrb[148].mxu1 %v8583_v12  ;;  %v8574_v30 = vmax.f32 %v8542_v47, 0.0 }
0x19aa   : > { %v8537_v9 = vadd.f32 %v9147_v11, %v8536_v57  ;;  %v8572_v7 = vmax.f32 %v8534_v61, 0.0 }
0x19ab   : > { %v8575_v33 = vmax.f32 %v8545_v4, 0.0 }
0x19ac   : > { %v8573_v2 = vmax.f32 %v8537_v9, 0.0 }
0x19ad   : > { %v8585_v15 = vpack.c.bf16 %v8575_v33, %v8574_v30 }
0x19ae   : > { %v8584_v36 = vpack.c.bf16 %v8573_v2, %v8572_v7 }
0x19b0   : > { %10077 = vmatprep.mubr.bf16.mxu1 %v8584_v36 }
0x19b1   : > { %10078 = vmatmul.mubr.bf16.gmra.mrb[152].mxu1 %v8585_v15 }
0x19d1   : > { %v10051_v0 = vpop.f32.mrb[172].mxu0 }
0x19d2   : > { %v8558_v18 = vadd.f32 %v10051_v0, %v9147_v11  ;;  %v8549_v19 = vpop.f32.mrb[173].mxu0 }
0x19d3   : > { %v8550_v8 = vadd.f32 %v9147_v11, %v8549_v19  ;;  %v10052_v62 = vpop.f32.mrb[174].mxu0 }
0x19d4   : > { %v8561_v59 = vadd.f32 %v10052_v62, %v9147_v11  ;;  %v8552_v48 = vpop.f32.mrb[175].mxu0  ;;  %v8578_v63 = vmax.f32 %v8558_v18, 0.0 }
0x19d5   : > { %v8553_v3 = vadd.f32 %v9147_v11, %v8552_v48  ;;  %v8576_v22 = vmax.f32 %v8550_v8, 0.0 }
0x19d6   : > { %v8579_v53 = vmax.f32 %v8561_v59, 0.0 }
0x19d7   : > { %v8577_v29 = vmax.f32 %v8553_v3, 0.0 }
0x19d8   : > { %v8587_v40 = vpack.c.bf16 %v8579_v53, %v8578_v63 }
0x19d9   : > { %v8586_v41 = vpack.c.bf16 %v8577_v29, %v8576_v22 }
0x19db   : > { %10081 = vmatprep.mubr.bf16.mxu1 %v8586_v41 }
0x19dc   : > { %10082 = vmatmul.mubr.bf16.gmra.mrb[156].mxu1 %v8587_v40 }
0x1a74   : > { %v10071_v32 = vpop.f32.mrb[144].mxu1 }
0x1a75   : > { %v8700_v5 = vadd.f32 %v10071_v32, %v9156_v55  ;;  %v8691_v17 = vpop.f32.mrb[145].mxu1 }
0x1a76   : > { %v8692_v14 = vadd.f32 %v9156_v55, %v8691_v17  ;;  %v10072_v43 = vpop.f32.mrb[146].mxu1 }
0x1a77   : > { %v8756_v56 = vadd.f32 %v8700_v5, %v17210_v27  ;;  %v8703_v11 = vadd.f32 %v10072_v43, %v9156_v55  ;;  %v8694_v46 = vpop.f32.mrb[147].mxu1 }
0x1a78   : > { %v8754_v38 = vadd.f32 %v8692_v14, %v17199_v21  ;;  %v8695_v13 = vadd.f32 %v9156_v55, %v8694_v46 }
0x1a79   : > { %8772 = vst [vmem:[%s17404_s29 + $0x10] sm:$0xff] %v8756_v56  ;;  %v8757_v45 = vadd.f32 %v8703_v11, %v17206_v50 }
0x1a7a   : > { %8770 = vst [vmem:[%s17404_s29] sm:$0xff] %v8754_v38  ;;  %v8755_v54 = vadd.f32 %v8695_v13, %v17202_v28 }
0x1a7b   : > { %8773 = vst [vmem:[%s17404_s29 + $0x18] sm:$0xff] %v8757_v45 }
0x1a7c   : > { %8771 = vst [vmem:[%s17404_s29 + $0x8] sm:$0xff] %v8755_v54  ;;  %v10075_v21 = vpop.f32.mrb[148].mxu1 }
0x1a7d   : > { %v8716_v27 = vadd.f32 %v10075_v21, %v9156_v55  ;;  %v8707_v1 = vpop.f32.mrb[149].mxu1 }
0x1a7e   : > { %v8708_v60 = vadd.f32 %v9156_v55, %v8707_v1  ;;  %v10076_v39 = vpop.f32.mrb[150].mxu1 }
0x1a7f   : > { %v8760_v51 = vadd.f32 %v8716_v27, %v17223_v10  ;;  %v8719_v25 = vadd.f32 %v10076_v39, %v9156_v55  ;;  %v8710_v12 = vpop.f32.mrb[151].mxu1 }
0x1a80   : > { %v8758_v44 = vadd.f32 %v8708_v60, %v17215_v37  ;;  %v8711_v50 = vadd.f32 %v9156_v55, %v8710_v12 }
0x1a81   : > { %8776 = vst [vmem:[%s17404_s29 + $0x30] sm:$0xff] %v8760_v51  ;;  %v8761_v28 = vadd.f32 %v8719_v25, %v17226_v35 }
0x1a82   : > { %8774 = vst [vmem:[%s17404_s29 + $0x20] sm:$0xff] %v8758_v44  ;;  %v8759_v6 = vadd.f32 %v8711_v50, %v17218_v23 }
0x1a83   : > { %8777 = vst [vmem:[%s17404_s29 + $0x38] sm:$0xff] %v8761_v28 }
0x1a84   : > { %8775 = vst [vmem:[%s17404_s29 + $0x28] sm:$0xff] %v8759_v6  ;;  %v10079_v47 = vpop.f32.mrb[152].mxu1 }
0x1a85   : > { %v8732_v26 = vadd.f32 %v10079_v47, %v9156_v55  ;;  %v8723_v10 = vpop.f32.mrb[153].mxu1 }
0x1a86   : > { %v8724_v61 = vadd.f32 %v9156_v55, %v8723_v10  ;;  %v10080_v20 = vpop.f32.mrb[154].mxu1 }
0x1a87   : > { %v8764_v37 = vadd.f32 %v8732_v26, %v17239_v58  ;;  %v8735_v4 = vadd.f32 %v10080_v20, %v9156_v55  ;;  %v8726_v57 = vpop.f32.mrb[155].mxu1 }
0x1a88   : > { %v8762_v35 = vadd.f32 %v8724_v61, %v17231_v16  ;;  %v8727_v9 = vadd.f32 %v9156_v55, %v8726_v57 }
0x1a89   : > { %8780 = vst [vmem:[%s17404_s29 + $0x50] sm:$0xff] %v8764_v37  ;;  %v8765_v23 = vadd.f32 %v8735_v4, %v17242_v31 }
0x1a8a   : > { %8778 = vst [vmem:[%s17404_s29 + $0x40] sm:$0xff] %v8762_v35  ;;  %v8763_v30 = vadd.f32 %v8727_v9, %v17234_v52 }
0x1a8b   : > { %8781 = vst [vmem:[%s17404_s29 + $0x58] sm:$0xff] %v8765_v23 }
0x1a8c   : > { %8779 = vst [vmem:[%s17404_s29 + $0x48] sm:$0xff] %v8763_v30 }
0x1aaf   : > { %v10083_v33 = vpop.f32.mrb[156].mxu1 }
0x1ab0   : > { %v8748_v7 = vadd.f32 %v10083_v33, %v9156_v55  ;;  %v8739_v58 = vpop.f32.mrb[157].mxu1 }
0x1ab1   : > { %v8740_v2 = vadd.f32 %v9156_v55, %v8739_v58  ;;  %v10084_v15 = vpop.f32.mrb[158].mxu1 }
0x1ab2   : > { %v8768_v16 = vadd.f32 %v8748_v7, %v17254_v42  ;;  %v8751_v31 = vadd.f32 %v10084_v15, %v9156_v55  ;;  %v8742_v36 = vpop.f32.mrb[159].mxu1 }
0x1ab3   : > { %v8766_v52 = vadd.f32 %v8740_v2, %v17247_v34  ;;  %v8743_v0 = vadd.f32 %v9156_v55, %v8742_v36 }
0x1ab4   : > { %8784 = vst [vmem:[%s17404_s29 + $0x70] sm:$0xff] %v8768_v16  ;;  %v8769_v18 = vadd.f32 %v8751_v31, %v17258_v49 }
0x1ab5   : > { %8782 = vst [vmem:[%s17404_s29 + $0x60] sm:$0xff] %v8766_v52  ;;  %v8767_v42 = vadd.f32 %v8743_v0, %v17250_v24 }
0x1ab6   : > { %8785 = vst [vmem:[%s17404_s29 + $0x78] sm:$0xff] %v8769_v18 }
0x1ab7   : > { %8783 = vst [vmem:[%s17404_s29 + $0x68] sm:$0xff] %v8767_v42 }
0x1ab8   : > { %11282 = shalt.err (!%p11279_p7)
}
0x1ab9   : > { %s11283_s1 = scalar_lea.hbm %s17437_s19, 2048  ;;  %s11287_s12 = scalar_lea.hbm %s18709_s17, 8192 }
0x1aba   : > { %p11284_p8 = scmp.ne.s32.totalorder %s17437_s19, %s11283_s1  ;;  %p11288_p1 = scmp.lt.u32.totalorder %s17437_s19, %s18709_s17 }
0x1abb   : > { %p11289_p6 = scmp.lt.u32.totalorder %s11287_s12, %s11283_s1  ;;  %p11291_p5 = scmp.lt.u32.totalorder %s11283_s1, %s17437_s19 }
0x1abc   : > { %p11285_p11 = pnand %p11284_p8, %p18710_p0 }
0x1abd   : > { %p11290_p9 = por %p11289_p6, %p11288_p1 }
0x1abe   : > { %p11286_p13 = pneg %p11285_p11 }
0x1abf   : > { %p11292_p10 = por %p11291_p5, %p11290_p9 }
0x1ac1   : > { %p11293_p2 = pnand %p11292_p10, %p11286_p13 }
0x1ac3   : > { %11296 = shalt.err (!%p11293_p2)
}
0x1ac4   : > { %s11395_s6 = smov 128   ;;  %s11396_s29 = smov 8  }
0x1ac5   : > { %10193 = dma.vmem_to_hbm [thread:$0]  (%p18710_p0), %s17439_s26, 2048, %s17437_s19, %s17447_s25, %s11395_s6, %s11395_s6, %s11396_s29  }
0x1ac6 PF: > { %s18711_s20 = sld [smem:[#allocation31_spill]]  ;;  %s18712_s27 = sld [smem:[#allocation28_spill]] }
0x1ac7   : > { %s18713_s4 = sld [smem:[#allocation35_spill]] }
0x1acc   : > { %p10255_p3 = scmp.ge.s32.totalorder %s18711_s20, 2  ;;  %s8815_s30 = sand.u32 1, %s18712_s27  }
0x1acd   : > { %p18714_p4 = scmp.ne.s32.totalorder %s18713_s4, 0  ;;  %s8816_s21 = scalar_lea.sflag [#allocation4], %s8815_s30 }
0x1acf   : > { %p10230_p12 = pnand %p10255_p3, %p18714_p4 }
0x1ad1   : > { %11338 = dma.done.wait (!%p10230_p12), %s8816_s21, 2048  }
0x1ad2   : > { %11340 = vsyncadd (!%p10230_p12), %s8816_s21, 4294965248  ;;  %s18715_s24 = sld [smem:[#allocation32_spill]]  ;;  %s18716_s21 = sld [smem:[#allocation29_spill]] }
0x1ad3   : > { %s18717_s22 = sld [smem:[#allocation30_spill]]  ;;  %s18718_s23 = sld [smem:[#allocation33_spill]] }
0x1ad8   : > { %p32_p7 = scmp.ge.s32.totalorder %s18715_s24, 6  }
0x1ada   :  { %34 = sbr.rel (!%p32_p7) target bundleno = 16 (0x10), region = 169 }
0x1ae1   :  { %8821 = vsyncpa [#allocation3], 1 }
0x1ae2   :  { %8823 = vsyncpa [#allocation3 + $0x1], 1 }
0x1ae3   :  { %8824 = vsyncpa [#allocation6], 1 }
0x1ae4   :  { %8825 = vsyncpa [#allocation9], 1 }
0x1ae5   :  { %8826 = vsyncpa [#allocation12], 1 }
0x1ae6   :  { %8827 = vsyncpa [#allocation15], 1 }
0x1ae7   :  { %8828 = vsyncpa [#allocation18], 1 }
0x1ae8   :  { %8829 = vsyncpa [#allocation4], 1 }
0x1ae9   :  { %8831 = vsyncpa [#allocation4 + $0x1], 1 }

</bundles_post_ra>
